<compile_context>
chip_gen: v7x
topology: tpu7x:2x2x1
jax: 0.10.0
libtpu: 0.0.40
codegen_flags: <defaults>
</compile_context>

<pallas_src>
import functools
import numpy as np

import jax
import jax.numpy as jnp
from jax.experimental import pallas as pl
from jax.experimental.pallas import tpu as pltpu

# ---------------- small synthetic config (original values in comments) ----------------
IMG_IN = 64            # raw input spatial size
IMG_SIZE = 32          # resize target            (orig 224)
PATCH = 8              # patch size               (orig 8)
INPUT_SIZE = IMG_SIZE // PATCH        # 4         (orig 28)
N_PATCH = INPUT_SIZE * INPUT_SIZE     # 16        (orig 784)
VIT_DIM = 32           # ViT embed dim            (orig 768)
VIT_DEPTH = 10         # enough blocks so features 6..9 exist (orig 12)
VIT_HEADS = 4          # (orig 12)
VIT_MLP = 4 * VIT_DIM
EMBED_DIM = 32         # MANIQA embed_dim         (orig 768)
DIM_MLP = 32           # (orig 768)
NUM_HEADS = (2, 2)     # (orig (4, 4))
WINDOW = 2             # (orig 4)
DEPTHS = (2, 2)
NUM_TAB = 2
SCALE = 0.8
NUM_OUT = 1
LN_EPS_VIT = 1e-6
LN_EPS = 1e-5
FEAT_BLOCKS = (6, 7, 8, 9)
BLOCK_KEYS = ("ln1_g", "ln1_b", "qkv_w", "qkv_b", "proj_w", "proj_b",
              "ln2_g", "ln2_b", "fc1_w", "fc1_b", "fc2_w", "fc2_b")
NEG_INF = -1e30


# ----------------------------- host-side constant tables ------------------------------
def _resize_matrix_np(out_size, in_size):
    # bilinear, half-pixel centers (align_corners=False), no antialias
    i = np.arange(out_size, dtype=np.float64)
    src = (i + 0.5) * in_size / out_size - 0.5
    src = np.clip(src, 0.0, in_size - 1)
    lo = np.floor(src).astype(np.int64)
    hi = np.minimum(lo + 1, in_size - 1)
    w_hi = src - lo
    w_lo = 1.0 - w_hi
    R = np.zeros((out_size, in_size), np.float32)
    R[np.arange(out_size), lo] += w_lo.astype(np.float32)
    R[np.arange(out_size), hi] += w_hi.astype(np.float32)
    return R


def _relative_position_index(ws):
    coords = np.stack(np.meshgrid(np.arange(ws), np.arange(ws), indexing="ij"))
    coords_flat = coords.reshape(2, -1)
    rel = coords_flat[:, :, None] - coords_flat[:, None, :]
    rel = rel.transpose(1, 2, 0).astype(np.int64)
    rel[:, :, 0] += ws - 1
    rel[:, :, 1] += ws - 1
    rel[:, :, 0] *= 2 * ws - 1
    return rel.sum(-1)                      # (ws*ws, ws*ws)


def _shifted_window_mask(H, W, ws, shift):
    img_mask = np.zeros((1, H, W, 1), np.float32)
    h_slices = (slice(0, -ws), slice(-ws, -shift), slice(-shift, None))
    w_slices = (slice(0, -ws), slice(-ws, -shift), slice(-shift, None))
    cnt = 0
    for hs in h_slices:
        for wsl in w_slices:
            img_mask[:, hs, wsl, :] = cnt
            cnt += 1
    mw = (img_mask.reshape(1, H // ws, ws, W // ws, ws, 1)
                  .transpose(0, 1, 3, 2, 4, 5)
                  .reshape(-1, ws * ws))
    am = mw[:, None, :] - mw[:, :, None]
    return np.where(am != 0, -100.0, 0.0).astype(np.float32)     # (nW, N, N)


def _window_layout(H, W, ws, shift):
    # window id / in-window position of each ORIGINAL token under roll(-shift)+partition
    hh, ww = np.meshgrid(np.arange(H), np.arange(W), indexing="ij")
    hs = (hh - shift) % H
    wsft = (ww - shift) % W
    wid = (hs // ws) * (W // ws) + (wsft // ws)
    pos = (hs % ws) * ws + (wsft % ws)
    return wid.reshape(-1), pos.reshape(-1)


REL_INDEX = _relative_position_index(WINDOW)
_MASK_NP = _shifted_window_mask(INPUT_SIZE, INPUT_SIZE, WINDOW, WINDOW // 2)

_SWIN_RELIDX, _SWIN_SAME, _SWIN_EXTRA = [], [], []
for _shift in (0, WINDOW // 2):
    _wid, _pos = _window_layout(INPUT_SIZE, INPUT_SIZE, WINDOW, _shift)
    _SWIN_SAME.append(_wid[:, None] == _wid[None, :])
    _SWIN_RELIDX.append(REL_INDEX[_pos[:, None], _pos[None, :]])
    if _shift:
        _SWIN_EXTRA.append(_MASK_NP[_wid[:, None], _pos[:, None], _pos[None, :]]
                           .astype(np.float32))
    else:
        _SWIN_EXTRA.append(np.zeros((N_PATCH, N_PATCH), np.float32))


# ------------------------------- in-kernel helpers ------------------------------------
def _mm(a, w):
    """Matmul with f32 operands and f32 accumulation (MXU handles F32xF32=F32;
    bf16 operands are unsupported by the interpret-mode CPU executor)."""
    return jnp.dot(a, w, preferred_element_type=jnp.float32)


def _ln(x, g, b, eps):
    mu = jnp.mean(x, axis=-1, keepdims=True)
    xc = x - mu
    var = jnp.mean(xc * xc, axis=-1, keepdims=True)
    return xc * jax.lax.rsqrt(var + eps) * g + b


def _attend(q, k, v, bias, scale):
    s = jax.lax.dot_general(q, k, (((1,), (1,)), ((), ())),
                            preferred_element_type=jnp.float32) * scale
    if bias is not None:
        s = s + bias
    s = s - jnp.max(s, axis=-1, keepdims=True)
    p = jnp.exp(s)
    p = p * pl.reciprocal(jnp.sum(p, axis=-1, keepdims=True), approx=True)
    return jnp.dot(p, v, preferred_element_type=jnp.float32)


def _block_body(x, refs, bias_ref, heads, res_scale, eps):
    """One pre-norm transformer block (LN->MHA->proj->res, LN->MLP->res)."""
    (ln1g, ln1b, qkvw, qkvb, projw, projb,
     ln2g, ln2b, fc1w, fc1b, fc2w, fc2b) = refs
    C = x.shape[-1]
    hd = C // heads
    h = _ln(x, ln1g[0], ln1b[0], eps)
    qkv = _mm(h, qkvw[0]) + qkvb[0]                 # (rows, 3C)
    pw = projw[0]                                   # (C, C)
    acc = None
    for he in range(heads):
        q = qkv[:, he * hd:(he + 1) * hd]
        k = qkv[:, C + he * hd:C + (he + 1) * hd]
        v = qkv[:, 2 * C + he * hd:2 * C + (he + 1) * hd]
        b_he = None if bias_ref is None else bias_ref[0, he]
        o_he = _attend(q, k, v, b_he, hd ** -0.5)
        contrib = _mm(o_he, pw[he * hd:(he + 1) * hd, :])
        acc = contrib if acc is None else acc + contrib
    x = x + res_scale * (acc + projb[0])
    h = _ln(x, ln2g[0], ln2b[0], eps)
    h = jax.nn.gelu(_mm(h, fc1w[0]) + fc1b[0], approximate=True)
    h = _mm(h, fc2w[0]) + fc2b[0]
    return x + res_scale * h


# ---------------------------------- Pallas kernels -------------------------------------
def _resize_kernel(x_ref, rwt_ref, rh_ref, o_ref, *, channels, in_h):
    # separable bilinear resize for one batch element (all channels at once)
    t = jnp.dot(x_ref[...], rwt_ref[...], preferred_element_type=jnp.float32)
    for c in range(channels):
        o_ref[c] = jnp.dot(rh_ref[...], t[c * in_h:(c + 1) * in_h, :],
                           preferred_element_type=jnp.float32)


def _vit_kernel(patches_ref, pew_ref, pebias_ref, clstok_ref,
                ln1g, ln1b, qkvw, qkvb, projw, projb,
                ln2g, ln2b, fc1w, fc1b, fc2w, fc2b,
                feat_ref, x_ref):
    d = pl.program_id(1)

    @pl.when(d == 0)
    def _():
        # patch embedding (Normalize folded into pe_w / pe_bias) + pos embed; cls token
        # is stored LAST (attention is permutation invariant so this is equivalent).
        x_ref[0:N_PATCH, :] = _mm(patches_ref[...], pew_ref[...]) + pebias_ref[...]
        x_ref[N_PATCH:, :] = clstok_ref[...]

    refs = (ln1g, ln1b, qkvw, qkvb, projw, projb, ln2g, ln2b, fc1w, fc1b, fc2w, fc2b)
    x = _block_body(x_ref[...], refs, None, VIT_HEADS, 1.0, LN_EPS_VIT)
    x_ref[...] = x
    # extract_feature: outputs of blocks 6..9 (patch tokens only), concat on channels
    for kf, blk in enumerate(FEAT_BLOCKS):
        @pl.when(d == blk)
        def _(kf=kf):
            feat_ref[:, kf * VIT_DIM:(kf + 1) * VIT_DIM] = x[0:N_PATCH, :]


def _swin_kernel(xin_ref, bias_ref,
                 ln1g, ln1b, qkvw, qkvb, projw, projb,
                 ln2g, ln2b, fc1w, fc1b, fc2w, fc2b,
                 o_ref, *, heads):
    d = pl.program_id(1)

    @pl.when(d == 0)
    def _():
        o_ref[...] = xin_ref[...]

    refs = (ln1g, ln1b, qkvw, qkvb, projw, projb, ln2g, ln2b, fc1w, fc1b, fc2w, fc2b)
    o_ref[...] = _block_body(o_ref[...], refs, bias_ref, heads, SCALE, LN_EPS)


def _tab_conv_kernel(x_ref, qw, qb, kw, kb, vw, vb, sel_ref, cw_ref, cb_ref, o_ref,
                     *, num_tab):
    # x_ref: token-major (N_PATCH, Cin) for one batch element
    np_tok = x_ref.shape[0]
    K = sel_ref.shape[0]
    inv_sqrt_n = float(np_tok) ** -0.5
    xcm = jnp.transpose(x_ref[...])                          # channel-major (Cin, N)
    for ti in range(num_tab):
        q = jnp.dot(xcm, qw[ti], preferred_element_type=jnp.float32) + qb[ti]
        k = jnp.dot(xcm, kw[ti], preferred_element_type=jnp.float32) + kb[ti]
        v = jnp.dot(xcm, vw[ti], preferred_element_type=jnp.float32) + vb[ti]
        s = jax.lax.dot_general(q, k, (((1,), (1,)), ((), ())),
                                preferred_element_type=jnp.float32) * inv_sqrt_n
        s = s - jnp.max(s, axis=-1, keepdims=True)
        p = jnp.exp(s)
        p = p * pl.reciprocal(jnp.sum(p, axis=-1, keepdims=True), approx=True)
        ov = jnp.dot(p, v, preferred_element_type=jnp.float32)   # (Cin, N)
        # torch quirk: (attn @ v).transpose(1, 2).reshape(B, C, N) — expressed as
        # y = sum_r S_r @ ov[r*N:(r+1)*N].T  (exact because Cin % N == 0 here)
        y = None
        for r in range(K):
            contrib = jax.lax.dot_general(
                sel_ref[r], ov[r * np_tok:(r + 1) * np_tok, :],
                (((1,), (1,)), ((), ())), preferred_element_type=jnp.float32)
            y = contrib if y is None else y + contrib
        xcm = xcm + y
    # fused 1x1 conv: back to token-major (N, Cout)
    o_ref[...] = _mm(jnp.transpose(xcm), cw_ref[...]) + cb_ref[...]


def _head_kernel(x_ref, w1_ref, b1_ref, w2s_ref, b2s_ref, w2w_ref, b2w_ref,
                 agg_ref, o_ref):
    half = w2s_ref.shape[0]
    x = x_ref[...]
    h = jnp.maximum(_mm(x, w1_ref[...]) + b1_ref[...], 0.0)       # fused fc_score/fc_weight L1
    f = jnp.maximum(_mm(h[:, 0:half], w2s_ref[...]) + b2s_ref[...], 0.0)
    w = jax.nn.sigmoid(_mm(h[:, half:2 * half], w2w_ref[...]) + b2w_ref[...])
    num = jnp.dot(agg_ref[...], f * w, preferred_element_type=jnp.float32)
    den = jnp.dot(agg_ref[...], w, preferred_element_type=jnp.float32)
    o_ref[...] = num / den


# ------------------------------------ wrappers -----------------------------------------
def _cp(sem):
    return pltpu.CompilerParams(dimension_semantics=sem)


def run_resize(image):
    Bn, C, H, W = image.shape
    rh = jnp.asarray(_resize_matrix_np(IMG_SIZE, H))             # (32, H)
    rwt = jnp.asarray(_resize_matrix_np(IMG_SIZE, W).T)          # (W, 32)
    x2 = image.reshape(Bn * C * H, W)
    return pl.pallas_call(
        functools.partial(_resize_kernel, channels=C, in_h=H),
        out_shape=jax.ShapeDtypeStruct((Bn * C, IMG_SIZE, IMG_SIZE), jnp.float32),
        grid=(Bn,),
        in_specs=[pl.BlockSpec((C * H, W), lambda b: (b, 0)),
                  pl.BlockSpec((W, IMG_SIZE), lambda b: (0, 0)),
                  pl.BlockSpec((IMG_SIZE, H), lambda b: (0, 0))],
        out_specs=pl.BlockSpec((C, IMG_SIZE, IMG_SIZE), lambda b: (b, 0, 0)),
        compiler_params=_cp(("parallel",)),
    )(x2, rwt, rh)


def run_vit(patches, vp):
    Bn = patches.shape[0] // N_PATCH
    blocks = vp["blocks"]

    def stacked_spec(a):
        nd = a.ndim
        return pl.BlockSpec((1,) + a.shape[1:],
                            lambda b, d, nd=nd: (d,) + (0,) * (nd - 1))

    def const_spec(a):
        nd = a.ndim
        return pl.BlockSpec(a.shape, lambda b, d, nd=nd: (0,) * nd)

    in_specs = ([pl.BlockSpec((N_PATCH, 3 * PATCH * PATCH), lambda b, d: (b, 0)),
                 const_spec(vp["pe_w"]), const_spec(vp["pe_bias"]),
                 const_spec(vp["cls_tok"])]
                + [stacked_spec(blocks[k]) for k in BLOCK_KEYS])
    return pl.pallas_call(
        _vit_kernel,
        out_shape=jax.ShapeDtypeStruct((Bn * N_PATCH, 4 * VIT_DIM), jnp.float32),
        grid=(Bn, VIT_DEPTH),
        in_specs=in_specs,
        out_specs=pl.BlockSpec((N_PATCH, 4 * VIT_DIM), lambda b, d: (b, 0)),
        scratch_shapes=[pltpu.VMEM((N_PATCH + 1, VIT_DIM), jnp.float32)],
        compiler_params=_cp(("parallel", "arbitrary")),
    )(patches, vp["pe_w"], vp["pe_bias"], vp["cls_tok"],
      *[blocks[k] for k in BLOCK_KEYS])


def run_tab_conv(x, tp, sel):
    Np = N_PATCH
    Bn = x.shape[0] // Np
    Cin = x.shape[1]
    Cout = tp["conv_w"].shape[1]

    def const_spec(a):
        nd = a.ndim
        return pl.BlockSpec(a.shape, lambda b, nd=nd: (0,) * nd)

    in_specs = ([pl.BlockSpec((Np, Cin), lambda b: (b, 0))]
                + [const_spec(tp[k]) for k in ("q_w", "q_b", "k_w", "k_b", "v_w", "v_b")]
                + [const_spec(sel), const_spec(tp["conv_w"]), const_spec(tp["conv_b"])])
    return pl.pallas_call(
        functools.partial(_tab_conv_kernel, num_tab=NUM_TAB),
        out_shape=jax.ShapeDtypeStruct((Bn * Np, Cout), jnp.float32),
        grid=(Bn,),
        in_specs=in_specs,
        out_specs=pl.BlockSpec((Np, Cout), lambda b: (b, 0)),
        compiler_params=_cp(("parallel",)),
    )(x, tp["q_w"], tp["q_b"], tp["k_w"], tp["k_b"], tp["v_w"], tp["v_b"],
      sel, tp["conv_w"], tp["conv_b"])


def run_swin_stage(x, sp, heads):
    L = N_PATCH
    Bn = x.shape[0] // L
    C = x.shape[1]
    nblk = sp["qkv_w"].shape[0]

    def stacked_spec(a):
        nd = a.ndim
        return pl.BlockSpec((1,) + a.shape[1:],
                            lambda b, d, nd=nd: (d,) + (0,) * (nd - 1))

    in_specs = ([pl.BlockSpec((L, C), lambda b, d: (b, 0)), stacked_spec(sp["bias"])]
                + [stacked_spec(sp[k]) for k in BLOCK_KEYS])
    return pl.pallas_call(
        functools.partial(_swin_kernel, heads=heads),
        out_shape=jax.ShapeDtypeStruct((Bn * L, C), jnp.float32),
        grid=(Bn, nblk),
        in_specs=in_specs,
        out_specs=pl.BlockSpec((L, C), lambda b, d: (b, 0)),
        compiler_params=_cp(("parallel", "arbitrary")),
    )(x, sp["bias"], *[sp[k] for k in BLOCK_KEYS])


def run_head(x, hp):
    Bn = x.shape[0] // N_PATCH
    agg = jnp.asarray(np.kron(np.eye(Bn, dtype=np.float32),
                              np.ones((1, N_PATCH), np.float32)))

    def const_spec(a):
        nd = a.ndim
        return pl.BlockSpec(a.shape, lambda i, nd=nd: (0,) * nd)

    out = pl.pallas_call(
        _head_kernel,
        out_shape=jax.ShapeDtypeStruct((Bn, 1), jnp.float32),
        grid=(1,),
        in_specs=[const_spec(x), const_spec(hp["w1"]), const_spec(hp["b1"]),
                  const_spec(hp["w2s"]), const_spec(hp["b2s"]),
                  const_spec(hp["w2w"]), const_spec(hp["b2w"]), const_spec(agg)],
        out_specs=pl.BlockSpec((Bn, 1), lambda i: (0, 0)),
        compiler_params=_cp(("arbitrary",)),
    )(x, hp["w1"], hp["b1"], hp["w2s"], hp["b2s"], hp["w2w"], hp["b2w"], agg)
    return out[:, 0]


# -------------------------------- parameter init --------------------------------------
class PInit:
    def __init__(self, seed=0):
        self.key = jax.random.PRNGKey(seed)
        self.i = 0

    def normal(self, shape, std=0.02):
        self.i += 1
        return std * jax.random.normal(jax.random.fold_in(self.key, self.i), shape,
                                       jnp.float32)


def init_params():
    rng = PInit(0)

    def lin(din, dout):
        return {"w": rng.normal((din, dout)), "b": jnp.zeros((dout,), jnp.float32)}

    vit_blocks = []
    for _ in range(VIT_DEPTH):
        vit_blocks.append({
            "ln1_g": jnp.ones((VIT_DIM,), jnp.float32), "ln1_b": jnp.zeros((VIT_DIM,), jnp.float32),
            "qkv": lin(VIT_DIM, 3 * VIT_DIM),
            "proj": lin(VIT_DIM, VIT_DIM),
            "ln2_g": jnp.ones((VIT_DIM,), jnp.float32), "ln2_b": jnp.zeros((VIT_DIM,), jnp.float32),
            "fc1": lin(VIT_DIM, VIT_MLP),
            "fc2": lin(VIT_MLP, VIT_DIM),
        })
    vit = {
        "patch": lin(3 * PATCH * PATCH, VIT_DIM),
        "cls": rng.normal((1, 1, VIT_DIM)),
        "pos": rng.normal((1, N_PATCH + 1, VIT_DIM)),
        "blocks": jax.tree_util.tree_map(lambda *xs: jnp.stack(xs), *vit_blocks),
    }

    def tab():
        return {"q": lin(N_PATCH, N_PATCH), "k": lin(N_PATCH, N_PATCH), "v": lin(N_PATCH, N_PATCH)}

    def swin_block_p(dim, heads):
        return {
            "ln1_g": jnp.ones((dim,), jnp.float32), "ln1_b": jnp.zeros((dim,), jnp.float32),
            "qkv": lin(dim, 3 * dim), "proj": lin(dim, dim),
            "rpb": rng.normal(((2 * WINDOW - 1) ** 2, heads)),
            "ln2_g": jnp.ones((dim,), jnp.float32), "ln2_b": jnp.zeros((dim,), jnp.float32),
            "fc1": lin(dim, DIM_MLP), "fc2": lin(DIM_MLP, dim),
        }

    def swin_stage_p(dim):
        return [[swin_block_p(dim, NUM_HEADS[li]) for _ in range(DEPTHS[li])]
                for li in range(len(DEPTHS))]

    return {
        "vit": vit,
        "tab1": [tab() for _ in range(NUM_TAB)],
        "conv1": lin(4 * VIT_DIM, EMBED_DIM),
        "swin1": swin_stage_p(EMBED_DIM),
        "tab2": [tab() for _ in range(NUM_TAB)],
        "conv2": lin(EMBED_DIM, EMBED_DIM // 2),
        "swin2": swin_stage_p(EMBED_DIM // 2),
        "fs1": lin(EMBED_DIM // 2, EMBED_DIM // 2),
        "fs2": lin(EMBED_DIM // 2, NUM_OUT),
        "fw1": lin(EMBED_DIM // 2, EMBED_DIM // 2),
        "fw2": lin(EMBED_DIM // 2, NUM_OUT),
    }


def _quirk_select(C, N):
    # y = (attn @ v).transpose.reshape(C, N)  ==  sum_r S_r @ ov[r*N:(r+1)*N].T  (C % N == 0)
    K = C // N
    S = np.zeros((K, C, N), np.float32)
    r = np.arange(K)[:, None]
    m = np.arange(N)[None, :]
    S[r, m * K + r, m] = 1.0
    return jnp.asarray(S)


def pack_params(p):
    D = VIT_DIM

    def vec3(a):
        return a.reshape(a.shape[0], 1, a.shape[-1])

    # ---- ViT backbone ----
    vb = p["vit"]["blocks"]
    vit_blocks = {
        "ln1_g": vec3(vb["ln1_g"]), "ln1_b": vec3(vb["ln1_b"]),
        "qkv_w": vb["qkv"]["w"], "qkv_b": vec3(vb["qkv"]["b"]),
        "proj_w": vb["proj"]["w"], "proj_b": vec3(vb["proj"]["b"]),
        "ln2_g": vec3(vb["ln2_g"]), "ln2_b": vec3(vb["ln2_b"]),
        "fc1_w": vb["fc1"]["w"], "fc1_b": vec3(vb["fc1"]["b"]),
        "fc2_w": vb["fc2"]["w"], "fc2_b": vec3(vb["fc2"]["b"]),
    }
    pw, pb = p["vit"]["patch"]["w"], p["vit"]["patch"]["b"]
    pos = p["vit"]["pos"][0]                                  # (Np+1, D)
    # fold Normalize((x - 0.5) / 0.5) == 2x - 1 into the patch embedding (exact)
    pe_w = 2.0 * pw
    pe_bias = (pb - jnp.sum(pw, axis=0))[None, :] + pos[1:, :]
    cls_tok = p["vit"]["cls"].reshape(1, D) + pos[0:1, :]
    vit = {"pe_w": pe_w, "pe_bias": pe_bias, "cls_tok": cls_tok, "blocks": vit_blocks}

    # ---- TAB stages (+ fused 1x1 conv) ----
    def pack_tab(tabs, conv):
        return {
            "q_w": jnp.stack([t["q"]["w"] for t in tabs]),
            "q_b": jnp.stack([t["q"]["b"] for t in tabs])[:, None, :],
            "k_w": jnp.stack([t["k"]["w"] for t in tabs]),
            "k_b": jnp.stack([t["k"]["b"] for t in tabs])[:, None, :],
            "v_w": jnp.stack([t["v"]["w"] for t in tabs]),
            "v_b": jnp.stack([t["v"]["b"] for t in tabs])[:, None, :],
            "conv_w": conv["w"],
            "conv_b": conv["b"][None, :],
        }

    # ---- Swin stages ----
    def pack_swin(stage_p):
        blocks = [bp for layer in stage_p for bp in layer]
        packed = {
            "ln1_g": vec3(jnp.stack([b["ln1_g"] for b in blocks])),
            "ln1_b": vec3(jnp.stack([b["ln1_b"] for b in blocks])),
            "qkv_w": jnp.stack([b["qkv"]["w"] for b in blocks]),
            "qkv_b": vec3(jnp.stack([b["qkv"]["b"] for b in blocks])),
            "proj_w": jnp.stack([b["proj"]["w"] for b in blocks]),
            "proj_b": vec3(jnp.stack([b["proj"]["b"] for b in blocks])),
            "ln2_g": vec3(jnp.stack([b["ln2_g"] for b in blocks])),
            "ln2_b": vec3(jnp.stack([b["ln2_b"] for b in blocks])),
            "fc1_w": jnp.stack([b["fc1"]["w"] for b in blocks]),
            "fc1_b": vec3(jnp.stack([b["fc1"]["b"] for b in blocks])),
            "fc2_w": jnp.stack([b["fc2"]["w"] for b in blocks]),
            "fc2_b": vec3(jnp.stack([b["fc2"]["b"] for b in blocks])),
        }
        biases = []
        for i, bp in enumerate(blocks):
            s = 1 if (i % 2 == 1) else 0      # blocks alternate no-shift / shift
            rpb_full = bp["rpb"][jnp.asarray(_SWIN_RELIDX[s])]      # (L, L, heads)
            rpb_full = jnp.transpose(rpb_full, (2, 0, 1))           # (heads, L, L)
            bias = jnp.where(jnp.asarray(_SWIN_SAME[s])[None],
                             rpb_full + jnp.asarray(_SWIN_EXTRA[s])[None],
                             NEG_INF)
            biases.append(bias.astype(jnp.float32))
        packed["bias"] = jnp.stack(biases)                          # (nblk, heads, L, L)
        return packed

    # ---- head (fused fc_score / fc_weight) ----
    head = {
        "w1": jnp.concatenate([p["fs1"]["w"], p["fw1"]["w"]], axis=1),
        "b1": jnp.concatenate([p["fs1"]["b"], p["fw1"]["b"]])[None, :],
        "w2s": p["fs2"]["w"], "b2s": p["fs2"]["b"][None, :],
        "w2w": p["fw2"]["w"], "b2w": p["fw2"]["b"][None, :],
    }

    return {
        "vit": vit,
        "tab1": pack_tab(p["tab1"], p["conv1"]),
        "swin1": pack_swin(p["swin1"]),
        "tab2": pack_tab(p["tab2"], p["conv2"]),
        "swin2": pack_swin(p["swin2"]),
        "head": head,
        "s1": _quirk_select(4 * VIT_DIM, N_PATCH),
        "s2": _quirk_select(EMBED_DIM, N_PATCH),
    }


# --------------------------------- full forward ---------------------------------------
def maniqa_forward(image, pp):
    Bn = image.shape[0]
    # 1) Resize (Normalize is folded into the patch embedding weights)
    resized = run_resize(image)                               # (B*3, 32, 32)
    patches = (resized.reshape(Bn, 3, INPUT_SIZE, PATCH, INPUT_SIZE, PATCH)
               .transpose(0, 2, 4, 1, 3, 5)
               .reshape(Bn * N_PATCH, 3 * PATCH * PATCH))
    # 2) ViT backbone -> concat features of blocks 6..9, token-major (B*Np, 4*VIT_DIM)
    feats = run_vit(patches, pp["vit"])
    # 3) stage 1: TABlock x2 + conv1 + Swin stage 1
    x = run_tab_conv(feats, pp["tab1"], pp["s1"])
    x = run_swin_stage(x, pp["swin1"], NUM_HEADS[0])          # NUM_HEADS[0] == NUM_HEADS[1]
    # 4) stage 2: TABlock x2 + conv2 + Swin stage 2
    x = run_tab_conv(x, pp["tab2"], pp["s2"])
    x = run_swin_stage(x, pp["swin2"], NUM_HEADS[0])
    # 5) dual head + weighted average per image
    return run_head(x, pp["head"])                            # (B,)


if __name__ == "__main__":
    key = jax.random.PRNGKey(0)
    image = jax.random.uniform(key, (2, 3, IMG_IN, IMG_IN), jnp.float32)   # NCHW in [0, 1]
    params = init_params()
    packed = pack_params(params)
    fwd = jax.jit(maniqa_forward)
    out = jax.block_until_ready(fwd(image, packed))
    assert out.shape == (2,) and bool(jnp.all(jnp.isfinite(out)))
    print("KERNEL_OK")
</pallas_src>

<mosaic_0001>
module attributes {stable_mosaic.version = 11 : i64} {
  func.func @_resize_kernel(%arg0: i32, %arg1: memref<192x64xf32, #tpu.memory_space<vmem>>, %arg2: memref<64x32xf32, #tpu.memory_space<vmem>>, %arg3: memref<32x64xf32, #tpu.memory_space<vmem>>, %arg4: memref<3x32x32xf32, #tpu.memory_space<vmem>>) attributes {dimension_semantics = [#tpu.dimension_semantics<parallel>], iteration_bounds = array<i64: 2>, scalar_prefetch = 0 : i64, scratch_operands = 0 : i64, tpu.core_type = #tpu.core_type<tc>, window_params = [{transform_indices = @transform_0, window_bounds = array<i64: 192, 64>}, {pipeline_mode = #tpu.pipeline_mode<synchronous>, transform_indices = @transform_1, window_bounds = array<i64: 64, 32>}, {pipeline_mode = #tpu.pipeline_mode<synchronous>, transform_indices = @transform_2, window_bounds = array<i64: 32, 64>}, {transform_indices = @transform_3, window_bounds = array<i64: 3, 32, 32>}]} {
    %c0 = arith.constant 0 : index
    %c0_0 = arith.constant 0 : index
    %0 = vector.load %arg1[%c0, %c0_0] : memref<192x64xf32, #tpu.memory_space<vmem>>, vector<192x64xf32>
    %c0_1 = arith.constant 0 : index
    %c0_2 = arith.constant 0 : index
    %1 = vector.load %arg2[%c0_1, %c0_2] : memref<64x32xf32, #tpu.memory_space<vmem>>, vector<64x32xf32>
    %cst = arith.constant dense<0.000000e+00> : vector<192x32xf32>
    %2 = tpu.matmul %0, %1, %cst {dimension_numbers = #tpu.dot_dimension_numbers<[1], [0], [0], [1], [0, 0, 1, 1], [], []>} : vector<192x64xf32>, vector<64x32xf32>, vector<192x32xf32> -> vector<192x32xf32>
    %c0_3 = arith.constant 0 : index
    %c0_4 = arith.constant 0 : index
    %3 = vector.load %arg3[%c0_3, %c0_4] : memref<32x64xf32, #tpu.memory_space<vmem>>, vector<32x64xf32>
    %4 = vector.extract_strided_slice %2 {offsets = [0, 0], sizes = [64, 32], strides = [1, 1]} : vector<192x32xf32> to vector<64x32xf32>
    %cst_5 = arith.constant dense<0.000000e+00> : vector<32x32xf32>
    %5 = tpu.matmul %3, %4, %cst_5 {dimension_numbers = #tpu.dot_dimension_numbers<[1], [0], [0], [1], [0, 0, 1, 1], [], []>} : vector<32x64xf32>, vector<64x32xf32>, vector<32x32xf32> -> vector<32x32xf32>
    %c0_6 = arith.constant 0 : index
    %c0_7 = arith.constant 0 : index
    %c0_8 = arith.constant 0 : index
    %6 = vector.load %arg4[%c0_6, %c0_7, %c0_8] : memref<3x32x32xf32, #tpu.memory_space<vmem>>, vector<1x32x32xf32>
    %7 = vector.shape_cast %6 : vector<1x32x32xf32> to vector<32x32xf32>
    %8 = vector.shape_cast %5 : vector<32x32xf32> to vector<1x32x32xf32>
    tpu.vector_store %arg4[%c0_6, %c0_7, %c0_8], %8 {strides = array<i32>} : memref<3x32x32xf32, #tpu.memory_space<vmem>>, vector<1x32x32xf32>,
    %c0_9 = arith.constant 0 : index
    %c0_10 = arith.constant 0 : index
    %9 = vector.load %arg3[%c0_9, %c0_10] : memref<32x64xf32, #tpu.memory_space<vmem>>, vector<32x64xf32>
    %10 = vector.extract_strided_slice %2 {offsets = [64, 0], sizes = [64, 32], strides = [1, 1]} : vector<192x32xf32> to vector<64x32xf32>
    %cst_11 = arith.constant dense<0.000000e+00> : vector<32x32xf32>
    %11 = tpu.matmul %9, %10, %cst_11 {dimension_numbers = #tpu.dot_dimension_numbers<[1], [0], [0], [1], [0, 0, 1, 1], [], []>} : vector<32x64xf32>, vector<64x32xf32>, vector<32x32xf32> -> vector<32x32xf32>
    %c1 = arith.constant 1 : index
    %c0_12 = arith.constant 0 : index
    %c0_13 = arith.constant 0 : index
    %12 = vector.load %arg4[%c1, %c0_12, %c0_13] : memref<3x32x32xf32, #tpu.memory_space<vmem>>, vector<1x32x32xf32>
    %13 = vector.shape_cast %12 : vector<1x32x32xf32> to vector<32x32xf32>
    %14 = vector.shape_cast %11 : vector<32x32xf32> to vector<1x32x32xf32>
    tpu.vector_store %arg4[%c1, %c0_12, %c0_13], %14 {strides = array<i32>} : memref<3x32x32xf32, #tpu.memory_space<vmem>>, vector<1x32x32xf32>,
    %c0_14 = arith.constant 0 : index
    %c0_15 = arith.constant 0 : index
    %15 = vector.load %arg3[%c0_14, %c0_15] : memref<32x64xf32, #tpu.memory_space<vmem>>, vector<32x64xf32>
    %16 = vector.extract_strided_slice %2 {offsets = [128, 0], sizes = [64, 32], strides = [1, 1]} : vector<192x32xf32> to vector<64x32xf32>
    %cst_16 = arith.constant dense<0.000000e+00> : vector<32x32xf32>
    %17 = tpu.matmul %15, %16, %cst_16 {dimension_numbers = #tpu.dot_dimension_numbers<[1], [0], [0], [1], [0, 0, 1, 1], [], []>} : vector<32x64xf32>, vector<64x32xf32>, vector<32x32xf32> -> vector<32x32xf32>
    %c2 = arith.constant 2 : index
    %c0_17 = arith.constant 0 : index
    %c0_18 = arith.constant 0 : index
    %18 = vector.load %arg4[%c2, %c0_17, %c0_18] : memref<3x32x32xf32, #tpu.memory_space<vmem>>, vector<1x32x32xf32>
    %19 = vector.shape_cast %18 : vector<1x32x32xf32> to vector<32x32xf32>
    %20 = vector.shape_cast %17 : vector<32x32xf32> to vector<1x32x32xf32>
    tpu.vector_store %arg4[%c2, %c0_17, %c0_18], %20 {strides = array<i32>} : memref<3x32x32xf32, #tpu.memory_space<vmem>>, vector<1x32x32xf32>,
    return
  }
  func.func @transform_0(%arg0: i32) -> (i32, i32) {
    %c0_i32 = arith.constant 0 : i32
    %c0_i32_0 = arith.constant 0 : i32
    return %arg0, %c0_i32 : i32, i32
  }
  func.func @transform_1(%arg0: i32) -> (i32, i32) {
    %c0_i32 = arith.constant 0 : i32
    %c0_i32_0 = arith.constant 0 : i32
    %c0_i32_1 = arith.constant 0 : i32
    return %c0_i32, %c0_i32_0 : i32, i32
  }
  func.func @transform_2(%arg0: i32) -> (i32, i32) {
    %c0_i32 = arith.constant 0 : i32
    %c0_i32_0 = arith.constant 0 : i32
    %c0_i32_1 = arith.constant 0 : i32
    return %c0_i32, %c0_i32_0 : i32, i32
  }
  func.func @transform_3(%arg0: i32) -> (i32, i32, i32) {
    %c0_i32 = arith.constant 0 : i32
    %c0_i32_0 = arith.constant 0 : i32
    %c0_i32_1 = arith.constant 0 : i32
    return %arg0, %c0_i32, %c0_i32_0 : i32, i32, i32
  }
}

module attributes {stable_mosaic.version = 11 : i64} {
  func.func @_vit_kernel(%arg0: i32, %arg1: i32, %arg2: memref<16x192xf32, #tpu.memory_space<vmem>>, %arg3: memref<192x32xf32, #tpu.memory_space<vmem>>, %arg4: memref<16x32xf32, #tpu.memory_space<vmem>>, %arg5: memref<1x32xf32, #tpu.memory_space<vmem>>, %arg6: memref<1x1x32xf32, #tpu.memory_space<vmem>>, %arg7: memref<1x1x32xf32, #tpu.memory_space<vmem>>, %arg8: memref<1x32x96xf32, #tpu.memory_space<vmem>>, %arg9: memref<1x1x96xf32, #tpu.memory_space<vmem>>, %arg10: memref<1x32x32xf32, #tpu.memory_space<vmem>>, %arg11: memref<1x1x32xf32, #tpu.memory_space<vmem>>, %arg12: memref<1x1x32xf32, #tpu.memory_space<vmem>>, %arg13: memref<1x1x32xf32, #tpu.memory_space<vmem>>, %arg14: memref<1x32x128xf32, #tpu.memory_space<vmem>>, %arg15: memref<1x1x128xf32, #tpu.memory_space<vmem>>, %arg16: memref<1x128x32xf32, #tpu.memory_space<vmem>>, %arg17: memref<1x1x32xf32, #tpu.memory_space<vmem>>, %arg18: memref<16x128xf32, #tpu.memory_space<vmem>>, %arg19: memref<17x32xf32, #tpu.memory_space<vmem>>) attributes {dimension_semantics = [#tpu.dimension_semantics<parallel>, #tpu.dimension_semantics<arbitrary>], iteration_bounds = array<i64: 2, 10>, scalar_prefetch = 0 : i64, scratch_operands = 1 : i64, tpu.core_type = #tpu.core_type<tc>, window_params = [{transform_indices = @transform_0, window_bounds = array<i64: 16, 192>}, {pipeline_mode = #tpu.pipeline_mode<synchronous>, transform_indices = @transform_1, window_bounds = array<i64: 192, 32>}, {pipeline_mode = #tpu.pipeline_mode<synchronous>, transform_indices = @transform_2, window_bounds = array<i64: 16, 32>}, {pipeline_mode = #tpu.pipeline_mode<synchronous>, transform_indices = @transform_3, window_bounds = array<i64: 1, 32>}, {transform_indices = @transform_4, window_bounds = array<i64: 1, 1, 32>}, {transform_indices = @transform_5, window_bounds = array<i64: 1, 1, 32>}, {transform_indices = @transform_6, window_bounds = array<i64: 1, 32, 96>}, {transform_indices = @transform_7, window_bounds = array<i64: 1, 1, 96>}, {transform_indices = @transform_8, window_bounds = array<i64: 1, 32, 32>}, {transform_indices = @transform_9, window_bounds = array<i64: 1, 1, 32>}, {transform_indices = @transform_10, window_bounds = array<i64: 1, 1, 32>}, {transform_indices = @transform_11, window_bounds = array<i64: 1, 1, 32>}, {transform_indices = @transform_12, window_bounds = array<i64: 1, 32, 128>}, {transform_indices = @transform_13, window_bounds = array<i64: 1, 1, 128>}, {transform_indices = @transform_14, window_bounds = array<i64: 1, 128, 32>}, {transform_indices = @transform_15, window_bounds = array<i64: 1, 1, 32>}, {transform_indices = @transform_16, window_bounds = array<i64: 16, 128>}]} {
    %c0_i32 = arith.constant 0 : i32
    %0 = arith.cmpi eq, %arg1, %c0_i32 : i32
    %1 = arith.extui %0 : i1 to i32
    %c0_i32_0 = arith.constant 0 : i32
    %2 = arith.cmpi ne, %1, %c0_i32_0 : i32
    scf.if %2 {
      %c0_86 = arith.constant 0 : index
      %c0_87 = arith.constant 0 : index
      %190 = vector.load %arg2[%c0_86, %c0_87] : memref<16x192xf32, #tpu.memory_space<vmem>>, vector<16x192xf32>
      %c0_88 = arith.constant 0 : index
      %c0_89 = arith.constant 0 : index
      %191 = vector.load %arg3[%c0_88, %c0_89] : memref<192x32xf32, #tpu.memory_space<vmem>>, vector<192x32xf32>
      %cst_90 = arith.constant dense<0.000000e+00> : vector<16x32xf32>
      %192 = tpu.matmul %190, %191, %cst_90 {dimension_numbers = #tpu.dot_dimension_numbers<[1], [0], [0], [1], [0, 0, 1, 1], [], []>} : vector<16x192xf32>, vector<192x32xf32>, vector<16x32xf32> -> vector<16x32xf32>
      %c0_91 = arith.constant 0 : index
      %c0_92 = arith.constant 0 : index
      %193 = vector.load %arg4[%c0_91, %c0_92] : memref<16x32xf32, #tpu.memory_space<vmem>>, vector<16x32xf32>
      %194 = arith.addf %192, %193 : vector<16x32xf32>
      %c0_93 = arith.constant 0 : index
      %c0_94 = arith.constant 0 : index
      %195 = vector.load %arg19[%c0_93, %c0_94] : memref<17x32xf32, #tpu.memory_space<vmem>>, vector<16x32xf32>
      tpu.vector_store %arg19[%c0_93, %c0_94], %194 {strides = array<i32>} : memref<17x32xf32, #tpu.memory_space<vmem>>, vector<16x32xf32>,
      %c0_95 = arith.constant 0 : index
      %c0_96 = arith.constant 0 : index
      %196 = vector.load %arg5[%c0_95, %c0_96] : memref<1x32xf32, #tpu.memory_space<vmem>>, vector<1x32xf32>
      %c16 = arith.constant 16 : index
      %c0_97 = arith.constant 0 : index
      %197 = vector.load %arg19[%c16, %c0_97] : memref<17x32xf32, #tpu.memory_space<vmem>>, vector<1x32xf32>
      tpu.vector_store %arg19[%c16, %c0_97], %196 {strides = array<i32>} : memref<17x32xf32, #tpu.memory_space<vmem>>, vector<1x32xf32>,
    } else {
    }
    %c0 = arith.constant 0 : index
    %c0_1 = arith.constant 0 : index
    %3 = vector.load %arg19[%c0, %c0_1] : memref<17x32xf32, #tpu.memory_space<vmem>>, vector<17x32xf32>
    %c0_2 = arith.constant 0 : index
    %c0_3 = arith.constant 0 : index
    %c0_4 = arith.constant 0 : index
    %4 = vector.load %arg6[%c0_2, %c0_3, %c0_4] : memref<1x1x32xf32, #tpu.memory_space<vmem>>, vector<1x1x32xf32>
    %5 = vector.shape_cast %4 : vector<1x1x32xf32> to vector<1x32xf32>
    %c0_5 = arith.constant 0 : index
    %c0_6 = arith.constant 0 : index
    %c0_7 = arith.constant 0 : index
    %6 = vector.load %arg7[%c0_5, %c0_6, %c0_7] : memref<1x1x32xf32, #tpu.memory_space<vmem>>, vector<1x1x32xf32>
    %7 = vector.shape_cast %6 : vector<1x1x32xf32> to vector<1x32xf32>
    %cst = arith.constant dense<0.000000e+00> : vector<17xf32>
    %8 = vector.multi_reduction <add>, %3, %cst [1] : vector<17x32xf32> to vector<17xf32>
    %9 = vector.shape_cast %8 : vector<17xf32> to vector<17x1xf32>
    %cst_8 = arith.constant 3.200000e+01 : f32
    %10 = vector.broadcast %cst_8 : f32 to vector<17x1xf32>
    %11 = arith.divf %9, %10 : vector<17x1xf32>
    %12 = vector.broadcast %11 : vector<17x1xf32> to vector<17x32xf32>
    %13 = arith.subf %3, %12 : vector<17x32xf32>
    %14 = arith.mulf %13, %13 : vector<17x32xf32>
    %cst_9 = arith.constant dense<0.000000e+00> : vector<17xf32>
    %15 = vector.multi_reduction <add>, %14, %cst_9 [1] : vector<17x32xf32> to vector<17xf32>
    %16 = vector.shape_cast %15 : vector<17xf32> to vector<17x1xf32>
    %cst_10 = arith.constant 3.200000e+01 : f32
    %17 = vector.broadcast %cst_10 : f32 to vector<17x1xf32>
    %18 = arith.divf %16, %17 : vector<17x1xf32>
    %cst_11 = arith.constant 9.99999997E-7 : f32
    %19 = vector.broadcast %cst_11 : f32 to vector<17x1xf32>
    %20 = arith.addf %18, %19 : vector<17x1xf32>
    %21 = math.rsqrt %20 : vector<17x1xf32>
    %22 = vector.broadcast %21 : vector<17x1xf32> to vector<17x32xf32>
    %23 = arith.mulf %13, %22 : vector<17x32xf32>
    %24 = vector.broadcast %5 : vector<1x32xf32> to vector<17x32xf32>
    %25 = arith.mulf %23, %24 : vector<17x32xf32>
    %26 = vector.broadcast %7 : vector<1x32xf32> to vector<17x32xf32>
    %27 = arith.addf %25, %26 : vector<17x32xf32>
    %c0_12 = arith.constant 0 : index
    %c0_13 = arith.constant 0 : index
    %c0_14 = arith.constant 0 : index
    %28 = vector.load %arg8[%c0_12, %c0_13, %c0_14] : memref<1x32x96xf32, #tpu.memory_space<vmem>>, vector<1x32x96xf32>
    %29 = vector.shape_cast %28 : vector<1x32x96xf32> to vector<32x96xf32>
    %cst_15 = arith.constant dense<0.000000e+00> : vector<17x96xf32>
    %30 = tpu.matmul %27, %29, %cst_15 {dimension_numbers = #tpu.dot_dimension_numbers<[1], [0], [0], [1], [0, 0, 1, 1], [], []>} : vector<17x32xf32>, vector<32x96xf32>, vector<17x96xf32> -> vector<17x96xf32>
    %c0_16 = arith.constant 0 : index
    %c0_17 = arith.constant 0 : index
    %c0_18 = arith.constant 0 : index
    %31 = vector.load %arg9[%c0_16, %c0_17, %c0_18] : memref<1x1x96xf32, #tpu.memory_space<vmem>>, vector<1x1x96xf32>
    %32 = vector.shape_cast %31 : vector<1x1x96xf32> to vector<1x96xf32>
    %33 = vector.broadcast %32 : vector<1x96xf32> to vector<17x96xf32>
    %34 = arith.addf %30, %33 : vector<17x96xf32>
    %c0_19 = arith.constant 0 : index
    %c0_20 = arith.constant 0 : index
    %c0_21 = arith.constant 0 : index
    %35 = vector.load %arg10[%c0_19, %c0_20, %c0_21] : memref<1x32x32xf32, #tpu.memory_space<vmem>>, vector<1x32x32xf32>
    %36 = vector.shape_cast %35 : vector<1x32x32xf32> to vector<32x32xf32>
    %37 = vector.extract_strided_slice %34 {offsets = [0, 0], sizes = [17, 8], strides = [1, 1]} : vector<17x96xf32> to vector<17x8xf32>
    %38 = vector.extract_strided_slice %34 {offsets = [0, 32], sizes = [17, 8], strides = [1, 1]} : vector<17x96xf32> to vector<17x8xf32>
    %39 = vector.extract_strided_slice %34 {offsets = [0, 64], sizes = [17, 8], strides = [1, 1]} : vector<17x96xf32> to vector<17x8xf32>
    %cst_22 = arith.constant dense<0.000000e+00> : vector<17x17xf32>
    %40 = tpu.matmul %37, %38, %cst_22 {dimension_numbers = #tpu.dot_dimension_numbers<[1], [1], [0], [0], [0, 0, 1, 0], [], []>} : vector<17x8xf32>, vector<17x8xf32>, vector<17x17xf32> -> vector<17x17xf32>
    %cst_23 = arith.constant 0.353553385 : f32
    %41 = vector.broadcast %cst_23 : f32 to vector<17x17xf32>
    %42 = arith.mulf %40, %41 : vector<17x17xf32>
    %cst_24 = arith.constant dense<0xFF800000> : vector<17xf32>
    %43 = vector.multi_reduction <maximumf>, %42, %cst_24 [1] : vector<17x17xf32> to vector<17xf32>
    %44 = vector.shape_cast %43 : vector<17xf32> to vector<17x1xf32>
    %45 = vector.broadcast %44 : vector<17x1xf32> to vector<17x17xf32>
    %46 = arith.subf %42, %45 : vector<17x17xf32>
    %47 = math.exp %46 : vector<17x17xf32>
    %cst_25 = arith.constant dense<0.000000e+00> : vector<17xf32>
    %48 = vector.multi_reduction <add>, %47, %cst_25 [1] : vector<17x17xf32> to vector<17xf32>
    %49 = vector.shape_cast %48 : vector<17xf32> to vector<17x1xf32>
    %50 = tpu.reciprocal %49 {approx = true} : vector<17x1xf32> -> vector<17x1xf32>
    %51 = vector.broadcast %50 : vector<17x1xf32> to vector<17x17xf32>
    %52 = arith.mulf %47, %51 : vector<17x17xf32>
    %cst_26 = arith.constant dense<0.000000e+00> : vector<17x8xf32>
    %53 = tpu.matmul %52, %39, %cst_26 {dimension_numbers = #tpu.dot_dimension_numbers<[1], [0], [0], [1], [0, 0, 1, 1], [], []>} : vector<17x17xf32>, vector<17x8xf32>, vector<17x8xf32> -> vector<17x8xf32>
    %54 = vector.extract_strided_slice %36 {offsets = [0, 0], sizes = [8, 32], strides = [1, 1]} : vector<32x32xf32> to vector<8x32xf32>
    %cst_27 = arith.constant dense<0.000000e+00> : vector<17x32xf32>
    %55 = tpu.matmul %53, %54, %cst_27 {dimension_numbers = #tpu.dot_dimension_numbers<[1], [0], [0], [1], [0, 0, 1, 1], [], []>} : vector<17x8xf32>, vector<8x32xf32>, vector<17x32xf32> -> vector<17x32xf32>
    %56 = vector.extract_strided_slice %34 {offsets = [0, 8], sizes = [17, 8], strides = [1, 1]} : vector<17x96xf32> to vector<17x8xf32>
    %57 = vector.extract_strided_slice %34 {offsets = [0, 40], sizes = [17, 8], strides = [1, 1]} : vector<17x96xf32> to vector<17x8xf32>
    %58 = vector.extract_strided_slice %34 {offsets = [0, 72], sizes = [17, 8], strides = [1, 1]} : vector<17x96xf32> to vector<17x8xf32>
    %cst_28 = arith.constant dense<0.000000e+00> : vector<17x17xf32>
    %59 = tpu.matmul %56, %57, %cst_28 {dimension_numbers = #tpu.dot_dimension_numbers<[1], [1], [0], [0], [0, 0, 1, 0], [], []>} : vector<17x8xf32>, vector<17x8xf32>, vector<17x17xf32> -> vector<17x17xf32>
    %cst_29 = arith.constant 0.353553385 : f32
    %60 = vector.broadcast %cst_29 : f32 to vector<17x17xf32>
    %61 = arith.mulf %59, %60 : vector<17x17xf32>
    %cst_30 = arith.constant dense<0xFF800000> : vector<17xf32>
    %62 = vector.multi_reduction <maximumf>, %61, %cst_30 [1] : vector<17x17xf32> to vector<17xf32>
    %63 = vector.shape_cast %62 : vector<17xf32> to vector<17x1xf32>
    %64 = vector.broadcast %63 : vector<17x1xf32> to vector<17x17xf32>
    %65 = arith.subf %61, %64 : vector<17x17xf32>
    %66 = math.exp %65 : vector<17x17xf32>
    %cst_31 = arith.constant dense<0.000000e+00> : vector<17xf32>
    %67 = vector.multi_reduction <add>, %66, %cst_31 [1] : vector<17x17xf32> to vector<17xf32>
    %68 = vector.shape_cast %67 : vector<17xf32> to vector<17x1xf32>
    %69 = tpu.reciprocal %68 {approx = true} : vector<17x1xf32> -> vector<17x1xf32>
    %70 = vector.broadcast %69 : vector<17x1xf32> to vector<17x17xf32>
    %71 = arith.mulf %66, %70 : vector<17x17xf32>
    %cst_32 = arith.constant dense<0.000000e+00> : vector<17x8xf32>
    %72 = tpu.matmul %71, %58, %cst_32 {dimension_numbers = #tpu.dot_dimension_numbers<[1], [0], [0], [1], [0, 0, 1, 1], [], []>} : vector<17x17xf32>, vector<17x8xf32>, vector<17x8xf32> -> vector<17x8xf32>
    %73 = vector.extract_strided_slice %36 {offsets = [8, 0], sizes = [8, 32], strides = [1, 1]} : vector<32x32xf32> to vector<8x32xf32>
    %cst_33 = arith.constant dense<0.000000e+00> : vector<17x32xf32>
    %74 = tpu.matmul %72, %73, %cst_33 {dimension_numbers = #tpu.dot_dimension_numbers<[1], [0], [0], [1], [0, 0, 1, 1], [], []>} : vector<17x8xf32>, vector<8x32xf32>, vector<17x32xf32> -> vector<17x32xf32>
    %75 = arith.addf %55, %74 : vector<17x32xf32>
    %76 = vector.extract_strided_slice %34 {offsets = [0, 16], sizes = [17, 8], strides = [1, 1]} : vector<17x96xf32> to vector<17x8xf32>
    %77 = vector.extract_strided_slice %34 {offsets = [0, 48], sizes = [17, 8], strides = [1, 1]} : vector<17x96xf32> to vector<17x8xf32>
    %78 = vector.extract_strided_slice %34 {offsets = [0, 80], sizes = [17, 8], strides = [1, 1]} : vector<17x96xf32> to vector<17x8xf32>
    %cst_34 = arith.constant dense<0.000000e+00> : vector<17x17xf32>
    %79 = tpu.matmul %76, %77, %cst_34 {dimension_numbers = #tpu.dot_dimension_numbers<[1], [1], [0], [0], [0, 0, 1, 0], [], []>} : vector<17x8xf32>, vector<17x8xf32>, vector<17x17xf32> -> vector<17x17xf32>
    %cst_35 = arith.constant 0.353553385 : f32
    %80 = vector.broadcast %cst_35 : f32 to vector<17x17xf32>
    %81 = arith.mulf %79, %80 : vector<17x17xf32>
    %cst_36 = arith.constant dense<0xFF800000> : vector<17xf32>
    %82 = vector.multi_reduction <maximumf>, %81, %cst_36 [1] : vector<17x17xf32> to vector<17xf32>
    %83 = vector.shape_cast %82 : vector<17xf32> to vector<17x1xf32>
    %84 = vector.broadcast %83 : vector<17x1xf32> to vector<17x17xf32>
    %85 = arith.subf %81, %84 : vector<17x17xf32>
    %86 = math.exp %85 : vector<17x17xf32>
    %cst_37 = arith.constant dense<0.000000e+00> : vector<17xf32>
    %87 = vector.multi_reduction <add>, %86, %cst_37 [1] : vector<17x17xf32> to vector<17xf32>
    %88 = vector.shape_cast %87 : vector<17xf32> to vector<17x1xf32>
    %89 = tpu.reciprocal %88 {approx = true} : vector<17x1xf32> -> vector<17x1xf32>
    %90 = vector.broadcast %89 : vector<17x1xf32> to vector<17x17xf32>
    %91 = arith.mulf %86, %90 : vector<17x17xf32>
    %cst_38 = arith.constant dense<0.000000e+00> : vector<17x8xf32>
    %92 = tpu.matmul %91, %78, %cst_38 {dimension_numbers = #tpu.dot_dimension_numbers<[1], [0], [0], [1], [0, 0, 1, 1], [], []>} : vector<17x17xf32>, vector<17x8xf32>, vector<17x8xf32> -> vector<17x8xf32>
    %93 = vector.extract_strided_slice %36 {offsets = [16, 0], sizes = [8, 32], strides = [1, 1]} : vector<32x32xf32> to vector<8x32xf32>
    %cst_39 = arith.constant dense<0.000000e+00> : vector<17x32xf32>
    %94 = tpu.matmul %92, %93, %cst_39 {dimension_numbers = #tpu.dot_dimension_numbers<[1], [0], [0], [1], [0, 0, 1, 1], [], []>} : vector<17x8xf32>, vector<8x32xf32>, vector<17x32xf32> -> vector<17x32xf32>
    %95 = arith.addf %75, %94 : vector<17x32xf32>
    %96 = vector.extract_strided_slice %34 {offsets = [0, 24], sizes = [17, 8], strides = [1, 1]} : vector<17x96xf32> to vector<17x8xf32>
    %97 = vector.extract_strided_slice %34 {offsets = [0, 56], sizes = [17, 8], strides = [1, 1]} : vector<17x96xf32> to vector<17x8xf32>
    %98 = vector.extract_strided_slice %34 {offsets = [0, 88], sizes = [17, 8], strides = [1, 1]} : vector<17x96xf32> to vector<17x8xf32>
    %cst_40 = arith.constant dense<0.000000e+00> : vector<17x17xf32>
    %99 = tpu.matmul %96, %97, %cst_40 {dimension_numbers = #tpu.dot_dimension_numbers<[1], [1], [0], [0], [0, 0, 1, 0], [], []>} : vector<17x8xf32>, vector<17x8xf32>, vector<17x17xf32> -> vector<17x17xf32>
    %cst_41 = arith.constant 0.353553385 : f32
    %100 = vector.broadcast %cst_41 : f32 to vector<17x17xf32>
    %101 = arith.mulf %99, %100 : vector<17x17xf32>
    %cst_42 = arith.constant dense<0xFF800000> : vector<17xf32>
    %102 = vector.multi_reduction <maximumf>, %101, %cst_42 [1] : vector<17x17xf32> to vector<17xf32>
    %103 = vector.shape_cast %102 : vector<17xf32> to vector<17x1xf32>
    %104 = vector.broadcast %103 : vector<17x1xf32> to vector<17x17xf32>
    %105 = arith.subf %101, %104 : vector<17x17xf32>
    %106 = math.exp %105 : vector<17x17xf32>
    %cst_43 = arith.constant dense<0.000000e+00> : vector<17xf32>
    %107 = vector.multi_reduction <add>, %106, %cst_43 [1] : vector<17x17xf32> to vector<17xf32>
    %108 = vector.shape_cast %107 : vector<17xf32> to vector<17x1xf32>
    %109 = tpu.reciprocal %108 {approx = true} : vector<17x1xf32> -> vector<17x1xf32>
    %110 = vector.broadcast %109 : vector<17x1xf32> to vector<17x17xf32>
    %111 = arith.mulf %106, %110 : vector<17x17xf32>
    %cst_44 = arith.constant dense<0.000000e+00> : vector<17x8xf32>
    %112 = tpu.matmul %111, %98, %cst_44 {dimension_numbers = #tpu.dot_dimension_numbers<[1], [0], [0], [1], [0, 0, 1, 1], [], []>} : vector<17x17xf32>, vector<17x8xf32>, vector<17x8xf32> -> vector<17x8xf32>
    %113 = vector.extract_strided_slice %36 {offsets = [24, 0], sizes = [8, 32], strides = [1, 1]} : vector<32x32xf32> to vector<8x32xf32>
    %cst_45 = arith.constant dense<0.000000e+00> : vector<17x32xf32>
    %114 = tpu.matmul %112, %113, %cst_45 {dimension_numbers = #tpu.dot_dimension_numbers<[1], [0], [0], [1], [0, 0, 1, 1], [], []>} : vector<17x8xf32>, vector<8x32xf32>, vector<17x32xf32> -> vector<17x32xf32>
    %115 = arith.addf %95, %114 : vector<17x32xf32>
    %c0_46 = arith.constant 0 : index
    %c0_47 = arith.constant 0 : index
    %c0_48 = arith.constant 0 : index
    %116 = vector.load %arg11[%c0_46, %c0_47, %c0_48] : memref<1x1x32xf32, #tpu.memory_space<vmem>>, vector<1x1x32xf32>
    %117 = vector.shape_cast %116 : vector<1x1x32xf32> to vector<1x32xf32>
    %118 = vector.broadcast %117 : vector<1x32xf32> to vector<17x32xf32>
    %119 = arith.addf %115, %118 : vector<17x32xf32>
    %cst_49 = arith.constant 1.000000e+00 : f32
    %120 = vector.broadcast %cst_49 : f32 to vector<17x32xf32>
    %121 = arith.mulf %120, %119 : vector<17x32xf32>
    %122 = arith.addf %3, %121 : vector<17x32xf32>
    %c0_50 = arith.constant 0 : index
    %c0_51 = arith.constant 0 : index
    %c0_52 = arith.constant 0 : index
    %123 = vector.load %arg12[%c0_50, %c0_51, %c0_52] : memref<1x1x32xf32, #tpu.memory_space<vmem>>, vector<1x1x32xf32>
    %124 = vector.shape_cast %123 : vector<1x1x32xf32> to vector<1x32xf32>
    %c0_53 = arith.constant 0 : index
    %c0_54 = arith.constant 0 : index
    %c0_55 = arith.constant 0 : index
    %125 = vector.load %arg13[%c0_53, %c0_54, %c0_55] : memref<1x1x32xf32, #tpu.memory_space<vmem>>, vector<1x1x32xf32>
    %126 = vector.shape_cast %125 : vector<1x1x32xf32> to vector<1x32xf32>
    %cst_56 = arith.constant dense<0.000000e+00> : vector<17xf32>
    %127 = vector.multi_reduction <add>, %122, %cst_56 [1] : vector<17x32xf32> to vector<17xf32>
    %128 = vector.shape_cast %127 : vector<17xf32> to vector<17x1xf32>
    %cst_57 = arith.constant 3.200000e+01 : f32
    %129 = vector.broadcast %cst_57 : f32 to vector<17x1xf32>
    %130 = arith.divf %128, %129 : vector<17x1xf32>
    %131 = vector.broadcast %130 : vector<17x1xf32> to vector<17x32xf32>
    %132 = arith.subf %122, %131 : vector<17x32xf32>
    %133 = arith.mulf %132, %132 : vector<17x32xf32>
    %cst_58 = arith.constant dense<0.000000e+00> : vector<17xf32>
    %134 = vector.multi_reduction <add>, %133, %cst_58 [1] : vector<17x32xf32> to vector<17xf32>
    %135 = vector.shape_cast %134 : vector<17xf32> to vector<17x1xf32>
    %cst_59 = arith.constant 3.200000e+01 : f32
    %136 = vector.broadcast %cst_59 : f32 to vector<17x1xf32>
    %137 = arith.divf %135, %136 : vector<17x1xf32>
    %cst_60 = arith.constant 9.99999997E-7 : f32
    %138 = vector.broadcast %cst_60 : f32 to vector<17x1xf32>
    %139 = arith.addf %137, %138 : vector<17x1xf32>
    %140 = math.rsqrt %139 : vector<17x1xf32>
    %141 = vector.broadcast %140 : vector<17x1xf32> to vector<17x32xf32>
    %142 = arith.mulf %132, %141 : vector<17x32xf32>
    %143 = vector.broadcast %124 : vector<1x32xf32> to vector<17x32xf32>
    %144 = arith.mulf %142, %143 : vector<17x32xf32>
    %145 = vector.broadcast %126 : vector<1x32xf32> to vector<17x32xf32>
    %146 = arith.addf %144, %145 : vector<17x32xf32>
    %c0_61 = arith.constant 0 : index
    %c0_62 = arith.constant 0 : index
    %c0_63 = arith.constant 0 : index
    %147 = vector.load %arg14[%c0_61, %c0_62, %c0_63] : memref<1x32x128xf32, #tpu.memory_space<vmem>>, vector<1x32x128xf32>
    %148 = vector.shape_cast %147 : vector<1x32x128xf32> to vector<32x128xf32>
    %cst_64 = arith.constant dense<0.000000e+00> : vector<17x128xf32>
    %149 = tpu.matmul %146, %148, %cst_64 {dimension_numbers = #tpu.dot_dimension_numbers<[1], [0], [0], [1], [0, 0, 1, 1], [], []>} : vector<17x32xf32>, vector<32x128xf32>, vector<17x128xf32> -> vector<17x128xf32>
    %c0_65 = arith.constant 0 : index
    %c0_66 = arith.constant 0 : index
    %c0_67 = arith.constant 0 : index
    %150 = vector.load %arg15[%c0_65, %c0_66, %c0_67] : memref<1x1x128xf32, #tpu.memory_space<vmem>>, vector<1x1x128xf32>
    %151 = vector.shape_cast %150 : vector<1x1x128xf32> to vector<1x128xf32>
    %152 = vector.broadcast %151 : vector<1x128xf32> to vector<17x128xf32>
    %153 = arith.addf %149, %152 : vector<17x128xf32>
    %154 = arith.mulf %153, %153 : vector<17x128xf32>
    %155 = arith.mulf %153, %154 : vector<17x128xf32>
    %cst_68 = arith.constant 4.471500e-02 : f32
    %156 = vector.broadcast %cst_68 : f32 to vector<17x128xf32>
    %157 = arith.mulf %156, %155 : vector<17x128xf32>
    %158 = arith.addf %153, %157 : vector<17x128xf32>
    %cst_69 = arith.constant 0.797884583 : f32
    %159 = vector.broadcast %cst_69 : f32 to vector<17x128xf32>
    %160 = arith.mulf %159, %158 : vector<17x128xf32>
    %161 = math.tanh %160 : vector<17x128xf32>
    %cst_70 = arith.constant 1.000000e+00 : f32
    %162 = vector.broadcast %cst_70 : f32 to vector<17x128xf32>
    %163 = arith.addf %162, %161 : vector<17x128xf32>
    %cst_71 = arith.constant 5.000000e-01 : f32
    %164 = vector.broadcast %cst_71 : f32 to vector<17x128xf32>
    %165 = arith.mulf %164, %163 : vector<17x128xf32>
    %166 = arith.mulf %153, %165 : vector<17x128xf32>
    %c0_72 = arith.constant 0 : index
    %c0_73 = arith.constant 0 : index
    %c0_74 = arith.constant 0 : index
    %167 = vector.load %arg16[%c0_72, %c0_73, %c0_74] : memref<1x128x32xf32, #tpu.memory_space<vmem>>, vector<1x128x32xf32>
    %168 = vector.shape_cast %167 : vector<1x128x32xf32> to vector<128x32xf32>
    %cst_75 = arith.constant dense<0.000000e+00> : vector<17x32xf32>
    %169 = tpu.matmul %166, %168, %cst_75 {dimension_numbers = #tpu.dot_dimension_numbers<[1], [0], [0], [1], [0, 0, 1, 1], [], []>} : vector<17x128xf32>, vector<128x32xf32>, vector<17x32xf32> -> vector<17x32xf32>
    %c0_76 = arith.constant 0 : index
    %c0_77 = arith.constant 0 : index
    %c0_78 = arith.constant 0 : index
    %170 = vector.load %arg17[%c0_76, %c0_77, %c0_78] : memref<1x1x32xf32, #tpu.memory_space<vmem>>, vector<1x1x32xf32>
    %171 = vector.shape_cast %170 : vector<1x1x32xf32> to vector<1x32xf32>
    %172 = vector.broadcast %171 : vector<1x32xf32> to vector<17x32xf32>
    %173 = arith.addf %169, %172 : vector<17x32xf32>
    %cst_79 = arith.constant 1.000000e+00 : f32
    %174 = vector.broadcast %cst_79 : f32 to vector<17x32xf32>
    %175 = arith.mulf %174, %173 : vector<17x32xf32>
    %176 = arith.addf %122, %175 : vector<17x32xf32>
    %c0_80 = arith.constant 0 : index
    %c0_81 = arith.constant 0 : index
    %177 = vector.load %arg19[%c0_80, %c0_81] : memref<17x32xf32, #tpu.memory_space<vmem>>, vector<17x32xf32>
    tpu.vector_store %arg19[%c0_80, %c0_81], %176 {strides = array<i32>} : memref<17x32xf32, #tpu.memory_space<vmem>>, vector<17x32xf32>,
    %c6_i32 = arith.constant 6 : i32
    %178 = arith.cmpi eq, %arg1, %c6_i32 : i32
    %179 = arith.extui %178 : i1 to i32
    %c0_i32_82 = arith.constant 0 : i32
    %180 = arith.cmpi ne, %179, %c0_i32_82 : i32
    scf.if %180 {
      %190 = vector.extract_strided_slice %176 {offsets = [0, 0], sizes = [16, 32], strides = [1, 1]} : vector<17x32xf32> to vector<16x32xf32>
      %c0_86 = arith.constant 0 : index
      %c0_87 = arith.constant 0 : index
      %191 = vector.load %arg18[%c0_86, %c0_87] : memref<16x128xf32, #tpu.memory_space<vmem>>, vector<16x32xf32>
      tpu.vector_store %arg18[%c0_86, %c0_87], %190 {strides = array<i32>} : memref<16x128xf32, #tpu.memory_space<vmem>>, vector<16x32xf32>,
    } else {
    }
    %c7_i32 = arith.constant 7 : i32
    %181 = arith.cmpi eq, %arg1, %c7_i32 : i32
    %182 = arith.extui %181 : i1 to i32
    %c0_i32_83 = arith.constant 0 : i32
    %183 = arith.cmpi ne, %182, %c0_i32_83 : i32
    scf.if %183 {
      %190 = vector.extract_strided_slice %176 {offsets = [0, 0], sizes = [16, 32], strides = [1, 1]} : vector<17x32xf32> to vector<16x32xf32>
      %c0_86 = arith.constant 0 : index
      %c32 = arith.constant 32 : index
      %191 = vector.load %arg18[%c0_86, %c32] : memref<16x128xf32, #tpu.memory_space<vmem>>, vector<16x32xf32>
      tpu.vector_store %arg18[%c0_86, %c32], %190 {strides = array<i32>} : memref<16x128xf32, #tpu.memory_space<vmem>>, vector<16x32xf32>,
    } else {
    }
    %c8_i32 = arith.constant 8 : i32
    %184 = arith.cmpi eq, %arg1, %c8_i32 : i32
    %185 = arith.extui %184 : i1 to i32
    %c0_i32_84 = arith.constant 0 : i32
    %186 = arith.cmpi ne, %185, %c0_i32_84 : i32
    scf.if %186 {
      %190 = vector.extract_strided_slice %176 {offsets = [0, 0], sizes = [16, 32], strides = [1, 1]} : vector<17x32xf32> to vector<16x32xf32>
      %c0_86 = arith.constant 0 : index
      %c64 = arith.constant 64 : index
      %191 = vector.load %arg18[%c0_86, %c64] : memref<16x128xf32, #tpu.memory_space<vmem>>, vector<16x32xf32>
      tpu.vector_store %arg18[%c0_86, %c64], %190 {strides = array<i32>} : memref<16x128xf32, #tpu.memory_space<vmem>>, vector<16x32xf32>,
    } else {
    }
    %c9_i32 = arith.constant 9 : i32
    %187 = arith.cmpi eq, %arg1, %c9_i32 : i32
    %188 = arith.extui %187 : i1 to i32
    %c0_i32_85 = arith.constant 0 : i32
    %189 = arith.cmpi ne, %188, %c0_i32_85 : i32
    scf.if %189 {
      %190 = vector.extract_strided_slice %176 {offsets = [0, 0], sizes = [16, 32], strides = [1, 1]} : vector<17x32xf32> to vector<16x32xf32>
      %c0_86 = arith.constant 0 : index
      %c96 = arith.constant 96 : index
      %191 = vector.load %arg18[%c0_86, %c96] : memref<16x128xf32, #tpu.memory_space<vmem>>, vector<16x32xf32>
      tpu.vector_store %arg18[%c0_86, %c96], %190 {strides = array<i32>} : memref<16x128xf32, #tpu.memory_space<vmem>>, vector<16x32xf32>,
    } else {
    }
    return
  }
  func.func @transform_0(%arg0: i32, %arg1: i32) -> (i32, i32) {
    %c0_i32 = arith.constant 0 : i32
    %c0_i32_0 = arith.constant 0 : i32
    return %arg0, %c0_i32 : i32, i32
  }
  func.func @transform_1(%arg0: i32, %arg1: i32) -> (i32, i32) {
    %c0_i32 = arith.constant 0 : i32
    %c0_i32_0 = arith.constant 0 : i32
    %c0_i32_1 = arith.constant 0 : i32
    return %c0_i32, %c0_i32_0 : i32, i32
  }
  func.func @transform_2(%arg0: i32, %arg1: i32) -> (i32, i32) {
    %c0_i32 = arith.constant 0 : i32
    %c0_i32_0 = arith.constant 0 : i32
    %c0_i32_1 = arith.constant 0 : i32
    return %c0_i32, %c0_i32_0 : i32, i32
  }
  func.func @transform_3(%arg0: i32, %arg1: i32) -> (i32, i32) {
    %c0_i32 = arith.constant 0 : i32
    %c0_i32_0 = arith.constant 0 : i32
    %c0_i32_1 = arith.constant 0 : i32
    return %c0_i32, %c0_i32_0 : i32, i32
  }
  func.func @transform_4(%arg0: i32, %arg1: i32) -> (i32, i32, i32) {
    %c0_i32 = arith.constant 0 : i32
    %c0_i32_0 = arith.constant 0 : i32
    %c0_i32_1 = arith.constant 0 : i32
    return %arg1, %c0_i32, %c0_i32_0 : i32, i32, i32
  }
  func.func @transform_5(%arg0: i32, %arg1: i32) -> (i32, i32, i32) {
    %c0_i32 = arith.constant 0 : i32
    %c0_i32_0 = arith.constant 0 : i32
    %c0_i32_1 = arith.constant 0 : i32
    return %arg1, %c0_i32, %c0_i32_0 : i32, i32, i32
  }
  func.func @transform_6(%arg0: i32, %arg1: i32) -> (i32, i32, i32) {
    %c0_i32 = arith.constant 0 : i32
    %c0_i32_0 = arith.constant 0 : i32
    %c0_i32_1 = arith.constant 0 : i32
    return %arg1, %c0_i32, %c0_i32_0 : i32, i32, i32
  }
  func.func @transform_7(%arg0: i32, %arg1: i32) -> (i32, i32, i32) {
    %c0_i32 = arith.constant 0 : i32
    %c0_i32_0 = arith.constant 0 : i32
    %c0_i32_1 = arith.constant 0 : i32
    return %arg1, %c0_i32, %c0_i32_0 : i32, i32, i32
  }
  func.func @transform_8(%arg0: i32, %arg1: i32) -> (i32, i32, i32) {
    %c0_i32 = arith.constant 0 : i32
    %c0_i32_0 = arith.constant 0 : i32
    %c0_i32_1 = arith.constant 0 : i32
    return %arg1, %c0_i32, %c0_i32_0 : i32, i32, i32
  }
  func.func @transform_9(%arg0: i32, %arg1: i32) -> (i32, i32, i32) {
    %c0_i32 = arith.constant 0 : i32
    %c0_i32_0 = arith.constant 0 : i32
    %c0_i32_1 = arith.constant 0 : i32
    return %arg1, %c0_i32, %c0_i32_0 : i32, i32, i32
  }
  func.func @transform_10(%arg0: i32, %arg1: i32) -> (i32, i32, i32) {
    %c0_i32 = arith.constant 0 : i32
    %c0_i32_0 = arith.constant 0 : i32
    %c0_i32_1 = arith.constant 0 : i32
    return %arg1, %c0_i32, %c0_i32_0 : i32, i32, i32
  }
  func.func @transform_11(%arg0: i32, %arg1: i32) -> (i32, i32, i32) {
    %c0_i32 = arith.constant 0 : i32
    %c0_i32_0 = arith.constant 0 : i32
    %c0_i32_1 = arith.constant 0 : i32
    return %arg1, %c0_i32, %c0_i32_0 : i32, i32, i32
  }
  func.func @transform_12(%arg0: i32, %arg1: i32) -> (i32, i32, i32) {
    %c0_i32 = arith.constant 0 : i32
    %c0_i32_0 = arith.constant 0 : i32
    %c0_i32_1 = arith.constant 0 : i32
    return %arg1, %c0_i32, %c0_i32_0 : i32, i32, i32
  }
  func.func @transform_13(%arg0: i32, %arg1: i32) -> (i32, i32, i32) {
    %c0_i32 = arith.constant 0 : i32
    %c0_i32_0 = arith.constant 0 : i32
    %c0_i32_1 = arith.constant 0 : i32
    return %arg1, %c0_i32, %c0_i32_0 : i32, i32, i32
  }
  func.func @transform_14(%arg0: i32, %arg1: i32) -> (i32, i32, i32) {
    %c0_i32 = arith.constant 0 : i32
    %c0_i32_0 = arith.constant 0 : i32
    %c0_i32_1 = arith.constant 0 : i32
    return %arg1, %c0_i32, %c0_i32_0 : i32, i32, i32
  }
  func.func @transform_15(%arg0: i32, %arg1: i32) -> (i32, i32, i32) {
    %c0_i32 = arith.constant 0 : i32
    %c0_i32_0 = arith.constant 0 : i32
    %c0_i32_1 = arith.constant 0 : i32
    return %arg1, %c0_i32, %c0_i32_0 : i32, i32, i32
  }
  func.func @transform_16(%arg0: i32, %arg1: i32) -> (i32, i32) {
    %c0_i32 = arith.constant 0 : i32
    %c0_i32_0 = arith.constant 0 : i32
    return %arg0, %c0_i32 : i32, i32
  }
}

module attributes {stable_mosaic.version = 11 : i64} {
  func.func @_tab_conv_kernel(%arg0: i32, %arg1: memref<16x128xf32, #tpu.memory_space<vmem>>, %arg2: memref<2x16x16xf32, #tpu.memory_space<vmem>>, %arg3: memref<2x1x16xf32, #tpu.memory_space<vmem>>, %arg4: memref<2x16x16xf32, #tpu.memory_space<vmem>>, %arg5: memref<2x1x16xf32, #tpu.memory_space<vmem>>, %arg6: memref<2x16x16xf32, #tpu.memory_space<vmem>>, %arg7: memref<2x1x16xf32, #tpu.memory_space<vmem>>, %arg8: memref<8x128x16xf32, #tpu.memory_space<vmem>>, %arg9: memref<128x32xf32, #tpu.memory_space<vmem>>, %arg10: memref<1x32xf32, #tpu.memory_space<vmem>>, %arg11: memref<16x32xf32, #tpu.memory_space<vmem>>) attributes {dimension_semantics = [#tpu.dimension_semantics<parallel>], iteration_bounds = array<i64: 2>, scalar_prefetch = 0 : i64, scratch_operands = 0 : i64, tpu.core_type = #tpu.core_type<tc>, window_params = [{transform_indices = @transform_0, window_bounds = array<i64: 16, 128>}, {pipeline_mode = #tpu.pipeline_mode<synchronous>, transform_indices = @transform_1, window_bounds = array<i64: 2, 16, 16>}, {pipeline_mode = #tpu.pipeline_mode<synchronous>, transform_indices = @transform_2, window_bounds = array<i64: 2, 1, 16>}, {pipeline_mode = #tpu.pipeline_mode<synchronous>, transform_indices = @transform_3, window_bounds = array<i64: 2, 16, 16>}, {pipeline_mode = #tpu.pipeline_mode<synchronous>, transform_indices = @transform_4, window_bounds = array<i64: 2, 1, 16>}, {pipeline_mode = #tpu.pipeline_mode<synchronous>, transform_indices = @transform_5, window_bounds = array<i64: 2, 16, 16>}, {pipeline_mode = #tpu.pipeline_mode<synchronous>, transform_indices = @transform_6, window_bounds = array<i64: 2, 1, 16>}, {pipeline_mode = #tpu.pipeline_mode<synchronous>, transform_indices = @transform_7, window_bounds = array<i64: 8, 128, 16>}, {pipeline_mode = #tpu.pipeline_mode<synchronous>, transform_indices = @transform_8, window_bounds = array<i64: 128, 32>}, {pipeline_mode = #tpu.pipeline_mode<synchronous>, transform_indices = @transform_9, window_bounds = array<i64: 1, 32>}, {transform_indices = @transform_10, window_bounds = array<i64: 16, 32>}]} {
    %c0 = arith.constant 0 : index
    %c0_0 = arith.constant 0 : index
    %0 = vector.load %arg1[%c0, %c0_0] : memref<16x128xf32, #tpu.memory_space<vmem>>, vector<16x128xf32>
    %1 = tpu.transpose %0, [1, 0] : vector<16x128xf32> -> vector<128x16xf32>
    %c0_1 = arith.constant 0 : index
    %c0_2 = arith.constant 0 : index
    %c0_3 = arith.constant 0 : index
    %2 = vector.load %arg2[%c0_1, %c0_2, %c0_3] : memref<2x16x16xf32, #tpu.memory_space<vmem>>, vector<1x16x16xf32>
    %3 = vector.shape_cast %2 : vector<1x16x16xf32> to vector<16x16xf32>
    %cst = arith.constant dense<0.000000e+00> : vector<128x16xf32>
    %4 = tpu.matmul %1, %3, %cst {dimension_numbers = #tpu.dot_dimension_numbers<[1], [0], [0], [1], [0, 0, 1, 1], [], []>} : vector<128x16xf32>, vector<16x16xf32>, vector<128x16xf32> -> vector<128x16xf32>
    %c0_4 = arith.constant 0 : index
    %c0_5 = arith.constant 0 : index
    %c0_6 = arith.constant 0 : index
    %5 = vector.load %arg3[%c0_4, %c0_5, %c0_6] : memref<2x1x16xf32, #tpu.memory_space<vmem>>, vector<1x1x16xf32>
    %6 = vector.shape_cast %5 : vector<1x1x16xf32> to vector<1x16xf32>
    %7 = vector.broadcast %6 : vector<1x16xf32> to vector<128x16xf32>
    %8 = arith.addf %4, %7 : vector<128x16xf32>
    %c0_7 = arith.constant 0 : index
    %c0_8 = arith.constant 0 : index
    %c0_9 = arith.constant 0 : index
    %9 = vector.load %arg4[%c0_7, %c0_8, %c0_9] : memref<2x16x16xf32, #tpu.memory_space<vmem>>, vector<1x16x16xf32>
    %10 = vector.shape_cast %9 : vector<1x16x16xf32> to vector<16x16xf32>
    %cst_10 = arith.constant dense<0.000000e+00> : vector<128x16xf32>
    %11 = tpu.matmul %1, %10, %cst_10 {dimension_numbers = #tpu.dot_dimension_numbers<[1], [0], [0], [1], [0, 0, 1, 1], [], []>} : vector<128x16xf32>, vector<16x16xf32>, vector<128x16xf32> -> vector<128x16xf32>
    %c0_11 = arith.constant 0 : index
    %c0_12 = arith.constant 0 : index
    %c0_13 = arith.constant 0 : index
    %12 = vector.load %arg5[%c0_11, %c0_12, %c0_13] : memref<2x1x16xf32, #tpu.memory_space<vmem>>, vector<1x1x16xf32>
    %13 = vector.shape_cast %12 : vector<1x1x16xf32> to vector<1x16xf32>
    %14 = vector.broadcast %13 : vector<1x16xf32> to vector<128x16xf32>
    %15 = arith.addf %11, %14 : vector<128x16xf32>
    %c0_14 = arith.constant 0 : index
    %c0_15 = arith.constant 0 : index
    %c0_16 = arith.constant 0 : index
    %16 = vector.load %arg6[%c0_14, %c0_15, %c0_16] : memref<2x16x16xf32, #tpu.memory_space<vmem>>, vector<1x16x16xf32>
    %17 = vector.shape_cast %16 : vector<1x16x16xf32> to vector<16x16xf32>
    %cst_17 = arith.constant dense<0.000000e+00> : vector<128x16xf32>
    %18 = tpu.matmul %1, %17, %cst_17 {dimension_numbers = #tpu.dot_dimension_numbers<[1], [0], [0], [1], [0, 0, 1, 1], [], []>} : vector<128x16xf32>, vector<16x16xf32>, vector<128x16xf32> -> vector<128x16xf32>
    %c0_18 = arith.constant 0 : index
    %c0_19 = arith.constant 0 : index
    %c0_20 = arith.constant 0 : index
    %19 = vector.load %arg7[%c0_18, %c0_19, %c0_20] : memref<2x1x16xf32, #tpu.memory_space<vmem>>, vector<1x1x16xf32>
    %20 = vector.shape_cast %19 : vector<1x1x16xf32> to vector<1x16xf32>
    %21 = vector.broadcast %20 : vector<1x16xf32> to vector<128x16xf32>
    %22 = arith.addf %18, %21 : vector<128x16xf32>
    %cst_21 = arith.constant dense<0.000000e+00> : vector<128x128xf32>
    %23 = tpu.matmul %8, %15, %cst_21 {dimension_numbers = #tpu.dot_dimension_numbers<[1], [1], [0], [0], [0, 0, 1, 0], [], []>} : vector<128x16xf32>, vector<128x16xf32>, vector<128x128xf32> -> vector<128x128xf32>
    %cst_22 = arith.constant 2.500000e-01 : f32
    %24 = vector.broadcast %cst_22 : f32 to vector<128x128xf32>
    %25 = arith.mulf %23, %24 : vector<128x128xf32>
    %cst_23 = arith.constant dense<0xFF800000> : vector<128xf32>
    %26 = vector.multi_reduction <maximumf>, %25, %cst_23 [1] : vector<128x128xf32> to vector<128xf32>
    %27 = vector.shape_cast %26 : vector<128xf32> to vector<128x1xf32>
    %28 = vector.broadcast %27 : vector<128x1xf32> to vector<128x128xf32>
    %29 = arith.subf %25, %28 : vector<128x128xf32>
    %30 = math.exp %29 : vector<128x128xf32>
    %cst_24 = arith.constant dense<0.000000e+00> : vector<128xf32>
    %31 = vector.multi_reduction <add>, %30, %cst_24 [1] : vector<128x128xf32> to vector<128xf32>
    %32 = vector.shape_cast %31 : vector<128xf32> to vector<128x1xf32>
    %33 = tpu.reciprocal %32 {approx = true} : vector<128x1xf32> -> vector<128x1xf32>
    %34 = vector.broadcast %33 : vector<128x1xf32> to vector<128x128xf32>
    %35 = arith.mulf %30, %34 : vector<128x128xf32>
    %cst_25 = arith.constant dense<0.000000e+00> : vector<128x16xf32>
    %36 = tpu.matmul %35, %22, %cst_25 {dimension_numbers = #tpu.dot_dimension_numbers<[1], [0], [0], [1], [0, 0, 1, 1], [], []>} : vector<128x128xf32>, vector<128x16xf32>, vector<128x16xf32> -> vector<128x16xf32>
    %c0_26 = arith.constant 0 : index
    %c0_27 = arith.constant 0 : index
    %c0_28 = arith.constant 0 : index
    %37 = vector.load %arg8[%c0_26, %c0_27, %c0_28] : memref<8x128x16xf32, #tpu.memory_space<vmem>>, vector<1x128x16xf32>
    %38 = vector.shape_cast %37 : vector<1x128x16xf32> to vector<128x16xf32>
    %39 = vector.extract_strided_slice %36 {offsets = [0, 0], sizes = [16, 16], strides = [1, 1]} : vector<128x16xf32> to vector<16x16xf32>
    %cst_29 = arith.constant dense<0.000000e+00> : vector<128x16xf32>
    %40 = tpu.matmul %38, %39, %cst_29 {dimension_numbers = #tpu.dot_dimension_numbers<[1], [1], [0], [0], [0, 0, 1, 0], [], []>} : vector<128x16xf32>, vector<16x16xf32>, vector<128x16xf32> -> vector<128x16xf32>
    %c1 = arith.constant 1 : index
    %c0_30 = arith.constant 0 : index
    %c0_31 = arith.constant 0 : index
    %41 = vector.load %arg8[%c1, %c0_30, %c0_31] : memref<8x128x16xf32, #tpu.memory_space<vmem>>, vector<1x128x16xf32>
    %42 = vector.shape_cast %41 : vector<1x128x16xf32> to vector<128x16xf32>
    %43 = vector.extract_strided_slice %36 {offsets = [16, 0], sizes = [16, 16], strides = [1, 1]} : vector<128x16xf32> to vector<16x16xf32>
    %cst_32 = arith.constant dense<0.000000e+00> : vector<128x16xf32>
    %44 = tpu.matmul %42, %43, %cst_32 {dimension_numbers = #tpu.dot_dimension_numbers<[1], [1], [0], [0], [0, 0, 1, 0], [], []>} : vector<128x16xf32>, vector<16x16xf32>, vector<128x16xf32> -> vector<128x16xf32>
    %45 = arith.addf %40, %44 : vector<128x16xf32>
    %c2 = arith.constant 2 : index
    %c0_33 = arith.constant 0 : index
    %c0_34 = arith.constant 0 : index
    %46 = vector.load %arg8[%c2, %c0_33, %c0_34] : memref<8x128x16xf32, #tpu.memory_space<vmem>>, vector<1x128x16xf32>
    %47 = vector.shape_cast %46 : vector<1x128x16xf32> to vector<128x16xf32>
    %48 = vector.extract_strided_slice %36 {offsets = [32, 0], sizes = [16, 16], strides = [1, 1]} : vector<128x16xf32> to vector<16x16xf32>
    %cst_35 = arith.constant dense<0.000000e+00> : vector<128x16xf32>
    %49 = tpu.matmul %47, %48, %cst_35 {dimension_numbers = #tpu.dot_dimension_numbers<[1], [1], [0], [0], [0, 0, 1, 0], [], []>} : vector<128x16xf32>, vector<16x16xf32>, vector<128x16xf32> -> vector<128x16xf32>
    %50 = arith.addf %45, %49 : vector<128x16xf32>
    %c3 = arith.constant 3 : index
    %c0_36 = arith.constant 0 : index
    %c0_37 = arith.constant 0 : index
    %51 = vector.load %arg8[%c3, %c0_36, %c0_37] : memref<8x128x16xf32, #tpu.memory_space<vmem>>, vector<1x128x16xf32>
    %52 = vector.shape_cast %51 : vector<1x128x16xf32> to vector<128x16xf32>
    %53 = vector.extract_strided_slice %36 {offsets = [48, 0], sizes = [16, 16], strides = [1, 1]} : vector<128x16xf32> to vector<16x16xf32>
    %cst_38 = arith.constant dense<0.000000e+00> : vector<128x16xf32>
    %54 = tpu.matmul %52, %53, %cst_38 {dimension_numbers = #tpu.dot_dimension_numbers<[1], [1], [0], [0], [0, 0, 1, 0], [], []>} : vector<128x16xf32>, vector<16x16xf32>, vector<128x16xf32> -> vector<128x16xf32>
    %55 = arith.addf %50, %54 : vector<128x16xf32>
    %c4 = arith.constant 4 : index
    %c0_39 = arith.constant 0 : index
    %c0_40 = arith.constant 0 : index
    %56 = vector.load %arg8[%c4, %c0_39, %c0_40] : memref<8x128x16xf32, #tpu.memory_space<vmem>>, vector<1x128x16xf32>
    %57 = vector.shape_cast %56 : vector<1x128x16xf32> to vector<128x16xf32>
    %58 = vector.extract_strided_slice %36 {offsets = [64, 0], sizes = [16, 16], strides = [1, 1]} : vector<128x16xf32> to vector<16x16xf32>
    %cst_41 = arith.constant dense<0.000000e+00> : vector<128x16xf32>
    %59 = tpu.matmul %57, %58, %cst_41 {dimension_numbers = #tpu.dot_dimension_numbers<[1], [1], [0], [0], [0, 0, 1, 0], [], []>} : vector<128x16xf32>, vector<16x16xf32>, vector<128x16xf32> -> vector<128x16xf32>
    %60 = arith.addf %55, %59 : vector<128x16xf32>
    %c5 = arith.constant 5 : index
    %c0_42 = arith.constant 0 : index
    %c0_43 = arith.constant 0 : index
    %61 = vector.load %arg8[%c5, %c0_42, %c0_43] : memref<8x128x16xf32, #tpu.memory_space<vmem>>, vector<1x128x16xf32>
    %62 = vector.shape_cast %61 : vector<1x128x16xf32> to vector<128x16xf32>
    %63 = vector.extract_strided_slice %36 {offsets = [80, 0], sizes = [16, 16], strides = [1, 1]} : vector<128x16xf32> to vector<16x16xf32>
    %cst_44 = arith.constant dense<0.000000e+00> : vector<128x16xf32>
    %64 = tpu.matmul %62, %63, %cst_44 {dimension_numbers = #tpu.dot_dimension_numbers<[1], [1], [0], [0], [0, 0, 1, 0], [], []>} : vector<128x16xf32>, vector<16x16xf32>, vector<128x16xf32> -> vector<128x16xf32>
    %65 = arith.addf %60, %64 : vector<128x16xf32>
    %c6 = arith.constant 6 : index
    %c0_45 = arith.constant 0 : index
    %c0_46 = arith.constant 0 : index
    %66 = vector.load %arg8[%c6, %c0_45, %c0_46] : memref<8x128x16xf32, #tpu.memory_space<vmem>>, vector<1x128x16xf32>
    %67 = vector.shape_cast %66 : vector<1x128x16xf32> to vector<128x16xf32>
    %68 = vector.extract_strided_slice %36 {offsets = [96, 0], sizes = [16, 16], strides = [1, 1]} : vector<128x16xf32> to vector<16x16xf32>
    %cst_47 = arith.constant dense<0.000000e+00> : vector<128x16xf32>
    %69 = tpu.matmul %67, %68, %cst_47 {dimension_numbers = #tpu.dot_dimension_numbers<[1], [1], [0], [0], [0, 0, 1, 0], [], []>} : vector<128x16xf32>, vector<16x16xf32>, vector<128x16xf32> -> vector<128x16xf32>
    %70 = arith.addf %65, %69 : vector<128x16xf32>
    %c7 = arith.constant 7 : index
    %c0_48 = arith.constant 0 : index
    %c0_49 = arith.constant 0 : index
    %71 = vector.load %arg8[%c7, %c0_48, %c0_49] : memref<8x128x16xf32, #tpu.memory_space<vmem>>, vector<1x128x16xf32>
    %72 = vector.shape_cast %71 : vector<1x128x16xf32> to vector<128x16xf32>
    %73 = vector.extract_strided_slice %36 {offsets = [112, 0], sizes = [16, 16], strides = [1, 1]} : vector<128x16xf32> to vector<16x16xf32>
    %cst_50 = arith.constant dense<0.000000e+00> : vector<128x16xf32>
    %74 = tpu.matmul %72, %73, %cst_50 {dimension_numbers = #tpu.dot_dimension_numbers<[1], [1], [0], [0], [0, 0, 1, 0], [], []>} : vector<128x16xf32>, vector<16x16xf32>, vector<128x16xf32> -> vector<128x16xf32>
    %75 = arith.addf %70, %74 : vector<128x16xf32>
    %76 = arith.addf %1, %75 : vector<128x16xf32>
    %c1_51 = arith.constant 1 : index
    %c0_52 = arith.constant 0 : index
    %c0_53 = arith.constant 0 : index
    %77 = vector.load %arg2[%c1_51, %c0_52, %c0_53] : memref<2x16x16xf32, #tpu.memory_space<vmem>>, vector<1x16x16xf32>
    %78 = vector.shape_cast %77 : vector<1x16x16xf32> to vector<16x16xf32>
    %cst_54 = arith.constant dense<0.000000e+00> : vector<128x16xf32>
    %79 = tpu.matmul %76, %78, %cst_54 {dimension_numbers = #tpu.dot_dimension_numbers<[1], [0], [0], [1], [0, 0, 1, 1], [], []>} : vector<128x16xf32>, vector<16x16xf32>, vector<128x16xf32> -> vector<128x16xf32>
    %c1_55 = arith.constant 1 : index
    %c0_56 = arith.constant 0 : index
    %c0_57 = arith.constant 0 : index
    %80 = vector.load %arg3[%c1_55, %c0_56, %c0_57] : memref<2x1x16xf32, #tpu.memory_space<vmem>>, vector<1x1x16xf32>
    %81 = vector.shape_cast %80 : vector<1x1x16xf32> to vector<1x16xf32>
    %82 = vector.broadcast %81 : vector<1x16xf32> to vector<128x16xf32>
    %83 = arith.addf %79, %82 : vector<128x16xf32>
    %c1_58 = arith.constant 1 : index
    %c0_59 = arith.constant 0 : index
    %c0_60 = arith.constant 0 : index
    %84 = vector.load %arg4[%c1_58, %c0_59, %c0_60] : memref<2x16x16xf32, #tpu.memory_space<vmem>>, vector<1x16x16xf32>
    %85 = vector.shape_cast %84 : vector<1x16x16xf32> to vector<16x16xf32>
    %cst_61 = arith.constant dense<0.000000e+00> : vector<128x16xf32>
    %86 = tpu.matmul %76, %85, %cst_61 {dimension_numbers = #tpu.dot_dimension_numbers<[1], [0], [0], [1], [0, 0, 1, 1], [], []>} : vector<128x16xf32>, vector<16x16xf32>, vector<128x16xf32> -> vector<128x16xf32>
    %c1_62 = arith.constant 1 : index
    %c0_63 = arith.constant 0 : index
    %c0_64 = arith.constant 0 : index
    %87 = vector.load %arg5[%c1_62, %c0_63, %c0_64] : memref<2x1x16xf32, #tpu.memory_space<vmem>>, vector<1x1x16xf32>
    %88 = vector.shape_cast %87 : vector<1x1x16xf32> to vector<1x16xf32>
    %89 = vector.broadcast %88 : vector<1x16xf32> to vector<128x16xf32>
    %90 = arith.addf %86, %89 : vector<128x16xf32>
    %c1_65 = arith.constant 1 : index
    %c0_66 = arith.constant 0 : index
    %c0_67 = arith.constant 0 : index
    %91 = vector.load %arg6[%c1_65, %c0_66, %c0_67] : memref<2x16x16xf32, #tpu.memory_space<vmem>>, vector<1x16x16xf32>
    %92 = vector.shape_cast %91 : vector<1x16x16xf32> to vector<16x16xf32>
    %cst_68 = arith.constant dense<0.000000e+00> : vector<128x16xf32>
    %93 = tpu.matmul %76, %92, %cst_68 {dimension_numbers = #tpu.dot_dimension_numbers<[1], [0], [0], [1], [0, 0, 1, 1], [], []>} : vector<128x16xf32>, vector<16x16xf32>, vector<128x16xf32> -> vector<128x16xf32>
    %c1_69 = arith.constant 1 : index
    %c0_70 = arith.constant 0 : index
    %c0_71 = arith.constant 0 : index
    %94 = vector.load %arg7[%c1_69, %c0_70, %c0_71] : memref<2x1x16xf32, #tpu.memory_space<vmem>>, vector<1x1x16xf32>
    %95 = vector.shape_cast %94 : vector<1x1x16xf32> to vector<1x16xf32>
    %96 = vector.broadcast %95 : vector<1x16xf32> to vector<128x16xf32>
    %97 = arith.addf %93, %96 : vector<128x16xf32>
    %cst_72 = arith.constant dense<0.000000e+00> : vector<128x128xf32>
    %98 = tpu.matmul %83, %90, %cst_72 {dimension_numbers = #tpu.dot_dimension_numbers<[1], [1], [0], [0], [0, 0, 1, 0], [], []>} : vector<128x16xf32>, vector<128x16xf32>, vector<128x128xf32> -> vector<128x128xf32>
    %cst_73 = arith.constant 2.500000e-01 : f32
    %99 = vector.broadcast %cst_73 : f32 to vector<128x128xf32>
    %100 = arith.mulf %98, %99 : vector<128x128xf32>
    %cst_74 = arith.constant dense<0xFF800000> : vector<128xf32>
    %101 = vector.multi_reduction <maximumf>, %100, %cst_74 [1] : vector<128x128xf32> to vector<128xf32>
    %102 = vector.shape_cast %101 : vector<128xf32> to vector<128x1xf32>
    %103 = vector.broadcast %102 : vector<128x1xf32> to vector<128x128xf32>
    %104 = arith.subf %100, %103 : vector<128x128xf32>
    %105 = math.exp %104 : vector<128x128xf32>
    %cst_75 = arith.constant dense<0.000000e+00> : vector<128xf32>
    %106 = vector.multi_reduction <add>, %105, %cst_75 [1] : vector<128x128xf32> to vector<128xf32>
    %107 = vector.shape_cast %106 : vector<128xf32> to vector<128x1xf32>
    %108 = tpu.reciprocal %107 {approx = true} : vector<128x1xf32> -> vector<128x1xf32>
    %109 = vector.broadcast %108 : vector<128x1xf32> to vector<128x128xf32>
    %110 = arith.mulf %105, %109 : vector<128x128xf32>
    %cst_76 = arith.constant dense<0.000000e+00> : vector<128x16xf32>
    %111 = tpu.matmul %110, %97, %cst_76 {dimension_numbers = #tpu.dot_dimension_numbers<[1], [0], [0], [1], [0, 0, 1, 1], [], []>} : vector<128x128xf32>, vector<128x16xf32>, vector<128x16xf32> -> vector<128x16xf32>
    %c0_77 = arith.constant 0 : index
    %c0_78 = arith.constant 0 : index
    %c0_79 = arith.constant 0 : index
    %112 = vector.load %arg8[%c0_77, %c0_78, %c0_79] : memref<8x128x16xf32, #tpu.memory_space<vmem>>, vector<1x128x16xf32>
    %113 = vector.shape_cast %112 : vector<1x128x16xf32> to vector<128x16xf32>
    %114 = vector.extract_strided_slice %111 {offsets = [0, 0], sizes = [16, 16], strides = [1, 1]} : vector<128x16xf32> to vector<16x16xf32>
    %cst_80 = arith.constant dense<0.000000e+00> : vector<128x16xf32>
    %115 = tpu.matmul %113, %114, %cst_80 {dimension_numbers = #tpu.dot_dimension_numbers<[1], [1], [0], [0], [0, 0, 1, 0], [], []>} : vector<128x16xf32>, vector<16x16xf32>, vector<128x16xf32> -> vector<128x16xf32>
    %c1_81 = arith.constant 1 : index
    %c0_82 = arith.constant 0 : index
    %c0_83 = arith.constant 0 : index
    %116 = vector.load %arg8[%c1_81, %c0_82, %c0_83] : memref<8x128x16xf32, #tpu.memory_space<vmem>>, vector<1x128x16xf32>
    %117 = vector.shape_cast %116 : vector<1x128x16xf32> to vector<128x16xf32>
    %118 = vector.extract_strided_slice %111 {offsets = [16, 0], sizes = [16, 16], strides = [1, 1]} : vector<128x16xf32> to vector<16x16xf32>
    %cst_84 = arith.constant dense<0.000000e+00> : vector<128x16xf32>
    %119 = tpu.matmul %117, %118, %cst_84 {dimension_numbers = #tpu.dot_dimension_numbers<[1], [1], [0], [0], [0, 0, 1, 0], [], []>} : vector<128x16xf32>, vector<16x16xf32>, vector<128x16xf32> -> vector<128x16xf32>
    %120 = arith.addf %115, %119 : vector<128x16xf32>
    %c2_85 = arith.constant 2 : index
    %c0_86 = arith.constant 0 : index
    %c0_87 = arith.constant 0 : index
    %121 = vector.load %arg8[%c2_85, %c0_86, %c0_87] : memref<8x128x16xf32, #tpu.memory_space<vmem>>, vector<1x128x16xf32>
    %122 = vector.shape_cast %121 : vector<1x128x16xf32> to vector<128x16xf32>
    %123 = vector.extract_strided_slice %111 {offsets = [32, 0], sizes = [16, 16], strides = [1, 1]} : vector<128x16xf32> to vector<16x16xf32>
    %cst_88 = arith.constant dense<0.000000e+00> : vector<128x16xf32>
    %124 = tpu.matmul %122, %123, %cst_88 {dimension_numbers = #tpu.dot_dimension_numbers<[1], [1], [0], [0], [0, 0, 1, 0], [], []>} : vector<128x16xf32>, vector<16x16xf32>, vector<128x16xf32> -> vector<128x16xf32>
    %125 = arith.addf %120, %124 : vector<128x16xf32>
    %c3_89 = arith.constant 3 : index
    %c0_90 = arith.constant 0 : index
    %c0_91 = arith.constant 0 : index
    %126 = vector.load %arg8[%c3_89, %c0_90, %c0_91] : memref<8x128x16xf32, #tpu.memory_space<vmem>>, vector<1x128x16xf32>
    %127 = vector.shape_cast %126 : vector<1x128x16xf32> to vector<128x16xf32>
    %128 = vector.extract_strided_slice %111 {offsets = [48, 0], sizes = [16, 16], strides = [1, 1]} : vector<128x16xf32> to vector<16x16xf32>
    %cst_92 = arith.constant dense<0.000000e+00> : vector<128x16xf32>
    %129 = tpu.matmul %127, %128, %cst_92 {dimension_numbers = #tpu.dot_dimension_numbers<[1], [1], [0], [0], [0, 0, 1, 0], [], []>} : vector<128x16xf32>, vector<16x16xf32>, vector<128x16xf32> -> vector<128x16xf32>
    %130 = arith.addf %125, %129 : vector<128x16xf32>
    %c4_93 = arith.constant 4 : index
    %c0_94 = arith.constant 0 : index
    %c0_95 = arith.constant 0 : index
    %131 = vector.load %arg8[%c4_93, %c0_94, %c0_95] : memref<8x128x16xf32, #tpu.memory_space<vmem>>, vector<1x128x16xf32>
    %132 = vector.shape_cast %131 : vector<1x128x16xf32> to vector<128x16xf32>
    %133 = vector.extract_strided_slice %111 {offsets = [64, 0], sizes = [16, 16], strides = [1, 1]} : vector<128x16xf32> to vector<16x16xf32>
    %cst_96 = arith.constant dense<0.000000e+00> : vector<128x16xf32>
    %134 = tpu.matmul %132, %133, %cst_96 {dimension_numbers = #tpu.dot_dimension_numbers<[1], [1], [0], [0], [0, 0, 1, 0], [], []>} : vector<128x16xf32>, vector<16x16xf32>, vector<128x16xf32> -> vector<128x16xf32>
    %135 = arith.addf %130, %134 : vector<128x16xf32>
    %c5_97 = arith.constant 5 : index
    %c0_98 = arith.constant 0 : index
    %c0_99 = arith.constant 0 : index
    %136 = vector.load %arg8[%c5_97, %c0_98, %c0_99] : memref<8x128x16xf32, #tpu.memory_space<vmem>>, vector<1x128x16xf32>
    %137 = vector.shape_cast %136 : vector<1x128x16xf32> to vector<128x16xf32>
    %138 = vector.extract_strided_slice %111 {offsets = [80, 0], sizes = [16, 16], strides = [1, 1]} : vector<128x16xf32> to vector<16x16xf32>
    %cst_100 = arith.constant dense<0.000000e+00> : vector<128x16xf32>
    %139 = tpu.matmul %137, %138, %cst_100 {dimension_numbers = #tpu.dot_dimension_numbers<[1], [1], [0], [0], [0, 0, 1, 0], [], []>} : vector<128x16xf32>, vector<16x16xf32>, vector<128x16xf32> -> vector<128x16xf32>
    %140 = arith.addf %135, %139 : vector<128x16xf32>
    %c6_101 = arith.constant 6 : index
    %c0_102 = arith.constant 0 : index
    %c0_103 = arith.constant 0 : index
    %141 = vector.load %arg8[%c6_101, %c0_102, %c0_103] : memref<8x128x16xf32, #tpu.memory_space<vmem>>, vector<1x128x16xf32>
    %142 = vector.shape_cast %141 : vector<1x128x16xf32> to vector<128x16xf32>
    %143 = vector.extract_strided_slice %111 {offsets = [96, 0], sizes = [16, 16], strides = [1, 1]} : vector<128x16xf32> to vector<16x16xf32>
    %cst_104 = arith.constant dense<0.000000e+00> : vector<128x16xf32>
    %144 = tpu.matmul %142, %143, %cst_104 {dimension_numbers = #tpu.dot_dimension_numbers<[1], [1], [0], [0], [0, 0, 1, 0], [], []>} : vector<128x16xf32>, vector<16x16xf32>, vector<128x16xf32> -> vector<128x16xf32>
    %145 = arith.addf %140, %144 : vector<128x16xf32>
    %c7_105 = arith.constant 7 : index
    %c0_106 = arith.constant 0 : index
    %c0_107 = arith.constant 0 : index
    %146 = vector.load %arg8[%c7_105, %c0_106, %c0_107] : memref<8x128x16xf32, #tpu.memory_space<vmem>>, vector<1x128x16xf32>
    %147 = vector.shape_cast %146 : vector<1x128x16xf32> to vector<128x16xf32>
    %148 = vector.extract_strided_slice %111 {offsets = [112, 0], sizes = [16, 16], strides = [1, 1]} : vector<128x16xf32> to vector<16x16xf32>
    %cst_108 = arith.constant dense<0.000000e+00> : vector<128x16xf32>
    %149 = tpu.matmul %147, %148, %cst_108 {dimension_numbers = #tpu.dot_dimension_numbers<[1], [1], [0], [0], [0, 0, 1, 0], [], []>} : vector<128x16xf32>, vector<16x16xf32>, vector<128x16xf32> -> vector<128x16xf32>
    %150 = arith.addf %145, %149 : vector<128x16xf32>
    %151 = arith.addf %76, %150 : vector<128x16xf32>
    %152 = tpu.transpose %151, [1, 0] : vector<128x16xf32> -> vector<16x128xf32>
    %c0_109 = arith.constant 0 : index
    %c0_110 = arith.constant 0 : index
    %153 = vector.load %arg9[%c0_109, %c0_110] : memref<128x32xf32, #tpu.memory_space<vmem>>, vector<128x32xf32>
    %cst_111 = arith.constant dense<0.000000e+00> : vector<16x32xf32>
    %154 = tpu.matmul %152, %153, %cst_111 {dimension_numbers = #tpu.dot_dimension_numbers<[1], [0], [0], [1], [0, 0, 1, 1], [], []>} : vector<16x128xf32>, vector<128x32xf32>, vector<16x32xf32> -> vector<16x32xf32>
    %c0_112 = arith.constant 0 : index
    %c0_113 = arith.constant 0 : index
    %155 = vector.load %arg10[%c0_112, %c0_113] : memref<1x32xf32, #tpu.memory_space<vmem>>, vector<1x32xf32>
    %156 = vector.broadcast %155 : vector<1x32xf32> to vector<16x32xf32>
    %157 = arith.addf %154, %156 : vector<16x32xf32>
    %c0_114 = arith.constant 0 : index
    %c0_115 = arith.constant 0 : index
    %158 = vector.load %arg11[%c0_114, %c0_115] : memref<16x32xf32, #tpu.memory_space<vmem>>, vector<16x32xf32>
    tpu.vector_store %arg11[%c0_114, %c0_115], %157 {strides = array<i32>} : memref<16x32xf32, #tpu.memory_space<vmem>>, vector<16x32xf32>,
    return
  }
  func.func @transform_0(%arg0: i32) -> (i32, i32) {
    %c0_i32 = arith.constant 0 : i32
    %c0_i32_0 = arith.constant 0 : i32
    return %arg0, %c0_i32 : i32, i32
  }
  func.func @transform_1(%arg0: i32) -> (i32, i32, i32) {
    %c0_i32 = arith.constant 0 : i32
    %c0_i32_0 = arith.constant 0 : i32
    %c0_i32_1 = arith.constant 0 : i32
    %c0_i32_2 = arith.constant 0 : i32
    return %c0_i32, %c0_i32_0, %c0_i32_1 : i32, i32, i32
  }
  func.func @transform_2(%arg0: i32) -> (i32, i32, i32) {
    %c0_i32 = arith.constant 0 : i32
    %c0_i32_0 = arith.constant 0 : i32
    %c0_i32_1 = arith.constant 0 : i32
    %c0_i32_2 = arith.constant 0 : i32
    return %c0_i32, %c0_i32_0, %c0_i32_1 : i32, i32, i32
  }
  func.func @transform_3(%arg0: i32) -> (i32, i32, i32) {
    %c0_i32 = arith.constant 0 : i32
    %c0_i32_0 = arith.constant 0 : i32
    %c0_i32_1 = arith.constant 0 : i32
    %c0_i32_2 = arith.constant 0 : i32
    return %c0_i32, %c0_i32_0, %c0_i32_1 : i32, i32, i32
  }
  func.func @transform_4(%arg0: i32) -> (i32, i32, i32) {
    %c0_i32 = arith.constant 0 : i32
    %c0_i32_0 = arith.constant 0 : i32
    %c0_i32_1 = arith.constant 0 : i32
    %c0_i32_2 = arith.constant 0 : i32
    return %c0_i32, %c0_i32_0, %c0_i32_1 : i32, i32, i32
  }
  func.func @transform_5(%arg0: i32) -> (i32, i32, i32) {
    %c0_i32 = arith.constant 0 : i32
    %c0_i32_0 = arith.constant 0 : i32
    %c0_i32_1 = arith.constant 0 : i32
    %c0_i32_2 = arith.constant 0 : i32
    return %c0_i32, %c0_i32_0, %c0_i32_1 : i32, i32, i32
  }
  func.func @transform_6(%arg0: i32) -> (i32, i32, i32) {
    %c0_i32 = arith.constant 0 : i32
    %c0_i32_0 = arith.constant 0 : i32
    %c0_i32_1 = arith.constant 0 : i32
    %c0_i32_2 = arith.constant 0 : i32
    return %c0_i32, %c0_i32_0, %c0_i32_1 : i32, i32, i32
  }
  func.func @transform_7(%arg0: i32) -> (i32, i32, i32) {
    %c0_i32 = arith.constant 0 : i32
    %c0_i32_0 = arith.constant 0 : i32
    %c0_i32_1 = arith.constant 0 : i32
    %c0_i32_2 = arith.constant 0 : i32
    return %c0_i32, %c0_i32_0, %c0_i32_1 : i32, i32, i32
  }
  func.func @transform_8(%arg0: i32) -> (i32, i32) {
    %c0_i32 = arith.constant 0 : i32
    %c0_i32_0 = arith.constant 0 : i32
    %c0_i32_1 = arith.constant 0 : i32
    return %c0_i32, %c0_i32_0 : i32, i32
  }
  func.func @transform_9(%arg0: i32) -> (i32, i32) {
    %c0_i32 = arith.constant 0 : i32
    %c0_i32_0 = arith.constant 0 : i32
    %c0_i32_1 = arith.constant 0 : i32
    return %c0_i32, %c0_i32_0 : i32, i32
  }
  func.func @transform_10(%arg0: i32) -> (i32, i32) {
    %c0_i32 = arith.constant 0 : i32
    %c0_i32_0 = arith.constant 0 : i32
    return %arg0, %c0_i32 : i32, i32
  }
}

module attributes {stable_mosaic.version = 11 : i64} {
  func.func @_swin_kernel(%arg0: i32, %arg1: i32, %arg2: memref<16x32xf32, #tpu.memory_space<vmem>>, %arg3: memref<1x2x16x16xf32, #tpu.memory_space<vmem>>, %arg4: memref<1x1x32xf32, #tpu.memory_space<vmem>>, %arg5: memref<1x1x32xf32, #tpu.memory_space<vmem>>, %arg6: memref<1x32x96xf32, #tpu.memory_space<vmem>>, %arg7: memref<1x1x96xf32, #tpu.memory_space<vmem>>, %arg8: memref<1x32x32xf32, #tpu.memory_space<vmem>>, %arg9: memref<1x1x32xf32, #tpu.memory_space<vmem>>, %arg10: memref<1x1x32xf32, #tpu.memory_space<vmem>>, %arg11: memref<1x1x32xf32, #tpu.memory_space<vmem>>, %arg12: memref<1x32x32xf32, #tpu.memory_space<vmem>>, %arg13: memref<1x1x32xf32, #tpu.memory_space<vmem>>, %arg14: memref<1x32x32xf32, #tpu.memory_space<vmem>>, %arg15: memref<1x1x32xf32, #tpu.memory_space<vmem>>, %arg16: memref<16x32xf32, #tpu.memory_space<vmem>>) attributes {dimension_semantics = [#tpu.dimension_semantics<parallel>, #tpu.dimension_semantics<arbitrary>], iteration_bounds = array<i64: 2, 4>, scalar_prefetch = 0 : i64, scratch_operands = 0 : i64, tpu.core_type = #tpu.core_type<tc>, window_params = [{transform_indices = @transform_0, window_bounds = array<i64: 16, 32>}, {transform_indices = @transform_1, window_bounds = array<i64: 1, 2, 16, 16>}, {transform_indices = @transform_2, window_bounds = array<i64: 1, 1, 32>}, {transform_indices = @transform_3, window_bounds = array<i64: 1, 1, 32>}, {transform_indices = @transform_4, window_bounds = array<i64: 1, 32, 96>}, {transform_indices = @transform_5, window_bounds = array<i64: 1, 1, 96>}, {transform_indices = @transform_6, window_bounds = array<i64: 1, 32, 32>}, {transform_indices = @transform_7, window_bounds = array<i64: 1, 1, 32>}, {transform_indices = @transform_8, window_bounds = array<i64: 1, 1, 32>}, {transform_indices = @transform_9, window_bounds = array<i64: 1, 1, 32>}, {transform_indices = @transform_10, window_bounds = array<i64: 1, 32, 32>}, {transform_indices = @transform_11, window_bounds = array<i64: 1, 1, 32>}, {transform_indices = @transform_12, window_bounds = array<i64: 1, 32, 32>}, {transform_indices = @transform_13, window_bounds = array<i64: 1, 1, 32>}, {transform_indices = @transform_14, window_bounds = array<i64: 16, 32>}]} {
    %c0_i32 = arith.constant 0 : i32
    %0 = arith.cmpi eq, %arg1, %c0_i32 : i32
    %1 = arith.extui %0 : i1 to i32
    %c0_i32_0 = arith.constant 0 : i32
    %2 = arith.cmpi ne, %1, %c0_i32_0 : i32
    scf.if %2 {
      %c0_77 = arith.constant 0 : index
      %c0_78 = arith.constant 0 : index
      %144 = vector.load %arg2[%c0_77, %c0_78] : memref<16x32xf32, #tpu.memory_space<vmem>>, vector<16x32xf32>
      %c0_79 = arith.constant 0 : index
      %c0_80 = arith.constant 0 : index
      %145 = vector.load %arg16[%c0_79, %c0_80] : memref<16x32xf32, #tpu.memory_space<vmem>>, vector<16x32xf32>
      tpu.vector_store %arg16[%c0_79, %c0_80], %144 {strides = array<i32>} : memref<16x32xf32, #tpu.memory_space<vmem>>, vector<16x32xf32>,
    } else {
    }
    %c0 = arith.constant 0 : index
    %c0_1 = arith.constant 0 : index
    %3 = vector.load %arg16[%c0, %c0_1] : memref<16x32xf32, #tpu.memory_space<vmem>>, vector<16x32xf32>
    %c0_2 = arith.constant 0 : index
    %c0_3 = arith.constant 0 : index
    %c0_4 = arith.constant 0 : index
    %4 = vector.load %arg4[%c0_2, %c0_3, %c0_4] : memref<1x1x32xf32, #tpu.memory_space<vmem>>, vector<1x1x32xf32>
    %5 = vector.shape_cast %4 : vector<1x1x32xf32> to vector<1x32xf32>
    %c0_5 = arith.constant 0 : index
    %c0_6 = arith.constant 0 : index
    %c0_7 = arith.constant 0 : index
    %6 = vector.load %arg5[%c0_5, %c0_6, %c0_7] : memref<1x1x32xf32, #tpu.memory_space<vmem>>, vector<1x1x32xf32>
    %7 = vector.shape_cast %6 : vector<1x1x32xf32> to vector<1x32xf32>
    %cst = arith.constant dense<0.000000e+00> : vector<16xf32>
    %8 = vector.multi_reduction <add>, %3, %cst [1] : vector<16x32xf32> to vector<16xf32>
    %9 = vector.shape_cast %8 : vector<16xf32> to vector<16x1xf32>
    %cst_8 = arith.constant 3.200000e+01 : f32
    %10 = vector.broadcast %cst_8 : f32 to vector<16x1xf32>
    %11 = arith.divf %9, %10 : vector<16x1xf32>
    %12 = vector.broadcast %11 : vector<16x1xf32> to vector<16x32xf32>
    %13 = arith.subf %3, %12 : vector<16x32xf32>
    %14 = arith.mulf %13, %13 : vector<16x32xf32>
    %cst_9 = arith.constant dense<0.000000e+00> : vector<16xf32>
    %15 = vector.multi_reduction <add>, %14, %cst_9 [1] : vector<16x32xf32> to vector<16xf32>
    %16 = vector.shape_cast %15 : vector<16xf32> to vector<16x1xf32>
    %cst_10 = arith.constant 3.200000e+01 : f32
    %17 = vector.broadcast %cst_10 : f32 to vector<16x1xf32>
    %18 = arith.divf %16, %17 : vector<16x1xf32>
    %cst_11 = arith.constant 9.99999974E-6 : f32
    %19 = vector.broadcast %cst_11 : f32 to vector<16x1xf32>
    %20 = arith.addf %18, %19 : vector<16x1xf32>
    %21 = math.rsqrt %20 : vector<16x1xf32>
    %22 = vector.broadcast %21 : vector<16x1xf32> to vector<16x32xf32>
    %23 = arith.mulf %13, %22 : vector<16x32xf32>
    %24 = vector.broadcast %5 : vector<1x32xf32> to vector<16x32xf32>
    %25 = arith.mulf %23, %24 : vector<16x32xf32>
    %26 = vector.broadcast %7 : vector<1x32xf32> to vector<16x32xf32>
    %27 = arith.addf %25, %26 : vector<16x32xf32>
    %c0_12 = arith.constant 0 : index
    %c0_13 = arith.constant 0 : index
    %c0_14 = arith.constant 0 : index
    %28 = vector.load %arg6[%c0_12, %c0_13, %c0_14] : memref<1x32x96xf32, #tpu.memory_space<vmem>>, vector<1x32x96xf32>
    %29 = vector.shape_cast %28 : vector<1x32x96xf32> to vector<32x96xf32>
    %cst_15 = arith.constant dense<0.000000e+00> : vector<16x96xf32>
    %30 = tpu.matmul %27, %29, %cst_15 {dimension_numbers = #tpu.dot_dimension_numbers<[1], [0], [0], [1], [0, 0, 1, 1], [], []>} : vector<16x32xf32>, vector<32x96xf32>, vector<16x96xf32> -> vector<16x96xf32>
    %c0_16 = arith.constant 0 : index
    %c0_17 = arith.constant 0 : index
    %c0_18 = arith.constant 0 : index
    %31 = vector.load %arg7[%c0_16, %c0_17, %c0_18] : memref<1x1x96xf32, #tpu.memory_space<vmem>>, vector<1x1x96xf32>
    %32 = vector.shape_cast %31 : vector<1x1x96xf32> to vector<1x96xf32>
    %33 = vector.broadcast %32 : vector<1x96xf32> to vector<16x96xf32>
    %34 = arith.addf %30, %33 : vector<16x96xf32>
    %c0_19 = arith.constant 0 : index
    %c0_20 = arith.constant 0 : index
    %c0_21 = arith.constant 0 : index
    %35 = vector.load %arg8[%c0_19, %c0_20, %c0_21] : memref<1x32x32xf32, #tpu.memory_space<vmem>>, vector<1x32x32xf32>
    %36 = vector.shape_cast %35 : vector<1x32x32xf32> to vector<32x32xf32>
    %37 = vector.extract_strided_slice %34 {offsets = [0, 0], sizes = [16, 16], strides = [1, 1]} : vector<16x96xf32> to vector<16x16xf32>
    %38 = vector.extract_strided_slice %34 {offsets = [0, 32], sizes = [16, 16], strides = [1, 1]} : vector<16x96xf32> to vector<16x16xf32>
    %39 = vector.extract_strided_slice %34 {offsets = [0, 64], sizes = [16, 16], strides = [1, 1]} : vector<16x96xf32> to vector<16x16xf32>
    %c0_22 = arith.constant 0 : index
    %c0_23 = arith.constant 0 : index
    %c0_24 = arith.constant 0 : index
    %c0_25 = arith.constant 0 : index
    %40 = vector.load %arg3[%c0_22, %c0_23, %c0_24, %c0_25] : memref<1x2x16x16xf32, #tpu.memory_space<vmem>>, vector<1x1x16x16xf32>
    %41 = vector.shape_cast %40 : vector<1x1x16x16xf32> to vector<16x16xf32>
    %cst_26 = arith.constant dense<0.000000e+00> : vector<16x16xf32>
    %42 = tpu.matmul %37, %38, %cst_26 {dimension_numbers = #tpu.dot_dimension_numbers<[1], [1], [0], [0], [0, 0, 1, 0], [], []>} : vector<16x16xf32>, vector<16x16xf32>, vector<16x16xf32> -> vector<16x16xf32>
    %cst_27 = arith.constant 2.500000e-01 : f32
    %43 = vector.broadcast %cst_27 : f32 to vector<16x16xf32>
    %44 = arith.mulf %42, %43 : vector<16x16xf32>
    %45 = arith.addf %44, %41 : vector<16x16xf32>
    %cst_28 = arith.constant dense<0xFF800000> : vector<16xf32>
    %46 = vector.multi_reduction <maximumf>, %45, %cst_28 [1] : vector<16x16xf32> to vector<16xf32>
    %47 = vector.shape_cast %46 : vector<16xf32> to vector<16x1xf32>
    %48 = vector.broadcast %47 : vector<16x1xf32> to vector<16x16xf32>
    %49 = arith.subf %45, %48 : vector<16x16xf32>
    %50 = math.exp %49 : vector<16x16xf32>
    %cst_29 = arith.constant dense<0.000000e+00> : vector<16xf32>
    %51 = vector.multi_reduction <add>, %50, %cst_29 [1] : vector<16x16xf32> to vector<16xf32>
    %52 = vector.shape_cast %51 : vector<16xf32> to vector<16x1xf32>
    %53 = tpu.reciprocal %52 {approx = true} : vector<16x1xf32> -> vector<16x1xf32>
    %54 = vector.broadcast %53 : vector<16x1xf32> to vector<16x16xf32>
    %55 = arith.mulf %50, %54 : vector<16x16xf32>
    %cst_30 = arith.constant dense<0.000000e+00> : vector<16x16xf32>
    %56 = tpu.matmul %55, %39, %cst_30 {dimension_numbers = #tpu.dot_dimension_numbers<[1], [0], [0], [1], [0, 0, 1, 1], [], []>} : vector<16x16xf32>, vector<16x16xf32>, vector<16x16xf32> -> vector<16x16xf32>
    %57 = vector.extract_strided_slice %36 {offsets = [0, 0], sizes = [16, 32], strides = [1, 1]} : vector<32x32xf32> to vector<16x32xf32>
    %cst_31 = arith.constant dense<0.000000e+00> : vector<16x32xf32>
    %58 = tpu.matmul %56, %57, %cst_31 {dimension_numbers = #tpu.dot_dimension_numbers<[1], [0], [0], [1], [0, 0, 1, 1], [], []>} : vector<16x16xf32>, vector<16x32xf32>, vector<16x32xf32> -> vector<16x32xf32>
    %59 = vector.extract_strided_slice %34 {offsets = [0, 16], sizes = [16, 16], strides = [1, 1]} : vector<16x96xf32> to vector<16x16xf32>
    %60 = vector.extract_strided_slice %34 {offsets = [0, 48], sizes = [16, 16], strides = [1, 1]} : vector<16x96xf32> to vector<16x16xf32>
    %61 = vector.extract_strided_slice %34 {offsets = [0, 80], sizes = [16, 16], strides = [1, 1]} : vector<16x96xf32> to vector<16x16xf32>
    %c0_32 = arith.constant 0 : index
    %c1 = arith.constant 1 : index
    %c0_33 = arith.constant 0 : index
    %c0_34 = arith.constant 0 : index
    %62 = vector.load %arg3[%c0_32, %c1, %c0_33, %c0_34] : memref<1x2x16x16xf32, #tpu.memory_space<vmem>>, vector<1x1x16x16xf32>
    %63 = vector.shape_cast %62 : vector<1x1x16x16xf32> to vector<16x16xf32>
    %cst_35 = arith.constant dense<0.000000e+00> : vector<16x16xf32>
    %64 = tpu.matmul %59, %60, %cst_35 {dimension_numbers = #tpu.dot_dimension_numbers<[1], [1], [0], [0], [0, 0, 1, 0], [], []>} : vector<16x16xf32>, vector<16x16xf32>, vector<16x16xf32> -> vector<16x16xf32>
    %cst_36 = arith.constant 2.500000e-01 : f32
    %65 = vector.broadcast %cst_36 : f32 to vector<16x16xf32>
    %66 = arith.mulf %64, %65 : vector<16x16xf32>
    %67 = arith.addf %66, %63 : vector<16x16xf32>
    %cst_37 = arith.constant dense<0xFF800000> : vector<16xf32>
    %68 = vector.multi_reduction <maximumf>, %67, %cst_37 [1] : vector<16x16xf32> to vector<16xf32>
    %69 = vector.shape_cast %68 : vector<16xf32> to vector<16x1xf32>
    %70 = vector.broadcast %69 : vector<16x1xf32> to vector<16x16xf32>
    %71 = arith.subf %67, %70 : vector<16x16xf32>
    %72 = math.exp %71 : vector<16x16xf32>
    %cst_38 = arith.constant dense<0.000000e+00> : vector<16xf32>
    %73 = vector.multi_reduction <add>, %72, %cst_38 [1] : vector<16x16xf32> to vector<16xf32>
    %74 = vector.shape_cast %73 : vector<16xf32> to vector<16x1xf32>
    %75 = tpu.reciprocal %74 {approx = true} : vector<16x1xf32> -> vector<16x1xf32>
    %76 = vector.broadcast %75 : vector<16x1xf32> to vector<16x16xf32>
    %77 = arith.mulf %72, %76 : vector<16x16xf32>
    %cst_39 = arith.constant dense<0.000000e+00> : vector<16x16xf32>
    %78 = tpu.matmul %77, %61, %cst_39 {dimension_numbers = #tpu.dot_dimension_numbers<[1], [0], [0], [1], [0, 0, 1, 1], [], []>} : vector<16x16xf32>, vector<16x16xf32>, vector<16x16xf32> -> vector<16x16xf32>
    %79 = vector.extract_strided_slice %36 {offsets = [16, 0], sizes = [16, 32], strides = [1, 1]} : vector<32x32xf32> to vector<16x32xf32>
    %cst_40 = arith.constant dense<0.000000e+00> : vector<16x32xf32>
    %80 = tpu.matmul %78, %79, %cst_40 {dimension_numbers = #tpu.dot_dimension_numbers<[1], [0], [0], [1], [0, 0, 1, 1], [], []>} : vector<16x16xf32>, vector<16x32xf32>, vector<16x32xf32> -> vector<16x32xf32>
    %81 = arith.addf %58, %80 : vector<16x32xf32>
    %c0_41 = arith.constant 0 : index
    %c0_42 = arith.constant 0 : index
    %c0_43 = arith.constant 0 : index
    %82 = vector.load %arg9[%c0_41, %c0_42, %c0_43] : memref<1x1x32xf32, #tpu.memory_space<vmem>>, vector<1x1x32xf32>
    %83 = vector.shape_cast %82 : vector<1x1x32xf32> to vector<1x32xf32>
    %84 = vector.broadcast %83 : vector<1x32xf32> to vector<16x32xf32>
    %85 = arith.addf %81, %84 : vector<16x32xf32>
    %cst_44 = arith.constant 8.000000e-01 : f32
    %86 = vector.broadcast %cst_44 : f32 to vector<16x32xf32>
    %87 = arith.mulf %86, %85 : vector<16x32xf32>
    %88 = arith.addf %3, %87 : vector<16x32xf32>
    %c0_45 = arith.constant 0 : index
    %c0_46 = arith.constant 0 : index
    %c0_47 = arith.constant 0 : index
    %89 = vector.load %arg10[%c0_45, %c0_46, %c0_47] : memref<1x1x32xf32, #tpu.memory_space<vmem>>, vector<1x1x32xf32>
    %90 = vector.shape_cast %89 : vector<1x1x32xf32> to vector<1x32xf32>
    %c0_48 = arith.constant 0 : index
    %c0_49 = arith.constant 0 : index
    %c0_50 = arith.constant 0 : index
    %91 = vector.load %arg11[%c0_48, %c0_49, %c0_50] : memref<1x1x32xf32, #tpu.memory_space<vmem>>, vector<1x1x32xf32>
    %92 = vector.shape_cast %91 : vector<1x1x32xf32> to vector<1x32xf32>
    %cst_51 = arith.constant dense<0.000000e+00> : vector<16xf32>
    %93 = vector.multi_reduction <add>, %88, %cst_51 [1] : vector<16x32xf32> to vector<16xf32>
    %94 = vector.shape_cast %93 : vector<16xf32> to vector<16x1xf32>
    %cst_52 = arith.constant 3.200000e+01 : f32
    %95 = vector.broadcast %cst_52 : f32 to vector<16x1xf32>
    %96 = arith.divf %94, %95 : vector<16x1xf32>
    %97 = vector.broadcast %96 : vector<16x1xf32> to vector<16x32xf32>
    %98 = arith.subf %88, %97 : vector<16x32xf32>
    %99 = arith.mulf %98, %98 : vector<16x32xf32>
    %cst_53 = arith.constant dense<0.000000e+00> : vector<16xf32>
    %100 = vector.multi_reduction <add>, %99, %cst_53 [1] : vector<16x32xf32> to vector<16xf32>
    %101 = vector.shape_cast %100 : vector<16xf32> to vector<16x1xf32>
    %cst_54 = arith.constant 3.200000e+01 : f32
    %102 = vector.broadcast %cst_54 : f32 to vector<16x1xf32>
    %103 = arith.divf %101, %102 : vector<16x1xf32>
    %cst_55 = arith.constant 9.99999974E-6 : f32
    %104 = vector.broadcast %cst_55 : f32 to vector<16x1xf32>
    %105 = arith.addf %103, %104 : vector<16x1xf32>
    %106 = math.rsqrt %105 : vector<16x1xf32>
    %107 = vector.broadcast %106 : vector<16x1xf32> to vector<16x32xf32>
    %108 = arith.mulf %98, %107 : vector<16x32xf32>
    %109 = vector.broadcast %90 : vector<1x32xf32> to vector<16x32xf32>
    %110 = arith.mulf %108, %109 : vector<16x32xf32>
    %111 = vector.broadcast %92 : vector<1x32xf32> to vector<16x32xf32>
    %112 = arith.addf %110, %111 : vector<16x32xf32>
    %c0_56 = arith.constant 0 : index
    %c0_57 = arith.constant 0 : index
    %c0_58 = arith.constant 0 : index
    %113 = vector.load %arg12[%c0_56, %c0_57, %c0_58] : memref<1x32x32xf32, #tpu.memory_space<vmem>>, vector<1x32x32xf32>
    %114 = vector.shape_cast %113 : vector<1x32x32xf32> to vector<32x32xf32>
    %cst_59 = arith.constant dense<0.000000e+00> : vector<16x32xf32>
    %115 = tpu.matmul %112, %114, %cst_59 {dimension_numbers = #tpu.dot_dimension_numbers<[1], [0], [0], [1], [0, 0, 1, 1], [], []>} : vector<16x32xf32>, vector<32x32xf32>, vector<16x32xf32> -> vector<16x32xf32>
    %c0_60 = arith.constant 0 : index
    %c0_61 = arith.constant 0 : index
    %c0_62 = arith.constant 0 : index
    %116 = vector.load %arg13[%c0_60, %c0_61, %c0_62] : memref<1x1x32xf32, #tpu.memory_space<vmem>>, vector<1x1x32xf32>
    %117 = vector.shape_cast %116 : vector<1x1x32xf32> to vector<1x32xf32>
    %118 = vector.broadcast %117 : vector<1x32xf32> to vector<16x32xf32>
    %119 = arith.addf %115, %118 : vector<16x32xf32>
    %120 = arith.mulf %119, %119 : vector<16x32xf32>
    %121 = arith.mulf %119, %120 : vector<16x32xf32>
    %cst_63 = arith.constant 4.471500e-02 : f32
    %122 = vector.broadcast %cst_63 : f32 to vector<16x32xf32>
    %123 = arith.mulf %122, %121 : vector<16x32xf32>
    %124 = arith.addf %119, %123 : vector<16x32xf32>
    %cst_64 = arith.constant 0.797884583 : f32
    %125 = vector.broadcast %cst_64 : f32 to vector<16x32xf32>
    %126 = arith.mulf %125, %124 : vector<16x32xf32>
    %127 = math.tanh %126 : vector<16x32xf32>
    %cst_65 = arith.constant 1.000000e+00 : f32
    %128 = vector.broadcast %cst_65 : f32 to vector<16x32xf32>
    %129 = arith.addf %128, %127 : vector<16x32xf32>
    %cst_66 = arith.constant 5.000000e-01 : f32
    %130 = vector.broadcast %cst_66 : f32 to vector<16x32xf32>
    %131 = arith.mulf %130, %129 : vector<16x32xf32>
    %132 = arith.mulf %119, %131 : vector<16x32xf32>
    %c0_67 = arith.constant 0 : index
    %c0_68 = arith.constant 0 : index
    %c0_69 = arith.constant 0 : index
    %133 = vector.load %arg14[%c0_67, %c0_68, %c0_69] : memref<1x32x32xf32, #tpu.memory_space<vmem>>, vector<1x32x32xf32>
    %134 = vector.shape_cast %133 : vector<1x32x32xf32> to vector<32x32xf32>
    %cst_70 = arith.constant dense<0.000000e+00> : vector<16x32xf32>
    %135 = tpu.matmul %132, %134, %cst_70 {dimension_numbers = #tpu.dot_dimension_numbers<[1], [0], [0], [1], [0, 0, 1, 1], [], []>} : vector<16x32xf32>, vector<32x32xf32>, vector<16x32xf32> -> vector<16x32xf32>
    %c0_71 = arith.constant 0 : index
    %c0_72 = arith.constant 0 : index
    %c0_73 = arith.constant 0 : index
    %136 = vector.load %arg15[%c0_71, %c0_72, %c0_73] : memref<1x1x32xf32, #tpu.memory_space<vmem>>, vector<1x1x32xf32>
    %137 = vector.shape_cast %136 : vector<1x1x32xf32> to vector<1x32xf32>
    %138 = vector.broadcast %137 : vector<1x32xf32> to vector<16x32xf32>
    %139 = arith.addf %135, %138 : vector<16x32xf32>
    %cst_74 = arith.constant 8.000000e-01 : f32
    %140 = vector.broadcast %cst_74 : f32 to vector<16x32xf32>
    %141 = arith.mulf %140, %139 : vector<16x32xf32>
    %142 = arith.addf %88, %141 : vector<16x32xf32>
    %c0_75 = arith.constant 0 : index
    %c0_76 = arith.constant 0 : index
    %143 = vector.load %arg16[%c0_75, %c0_76] : memref<16x32xf32, #tpu.memory_space<vmem>>, vector<16x32xf32>
    tpu.vector_store %arg16[%c0_75, %c0_76], %142 {strides = array<i32>} : memref<16x32xf32, #tpu.memory_space<vmem>>, vector<16x32xf32>,
    return
  }
  func.func @transform_0(%arg0: i32, %arg1: i32) -> (i32, i32) {
    %c0_i32 = arith.constant 0 : i32
    %c0_i32_0 = arith.constant 0 : i32
    return %arg0, %c0_i32 : i32, i32
  }
  func.func @transform_1(%arg0: i32, %arg1: i32) -> (i32, i32, i32, i32) {
    %c0_i32 = arith.constant 0 : i32
    %c0_i32_0 = arith.constant 0 : i32
    %c0_i32_1 = arith.constant 0 : i32
    %c0_i32_2 = arith.constant 0 : i32
    return %arg1, %c0_i32, %c0_i32_0, %c0_i32_1 : i32, i32, i32, i32
  }
  func.func @transform_2(%arg0: i32, %arg1: i32) -> (i32, i32, i32) {
    %c0_i32 = arith.constant 0 : i32
    %c0_i32_0 = arith.constant 0 : i32
    %c0_i32_1 = arith.constant 0 : i32
    return %arg1, %c0_i32, %c0_i32_0 : i32, i32, i32
  }
  func.func @transform_3(%arg0: i32, %arg1: i32) -> (i32, i32, i32) {
    %c0_i32 = arith.constant 0 : i32
    %c0_i32_0 = arith.constant 0 : i32
    %c0_i32_1 = arith.constant 0 : i32
    return %arg1, %c0_i32, %c0_i32_0 : i32, i32, i32
  }
  func.func @transform_4(%arg0: i32, %arg1: i32) -> (i32, i32, i32) {
    %c0_i32 = arith.constant 0 : i32
    %c0_i32_0 = arith.constant 0 : i32
    %c0_i32_1 = arith.constant 0 : i32
    return %arg1, %c0_i32, %c0_i32_0 : i32, i32, i32
  }
  func.func @transform_5(%arg0: i32, %arg1: i32) -> (i32, i32, i32) {
    %c0_i32 = arith.constant 0 : i32
    %c0_i32_0 = arith.constant 0 : i32
    %c0_i32_1 = arith.constant 0 : i32
    return %arg1, %c0_i32, %c0_i32_0 : i32, i32, i32
  }
  func.func @transform_6(%arg0: i32, %arg1: i32) -> (i32, i32, i32) {
    %c0_i32 = arith.constant 0 : i32
    %c0_i32_0 = arith.constant 0 : i32
    %c0_i32_1 = arith.constant 0 : i32
    return %arg1, %c0_i32, %c0_i32_0 : i32, i32, i32
  }
  func.func @transform_7(%arg0: i32, %arg1: i32) -> (i32, i32, i32) {
    %c0_i32 = arith.constant 0 : i32
    %c0_i32_0 = arith.constant 0 : i32
    %c0_i32_1 = arith.constant 0 : i32
    return %arg1, %c0_i32, %c0_i32_0 : i32, i32, i32
  }
  func.func @transform_8(%arg0: i32, %arg1: i32) -> (i32, i32, i32) {
    %c0_i32 = arith.constant 0 : i32
    %c0_i32_0 = arith.constant 0 : i32
    %c0_i32_1 = arith.constant 0 : i32
    return %arg1, %c0_i32, %c0_i32_0 : i32, i32, i32
  }
  func.func @transform_9(%arg0: i32, %arg1: i32) -> (i32, i32, i32) {
    %c0_i32 = arith.constant 0 : i32
    %c0_i32_0 = arith.constant 0 : i32
    %c0_i32_1 = arith.constant 0 : i32
    return %arg1, %c0_i32, %c0_i32_0 : i32, i32, i32
  }
  func.func @transform_10(%arg0: i32, %arg1: i32) -> (i32, i32, i32) {
    %c0_i32 = arith.constant 0 : i32
    %c0_i32_0 = arith.constant 0 : i32
    %c0_i32_1 = arith.constant 0 : i32
    return %arg1, %c0_i32, %c0_i32_0 : i32, i32, i32
  }
  func.func @transform_11(%arg0: i32, %arg1: i32) -> (i32, i32, i32) {
    %c0_i32 = arith.constant 0 : i32
    %c0_i32_0 = arith.constant 0 : i32
    %c0_i32_1 = arith.constant 0 : i32
    return %arg1, %c0_i32, %c0_i32_0 : i32, i32, i32
  }
  func.func @transform_12(%arg0: i32, %arg1: i32) -> (i32, i32, i32) {
    %c0_i32 = arith.constant 0 : i32
    %c0_i32_0 = arith.constant 0 : i32
    %c0_i32_1 = arith.constant 0 : i32
    return %arg1, %c0_i32, %c0_i32_0 : i32, i32, i32
  }
  func.func @transform_13(%arg0: i32, %arg1: i32) -> (i32, i32, i32) {
    %c0_i32 = arith.constant 0 : i32
    %c0_i32_0 = arith.constant 0 : i32
    %c0_i32_1 = arith.constant 0 : i32
    return %arg1, %c0_i32, %c0_i32_0 : i32, i32, i32
  }
  func.func @transform_14(%arg0: i32, %arg1: i32) -> (i32, i32) {
    %c0_i32 = arith.constant 0 : i32
    %c0_i32_0 = arith.constant 0 : i32
    return %arg0, %c0_i32 : i32, i32
  }
}

module attributes {stable_mosaic.version = 11 : i64} {
  func.func @_tab_conv_kernel(%arg0: i32, %arg1: memref<16x32xf32, #tpu.memory_space<vmem>>, %arg2: memref<2x16x16xf32, #tpu.memory_space<vmem>>, %arg3: memref<2x1x16xf32, #tpu.memory_space<vmem>>, %arg4: memref<2x16x16xf32, #tpu.memory_space<vmem>>, %arg5: memref<2x1x16xf32, #tpu.memory_space<vmem>>, %arg6: memref<2x16x16xf32, #tpu.memory_space<vmem>>, %arg7: memref<2x1x16xf32, #tpu.memory_space<vmem>>, %arg8: memref<2x32x16xf32, #tpu.memory_space<vmem>>, %arg9: memref<32x16xf32, #tpu.memory_space<vmem>>, %arg10: memref<1x16xf32, #tpu.memory_space<vmem>>, %arg11: memref<16x16xf32, #tpu.memory_space<vmem>>) attributes {dimension_semantics = [#tpu.dimension_semantics<parallel>], iteration_bounds = array<i64: 2>, scalar_prefetch = 0 : i64, scratch_operands = 0 : i64, tpu.core_type = #tpu.core_type<tc>, window_params = [{transform_indices = @transform_0, window_bounds = array<i64: 16, 32>}, {pipeline_mode = #tpu.pipeline_mode<synchronous>, transform_indices = @transform_1, window_bounds = array<i64: 2, 16, 16>}, {pipeline_mode = #tpu.pipeline_mode<synchronous>, transform_indices = @transform_2, window_bounds = array<i64: 2, 1, 16>}, {pipeline_mode = #tpu.pipeline_mode<synchronous>, transform_indices = @transform_3, window_bounds = array<i64: 2, 16, 16>}, {pipeline_mode = #tpu.pipeline_mode<synchronous>, transform_indices = @transform_4, window_bounds = array<i64: 2, 1, 16>}, {pipeline_mode = #tpu.pipeline_mode<synchronous>, transform_indices = @transform_5, window_bounds = array<i64: 2, 16, 16>}, {pipeline_mode = #tpu.pipeline_mode<synchronous>, transform_indices = @transform_6, window_bounds = array<i64: 2, 1, 16>}, {pipeline_mode = #tpu.pipeline_mode<synchronous>, transform_indices = @transform_7, window_bounds = array<i64: 2, 32, 16>}, {pipeline_mode = #tpu.pipeline_mode<synchronous>, transform_indices = @transform_8, window_bounds = array<i64: 32, 16>}, {pipeline_mode = #tpu.pipeline_mode<synchronous>, transform_indices = @transform_9, window_bounds = array<i64: 1, 16>}, {transform_indices = @transform_10, window_bounds = array<i64: 16, 16>}]} {
    %c0 = arith.constant 0 : index
    %c0_0 = arith.constant 0 : index
    %0 = vector.load %arg1[%c0, %c0_0] : memref<16x32xf32, #tpu.memory_space<vmem>>, vector<16x32xf32>
    %1 = tpu.transpose %0, [1, 0] : vector<16x32xf32> -> vector<32x16xf32>
    %c0_1 = arith.constant 0 : index
    %c0_2 = arith.constant 0 : index
    %c0_3 = arith.constant 0 : index
    %2 = vector.load %arg2[%c0_1, %c0_2, %c0_3] : memref<2x16x16xf32, #tpu.memory_space<vmem>>, vector<1x16x16xf32>
    %3 = vector.shape_cast %2 : vector<1x16x16xf32> to vector<16x16xf32>
    %cst = arith.constant dense<0.000000e+00> : vector<32x16xf32>
    %4 = tpu.matmul %1, %3, %cst {dimension_numbers = #tpu.dot_dimension_numbers<[1], [0], [0], [1], [0, 0, 1, 1], [], []>} : vector<32x16xf32>, vector<16x16xf32>, vector<32x16xf32> -> vector<32x16xf32>
    %c0_4 = arith.constant 0 : index
    %c0_5 = arith.constant 0 : index
    %c0_6 = arith.constant 0 : index
    %5 = vector.load %arg3[%c0_4, %c0_5, %c0_6] : memref<2x1x16xf32, #tpu.memory_space<vmem>>, vector<1x1x16xf32>
    %6 = vector.shape_cast %5 : vector<1x1x16xf32> to vector<1x16xf32>
    %7 = vector.broadcast %6 : vector<1x16xf32> to vector<32x16xf32>
    %8 = arith.addf %4, %7 : vector<32x16xf32>
    %c0_7 = arith.constant 0 : index
    %c0_8 = arith.constant 0 : index
    %c0_9 = arith.constant 0 : index
    %9 = vector.load %arg4[%c0_7, %c0_8, %c0_9] : memref<2x16x16xf32, #tpu.memory_space<vmem>>, vector<1x16x16xf32>
    %10 = vector.shape_cast %9 : vector<1x16x16xf32> to vector<16x16xf32>
    %cst_10 = arith.constant dense<0.000000e+00> : vector<32x16xf32>
    %11 = tpu.matmul %1, %10, %cst_10 {dimension_numbers = #tpu.dot_dimension_numbers<[1], [0], [0], [1], [0, 0, 1, 1], [], []>} : vector<32x16xf32>, vector<16x16xf32>, vector<32x16xf32> -> vector<32x16xf32>
    %c0_11 = arith.constant 0 : index
    %c0_12 = arith.constant 0 : index
    %c0_13 = arith.constant 0 : index
    %12 = vector.load %arg5[%c0_11, %c0_12, %c0_13] : memref<2x1x16xf32, #tpu.memory_space<vmem>>, vector<1x1x16xf32>
    %13 = vector.shape_cast %12 : vector<1x1x16xf32> to vector<1x16xf32>
    %14 = vector.broadcast %13 : vector<1x16xf32> to vector<32x16xf32>
    %15 = arith.addf %11, %14 : vector<32x16xf32>
    %c0_14 = arith.constant 0 : index
    %c0_15 = arith.constant 0 : index
    %c0_16 = arith.constant 0 : index
    %16 = vector.load %arg6[%c0_14, %c0_15, %c0_16] : memref<2x16x16xf32, #tpu.memory_space<vmem>>, vector<1x16x16xf32>
    %17 = vector.shape_cast %16 : vector<1x16x16xf32> to vector<16x16xf32>
    %cst_17 = arith.constant dense<0.000000e+00> : vector<32x16xf32>
    %18 = tpu.matmul %1, %17, %cst_17 {dimension_numbers = #tpu.dot_dimension_numbers<[1], [0], [0], [1], [0, 0, 1, 1], [], []>} : vector<32x16xf32>, vector<16x16xf32>, vector<32x16xf32> -> vector<32x16xf32>
    %c0_18 = arith.constant 0 : index
    %c0_19 = arith.constant 0 : index
    %c0_20 = arith.constant 0 : index
    %19 = vector.load %arg7[%c0_18, %c0_19, %c0_20] : memref<2x1x16xf32, #tpu.memory_space<vmem>>, vector<1x1x16xf32>
    %20 = vector.shape_cast %19 : vector<1x1x16xf32> to vector<1x16xf32>
    %21 = vector.broadcast %20 : vector<1x16xf32> to vector<32x16xf32>
    %22 = arith.addf %18, %21 : vector<32x16xf32>
    %cst_21 = arith.constant dense<0.000000e+00> : vector<32x32xf32>
    %23 = tpu.matmul %8, %15, %cst_21 {dimension_numbers = #tpu.dot_dimension_numbers<[1], [1], [0], [0], [0, 0, 1, 0], [], []>} : vector<32x16xf32>, vector<32x16xf32>, vector<32x32xf32> -> vector<32x32xf32>
    %cst_22 = arith.constant 2.500000e-01 : f32
    %24 = vector.broadcast %cst_22 : f32 to vector<32x32xf32>
    %25 = arith.mulf %23, %24 : vector<32x32xf32>
    %cst_23 = arith.constant dense<0xFF800000> : vector<32xf32>
    %26 = vector.multi_reduction <maximumf>, %25, %cst_23 [1] : vector<32x32xf32> to vector<32xf32>
    %27 = vector.shape_cast %26 : vector<32xf32> to vector<32x1xf32>
    %28 = vector.broadcast %27 : vector<32x1xf32> to vector<32x32xf32>
    %29 = arith.subf %25, %28 : vector<32x32xf32>
    %30 = math.exp %29 : vector<32x32xf32>
    %cst_24 = arith.constant dense<0.000000e+00> : vector<32xf32>
    %31 = vector.multi_reduction <add>, %30, %cst_24 [1] : vector<32x32xf32> to vector<32xf32>
    %32 = vector.shape_cast %31 : vector<32xf32> to vector<32x1xf32>
    %33 = tpu.reciprocal %32 {approx = true} : vector<32x1xf32> -> vector<32x1xf32>
    %34 = vector.broadcast %33 : vector<32x1xf32> to vector<32x32xf32>
    %35 = arith.mulf %30, %34 : vector<32x32xf32>
    %cst_25 = arith.constant dense<0.000000e+00> : vector<32x16xf32>
    %36 = tpu.matmul %35, %22, %cst_25 {dimension_numbers = #tpu.dot_dimension_numbers<[1], [0], [0], [1], [0, 0, 1, 1], [], []>} : vector<32x32xf32>, vector<32x16xf32>, vector<32x16xf32> -> vector<32x16xf32>
    %c0_26 = arith.constant 0 : index
    %c0_27 = arith.constant 0 : index
    %c0_28 = arith.constant 0 : index
    %37 = vector.load %arg8[%c0_26, %c0_27, %c0_28] : memref<2x32x16xf32, #tpu.memory_space<vmem>>, vector<1x32x16xf32>
    %38 = vector.shape_cast %37 : vector<1x32x16xf32> to vector<32x16xf32>
    %39 = vector.extract_strided_slice %36 {offsets = [0, 0], sizes = [16, 16], strides = [1, 1]} : vector<32x16xf32> to vector<16x16xf32>
    %cst_29 = arith.constant dense<0.000000e+00> : vector<32x16xf32>
    %40 = tpu.matmul %38, %39, %cst_29 {dimension_numbers = #tpu.dot_dimension_numbers<[1], [1], [0], [0], [0, 0, 1, 0], [], []>} : vector<32x16xf32>, vector<16x16xf32>, vector<32x16xf32> -> vector<32x16xf32>
    %c1 = arith.constant 1 : index
    %c0_30 = arith.constant 0 : index
    %c0_31 = arith.constant 0 : index
    %41 = vector.load %arg8[%c1, %c0_30, %c0_31] : memref<2x32x16xf32, #tpu.memory_space<vmem>>, vector<1x32x16xf32>
    %42 = vector.shape_cast %41 : vector<1x32x16xf32> to vector<32x16xf32>
    %43 = vector.extract_strided_slice %36 {offsets = [16, 0], sizes = [16, 16], strides = [1, 1]} : vector<32x16xf32> to vector<16x16xf32>
    %cst_32 = arith.constant dense<0.000000e+00> : vector<32x16xf32>
    %44 = tpu.matmul %42, %43, %cst_32 {dimension_numbers = #tpu.dot_dimension_numbers<[1], [1], [0], [0], [0, 0, 1, 0], [], []>} : vector<32x16xf32>, vector<16x16xf32>, vector<32x16xf32> -> vector<32x16xf32>
    %45 = arith.addf %40, %44 : vector<32x16xf32>
    %46 = arith.addf %1, %45 : vector<32x16xf32>
    %c1_33 = arith.constant 1 : index
    %c0_34 = arith.constant 0 : index
    %c0_35 = arith.constant 0 : index
    %47 = vector.load %arg2[%c1_33, %c0_34, %c0_35] : memref<2x16x16xf32, #tpu.memory_space<vmem>>, vector<1x16x16xf32>
    %48 = vector.shape_cast %47 : vector<1x16x16xf32> to vector<16x16xf32>
    %cst_36 = arith.constant dense<0.000000e+00> : vector<32x16xf32>
    %49 = tpu.matmul %46, %48, %cst_36 {dimension_numbers = #tpu.dot_dimension_numbers<[1], [0], [0], [1], [0, 0, 1, 1], [], []>} : vector<32x16xf32>, vector<16x16xf32>, vector<32x16xf32> -> vector<32x16xf32>
    %c1_37 = arith.constant 1 : index
    %c0_38 = arith.constant 0 : index
    %c0_39 = arith.constant 0 : index
    %50 = vector.load %arg3[%c1_37, %c0_38, %c0_39] : memref<2x1x16xf32, #tpu.memory_space<vmem>>, vector<1x1x16xf32>
    %51 = vector.shape_cast %50 : vector<1x1x16xf32> to vector<1x16xf32>
    %52 = vector.broadcast %51 : vector<1x16xf32> to vector<32x16xf32>
    %53 = arith.addf %49, %52 : vector<32x16xf32>
    %c1_40 = arith.constant 1 : index
    %c0_41 = arith.constant 0 : index
    %c0_42 = arith.constant 0 : index
    %54 = vector.load %arg4[%c1_40, %c0_41, %c0_42] : memref<2x16x16xf32, #tpu.memory_space<vmem>>, vector<1x16x16xf32>
    %55 = vector.shape_cast %54 : vector<1x16x16xf32> to vector<16x16xf32>
    %cst_43 = arith.constant dense<0.000000e+00> : vector<32x16xf32>
    %56 = tpu.matmul %46, %55, %cst_43 {dimension_numbers = #tpu.dot_dimension_numbers<[1], [0], [0], [1], [0, 0, 1, 1], [], []>} : vector<32x16xf32>, vector<16x16xf32>, vector<32x16xf32> -> vector<32x16xf32>
    %c1_44 = arith.constant 1 : index
    %c0_45 = arith.constant 0 : index
    %c0_46 = arith.constant 0 : index
    %57 = vector.load %arg5[%c1_44, %c0_45, %c0_46] : memref<2x1x16xf32, #tpu.memory_space<vmem>>, vector<1x1x16xf32>
    %58 = vector.shape_cast %57 : vector<1x1x16xf32> to vector<1x16xf32>
    %59 = vector.broadcast %58 : vector<1x16xf32> to vector<32x16xf32>
    %60 = arith.addf %56, %59 : vector<32x16xf32>
    %c1_47 = arith.constant 1 : index
    %c0_48 = arith.constant 0 : index
    %c0_49 = arith.constant 0 : index
    %61 = vector.load %arg6[%c1_47, %c0_48, %c0_49] : memref<2x16x16xf32, #tpu.memory_space<vmem>>, vector<1x16x16xf32>
    %62 = vector.shape_cast %61 : vector<1x16x16xf32> to vector<16x16xf32>
    %cst_50 = arith.constant dense<0.000000e+00> : vector<32x16xf32>
    %63 = tpu.matmul %46, %62, %cst_50 {dimension_numbers = #tpu.dot_dimension_numbers<[1], [0], [0], [1], [0, 0, 1, 1], [], []>} : vector<32x16xf32>, vector<16x16xf32>, vector<32x16xf32> -> vector<32x16xf32>
    %c1_51 = arith.constant 1 : index
    %c0_52 = arith.constant 0 : index
    %c0_53 = arith.constant 0 : index
    %64 = vector.load %arg7[%c1_51, %c0_52, %c0_53] : memref<2x1x16xf32, #tpu.memory_space<vmem>>, vector<1x1x16xf32>
    %65 = vector.shape_cast %64 : vector<1x1x16xf32> to vector<1x16xf32>
    %66 = vector.broadcast %65 : vector<1x16xf32> to vector<32x16xf32>
    %67 = arith.addf %63, %66 : vector<32x16xf32>
    %cst_54 = arith.constant dense<0.000000e+00> : vector<32x32xf32>
    %68 = tpu.matmul %53, %60, %cst_54 {dimension_numbers = #tpu.dot_dimension_numbers<[1], [1], [0], [0], [0, 0, 1, 0], [], []>} : vector<32x16xf32>, vector<32x16xf32>, vector<32x32xf32> -> vector<32x32xf32>
    %cst_55 = arith.constant 2.500000e-01 : f32
    %69 = vector.broadcast %cst_55 : f32 to vector<32x32xf32>
    %70 = arith.mulf %68, %69 : vector<32x32xf32>
    %cst_56 = arith.constant dense<0xFF800000> : vector<32xf32>
    %71 = vector.multi_reduction <maximumf>, %70, %cst_56 [1] : vector<32x32xf32> to vector<32xf32>
    %72 = vector.shape_cast %71 : vector<32xf32> to vector<32x1xf32>
    %73 = vector.broadcast %72 : vector<32x1xf32> to vector<32x32xf32>
    %74 = arith.subf %70, %73 : vector<32x32xf32>
    %75 = math.exp %74 : vector<32x32xf32>
    %cst_57 = arith.constant dense<0.000000e+00> : vector<32xf32>
    %76 = vector.multi_reduction <add>, %75, %cst_57 [1] : vector<32x32xf32> to vector<32xf32>
    %77 = vector.shape_cast %76 : vector<32xf32> to vector<32x1xf32>
    %78 = tpu.reciprocal %77 {approx = true} : vector<32x1xf32> -> vector<32x1xf32>
    %79 = vector.broadcast %78 : vector<32x1xf32> to vector<32x32xf32>
    %80 = arith.mulf %75, %79 : vector<32x32xf32>
    %cst_58 = arith.constant dense<0.000000e+00> : vector<32x16xf32>
    %81 = tpu.matmul %80, %67, %cst_58 {dimension_numbers = #tpu.dot_dimension_numbers<[1], [0], [0], [1], [0, 0, 1, 1], [], []>} : vector<32x32xf32>, vector<32x16xf32>, vector<32x16xf32> -> vector<32x16xf32>
    %c0_59 = arith.constant 0 : index
    %c0_60 = arith.constant 0 : index
    %c0_61 = arith.constant 0 : index
    %82 = vector.load %arg8[%c0_59, %c0_60, %c0_61] : memref<2x32x16xf32, #tpu.memory_space<vmem>>, vector<1x32x16xf32>
    %83 = vector.shape_cast %82 : vector<1x32x16xf32> to vector<32x16xf32>
    %84 = vector.extract_strided_slice %81 {offsets = [0, 0], sizes = [16, 16], strides = [1, 1]} : vector<32x16xf32> to vector<16x16xf32>
    %cst_62 = arith.constant dense<0.000000e+00> : vector<32x16xf32>
    %85 = tpu.matmul %83, %84, %cst_62 {dimension_numbers = #tpu.dot_dimension_numbers<[1], [1], [0], [0], [0, 0, 1, 0], [], []>} : vector<32x16xf32>, vector<16x16xf32>, vector<32x16xf32> -> vector<32x16xf32>
    %c1_63 = arith.constant 1 : index
    %c0_64 = arith.constant 0 : index
    %c0_65 = arith.constant 0 : index
    %86 = vector.load %arg8[%c1_63, %c0_64, %c0_65] : memref<2x32x16xf32, #tpu.memory_space<vmem>>, vector<1x32x16xf32>
    %87 = vector.shape_cast %86 : vector<1x32x16xf32> to vector<32x16xf32>
    %88 = vector.extract_strided_slice %81 {offsets = [16, 0], sizes = [16, 16], strides = [1, 1]} : vector<32x16xf32> to vector<16x16xf32>
    %cst_66 = arith.constant dense<0.000000e+00> : vector<32x16xf32>
    %89 = tpu.matmul %87, %88, %cst_66 {dimension_numbers = #tpu.dot_dimension_numbers<[1], [1], [0], [0], [0, 0, 1, 0], [], []>} : vector<32x16xf32>, vector<16x16xf32>, vector<32x16xf32> -> vector<32x16xf32>
    %90 = arith.addf %85, %89 : vector<32x16xf32>
    %91 = arith.addf %46, %90 : vector<32x16xf32>
    %92 = tpu.transpose %91, [1, 0] : vector<32x16xf32> -> vector<16x32xf32>
    %c0_67 = arith.constant 0 : index
    %c0_68 = arith.constant 0 : index
    %93 = vector.load %arg9[%c0_67, %c0_68] : memref<32x16xf32, #tpu.memory_space<vmem>>, vector<32x16xf32>
    %cst_69 = arith.constant dense<0.000000e+00> : vector<16x16xf32>
    %94 = tpu.matmul %92, %93, %cst_69 {dimension_numbers = #tpu.dot_dimension_numbers<[1], [0], [0], [1], [0, 0, 1, 1], [], []>} : vector<16x32xf32>, vector<32x16xf32>, vector<16x16xf32> -> vector<16x16xf32>
    %c0_70 = arith.constant 0 : index
    %c0_71 = arith.constant 0 : index
    %95 = vector.load %arg10[%c0_70, %c0_71] : memref<1x16xf32, #tpu.memory_space<vmem>>, vector<1x16xf32>
    %96 = vector.broadcast %95 : vector<1x16xf32> to vector<16x16xf32>
    %97 = arith.addf %94, %96 : vector<16x16xf32>
    %c0_72 = arith.constant 0 : index
    %c0_73 = arith.constant 0 : index
    %98 = vector.load %arg11[%c0_72, %c0_73] : memref<16x16xf32, #tpu.memory_space<vmem>>, vector<16x16xf32>
    tpu.vector_store %arg11[%c0_72, %c0_73], %97 {strides = array<i32>} : memref<16x16xf32, #tpu.memory_space<vmem>>, vector<16x16xf32>,
    return
  }
  func.func @transform_0(%arg0: i32) -> (i32, i32) {
    %c0_i32 = arith.constant 0 : i32
    %c0_i32_0 = arith.constant 0 : i32
    return %arg0, %c0_i32 : i32, i32
  }
  func.func @transform_1(%arg0: i32) -> (i32, i32, i32) {
    %c0_i32 = arith.constant 0 : i32
    %c0_i32_0 = arith.constant 0 : i32
    %c0_i32_1 = arith.constant 0 : i32
    %c0_i32_2 = arith.constant 0 : i32
    return %c0_i32, %c0_i32_0, %c0_i32_1 : i32, i32, i32
  }
  func.func @transform_2(%arg0: i32) -> (i32, i32, i32) {
    %c0_i32 = arith.constant 0 : i32
    %c0_i32_0 = arith.constant 0 : i32
    %c0_i32_1 = arith.constant 0 : i32
    %c0_i32_2 = arith.constant 0 : i32
    return %c0_i32, %c0_i32_0, %c0_i32_1 : i32, i32, i32
  }
  func.func @transform_3(%arg0: i32) -> (i32, i32, i32) {
    %c0_i32 = arith.constant 0 : i32
    %c0_i32_0 = arith.constant 0 : i32
    %c0_i32_1 = arith.constant 0 : i32
    %c0_i32_2 = arith.constant 0 : i32
    return %c0_i32, %c0_i32_0, %c0_i32_1 : i32, i32, i32
  }
  func.func @transform_4(%arg0: i32) -> (i32, i32, i32) {
    %c0_i32 = arith.constant 0 : i32
    %c0_i32_0 = arith.constant 0 : i32
    %c0_i32_1 = arith.constant 0 : i32
    %c0_i32_2 = arith.constant 0 : i32
    return %c0_i32, %c0_i32_0, %c0_i32_1 : i32, i32, i32
  }
  func.func @transform_5(%arg0: i32) -> (i32, i32, i32) {
    %c0_i32 = arith.constant 0 : i32
    %c0_i32_0 = arith.constant 0 : i32
    %c0_i32_1 = arith.constant 0 : i32
    %c0_i32_2 = arith.constant 0 : i32
    return %c0_i32, %c0_i32_0, %c0_i32_1 : i32, i32, i32
  }
  func.func @transform_6(%arg0: i32) -> (i32, i32, i32) {
    %c0_i32 = arith.constant 0 : i32
    %c0_i32_0 = arith.constant 0 : i32
    %c0_i32_1 = arith.constant 0 : i32
    %c0_i32_2 = arith.constant 0 : i32
    return %c0_i32, %c0_i32_0, %c0_i32_1 : i32, i32, i32
  }
  func.func @transform_7(%arg0: i32) -> (i32, i32, i32) {
    %c0_i32 = arith.constant 0 : i32
    %c0_i32_0 = arith.constant 0 : i32
    %c0_i32_1 = arith.constant 0 : i32
    %c0_i32_2 = arith.constant 0 : i32
    return %c0_i32, %c0_i32_0, %c0_i32_1 : i32, i32, i32
  }
  func.func @transform_8(%arg0: i32) -> (i32, i32) {
    %c0_i32 = arith.constant 0 : i32
    %c0_i32_0 = arith.constant 0 : i32
    %c0_i32_1 = arith.constant 0 : i32
    return %c0_i32, %c0_i32_0 : i32, i32
  }
  func.func @transform_9(%arg0: i32) -> (i32, i32) {
    %c0_i32 = arith.constant 0 : i32
    %c0_i32_0 = arith.constant 0 : i32
    %c0_i32_1 = arith.constant 0 : i32
    return %c0_i32, %c0_i32_0 : i32, i32
  }
  func.func @transform_10(%arg0: i32) -> (i32, i32) {
    %c0_i32 = arith.constant 0 : i32
    %c0_i32_0 = arith.constant 0 : i32
    return %arg0, %c0_i32 : i32, i32
  }
}

module attributes {stable_mosaic.version = 11 : i64} {
  func.func @_head_kernel(%arg0: i32, %arg1: memref<32x16xf32, #tpu.memory_space<vmem>>, %arg2: memref<16x32xf32, #tpu.memory_space<vmem>>, %arg3: memref<1x32xf32, #tpu.memory_space<vmem>>, %arg4: memref<16x1xf32, #tpu.memory_space<vmem>>, %arg5: memref<1x1xf32, #tpu.memory_space<vmem>>, %arg6: memref<16x1xf32, #tpu.memory_space<vmem>>, %arg7: memref<1x1xf32, #tpu.memory_space<vmem>>, %arg8: memref<2x32xf32, #tpu.memory_space<vmem>>, %arg9: memref<2x1xf32, #tpu.memory_space<vmem>>) attributes {dimension_semantics = [#tpu.dimension_semantics<arbitrary>], iteration_bounds = array<i64: 1>, scalar_prefetch = 0 : i64, scratch_operands = 0 : i64, tpu.core_type = #tpu.core_type<tc>, window_params = [{pipeline_mode = #tpu.pipeline_mode<synchronous>, transform_indices = @transform_0, window_bounds = array<i64: 32, 16>}, {pipeline_mode = #tpu.pipeline_mode<synchronous>, transform_indices = @transform_1, window_bounds = array<i64: 16, 32>}, {pipeline_mode = #tpu.pipeline_mode<synchronous>, transform_indices = @transform_2, window_bounds = array<i64: 1, 32>}, {pipeline_mode = #tpu.pipeline_mode<synchronous>, transform_indices = @transform_3, window_bounds = array<i64: 16, 1>}, {pipeline_mode = #tpu.pipeline_mode<synchronous>, transform_indices = @transform_4, window_bounds = array<i64: 1, 1>}, {pipeline_mode = #tpu.pipeline_mode<synchronous>, transform_indices = @transform_5, window_bounds = array<i64: 16, 1>}, {pipeline_mode = #tpu.pipeline_mode<synchronous>, transform_indices = @transform_6, window_bounds = array<i64: 1, 1>}, {pipeline_mode = #tpu.pipeline_mode<synchronous>, transform_indices = @transform_7, window_bounds = array<i64: 2, 32>}, {pipeline_mode = #tpu.pipeline_mode<synchronous>, transform_indices = @transform_8, window_bounds = array<i64: 2, 1>}]} {
    %c0 = arith.constant 0 : index
    %c0_0 = arith.constant 0 : index
    %0 = vector.load %arg1[%c0, %c0_0] : memref<32x16xf32, #tpu.memory_space<vmem>>, vector<32x16xf32>
    %c0_1 = arith.constant 0 : index
    %c0_2 = arith.constant 0 : index
    %1 = vector.load %arg2[%c0_1, %c0_2] : memref<16x32xf32, #tpu.memory_space<vmem>>, vector<16x32xf32>
    %cst = arith.constant dense<0.000000e+00> : vector<32x32xf32>
    %2 = tpu.matmul %0, %1, %cst {dimension_numbers = #tpu.dot_dimension_numbers<[1], [0], [0], [1], [0, 0, 1, 1], [], []>} : vector<32x16xf32>, vector<16x32xf32>, vector<32x32xf32> -> vector<32x32xf32>
    %c0_3 = arith.constant 0 : index
    %c0_4 = arith.constant 0 : index
    %3 = vector.load %arg3[%c0_3, %c0_4] : memref<1x32xf32, #tpu.memory_space<vmem>>, vector<1x32xf32>
    %4 = vector.broadcast %3 : vector<1x32xf32> to vector<32x32xf32>
    %5 = arith.addf %2, %4 : vector<32x32xf32>
    %cst_5 = arith.constant 0.000000e+00 : f32
    %6 = vector.broadcast %cst_5 : f32 to vector<32x32xf32>
    %7 = arith.maximumf %5, %6 : vector<32x32xf32>
    %8 = vector.extract_strided_slice %7 {offsets = [0, 0], sizes = [32, 16], strides = [1, 1]} : vector<32x32xf32> to vector<32x16xf32>
    %c0_6 = arith.constant 0 : index
    %c0_7 = arith.constant 0 : index
    %9 = vector.load %arg4[%c0_6, %c0_7] : memref<16x1xf32, #tpu.memory_space<vmem>>, vector<16x1xf32>
    %cst_8 = arith.constant dense<0.000000e+00> : vector<32x1xf32>
    %10 = tpu.matmul %8, %9, %cst_8 {dimension_numbers = #tpu.dot_dimension_numbers<[1], [0], [0], [1], [0, 0, 1, 1], [], []>} : vector<32x16xf32>, vector<16x1xf32>, vector<32x1xf32> -> vector<32x1xf32>
    %c0_9 = arith.constant 0 : index
    %c0_10 = arith.constant 0 : index
    %11 = vector.load %arg5[%c0_9, %c0_10] : memref<1x1xf32, #tpu.memory_space<vmem>>, vector<1x1xf32>
    %12 = vector.broadcast %11 : vector<1x1xf32> to vector<32x1xf32>
    %13 = arith.addf %10, %12 : vector<32x1xf32>
    %cst_11 = arith.constant 0.000000e+00 : f32
    %14 = vector.broadcast %cst_11 : f32 to vector<32x1xf32>
    %15 = arith.maximumf %13, %14 : vector<32x1xf32>
    %16 = vector.extract_strided_slice %7 {offsets = [0, 16], sizes = [32, 16], strides = [1, 1]} : vector<32x32xf32> to vector<32x16xf32>
    %c0_12 = arith.constant 0 : index
    %c0_13 = arith.constant 0 : index
    %17 = vector.load %arg6[%c0_12, %c0_13] : memref<16x1xf32, #tpu.memory_space<vmem>>, vector<16x1xf32>
    %cst_14 = arith.constant dense<0.000000e+00> : vector<32x1xf32>
    %18 = tpu.matmul %16, %17, %cst_14 {dimension_numbers = #tpu.dot_dimension_numbers<[1], [0], [0], [1], [0, 0, 1, 1], [], []>} : vector<32x16xf32>, vector<16x1xf32>, vector<32x1xf32> -> vector<32x1xf32>
    %c0_15 = arith.constant 0 : index
    %c0_16 = arith.constant 0 : index
    %19 = vector.load %arg7[%c0_15, %c0_16] : memref<1x1xf32, #tpu.memory_space<vmem>>, vector<1x1xf32>
    %20 = vector.broadcast %19 : vector<1x1xf32> to vector<32x1xf32>
    %21 = arith.addf %18, %20 : vector<32x1xf32>
    %22 = arith.negf %21 : vector<32x1xf32>
    %23 = math.exp %22 : vector<32x1xf32>
    %cst_17 = arith.constant 1.000000e+00 : f32
    %24 = vector.broadcast %cst_17 : f32 to vector<32x1xf32>
    %25 = arith.addf %24, %23 : vector<32x1xf32>
    %26 = arith.divf %24, %25 : vector<32x1xf32>
    %c0_18 = arith.constant 0 : index
    %c0_19 = arith.constant 0 : index
    %27 = vector.load %arg8[%c0_18, %c0_19] : memref<2x32xf32, #tpu.memory_space<vmem>>, vector<2x32xf32>
    %28 = arith.mulf %15, %26 : vector<32x1xf32>
    %cst_20 = arith.constant dense<0.000000e+00> : vector<2x1xf32>
    %29 = tpu.matmul %27, %28, %cst_20 {dimension_numbers = #tpu.dot_dimension_numbers<[1], [0], [0], [1], [0, 0, 1, 1], [], []>} : vector<2x32xf32>, vector<32x1xf32>, vector<2x1xf32> -> vector<2x1xf32>
    %c0_21 = arith.constant 0 : index
    %c0_22 = arith.constant 0 : index
    %30 = vector.load %arg8[%c0_21, %c0_22] : memref<2x32xf32, #tpu.memory_space<vmem>>, vector<2x32xf32>
    %cst_23 = arith.constant dense<0.000000e+00> : vector<2x1xf32>
    %31 = tpu.matmul %30, %26, %cst_23 {dimension_numbers = #tpu.dot_dimension_numbers<[1], [0], [0], [1], [0, 0, 1, 1], [], []>} : vector<2x32xf32>, vector<32x1xf32>, vector<2x1xf32> -> vector<2x1xf32>
    %32 = arith.divf %29, %31 : vector<2x1xf32>
    %c0_24 = arith.constant 0 : index
    %c0_25 = arith.constant 0 : index
    %33 = vector.load %arg9[%c0_24, %c0_25] : memref<2x1xf32, #tpu.memory_space<vmem>>, vector<2x1xf32>
    tpu.vector_store %arg9[%c0_24, %c0_25], %32 {strides = array<i32>} : memref<2x1xf32, #tpu.memory_space<vmem>>, vector<2x1xf32>,
    return
  }
  func.func @transform_0(%arg0: i32) -> (i32, i32) {
    %c0_i32 = arith.constant 0 : i32
    %c0_i32_0 = arith.constant 0 : i32
    %c0_i32_1 = arith.constant 0 : i32
    return %c0_i32, %c0_i32_0 : i32, i32
  }
  func.func @transform_1(%arg0: i32) -> (i32, i32) {
    %c0_i32 = arith.constant 0 : i32
    %c0_i32_0 = arith.constant 0 : i32
    %c0_i32_1 = arith.constant 0 : i32
    return %c0_i32, %c0_i32_0 : i32, i32
  }
  func.func @transform_2(%arg0: i32) -> (i32, i32) {
    %c0_i32 = arith.constant 0 : i32
    %c0_i32_0 = arith.constant 0 : i32
    %c0_i32_1 = arith.constant 0 : i32
    return %c0_i32, %c0_i32_0 : i32, i32
  }
  func.func @transform_3(%arg0: i32) -> (i32, i32) {
    %c0_i32 = arith.constant 0 : i32
    %c0_i32_0 = arith.constant 0 : i32
    %c0_i32_1 = arith.constant 0 : i32
    return %c0_i32, %c0_i32_0 : i32, i32
  }
  func.func @transform_4(%arg0: i32) -> (i32, i32) {
    %c0_i32 = arith.constant 0 : i32
    %c0_i32_0 = arith.constant 0 : i32
    %c0_i32_1 = arith.constant 0 : i32
    return %c0_i32, %c0_i32_0 : i32, i32
  }
  func.func @transform_5(%arg0: i32) -> (i32, i32) {
    %c0_i32 = arith.constant 0 : i32
    %c0_i32_0 = arith.constant 0 : i32
    %c0_i32_1 = arith.constant 0 : i32
    return %c0_i32, %c0_i32_0 : i32, i32
  }
  func.func @transform_6(%arg0: i32) -> (i32, i32) {
    %c0_i32 = arith.constant 0 : i32
    %c0_i32_0 = arith.constant 0 : i32
    %c0_i32_1 = arith.constant 0 : i32
    return %c0_i32, %c0_i32_0 : i32, i32
  }
  func.func @transform_7(%arg0: i32) -> (i32, i32) {
    %c0_i32 = arith.constant 0 : i32
    %c0_i32_0 = arith.constant 0 : i32
    %c0_i32_1 = arith.constant 0 : i32
    return %c0_i32, %c0_i32_0 : i32, i32
  }
  func.func @transform_8(%arg0: i32) -> (i32, i32) {
    %c0_i32 = arith.constant 0 : i32
    %c0_i32_0 = arith.constant 0 : i32
    %c0_i32_1 = arith.constant 0 : i32
    return %c0_i32, %c0_i32_0 : i32, i32
  }
}

module attributes {stable_mosaic.version = 11 : i64} {
  func.func @_swin_kernel(%arg0: i32, %arg1: i32, %arg2: memref<16x16xf32, #tpu.memory_space<vmem>>, %arg3: memref<1x2x16x16xf32, #tpu.memory_space<vmem>>, %arg4: memref<1x1x16xf32, #tpu.memory_space<vmem>>, %arg5: memref<1x1x16xf32, #tpu.memory_space<vmem>>, %arg6: memref<1x16x48xf32, #tpu.memory_space<vmem>>, %arg7: memref<1x1x48xf32, #tpu.memory_space<vmem>>, %arg8: memref<1x16x16xf32, #tpu.memory_space<vmem>>, %arg9: memref<1x1x16xf32, #tpu.memory_space<vmem>>, %arg10: memref<1x1x16xf32, #tpu.memory_space<vmem>>, %arg11: memref<1x1x16xf32, #tpu.memory_space<vmem>>, %arg12: memref<1x16x32xf32, #tpu.memory_space<vmem>>, %arg13: memref<1x1x32xf32, #tpu.memory_space<vmem>>, %arg14: memref<1x32x16xf32, #tpu.memory_space<vmem>>, %arg15: memref<1x1x16xf32, #tpu.memory_space<vmem>>, %arg16: memref<16x16xf32, #tpu.memory_space<vmem>>) attributes {dimension_semantics = [#tpu.dimension_semantics<parallel>, #tpu.dimension_semantics<arbitrary>], iteration_bounds = array<i64: 2, 4>, scalar_prefetch = 0 : i64, scratch_operands = 0 : i64, tpu.core_type = #tpu.core_type<tc>, window_params = [{transform_indices = @transform_0, window_bounds = array<i64: 16, 16>}, {transform_indices = @transform_1, window_bounds = array<i64: 1, 2, 16, 16>}, {transform_indices = @transform_2, window_bounds = array<i64: 1, 1, 16>}, {transform_indices = @transform_3, window_bounds = array<i64: 1, 1, 16>}, {transform_indices = @transform_4, window_bounds = array<i64: 1, 16, 48>}, {transform_indices = @transform_5, window_bounds = array<i64: 1, 1, 48>}, {transform_indices = @transform_6, window_bounds = array<i64: 1, 16, 16>}, {transform_indices = @transform_7, window_bounds = array<i64: 1, 1, 16>}, {transform_indices = @transform_8, window_bounds = array<i64: 1, 1, 16>}, {transform_indices = @transform_9, window_bounds = array<i64: 1, 1, 16>}, {transform_indices = @transform_10, window_bounds = array<i64: 1, 16, 32>}, {transform_indices = @transform_11, window_bounds = array<i64: 1, 1, 32>}, {transform_indices = @transform_12, window_bounds = array<i64: 1, 32, 16>}, {transform_indices = @transform_13, window_bounds = array<i64: 1, 1, 16>}, {transform_indices = @transform_14, window_bounds = array<i64: 16, 16>}]} {
    %c0_i32 = arith.constant 0 : i32
    %0 = arith.cmpi eq, %arg1, %c0_i32 : i32
    %1 = arith.extui %0 : i1 to i32
    %c0_i32_0 = arith.constant 0 : i32
    %2 = arith.cmpi ne, %1, %c0_i32_0 : i32
    scf.if %2 {
      %c0_77 = arith.constant 0 : index
      %c0_78 = arith.constant 0 : index
      %144 = vector.load %arg2[%c0_77, %c0_78] : memref<16x16xf32, #tpu.memory_space<vmem>>, vector<16x16xf32>
      %c0_79 = arith.constant 0 : index
      %c0_80 = arith.constant 0 : index
      %145 = vector.load %arg16[%c0_79, %c0_80] : memref<16x16xf32, #tpu.memory_space<vmem>>, vector<16x16xf32>
      tpu.vector_store %arg16[%c0_79, %c0_80], %144 {strides = array<i32>} : memref<16x16xf32, #tpu.memory_space<vmem>>, vector<16x16xf32>,
    } else {
    }
    %c0 = arith.constant 0 : index
    %c0_1 = arith.constant 0 : index
    %3 = vector.load %arg16[%c0, %c0_1] : memref<16x16xf32, #tpu.memory_space<vmem>>, vector<16x16xf32>
    %c0_2 = arith.constant 0 : index
    %c0_3 = arith.constant 0 : index
    %c0_4 = arith.constant 0 : index
    %4 = vector.load %arg4[%c0_2, %c0_3, %c0_4] : memref<1x1x16xf32, #tpu.memory_space<vmem>>, vector<1x1x16xf32>
    %5 = vector.shape_cast %4 : vector<1x1x16xf32> to vector<1x16xf32>
    %c0_5 = arith.constant 0 : index
    %c0_6 = arith.constant 0 : index
    %c0_7 = arith.constant 0 : index
    %6 = vector.load %arg5[%c0_5, %c0_6, %c0_7] : memref<1x1x16xf32, #tpu.memory_space<vmem>>, vector<1x1x16xf32>
    %7 = vector.shape_cast %6 : vector<1x1x16xf32> to vector<1x16xf32>
    %cst = arith.constant dense<0.000000e+00> : vector<16xf32>
    %8 = vector.multi_reduction <add>, %3, %cst [1] : vector<16x16xf32> to vector<16xf32>
    %9 = vector.shape_cast %8 : vector<16xf32> to vector<16x1xf32>
    %cst_8 = arith.constant 1.600000e+01 : f32
    %10 = vector.broadcast %cst_8 : f32 to vector<16x1xf32>
    %11 = arith.divf %9, %10 : vector<16x1xf32>
    %12 = vector.broadcast %11 : vector<16x1xf32> to vector<16x16xf32>
    %13 = arith.subf %3, %12 : vector<16x16xf32>
    %14 = arith.mulf %13, %13 : vector<16x16xf32>
    %cst_9 = arith.constant dense<0.000000e+00> : vector<16xf32>
    %15 = vector.multi_reduction <add>, %14, %cst_9 [1] : vector<16x16xf32> to vector<16xf32>
    %16 = vector.shape_cast %15 : vector<16xf32> to vector<16x1xf32>
    %cst_10 = arith.constant 1.600000e+01 : f32
    %17 = vector.broadcast %cst_10 : f32 to vector<16x1xf32>
    %18 = arith.divf %16, %17 : vector<16x1xf32>
    %cst_11 = arith.constant 9.99999974E-6 : f32
    %19 = vector.broadcast %cst_11 : f32 to vector<16x1xf32>
    %20 = arith.addf %18, %19 : vector<16x1xf32>
    %21 = math.rsqrt %20 : vector<16x1xf32>
    %22 = vector.broadcast %21 : vector<16x1xf32> to vector<16x16xf32>
    %23 = arith.mulf %13, %22 : vector<16x16xf32>
    %24 = vector.broadcast %5 : vector<1x16xf32> to vector<16x16xf32>
    %25 = arith.mulf %23, %24 : vector<16x16xf32>
    %26 = vector.broadcast %7 : vector<1x16xf32> to vector<16x16xf32>
    %27 = arith.addf %25, %26 : vector<16x16xf32>
    %c0_12 = arith.constant 0 : index
    %c0_13 = arith.constant 0 : index
    %c0_14 = arith.constant 0 : index
    %28 = vector.load %arg6[%c0_12, %c0_13, %c0_14] : memref<1x16x48xf32, #tpu.memory_space<vmem>>, vector<1x16x48xf32>
    %29 = vector.shape_cast %28 : vector<1x16x48xf32> to vector<16x48xf32>
    %cst_15 = arith.constant dense<0.000000e+00> : vector<16x48xf32>
    %30 = tpu.matmul %27, %29, %cst_15 {dimension_numbers = #tpu.dot_dimension_numbers<[1], [0], [0], [1], [0, 0, 1, 1], [], []>} : vector<16x16xf32>, vector<16x48xf32>, vector<16x48xf32> -> vector<16x48xf32>
    %c0_16 = arith.constant 0 : index
    %c0_17 = arith.constant 0 : index
    %c0_18 = arith.constant 0 : index
    %31 = vector.load %arg7[%c0_16, %c0_17, %c0_18] : memref<1x1x48xf32, #tpu.memory_space<vmem>>, vector<1x1x48xf32>
    %32 = vector.shape_cast %31 : vector<1x1x48xf32> to vector<1x48xf32>
    %33 = vector.broadcast %32 : vector<1x48xf32> to vector<16x48xf32>
    %34 = arith.addf %30, %33 : vector<16x48xf32>
    %c0_19 = arith.constant 0 : index
    %c0_20 = arith.constant 0 : index
    %c0_21 = arith.constant 0 : index
    %35 = vector.load %arg8[%c0_19, %c0_20, %c0_21] : memref<1x16x16xf32, #tpu.memory_space<vmem>>, vector<1x16x16xf32>
    %36 = vector.shape_cast %35 : vector<1x16x16xf32> to vector<16x16xf32>
    %37 = vector.extract_strided_slice %34 {offsets = [0, 0], sizes = [16, 8], strides = [1, 1]} : vector<16x48xf32> to vector<16x8xf32>
    %38 = vector.extract_strided_slice %34 {offsets = [0, 16], sizes = [16, 8], strides = [1, 1]} : vector<16x48xf32> to vector<16x8xf32>
    %39 = vector.extract_strided_slice %34 {offsets = [0, 32], sizes = [16, 8], strides = [1, 1]} : vector<16x48xf32> to vector<16x8xf32>
    %c0_22 = arith.constant 0 : index
    %c0_23 = arith.constant 0 : index
    %c0_24 = arith.constant 0 : index
    %c0_25 = arith.constant 0 : index
    %40 = vector.load %arg3[%c0_22, %c0_23, %c0_24, %c0_25] : memref<1x2x16x16xf32, #tpu.memory_space<vmem>>, vector<1x1x16x16xf32>
    %41 = vector.shape_cast %40 : vector<1x1x16x16xf32> to vector<16x16xf32>
    %cst_26 = arith.constant dense<0.000000e+00> : vector<16x16xf32>
    %42 = tpu.matmul %37, %38, %cst_26 {dimension_numbers = #tpu.dot_dimension_numbers<[1], [1], [0], [0], [0, 0, 1, 0], [], []>} : vector<16x8xf32>, vector<16x8xf32>, vector<16x16xf32> -> vector<16x16xf32>
    %cst_27 = arith.constant 0.353553385 : f32
    %43 = vector.broadcast %cst_27 : f32 to vector<16x16xf32>
    %44 = arith.mulf %42, %43 : vector<16x16xf32>
    %45 = arith.addf %44, %41 : vector<16x16xf32>
    %cst_28 = arith.constant dense<0xFF800000> : vector<16xf32>
    %46 = vector.multi_reduction <maximumf>, %45, %cst_28 [1] : vector<16x16xf32> to vector<16xf32>
    %47 = vector.shape_cast %46 : vector<16xf32> to vector<16x1xf32>
    %48 = vector.broadcast %47 : vector<16x1xf32> to vector<16x16xf32>
    %49 = arith.subf %45, %48 : vector<16x16xf32>
    %50 = math.exp %49 : vector<16x16xf32>
    %cst_29 = arith.constant dense<0.000000e+00> : vector<16xf32>
    %51 = vector.multi_reduction <add>, %50, %cst_29 [1] : vector<16x16xf32> to vector<16xf32>
    %52 = vector.shape_cast %51 : vector<16xf32> to vector<16x1xf32>
    %53 = tpu.reciprocal %52 {approx = true} : vector<16x1xf32> -> vector<16x1xf32>
    %54 = vector.broadcast %53 : vector<16x1xf32> to vector<16x16xf32>
    %55 = arith.mulf %50, %54 : vector<16x16xf32>
    %cst_30 = arith.constant dense<0.000000e+00> : vector<16x8xf32>
    %56 = tpu.matmul %55, %39, %cst_30 {dimension_numbers = #tpu.dot_dimension_numbers<[1], [0], [0], [1], [0, 0, 1, 1], [], []>} : vector<16x16xf32>, vector<16x8xf32>, vector<16x8xf32> -> vector<16x8xf32>
    %57 = vector.extract_strided_slice %36 {offsets = [0, 0], sizes = [8, 16], strides = [1, 1]} : vector<16x16xf32> to vector<8x16xf32>
    %cst_31 = arith.constant dense<0.000000e+00> : vector<16x16xf32>
    %58 = tpu.matmul %56, %57, %cst_31 {dimension_numbers = #tpu.dot_dimension_numbers<[1], [0], [0], [1], [0, 0, 1, 1], [], []>} : vector<16x8xf32>, vector<8x16xf32>, vector<16x16xf32> -> vector<16x16xf32>
    %59 = vector.extract_strided_slice %34 {offsets = [0, 8], sizes = [16, 8], strides = [1, 1]} : vector<16x48xf32> to vector<16x8xf32>
    %60 = vector.extract_strided_slice %34 {offsets = [0, 24], sizes = [16, 8], strides = [1, 1]} : vector<16x48xf32> to vector<16x8xf32>
    %61 = vector.extract_strided_slice %34 {offsets = [0, 40], sizes = [16, 8], strides = [1, 1]} : vector<16x48xf32> to vector<16x8xf32>
    %c0_32 = arith.constant 0 : index
    %c1 = arith.constant 1 : index
    %c0_33 = arith.constant 0 : index
    %c0_34 = arith.constant 0 : index
    %62 = vector.load %arg3[%c0_32, %c1, %c0_33, %c0_34] : memref<1x2x16x16xf32, #tpu.memory_space<vmem>>, vector<1x1x16x16xf32>
    %63 = vector.shape_cast %62 : vector<1x1x16x16xf32> to vector<16x16xf32>
    %cst_35 = arith.constant dense<0.000000e+00> : vector<16x16xf32>
    %64 = tpu.matmul %59, %60, %cst_35 {dimension_numbers = #tpu.dot_dimension_numbers<[1], [1], [0], [0], [0, 0, 1, 0], [], []>} : vector<16x8xf32>, vector<16x8xf32>, vector<16x16xf32> -> vector<16x16xf32>
    %cst_36 = arith.constant 0.353553385 : f32
    %65 = vector.broadcast %cst_36 : f32 to vector<16x16xf32>
    %66 = arith.mulf %64, %65 : vector<16x16xf32>
    %67 = arith.addf %66, %63 : vector<16x16xf32>
    %cst_37 = arith.constant dense<0xFF800000> : vector<16xf32>
    %68 = vector.multi_reduction <maximumf>, %67, %cst_37 [1] : vector<16x16xf32> to vector<16xf32>
    %69 = vector.shape_cast %68 : vector<16xf32> to vector<16x1xf32>
    %70 = vector.broadcast %69 : vector<16x1xf32> to vector<16x16xf32>
    %71 = arith.subf %67, %70 : vector<16x16xf32>
    %72 = math.exp %71 : vector<16x16xf32>
    %cst_38 = arith.constant dense<0.000000e+00> : vector<16xf32>
    %73 = vector.multi_reduction <add>, %72, %cst_38 [1] : vector<16x16xf32> to vector<16xf32>
    %74 = vector.shape_cast %73 : vector<16xf32> to vector<16x1xf32>
    %75 = tpu.reciprocal %74 {approx = true} : vector<16x1xf32> -> vector<16x1xf32>
    %76 = vector.broadcast %75 : vector<16x1xf32> to vector<16x16xf32>
    %77 = arith.mulf %72, %76 : vector<16x16xf32>
    %cst_39 = arith.constant dense<0.000000e+00> : vector<16x8xf32>
    %78 = tpu.matmul %77, %61, %cst_39 {dimension_numbers = #tpu.dot_dimension_numbers<[1], [0], [0], [1], [0, 0, 1, 1], [], []>} : vector<16x16xf32>, vector<16x8xf32>, vector<16x8xf32> -> vector<16x8xf32>
    %79 = vector.extract_strided_slice %36 {offsets = [8, 0], sizes = [8, 16], strides = [1, 1]} : vector<16x16xf32> to vector<8x16xf32>
    %cst_40 = arith.constant dense<0.000000e+00> : vector<16x16xf32>
    %80 = tpu.matmul %78, %79, %cst_40 {dimension_numbers = #tpu.dot_dimension_numbers<[1], [0], [0], [1], [0, 0, 1, 1], [], []>} : vector<16x8xf32>, vector<8x16xf32>, vector<16x16xf32> -> vector<16x16xf32>
    %81 = arith.addf %58, %80 : vector<16x16xf32>
    %c0_41 = arith.constant 0 : index
    %c0_42 = arith.constant 0 : index
    %c0_43 = arith.constant 0 : index
    %82 = vector.load %arg9[%c0_41, %c0_42, %c0_43] : memref<1x1x16xf32, #tpu.memory_space<vmem>>, vector<1x1x16xf32>
    %83 = vector.shape_cast %82 : vector<1x1x16xf32> to vector<1x16xf32>
    %84 = vector.broadcast %83 : vector<1x16xf32> to vector<16x16xf32>
    %85 = arith.addf %81, %84 : vector<16x16xf32>
    %cst_44 = arith.constant 8.000000e-01 : f32
    %86 = vector.broadcast %cst_44 : f32 to vector<16x16xf32>
    %87 = arith.mulf %86, %85 : vector<16x16xf32>
    %88 = arith.addf %3, %87 : vector<16x16xf32>
    %c0_45 = arith.constant 0 : index
    %c0_46 = arith.constant 0 : index
    %c0_47 = arith.constant 0 : index
    %89 = vector.load %arg10[%c0_45, %c0_46, %c0_47] : memref<1x1x16xf32, #tpu.memory_space<vmem>>, vector<1x1x16xf32>
    %90 = vector.shape_cast %89 : vector<1x1x16xf32> to vector<1x16xf32>
    %c0_48 = arith.constant 0 : index
    %c0_49 = arith.constant 0 : index
    %c0_50 = arith.constant 0 : index
    %91 = vector.load %arg11[%c0_48, %c0_49, %c0_50] : memref<1x1x16xf32, #tpu.memory_space<vmem>>, vector<1x1x16xf32>
    %92 = vector.shape_cast %91 : vector<1x1x16xf32> to vector<1x16xf32>
    %cst_51 = arith.constant dense<0.000000e+00> : vector<16xf32>
    %93 = vector.multi_reduction <add>, %88, %cst_51 [1] : vector<16x16xf32> to vector<16xf32>
    %94 = vector.shape_cast %93 : vector<16xf32> to vector<16x1xf32>
    %cst_52 = arith.constant 1.600000e+01 : f32
    %95 = vector.broadcast %cst_52 : f32 to vector<16x1xf32>
    %96 = arith.divf %94, %95 : vector<16x1xf32>
    %97 = vector.broadcast %96 : vector<16x1xf32> to vector<16x16xf32>
    %98 = arith.subf %88, %97 : vector<16x16xf32>
    %99 = arith.mulf %98, %98 : vector<16x16xf32>
    %cst_53 = arith.constant dense<0.000000e+00> : vector<16xf32>
    %100 = vector.multi_reduction <add>, %99, %cst_53 [1] : vector<16x16xf32> to vector<16xf32>
    %101 = vector.shape_cast %100 : vector<16xf32> to vector<16x1xf32>
    %cst_54 = arith.constant 1.600000e+01 : f32
    %102 = vector.broadcast %cst_54 : f32 to vector<16x1xf32>
    %103 = arith.divf %101, %102 : vector<16x1xf32>
    %cst_55 = arith.constant 9.99999974E-6 : f32
    %104 = vector.broadcast %cst_55 : f32 to vector<16x1xf32>
    %105 = arith.addf %103, %104 : vector<16x1xf32>
    %106 = math.rsqrt %105 : vector<16x1xf32>
    %107 = vector.broadcast %106 : vector<16x1xf32> to vector<16x16xf32>
    %108 = arith.mulf %98, %107 : vector<16x16xf32>
    %109 = vector.broadcast %90 : vector<1x16xf32> to vector<16x16xf32>
    %110 = arith.mulf %108, %109 : vector<16x16xf32>
    %111 = vector.broadcast %92 : vector<1x16xf32> to vector<16x16xf32>
    %112 = arith.addf %110, %111 : vector<16x16xf32>
    %c0_56 = arith.constant 0 : index
    %c0_57 = arith.constant 0 : index
    %c0_58 = arith.constant 0 : index
    %113 = vector.load %arg12[%c0_56, %c0_57, %c0_58] : memref<1x16x32xf32, #tpu.memory_space<vmem>>, vector<1x16x32xf32>
    %114 = vector.shape_cast %113 : vector<1x16x32xf32> to vector<16x32xf32>
    %cst_59 = arith.constant dense<0.000000e+00> : vector<16x32xf32>
    %115 = tpu.matmul %112, %114, %cst_59 {dimension_numbers = #tpu.dot_dimension_numbers<[1], [0], [0], [1], [0, 0, 1, 1], [], []>} : vector<16x16xf32>, vector<16x32xf32>, vector<16x32xf32> -> vector<16x32xf32>
    %c0_60 = arith.constant 0 : index
    %c0_61 = arith.constant 0 : index
    %c0_62 = arith.constant 0 : index
    %116 = vector.load %arg13[%c0_60, %c0_61, %c0_62] : memref<1x1x32xf32, #tpu.memory_space<vmem>>, vector<1x1x32xf32>
    %117 = vector.shape_cast %116 : vector<1x1x32xf32> to vector<1x32xf32>
    %118 = vector.broadcast %117 : vector<1x32xf32> to vector<16x32xf32>
    %119 = arith.addf %115, %118 : vector<16x32xf32>
    %120 = arith.mulf %119, %119 : vector<16x32xf32>
    %121 = arith.mulf %119, %120 : vector<16x32xf32>
    %cst_63 = arith.constant 4.471500e-02 : f32
    %122 = vector.broadcast %cst_63 : f32 to vector<16x32xf32>
    %123 = arith.mulf %122, %121 : vector<16x32xf32>
    %124 = arith.addf %119, %123 : vector<16x32xf32>
    %cst_64 = arith.constant 0.797884583 : f32
    %125 = vector.broadcast %cst_64 : f32 to vector<16x32xf32>
    %126 = arith.mulf %125, %124 : vector<16x32xf32>
    %127 = math.tanh %126 : vector<16x32xf32>
    %cst_65 = arith.constant 1.000000e+00 : f32
    %128 = vector.broadcast %cst_65 : f32 to vector<16x32xf32>
    %129 = arith.addf %128, %127 : vector<16x32xf32>
    %cst_66 = arith.constant 5.000000e-01 : f32
    %130 = vector.broadcast %cst_66 : f32 to vector<16x32xf32>
    %131 = arith.mulf %130, %129 : vector<16x32xf32>
    %132 = arith.mulf %119, %131 : vector<16x32xf32>
    %c0_67 = arith.constant 0 : index
    %c0_68 = arith.constant 0 : index
    %c0_69 = arith.constant 0 : index
    %133 = vector.load %arg14[%c0_67, %c0_68, %c0_69] : memref<1x32x16xf32, #tpu.memory_space<vmem>>, vector<1x32x16xf32>
    %134 = vector.shape_cast %133 : vector<1x32x16xf32> to vector<32x16xf32>
    %cst_70 = arith.constant dense<0.000000e+00> : vector<16x16xf32>
    %135 = tpu.matmul %132, %134, %cst_70 {dimension_numbers = #tpu.dot_dimension_numbers<[1], [0], [0], [1], [0, 0, 1, 1], [], []>} : vector<16x32xf32>, vector<32x16xf32>, vector<16x16xf32> -> vector<16x16xf32>
    %c0_71 = arith.constant 0 : index
    %c0_72 = arith.constant 0 : index
    %c0_73 = arith.constant 0 : index
    %136 = vector.load %arg15[%c0_71, %c0_72, %c0_73] : memref<1x1x16xf32, #tpu.memory_space<vmem>>, vector<1x1x16xf32>
    %137 = vector.shape_cast %136 : vector<1x1x16xf32> to vector<1x16xf32>
    %138 = vector.broadcast %137 : vector<1x16xf32> to vector<16x16xf32>
    %139 = arith.addf %135, %138 : vector<16x16xf32>
    %cst_74 = arith.constant 8.000000e-01 : f32
    %140 = vector.broadcast %cst_74 : f32 to vector<16x16xf32>
    %141 = arith.mulf %140, %139 : vector<16x16xf32>
    %142 = arith.addf %88, %141 : vector<16x16xf32>
    %c0_75 = arith.constant 0 : index
    %c0_76 = arith.constant 0 : index
    %143 = vector.load %arg16[%c0_75, %c0_76] : memref<16x16xf32, #tpu.memory_space<vmem>>, vector<16x16xf32>
    tpu.vector_store %arg16[%c0_75, %c0_76], %142 {strides = array<i32>} : memref<16x16xf32, #tpu.memory_space<vmem>>, vector<16x16xf32>,
    return
  }
  func.func @transform_0(%arg0: i32, %arg1: i32) -> (i32, i32) {
    %c0_i32 = arith.constant 0 : i32
    %c0_i32_0 = arith.constant 0 : i32
    return %arg0, %c0_i32 : i32, i32
  }
  func.func @transform_1(%arg0: i32, %arg1: i32) -> (i32, i32, i32, i32) {
    %c0_i32 = arith.constant 0 : i32
    %c0_i32_0 = arith.constant 0 : i32
    %c0_i32_1 = arith.constant 0 : i32
    %c0_i32_2 = arith.constant 0 : i32
    return %arg1, %c0_i32, %c0_i32_0, %c0_i32_1 : i32, i32, i32, i32
  }
  func.func @transform_2(%arg0: i32, %arg1: i32) -> (i32, i32, i32) {
    %c0_i32 = arith.constant 0 : i32
    %c0_i32_0 = arith.constant 0 : i32
    %c0_i32_1 = arith.constant 0 : i32
    return %arg1, %c0_i32, %c0_i32_0 : i32, i32, i32
  }
  func.func @transform_3(%arg0: i32, %arg1: i32) -> (i32, i32, i32) {
    %c0_i32 = arith.constant 0 : i32
    %c0_i32_0 = arith.constant 0 : i32
    %c0_i32_1 = arith.constant 0 : i32
    return %arg1, %c0_i32, %c0_i32_0 : i32, i32, i32
  }
  func.func @transform_4(%arg0: i32, %arg1: i32) -> (i32, i32, i32) {
    %c0_i32 = arith.constant 0 : i32
    %c0_i32_0 = arith.constant 0 : i32
    %c0_i32_1 = arith.constant 0 : i32
    return %arg1, %c0_i32, %c0_i32_0 : i32, i32, i32
  }
  func.func @transform_5(%arg0: i32, %arg1: i32) -> (i32, i32, i32) {
    %c0_i32 = arith.constant 0 : i32
    %c0_i32_0 = arith.constant 0 : i32
    %c0_i32_1 = arith.constant 0 : i32
    return %arg1, %c0_i32, %c0_i32_0 : i32, i32, i32
  }
  func.func @transform_6(%arg0: i32, %arg1: i32) -> (i32, i32, i32) {
    %c0_i32 = arith.constant 0 : i32
    %c0_i32_0 = arith.constant 0 : i32
    %c0_i32_1 = arith.constant 0 : i32
    return %arg1, %c0_i32, %c0_i32_0 : i32, i32, i32
  }
  func.func @transform_7(%arg0: i32, %arg1: i32) -> (i32, i32, i32) {
    %c0_i32 = arith.constant 0 : i32
    %c0_i32_0 = arith.constant 0 : i32
    %c0_i32_1 = arith.constant 0 : i32
    return %arg1, %c0_i32, %c0_i32_0 : i32, i32, i32
  }
  func.func @transform_8(%arg0: i32, %arg1: i32) -> (i32, i32, i32) {
    %c0_i32 = arith.constant 0 : i32
    %c0_i32_0 = arith.constant 0 : i32
    %c0_i32_1 = arith.constant 0 : i32
    return %arg1, %c0_i32, %c0_i32_0 : i32, i32, i32
  }
  func.func @transform_9(%arg0: i32, %arg1: i32) -> (i32, i32, i32) {
    %c0_i32 = arith.constant 0 : i32
    %c0_i32_0 = arith.constant 0 : i32
    %c0_i32_1 = arith.constant 0 : i32
    return %arg1, %c0_i32, %c0_i32_0 : i32, i32, i32
  }
  func.func @transform_10(%arg0: i32, %arg1: i32) -> (i32, i32, i32) {
    %c0_i32 = arith.constant 0 : i32
    %c0_i32_0 = arith.constant 0 : i32
    %c0_i32_1 = arith.constant 0 : i32
    return %arg1, %c0_i32, %c0_i32_0 : i32, i32, i32
  }
  func.func @transform_11(%arg0: i32, %arg1: i32) -> (i32, i32, i32) {
    %c0_i32 = arith.constant 0 : i32
    %c0_i32_0 = arith.constant 0 : i32
    %c0_i32_1 = arith.constant 0 : i32
    return %arg1, %c0_i32, %c0_i32_0 : i32, i32, i32
  }
  func.func @transform_12(%arg0: i32, %arg1: i32) -> (i32, i32, i32) {
    %c0_i32 = arith.constant 0 : i32
    %c0_i32_0 = arith.constant 0 : i32
    %c0_i32_1 = arith.constant 0 : i32
    return %arg1, %c0_i32, %c0_i32_0 : i32, i32, i32
  }
  func.func @transform_13(%arg0: i32, %arg1: i32) -> (i32, i32, i32) {
    %c0_i32 = arith.constant 0 : i32
    %c0_i32_0 = arith.constant 0 : i32
    %c0_i32_1 = arith.constant 0 : i32
    return %arg1, %c0_i32, %c0_i32_0 : i32, i32, i32
  }
  func.func @transform_14(%arg0: i32, %arg1: i32) -> (i32, i32) {
    %c0_i32 = arith.constant 0 : i32
    %c0_i32_0 = arith.constant 0 : i32
    return %arg0, %c0_i32 : i32, i32
  }
}

</mosaic_0001>

<bundles_post_ra>
// kernel: maniqa_forward.7
= control target key start
LH: loop header
LB: loop body
LE: loop exit
PB: predicated region body
PF: predicated region fallthrough
CT: control target
= control target key end

     0   :  { %8 = vsyncpa [#allocation3], 0  ;;  %s1532_s0 = inlined_call_operand.hbm [shape: f32[384,64], index: 0, kind: input, shape index: {}]   ;;  %s1533_s1 = inlined_call_operand.vmem [shape: f32[64,32], index: 1, kind: input, shape index: {}]   ;;  %s1534_s2 = inlined_call_operand.vmem [shape: f32[32,64], index: 2, kind: input, shape index: {}]   ;;  %s1535_s3 = inlined_call_operand.vmem [shape: f32[6,32,32], index: 3, kind: output, shape index: {}]  }
   0x1   :  { %10 = vsyncpa [#allocation3 + $0x1], 0  ;;  %s1310_s12 = smov 0   ;;  %s1312_s13 = smov 0  }
   0x2   :  { %s1314_s14 = smov 0   ;;  %s1316_s15 = smov 0  }
   0x3 LB: > { %s872_s16 = sadd.s32 4294967295, %s1285_s15   ;;  %s1330_s17 = sadd.s32 1, %s1285_s15   ;;  %s1285_s15 = sphi %s1316_s15, %s1542_s15   ;;  %s1281_s14 = sphi %s1314_s14, %s1541_s14   ;;  %s1277_s13 = sphi %s1312_s13, %s1540_s13   ;;  %s1273_s12 = sphi %s1310_s12, %s1539_s12  }
   0x4   : > { %s20_s18 = ssub.s32 %s1285_s15, %s1330_s17  ;;  %s23_s19 = sadd.s32 1, %s1281_s14 }
   0x5   : > { %p21_p0 = scmp.eq.s32.totalorder %s20_s18, 0  ;;  %p30_p1 = scmp.ne.s32.totalorder %s1281_s14, %s1277_s13 }
   0x6   : > { %p31_p2 = scmp.eq.s32.totalorder %s1285_s15, 0  ;;  %p36_p3 = scmp.ne.s32.totalorder %s1277_s13, %s1273_s12 }
   0x7   : > { %s1340_s20 = scalar_select %p21_p0, %s1281_s14, %s23_s19  }
   0x8   : > { %p32_p4 = por %p31_p2, %p30_p1  ;;  %p37_p5 = scmp.eq.s32.totalorder %s872_s16, 0 }
   0x9   : > { %p1186_p6 = scmp.lt.s32.totalorder %s1285_s15, 2  ;;  %s134_s22 = sand.u32 1, %s1281_s14  }
   0xa   : > { %p1345_p7 = por %p37_p5, %p36_p3  ;;  %s1178_s23 = smul.u32 192, %s134_s22 }
   0xb   : > { %s926_s24 = smul.u32 3072, %s1285_s15  ;;  %p1351_p8 = pnand %p1186_p6, %p32_p4 }
   0xc   : > { %s138_s29 = scalar_lea.vmem [#allocation2], %s1178_s23  ;;  %s1363_s4 = scalar_lea.sflag [#allocation3], %s134_s22 }
   0xd   : > { %s1358_s28 = scalar_lea.hbm %s1532_s0, %s926_s24  ;;  %s145_s30 = sshll.u32 %s138_s29, 4  ;;  %s1360_s30 = int_to_ptr.vmem [resolvable:$true] %s145_s30 }
   0xe   : > { %s1221_s5 = scalar_lea.hbm %s1358_s28, 3072  ;;  %p1223_p11 = pneg %p1351_p8 }
   0xf   : > { %p1222_p10 = scmp.ne.s32.totalorder %s1358_s28, %s1221_s5  ;;  %s1226_s8 = scalar_lea.hbm %s1532_s0, 6144 }
  0x10   : > { %p1227_p0 = scmp.lt.u32.totalorder %s1358_s28, %s1532_s0  ;;  %p1228_p1 = scmp.lt.u32.totalorder %s1226_s8, %s1221_s5 }
  0x11   : > { %p1224_p12 = pnand %p1223_p11, %p1222_p10  ;;  %p1230_p3 = scmp.lt.u32.totalorder %s1221_s5, %s1358_s28 }
  0x12   : > { %p1229_p2 = por %p1228_p1, %p1227_p0 }
  0x13   : > { %p1225_p13 = pneg %p1224_p12 }
  0x14   : > { %p1231_p4 = por %p1230_p3, %p1229_p2 }
  0x16   : > { %p1232_p5 = pnand %p1231_p4, %p1225_p13 }
  0x18   : > { %1235 = shalt.err (!%p1232_p5)
}
  0x19   : > { %s1236_s11 = scalar_lea.vmem %s1360_s30, 3072  ;;  %s1287_s12 = smov [#allocation2]  }
  0x1a   : > { %p1237_p6 = scmp.ne.s32.totalorder %s1360_s30, %s1236_s11  ;;  %s1241_s18 = sshll.u32 %s1287_s12, 4  ;;  %s1242_s18 = int_to_ptr.vmem [resolvable:$false] %s1241_s18 }
  0x1b   : > { %s1243_s19 = scalar_lea.vmem %s1242_s18, 6144  ;;  %p1244_p9 = scmp.lt.s32.totalorder %s1360_s30, %s1242_s18 }
  0x1c   : > { %p1239_p10 = pnand %p1237_p6, %p1223_p11  ;;  %p1245_p0 = scmp.lt.s32.totalorder %s1243_s19, %s1236_s11 }
  0x1e   : > { %p1240_p12 = pneg %p1239_p10  ;;  %p1246_p1 = por %p1245_p0, %p1244_p9 }
  0x20   : > { %p1247_p2 = pnand %p1246_p1, %p1240_p12 }
  0x22   : > { %1250 = shalt.err (!%p1247_p2)
}
  0x23   : > { %s1288_s22 = smov 128   ;;  %s1289_s23 = smov 8  }
  0x24   : > { %1185 = dma.hbm_to_vmem [thread:$0]  (!%p1351_p8), %s1358_s28, 3072, %s1360_s30, %s1363_s4, %s1288_s22, %s1288_s22, %s1289_s23  }
  0x25   : > { %p153_p11 = scmp.lt.s32.totalorder %s1285_s15, 3  ;;  %p1538_p13 = scmp.ge.s32.totalorder %s1285_s15, 1 }
  0x27   : > { %p154_p3 = pnand %p1538_p13, %p153_p11 }
  0x28   : > { %s159_s24 = sand.u32 (!%p154_p3), 1, %s1277_s13  }
  0x29   : > { %157 = sbr.rel (%p154_p3) target bundleno = 549 (0x225), region = 32  ;;  %s160_s27 = scalar_lea.sflag (!%p154_p3), [#allocation3], %s159_s24 }
  0x2a   : > { %s1179_s26 = smul.u32 (!%p154_p3), 192, %s159_s24 }
  0x2c   : > { %s1395_s29 = scalar_lea.vmem (!%p154_p3), [#allocation2], %s1179_s26 }
  0x30   : > { %1268 = dma.done.wait (%p1345_p7), %s160_s27, 3072  }
  0x31   : > { %1270 = vsyncadd (%p1345_p7), %s160_s27, 4294964224  ;;  %v219_v0 = vld [vmem:[%s1533_s1] sm:$0xff]  ;;  %v220_v1 = vld [vmem:[%s1533_s1 + $0x8] sm:$0xff]  ;;  %vm227_vm0 = vcmask 523264   ;;  %s188_s28 = smul.u32 3, %s872_s16  ;;  %vm586_vm1 = vcmask 261120  }
  0x32   : > { %v221_v2 = vld [vmem:[%s1533_s1 + $0x10] sm:$0xff]  ;;  %v1114_v3 = vpack.c.bf16 %v220_v1, %v219_v0  ;;  %v222_v4 = vld [vmem:[%s1533_s1 + $0x18] sm:$0xff]  ;;  %v223_v6 = vld [vmem:[%s1533_s1 + $0x20] sm:$0xff] }
  0x33   : > { %v1118_v5 = vpack.c.bf16 %v222_v4, %v221_v2  ;;  %v224_v7 = vld [vmem:[%s1533_s1 + $0x28] sm:$0xff]  ;;  %v195_v8 = vld [vmem:[%s1395_s29] sm:$0xff]  ;;  %v225_v10 = vld [vmem:[%s1533_s1 + $0x30] sm:$0xff]  ;;  %p189_p7 = scmp.lt.s32.totalorder %s188_s28, 5 }
  0x34   : > { %1115 = vmatprep.subr.bf16.mxu0 %v1114_v3  ;;  %1012 = vmatprep.mubr.msk.f32.mxu0 %vm227_vm0, %v195_v8  ;;  %v1122_v9 = vpack.c.bf16 %v224_v7, %v223_v6  ;;  %v226_v11 = vld [vmem:[%s1533_s1 + $0x38] sm:$0xff]  ;;  %v196_v13 = vld [vmem:[%s1395_s29 + $0x8] sm:$0xff]  ;;  %v197_v14 = vld [vmem:[%s1395_s29 + $0x10] sm:$0xff] }
  0x35   : > { %1117 = vmatpush3.bf16.msra.mxu0 %v1114_v3  ;;  %v1126_v12 = vpack.c.bf16 %v226_v11, %v225_v10  ;;  %v198_v15 = vld [vmem:[%s1395_s29 + $0x18] sm:$0xff]  ;;  %v199_v16 = vld [vmem:[%s1395_s29 + $0x20] sm:$0xff]  ;;  %v200_v17 = vld [vmem:[%s1395_s29 + $0x28] sm:$0xff]  ;;  %s1544_s28 = smov (!%p189_p7, %s188_s28), 5 }
  0x36   : > { %1119 = vmatprep.subr.bf16.mxu0 %v1118_v5  ;;  %v201_v18 = vld [vmem:[%s1395_s29 + $0x30] sm:$0xff]  ;;  %v202_v19 = vld [vmem:[%s1395_s29 + $0x38] sm:$0xff]  ;;  %v203_v20 = vld [vmem:[%s1395_s29 + $0x40] sm:$0xff]  ;;  %s927_s30 = sshll.u32 %s1544_s28, 5 }
  0x37   : > { %v204_v21 = vld [vmem:[%s1395_s29 + $0x48] sm:$0xff]  ;;  %v205_v22 = vld [vmem:[%s1395_s29 + $0x50] sm:$0xff]  ;;  %v206_v23 = vld [vmem:[%s1395_s29 + $0x58] sm:$0xff]  ;;  %s193_s8 = scalar_lea.vmem %s1535_s3, %s927_s30 }
  0x38   : > { %v207_v24 = vld [vmem:[%s1395_s29 + $0x60] sm:$0xff]  ;;  %v208_v25 = vld [vmem:[%s1395_s29 + $0x68] sm:$0xff]  ;;  %v209_v26 = vld [vmem:[%s1395_s29 + $0x70] sm:$0xff] }
  0x39   : > { %1121 = vmatpush3.bf16.msra.mxu0 %v1118_v5  ;;  %v210_v27 = vld [vmem:[%s1395_s29 + $0x78] sm:$0xff]  ;;  %v211_v28 = vld [vmem:[%s1395_s29 + $0x80] sm:$0xff]  ;;  %v212_v29 = vld [vmem:[%s1395_s29 + $0x88] sm:$0xff] }
  0x3a   : > { %1123 = vmatprep.subr.bf16.mxu0 %v1122_v9  ;;  %v213_v30 = vld [vmem:[%s1395_s29 + $0x90] sm:$0xff]  ;;  %v214_v31 = vld [vmem:[%s1395_s29 + $0x98] sm:$0xff]  ;;  %v215_v32 = vld [vmem:[%s1395_s29 + $0xa0] sm:$0xff] }
  0x3b   : > { %v216_v33 = vld [vmem:[%s1395_s29 + $0xa8] sm:$0xff]  ;;  %v217_v34 = vld [vmem:[%s1395_s29 + $0xb0] sm:$0xff]  ;;  %v218_v35 = vld [vmem:[%s1395_s29 + $0xb8] sm:$0xff] }
  0x3c   : > { %v1476_v36 = vld [vmem:[%s1534_s2] sm:$0xff]  ;;  %v486_v51 = vld [vmem:[%s1534_s2 + $0x8] sm:$0xff]  ;;  %v487_v53 = vld [vmem:[%s1534_s2 + $0x10] sm:$0xff] }
  0x3d   : > { %1125 = vmatpush3.bf16.msra.mxu0 %v1122_v9  ;;  %1064 = vmatprep.mubr.msk.f32.mxu1 %vm227_vm0, %v1476_v36  ;;  %v488_v56 = vld [vmem:[%s1534_s2 + $0x18] sm:$0xff] }
  0x3e   : > { %1127 = vmatprep.subr.bf16.mxu0 %v1126_v12 }
  0x41   : > { %1129 = vmatpush3.bf16.msra.mxu0 %v1126_v12 }
  0x44   : > { %1013 = vmatmul.mubr.msk.f32.vlgmr.msra.gmra.mrb[0].mxu0 %vm227_vm0, %v196_v13 }
  0x45   : > { %1015 = vmatprep.mubr.msk.f32.mxu0 %vm227_vm0, %v197_v14 }
  0x48   : > { %1016 = vmatmul.mubr.msk.f32.gmra.mrb[2].mxu0 %vm227_vm0, %v198_v15 }
  0x49   : > { %1018 = vmatprep.mubr.msk.f32.mxu0 %vm227_vm0, %v199_v16 }
  0x4c   : > { %1019 = vmatmul.mubr.msk.f32.gmra.mrb[4].mxu0 %vm227_vm0, %v200_v17 }
  0x4d   : > { %1021 = vmatprep.mubr.msk.f32.mxu0 %vm227_vm0, %v201_v18 }
  0x50   : > { %1022 = vmatmul.mubr.msk.f32.gmra.mrb[6].mxu0 %vm227_vm0, %v202_v19 }
  0x51   : > { %1024 = vmatprep.mubr.msk.f32.mxu0 %vm227_vm0, %v203_v20 }
  0x54   : > { %1025 = vmatmul.mubr.msk.f32.gmra.mrb[8].mxu0 %vm227_vm0, %v204_v21 }
  0x55   : > { %1027 = vmatprep.mubr.msk.f32.mxu0 %vm227_vm0, %v205_v22 }
  0x58   : > { %1028 = vmatmul.mubr.msk.f32.gmra.mrb[10].mxu0 %vm227_vm0, %v206_v23 }
  0x59   : > { %1030 = vmatprep.mubr.msk.f32.mxu0 %vm227_vm0, %v207_v24 }
  0x5c   : > { %1031 = vmatmul.mubr.msk.f32.gmra.mrb[12].mxu0 %vm227_vm0, %v208_v25 }
  0x5d   : > { %1033 = vmatprep.mubr.msk.f32.mxu0 %vm227_vm0, %v209_v26 }
  0x60   : > { %1034 = vmatmul.mubr.msk.f32.gmra.mrb[14].mxu0 %vm227_vm0, %v210_v27 }
  0x61   : > { %1036 = vmatprep.mubr.msk.f32.mxu0 %vm227_vm0, %v211_v28 }
  0x64   : > { %1037 = vmatmul.mubr.msk.f32.gmra.mrb[16].mxu0 %vm227_vm0, %v212_v29 }
  0x65   : > { %1039 = vmatprep.mubr.msk.f32.mxu0 %vm227_vm0, %v213_v30 }
  0x68   : > { %1040 = vmatmul.mubr.msk.f32.gmra.mrb[18].mxu0 %vm227_vm0, %v214_v31 }
  0x69   : > { %1042 = vmatprep.mubr.msk.f32.mxu0 %vm227_vm0, %v215_v32 }
  0x6c   : > { %1043 = vmatmul.mubr.msk.f32.gmra.mrb[20].mxu0 %vm227_vm0, %v216_v33 }
  0x6d   : > { %1045 = vmatprep.mubr.msk.f32.mxu0 %vm227_vm0, %v217_v34 }
  0x70   : > { %1046 = vmatmul.mubr.msk.f32.gmra.mrb[22].mxu0 %vm227_vm0, %v218_v35 }
 0x117   : > { %v1014_v37 = vpop.f32.mrb[0].mxu0 }
 0x118   : > { %v366_v38 = vpop.f32.mrb[1].mxu0 }
 0x119   : > { %v1130_v39 = vpack.c.bf16 %v1014_v37, %v366_v38 }
 0x11b   : > { %v1017_v40 = vpop.f32.mrb[2].mxu0  ;;  %1131 = vmatprep.subr.bf16.mxu1 %v1130_v39 }
 0x11c   : > { %v376_v41 = vpop.f32.mrb[3].mxu0  ;;  %1133 = vmatpush3.bf16.msra.mxu1 %v1130_v39 }
 0x11d   : > { %v1134_v42 = vpack.c.bf16 %v1017_v40, %v376_v41 }
 0x11f   : > { %v1020_v43 = vpop.f32.mrb[4].mxu0  ;;  %1135 = vmatprep.subr.bf16.mxu1 %v1134_v42 }
 0x120   : > { %v386_v44 = vpop.f32.mrb[5].mxu0  ;;  %1137 = vmatpush3.bf16.msra.mxu1 %v1134_v42 }
 0x121   : > { %v1138_v45 = vpack.c.bf16 %v1020_v43, %v386_v44 }
 0x123   : > { %v1023_v46 = vpop.f32.mrb[6].mxu0  ;;  %1139 = vmatprep.subr.bf16.mxu1 %v1138_v45 }
 0x124   : > { %v396_v47 = vpop.f32.mrb[7].mxu0  ;;  %1141 = vmatpush3.bf16.msra.mxu1 %v1138_v45 }
 0x125   : > { %v1142_v48 = vpack.c.bf16 %v1023_v46, %v396_v47 }
 0x127   : > { %v1026_v49 = vpop.f32.mrb[8].mxu0  ;;  %1143 = vmatprep.subr.bf16.mxu1 %v1142_v48 }
 0x128   : > { %v406_v50 = vpop.f32.mrb[9].mxu0  ;;  %1145 = vmatpush3.bf16.msra.mxu1 %v1142_v48 }
 0x129   : > { %v1146_v52 = vpack.c.bf16 %v1026_v49, %v406_v50 }
 0x12b   : > { %v1029_v54 = vpop.f32.mrb[10].mxu0  ;;  %1065 = vmatmul.mubr.msk.f32.vlgmr.msra.gmra.mrb[0].mxu1 %vm227_vm0, %v486_v51  ;;  %1147 = vmatprep.subr.bf16.mxu1 %v1146_v52 }
 0x12c   : > { %v416_v55 = vpop.f32.mrb[11].mxu0  ;;  %1149 = vmatpush3.bf16.msra.mxu1 %v1146_v52  ;;  %1067 = vmatprep.mubr.msk.f32.mxu1 %vm227_vm0, %v487_v53 }
 0x12d   : > { %v1150_v57 = vpack.c.bf16 %v1029_v54, %v416_v55 }
 0x12f   : > { %v1032_v58 = vpop.f32.mrb[12].mxu0  ;;  %1151 = vmatprep.subr.bf16.mxu1 %v1150_v57  ;;  %1068 = vmatmul.mubr.msk.f32.gmra.mrb[2].mxu1 %vm227_vm0, %v488_v56 }
 0x130   : > { %v426_v59 = vpop.f32.mrb[13].mxu0  ;;  %1153 = vmatpush3.bf16.msra.mxu1 %v1150_v57  ;;  %1086 = vmatprep.mubr.msk.f32.mxu1 %vm227_vm0, %v1476_v36 }
 0x131   : > { %v1154_v60 = vpack.c.bf16 %v1032_v58, %v426_v59 }
 0x133   : > { %v1035_v61 = vpop.f32.mrb[14].mxu0  ;;  %1155 = vmatprep.subr.bf16.mxu1 %v1154_v60 }
 0x134   : > { %v436_v62 = vpop.f32.mrb[15].mxu0  ;;  %1157 = vmatpush3.bf16.msra.mxu1 %v1154_v60 }
 0x135   : > { %v1158_v63 = vpack.c.bf16 %v1035_v61, %v436_v62 }
 0x137   : > { %v1038_v0 = vpop.f32.mrb[16].mxu0  ;;  %1159 = vmatprep.subr.bf16.mxu1 %v1158_v63 }
 0x138   : > { %v446_v1 = vpop.f32.mrb[17].mxu0  ;;  %1161 = vmatpush3.bf16.msra.mxu1 %v1158_v63 }
 0x139   : > { %v1162_v2 = vpack.c.bf16 %v1038_v0, %v446_v1 }
 0x13b   : > { %v1041_v3 = vpop.f32.mrb[18].mxu0  ;;  %1087 = vmatmul.mubr.msk.f32.vlgmr.msra.gmra.mrb[4].mxu1 %vm227_vm0, %v486_v51  ;;  %1163 = vmatprep.subr.bf16.mxu1 %v1162_v2 }
 0x13c   : > { %v456_v4 = vpop.f32.mrb[19].mxu0  ;;  %1165 = vmatpush3.bf16.msra.mxu1 %v1162_v2  ;;  %1089 = vmatprep.mubr.msk.f32.mxu1 %vm227_vm0, %v487_v53 }
 0x13d   : > { %v1166_v5 = vpack.c.bf16 %v1041_v3, %v456_v4 }
 0x13f   : > { %v1044_v6 = vpop.f32.mrb[20].mxu0  ;;  %1167 = vmatprep.subr.bf16.mxu1 %v1166_v5  ;;  %1090 = vmatmul.mubr.msk.f32.gmra.mrb[6].mxu1 %vm227_vm0, %v488_v56 }
 0x140   : > { %v466_v7 = vpop.f32.mrb[21].mxu0  ;;  %1169 = vmatpush3.bf16.msra.mxu1 %v1166_v5  ;;  %1108 = vmatprep.mubr.msk.f32.mxu1 %vm227_vm0, %v1476_v36 }
 0x141   : > { %v1170_v8 = vpack.c.bf16 %v1044_v6, %v466_v7 }
 0x143   : > { %v1047_v9 = vpop.f32.mrb[22].mxu0  ;;  %1171 = vmatprep.subr.bf16.mxu1 %v1170_v8 }
 0x144   : > { %v476_v10 = vpop.f32.mrb[23].mxu0  ;;  %1173 = vmatpush3.bf16.msra.mxu1 %v1170_v8 }
 0x145   : > { %v1174_v11 = vpack.c.bf16 %v1047_v9, %v476_v10 }
 0x147   : > { %1175 = vmatprep.subr.bf16.mxu1 %v1174_v11 }
 0x148   : > { %1177 = vmatpush3.bf16.msra.mxu1 %v1174_v11 }
 0x14b   : > { %1109 = vmatmul.mubr.msk.f32.vlgmr.msra.gmra.mrb[8].mxu1 %vm227_vm0, %v486_v51 }
 0x14c   : > { %1111 = vmatprep.mubr.msk.f32.mxu1 %vm227_vm0, %v487_v53 }
 0x14f   : > { %1112 = vmatmul.mubr.msk.f32.gmra.mrb[10].mxu1 %vm227_vm0, %v488_v56 }
 0x1fe   : > { %v1066_v12 = vpop.f32.mrb[0].mxu1 }
 0x1ff   : > { %588 = vst.msk [vmem:[%s193_s8 + $0x8] sm:$0xff] %vm586_vm1, %v1066_v12  ;;  %v567_v13 = vpop.f32.mrb[1].mxu1 }
 0x200   : > { %587 = vst.msk [vmem:[%s193_s8] sm:$0xff] %vm586_vm1, %v567_v13 }
 0x202   : > { %v1069_v14 = vpop.f32.mrb[2].mxu1 }
 0x203   : > { %590 = vst.msk [vmem:[%s193_s8 + $0x18] sm:$0xff] %vm586_vm1, %v1069_v14  ;;  %v577_v15 = vpop.f32.mrb[3].mxu1 }
 0x204   : > { %589 = vst.msk [vmem:[%s193_s8 + $0x10] sm:$0xff] %vm586_vm1, %v577_v15 }
 0x20e   : > { %v1088_v16 = vpop.f32.mrb[4].mxu1 }
 0x20f   : > { %913 = vst.msk [vmem:[%s193_s8 + $0x28] sm:$0xff] %vm586_vm1, %v1088_v16  ;;  %v673_v17 = vpop.f32.mrb[5].mxu1 }
 0x210   : > { %912 = vst.msk [vmem:[%s193_s8 + $0x20] sm:$0xff] %vm586_vm1, %v673_v17 }
 0x212   : > { %v1091_v18 = vpop.f32.mrb[6].mxu1 }
 0x213   : > { %915 = vst.msk [vmem:[%s193_s8 + $0x38] sm:$0xff] %vm586_vm1, %v1091_v18  ;;  %v683_v19 = vpop.f32.mrb[7].mxu1 }
 0x214   : > { %914 = vst.msk [vmem:[%s193_s8 + $0x30] sm:$0xff] %vm586_vm1, %v683_v19 }
 0x21e   : > { %v1110_v20 = vpop.f32.mrb[8].mxu1 }
 0x21f   : > { %921 = vst.msk [vmem:[%s193_s8 + $0x48] sm:$0xff] %vm586_vm1, %v1110_v20  ;;  %v779_v21 = vpop.f32.mrb[9].mxu1 }
 0x220   : > { %920 = vst.msk [vmem:[%s193_s8 + $0x40] sm:$0xff] %vm586_vm1, %v779_v21 }
 0x222   : > { %v1113_v22 = vpop.f32.mrb[10].mxu1 }
 0x223   : > { %923 = vst.msk [vmem:[%s193_s8 + $0x58] sm:$0xff] %vm586_vm1, %v1113_v22  ;;  %v789_v23 = vpop.f32.mrb[11].mxu1 }
 0x224   : > { %922 = vst.msk [vmem:[%s193_s8 + $0x50] sm:$0xff] %vm586_vm1, %v789_v23 }
 0x225 PF: > { %p13_p8 = scmp.ge.s32.totalorder %s1330_s17, 4   ;;  %s1539_s12 = smov %s1277_s13 }
 0x226   : > { %s1540_s13 = smov %s1281_s14  ;;  %s1541_s14 = smov %s1340_s20 }
 0x227   : > { %s1542_s15 = smov %s1330_s17  ;;  %15 = sbr.rel (!%p13_p8) target bundleno = 3 (0x3), region = 74 }
 0x22e   :  { %827 = vsyncpa [#allocation3], 1 }
 0x22f   :  { %829 = vsyncpa [#allocation3 + $0x1], 1 }

// kernel: maniqa_forward.8
= control target key start
LH: loop header
LB: loop body
LE: loop exit
PB: predicated region body
PF: predicated region fallthrough
CT: control target
= control target key end

     0   :  { %s3757_s21 = smov 0   ;;  %s3759_s22 = smov 0   ;;  %s4351_s0 = inlined_call_operand.vmem [shape: f32[32,192], index: 0, kind: input, shape index: {}]   ;;  %s4352_s1 = inlined_call_operand.vmem [shape: f32[192,32], index: 1, kind: input, shape index: {}]   ;;  %s4353_s2 = inlined_call_operand.vmem [shape: f32[16,32], index: 2, kind: input, shape index: {}]   ;;  %s4354_s3 = inlined_call_operand.vmem [shape: f32[1,32], index: 3, kind: input, shape index: {}]   ;;  %s4355_s4 = inlined_call_operand.vmem [shape: f32[10,1,32], index: 4, kind: input, shape index: {}]   ;;  %s4356_s5 = inlined_call_operand.vmem [shape: f32[10,1,32], index: 5, kind: input, shape index: {}]   ;;  %s4357_s6 = inlined_call_operand.vmem [shape: f32[10,32,96], index: 6, kind: input, shape index: {}]   ;;  %s4358_s7 = inlined_call_operand.vmem [shape: f32[10,1,96], index: 7, kind: input, shape index: {}]   ;;  %s4359_s8 = inlined_call_operand.vmem [shape: f32[10,32,32], index: 8, kind: input, shape index: {}]   ;;  %s4360_s9 = inlined_call_operand.vmem [shape: f32[10,1,32], index: 9, kind: input, shape index: {}]   ;;  %s4361_s10 = inlined_call_operand.vmem [shape: f32[10,1,32], index: 10, kind: input, shape index: {}]   ;;  %s4362_s11 = inlined_call_operand.vmem [shape: f32[10,1,32], index: 11, kind: input, shape index: {}]   ;;  %s4363_s12 = inlined_call_operand.vmem [shape: f32[10,32,128], index: 12, kind: input, shape index: {}]   ;;  %s4364_s13 = inlined_call_operand.vmem [shape: f32[10,1,128], index: 13, kind: input, shape index: {}]   ;;  %s4365_s14 = inlined_call_operand.vmem [shape: f32[10,128,32], index: 14, kind: input, shape index: {}]   ;;  %s4366_s15 = inlined_call_operand.vmem [shape: f32[10,1,32], index: 15, kind: input, shape index: {}]   ;;  %s4367_s16 = inlined_call_operand.vmem [shape: f32[32,128], index: 16, kind: output, shape index: {}]  }
   0x1   :  { %4374 = sst [smem:[#allocation9_spill]] %s4351_s0  ;;  %s3761_s23 = smov 0  }
   0x2   :  { %4375 = sst [smem:[#allocation10_spill]] %s4352_s1  ;;  %s3763_s24 = smov 0  }
   0x3   :  { %4376 = sst [smem:[#allocation11_spill]] %s4353_s2  ;;  %s3765_s25 = smov 0  }
   0x4   :  { %4377 = sst [smem:[#allocation12_spill]] %s4354_s3 }
   0x5   :  { %4378 = sst [smem:[#allocation13_spill]] %s4355_s4 }
   0x6   :  { %4379 = sst [smem:[#allocation14_spill]] %s4356_s5 }
   0x7   :  { %4380 = sst [smem:[#allocation15_spill]] %s4357_s6 }
   0x8   :  { %4381 = sst [smem:[#allocation16_spill]] %s4359_s8 }
   0x9 LB: > { %4382 = sst [smem:[#allocation3_spill]] %s3636_s21  ;;  %s35_s26 = sadd.s32 1, %s3644_s23  ;;  %s3652_s25 = sphi %s3765_s25, %s26_s25   ;;  %s3648_s24 = sphi %s3763_s24, %s4416_s24   ;;  %s3644_s23 = sphi %s3761_s23, %s4415_s23   ;;  %s3640_s22 = sphi %s3759_s22, %s4414_s22   ;;  %s3636_s21 = sphi %s3757_s21, %s4413_s21  }
   0xa   : > { %4383 = sst [smem:[#allocation4_spill]] %s3644_s23  ;;  %s38_s27 = sadd.s32 1, %s3648_s24 }
   0xb   : > { %4384 = sst [smem:[#allocation5_spill]] %s3648_s24  ;;  %p36_p0 = scmp.ge.s32.totalorder %s35_s26, 10 }
   0xc   : > { %4385 = sst [smem:[#allocation6_spill]] %s3652_s25  ;;  %p2893_p1 = scmp.ge.s32.totalorder %s3652_s25, 1 }
   0xd   : > { %p580_p2 = scmp.lt.s32.totalorder %s3652_s25, 21  ;;  %s4418_s26 = smov (%p36_p0, %s35_s26), 0 }
   0xe   : > { %4386 = sst [smem:[#allocation7_spill]] %s4418_s26  ;;  %s4420_s27 = smov (!%p36_p0, %s38_s27), %s3648_s24 }
   0xf   : > { %p581_p3 = pnand %p2893_p1, %p580_p2  ;;  %p40_p4 = scmp.ge.s32.totalorder %s4420_s27, 2 }
  0x10   : > { %s2894_s28 = sshll.u32 (!%p581_p3), %s3640_s22, 1  ;;  %p682_p5 = scmp.lt.s32.totalorder (!%p581_p3), %s3636_s21, 9 }
  0x11   : > { %s4422_s27 = smov (%p40_p4, %s4420_s27), 0  ;;  %584 = sbr.rel (%p581_p3) target bundleno = 4426 (0x114a), region = 84 }
  0x12   : > { %4387 = sst [smem:[#allocation8_spill]] %s4422_s27  ;;  %p676_p6 = scmp.lt.s32.totalorder (!%p581_p3), %s2894_s28, 3 }
  0x13   : > { %s4390_s23 = sld [smem:[#allocation9_spill]] (!%p581_p3)  ;;  %s4391_s6 = sld [smem:[#allocation15_spill]] (!%p581_p3) }
  0x14   : > { %s4392_s8 = sld [smem:[#allocation16_spill]] (!%p581_p3) }
  0x18   : > { %s3791_s29 = scalar_select %p682_p5, %s3636_s21, 9 }
  0x19   : > { %s4424_s28 = smov (!%p676_p6, %s2894_s28), 3 }
  0x1a   : > { %s2982_s22 = sshll.u32 %s4424_s28, 4  ;;  %s2983_s27 = sshll.u32 %s3791_s29, 5 }
  0x1b   : > { %s3805_s25 = scalar_lea.vmem %s4390_s23, %s2982_s22  ;;  %s3810_s1 = scalar_lea.vmem %s4391_s6, %s2983_s27 }
  0x1c   : > { %s3819_s18 = scalar_lea.vmem %s4392_s8, %s2983_s27  ;;  %s3836_s30 = scalar_lea.vmem %s4363_s12, %s2983_s27 }
  0x1d   : > { %s717_s0 = scalar_lea.vmem %s4364_s13, %s3791_s29  ;;  %s2986_s8 = sshll.u32 %s3791_s29, 7 }
  0x1e   : > { %s3846_s24 = scalar_lea.vmem %s4365_s14, %s2986_s8  ;;  %s725_s2 = scalar_lea.vmem %s4366_s15, %s3791_s29 }
  0x1f   : > { %s2906_s3 = sshll.u32 %s4424_s28, 3  ;;  %s4393_s27 = sld [smem:[#allocation3_spill]] }
  0x20   : > { %s3855_s5 = scalar_lea.vmem %s4367_s16, %s2906_s3 }
  0x25   : > { %p2907_p7 = scmp.ne.s32.totalorder %s4393_s27, 0 }
  0x26   : > { %s4394_s17 = sld [smem:[#allocation10_spill]] (!%p2907_p7)  ;;  %v3654_v3 = vmov (!%p2907_p7), 0.0|0.0   ;;  %vm766_vm0 = vcmask (!%p2907_p7), 523264   ;;  %v737_v12 = vld [vmem:[%s3805_s25 + $0x8] sm:$0xff] (!%p2907_p7)  ;;  %v739_v13 = vld [vmem:[%s3805_s25 + $0x18] sm:$0xff] (!%p2907_p7)  ;;  %v736_v39 = vld [vmem:[%s3805_s25] sm:$0xff] (!%p2907_p7) }
  0x27   : > { %735 = sbr.rel (%p2907_p7) target bundleno = 309 (0x135), region = 88  ;;  %3323 = vmatprep.subr.bf16.mxu0 (!%p2907_p7), %v3654_v3  ;;  %3423 = vmatprep.subr.bf16.mxu1 (!%p2907_p7), %v3654_v3  ;;  %v738_v40 = vld [vmem:[%s3805_s25 + $0x10] sm:$0xff] (!%p2907_p7)  ;;  %s4395_s20 = sld [smem:[#allocation12_spill]] (!%p2907_p7)  ;;  %vm852_vm1 = vcmask (!%p2907_p7), 253952   ;;  %vm848_vm2 = vcmask (!%p2907_p7), 261120  }
  0x28   : > { %2908 = vmatprep.mubr.msk.f32.mxu0 (!%p2907_p7), %vm766_vm0, %v737_v12  ;;  %2909 = vmatprep.mubr.msk.f32.mxu1 (!%p2907_p7), %vm766_vm0, %v739_v13  ;;  %s4396_s23 = sld [smem:[#allocation11_spill]] (!%p2907_p7) }
  0x2c   : > { %v740_v0 = vld [vmem:[%s4394_s17] sm:$0xff] (!%p2907_p7)  ;;  %v741_v1 = vld [vmem:[%s4394_s17 + $0x8] sm:$0xff] (!%p2907_p7)  ;;  %v742_v2 = vld [vmem:[%s4394_s17 + $0x10] sm:$0xff] (!%p2907_p7) }
  0x2d   : > { %v3324_v4 = vpack.c.bf16 (!%p2907_p7), %v741_v1, %v740_v0  ;;  %v743_v5 = vld [vmem:[%s4394_s17 + $0x18] sm:$0xff] (!%p2907_p7)  ;;  %v744_v7 = vld [vmem:[%s4394_s17 + $0x20] sm:$0xff] (!%p2907_p7)  ;;  %v745_v8 = vld [vmem:[%s4394_s17 + $0x28] sm:$0xff] (!%p2907_p7) }
  0x2e   : > { %v3327_v6 = vpack.c.bf16 %v743_v5, %v742_v2  ;;  %v3330_v9 = vpack.c.bf16 %v745_v8, %v744_v7  ;;  %v746_v10 = vld [vmem:[%s4394_s17 + $0x30] sm:$0xff]  ;;  %v747_v11 = vld [vmem:[%s4394_s17 + $0x38] sm:$0xff]  ;;  %v748_v15 = vld [vmem:[%s4394_s17 + $0x40] sm:$0xff]  ;;  %s4397_s6 = smov %s4396_s23 }
  0x2f   : > { %3325 = vmatpush1.bf16.msra.mxu0 %v3324_v4  ;;  %3435 = vmatpush1.bf16.msra.mxu1 %v3324_v4  ;;  %v3333_v14 = vpack.c.bf16 %v747_v11, %v746_v10  ;;  %v749_v16 = vld [vmem:[%s4394_s17 + $0x48] sm:$0xff]  ;;  %v750_v18 = vld [vmem:[%s4394_s17 + $0x50] sm:$0xff]  ;;  %v751_v19 = vld [vmem:[%s4394_s17 + $0x58] sm:$0xff] }
  0x30   : > { %3326 = vmatprep.subr.bf16.mxu0 %v3654_v3  ;;  %3424 = vmatprep.subr.bf16.mxu1 %v3654_v3  ;;  %v3336_v17 = vpack.c.bf16 %v749_v16, %v748_v15  ;;  %v3339_v20 = vpack.c.bf16 %v751_v19, %v750_v18  ;;  %v752_v21 = vld [vmem:[%s4394_s17 + $0x60] sm:$0xff]  ;;  %v753_v22 = vld [vmem:[%s4394_s17 + $0x68] sm:$0xff]  ;;  %v754_v24 = vld [vmem:[%s4394_s17 + $0x70] sm:$0xff] }
  0x31   : > { %v3342_v23 = vpack.c.bf16 %v753_v22, %v752_v21  ;;  %v755_v25 = vld [vmem:[%s4394_s17 + $0x78] sm:$0xff]  ;;  %v756_v27 = vld [vmem:[%s4394_s17 + $0x80] sm:$0xff]  ;;  %v757_v28 = vld [vmem:[%s4394_s17 + $0x88] sm:$0xff] }
  0x32   : > { %v3345_v26 = vpack.c.bf16 %v755_v25, %v754_v24  ;;  %v3348_v29 = vpack.c.bf16 %v757_v28, %v756_v27  ;;  %v758_v30 = vld [vmem:[%s4394_s17 + $0x90] sm:$0xff]  ;;  %v759_v31 = vld [vmem:[%s4394_s17 + $0x98] sm:$0xff]  ;;  %v760_v33 = vld [vmem:[%s4394_s17 + $0xa0] sm:$0xff] }
  0x33   : > { %3328 = vmatpush1.bf16.msra.mxu0 %v3327_v6  ;;  %3436 = vmatpush1.bf16.msra.mxu1 %v3327_v6  ;;  %v3351_v32 = vpack.c.bf16 %v759_v31, %v758_v30  ;;  %v761_v34 = vld [vmem:[%s4394_s17 + $0xa8] sm:$0xff]  ;;  %v762_v36 = vld [vmem:[%s4394_s17 + $0xb0] sm:$0xff]  ;;  %v763_v37 = vld [vmem:[%s4394_s17 + $0xb8] sm:$0xff] }
  0x34   : > { %3329 = vmatprep.subr.bf16.mxu0 %v3654_v3  ;;  %3425 = vmatprep.subr.bf16.mxu1 %v3654_v3  ;;  %v3354_v35 = vpack.c.bf16 %v761_v34, %v760_v33  ;;  %v3357_v38 = vpack.c.bf16 %v763_v37, %v762_v36  ;;  %v851_v41 = vld [vmem:[%s4395_s20] sm:$0x1]  ;;  %v765_v43 = vld [vmem:[%s4397_s6 + $0x8] sm:$0xff] }
  0x35   : > { %853 = vst.msk [vmem:[#allocation2 + $0x10] sm:$0x1] %vm852_vm1, %v851_v41  ;;  %v764_v42 = vld [vmem:[%s4396_s23] sm:$0xff] }
  0x37   : > { %3331 = vmatpush1.bf16.msra.mxu0 %v3330_v9  ;;  %3437 = vmatpush1.bf16.msra.mxu1 %v3330_v9 }
  0x38   : > { %3332 = vmatprep.subr.bf16.mxu0 %v3654_v3  ;;  %3426 = vmatprep.subr.bf16.mxu1 %v3654_v3 }
  0x3b   : > { %3334 = vmatpush1.bf16.msra.mxu0 %v3333_v14  ;;  %3438 = vmatpush1.bf16.msra.mxu1 %v3333_v14 }
  0x3c   : > { %3335 = vmatprep.subr.bf16.mxu0 %v3654_v3  ;;  %3427 = vmatprep.subr.bf16.mxu1 %v3654_v3 }
  0x3f   : > { %3337 = vmatpush1.bf16.msra.mxu0 %v3336_v17  ;;  %3439 = vmatpush1.bf16.msra.mxu1 %v3336_v17 }
  0x40   : > { %3338 = vmatprep.subr.bf16.mxu0 %v3654_v3  ;;  %3428 = vmatprep.subr.bf16.mxu1 %v3654_v3 }
  0x43   : > { %3340 = vmatpush1.bf16.msra.mxu0 %v3339_v20  ;;  %3440 = vmatpush1.bf16.msra.mxu1 %v3339_v20 }
  0x44   : > { %3341 = vmatprep.subr.bf16.mxu0 %v3654_v3  ;;  %3429 = vmatprep.subr.bf16.mxu1 %v3654_v3 }
  0x47   : > { %3343 = vmatpush1.bf16.msra.mxu0 %v3342_v23  ;;  %3441 = vmatpush1.bf16.msra.mxu1 %v3342_v23 }
  0x48   : > { %3344 = vmatprep.subr.bf16.mxu0 %v3654_v3  ;;  %3430 = vmatprep.subr.bf16.mxu1 %v3654_v3 }
  0x4b   : > { %3346 = vmatpush1.bf16.msra.mxu0 %v3345_v26  ;;  %3442 = vmatpush1.bf16.msra.mxu1 %v3345_v26 }
  0x4c   : > { %3347 = vmatprep.subr.bf16.mxu0 %v3654_v3  ;;  %3431 = vmatprep.subr.bf16.mxu1 %v3654_v3 }
  0x4f   : > { %3349 = vmatpush1.bf16.msra.mxu0 %v3348_v29  ;;  %3443 = vmatpush1.bf16.msra.mxu1 %v3348_v29 }
  0x50   : > { %3350 = vmatprep.subr.bf16.mxu0 %v3654_v3  ;;  %3432 = vmatprep.subr.bf16.mxu1 %v3654_v3 }
  0x53   : > { %3352 = vmatpush1.bf16.msra.mxu0 %v3351_v32  ;;  %3444 = vmatpush1.bf16.msra.mxu1 %v3351_v32 }
  0x54   : > { %3353 = vmatprep.subr.bf16.mxu0 %v3654_v3  ;;  %3433 = vmatprep.subr.bf16.mxu1 %v3654_v3 }
  0x57   : > { %3355 = vmatpush1.bf16.msra.mxu0 %v3354_v35  ;;  %3445 = vmatpush1.bf16.msra.mxu1 %v3354_v35 }
  0x58   : > { %3356 = vmatprep.subr.bf16.mxu0 %v3654_v3  ;;  %3434 = vmatprep.subr.bf16.mxu1 %v3654_v3 }
  0x5b   : > { %3358 = vmatpush1.bf16.msra.mxu0 %v3357_v38  ;;  %3446 = vmatpush1.bf16.msra.mxu1 %v3357_v38 }
  0x5e   : > { %838 = vmatmul.mubr.f32.vlgmr.msra.gmra.mrb[0].mxu0 %v736_v39  ;;  %843 = vmatmul.mubr.f32.vlgmr.msra.gmra.mrb[0].mxu1 %v738_v40 }
 0x131   : > { %v839_v44 = vpop.f32.mrb[0].mxu0  ;;  %v844_v45 = vpop.f32.mrb[0].mxu1 }
 0x132   : > { %v840_v46 = vadd.f32 %v839_v44, %v764_v42  ;;  %v845_v47 = vadd.f32 %v844_v45, %v765_v43  ;;  %v841_v48 = vpop.f32.mrb[1].mxu0  ;;  %v846_v49 = vpop.f32.mrb[1].mxu1 }
 0x134   : > { %849 = vst.msk [vmem:[#allocation2] sm:$0xff] %vm848_vm2, %v840_v46  ;;  %850 = vst.msk [vmem:[#allocation2 + $0x8] sm:$0xff] %vm848_vm2, %v845_v47 }
 0x135 PF: > { %vm859_vm3 = vcmask 261120   ;;  %v856_v51 = vld [vmem:[#allocation2 + $0x10] sm:$0x1]  ;;  %vm866_vm4 = vcmask 253952   ;;  %v919_v7 = vld [vmem:[%s3810_s1] sm:$0xff]  ;;  %v920_v8 = vld [vmem:[%s3810_s1 + $0x8] sm:$0xff]  ;;  %s4402_s23 = scalar_lea.vmem %s4358_s7, %s3791_s29 }
 0x136   : > { %v867_v54 = vsel %vm866_vm4, %v856_v51, 0.0  ;;  %v921_v9 = vld [vmem:[%s3810_s1 + $0x10] sm:$0xff]  ;;  %v3655_v10 = vmov 0.0|0.0   ;;  %v3360_v11 = vpack.c.bf16 %v920_v8, %v919_v7  ;;  %v922_v12 = vld [vmem:[%s3810_s1 + $0x18] sm:$0xff]  ;;  %vm3656_vm5 = vmmov 0   ;;  %s4398_s26 = sld [smem:[#allocation13_spill]] }
 0x137   : > { %868 = vadd.xlane.f32.xlu1 %v867_v54  ;;  %3359 = vmatprep.subr.bf16.mxu1 %v3655_v10  ;;  %v3657_v13 = vmov 0.0   ;;  %v3363_v14 = vpack.c.bf16 %v922_v12, %v921_v9  ;;  %s4400_s4 = sld [smem:[#allocation14_spill]]  ;;  %v2912_v40 = vld [vmem:[%s4402_s23] ss:$0 sm:$0xff]  ;;  %s3658_s28 = smov 96   ;;  %vm1032_vm6 = vcmask 64512  }
 0x138   : > { %3092 = vmatprep.mubr.msk.f32.mxu1 %vm3656_vm5, %v3657_v13  ;;  %3369 = vmatprep.subr.bf16.mxu0 %v3655_v10  ;;  %s3659_s22 = smov 120   ;;  %s3660_s1 = smov 88   ;;  %vm4028_vm7 = vmpackc.low %vm1032_vm6, %vm1032_vm6  ;;  %vm1128_vm8 = vcmask 138240   ;;  %vm1135_vm9 = vcmask 131072   ;;  %vm1180_vm10 = vcmask 1040384  }
 0x139   : > { %3122 = vmatprep.mubr.msk.f32.mxu0 %vm3656_vm5, %v3657_v13  ;;  %3361 = vmatpush3.bf16.msra.mxu1 %v3360_v11  ;;  %s3661_s25 = smov 64   ;;  %s3664_s27 = smov 112  }
 0x13a   : > { %3362 = vmatprep.subr.bf16.mxu1 %v3655_v10  ;;  %s3665_s21 = smov 48   ;;  %s3668_s8 = smov 40  }
 0x13b   : > { %v854_v50 = vld [vmem:[#allocation2] sm:$0xff]  ;;  %v855_v52 = vld [vmem:[#allocation2 + $0x8] sm:$0xff]  ;;  %s4405_s23 = scalar_lea.vmem %s4360_s9, %s3791_s29 }
 0x13c   : > { %v860_v53 = vsel %vm859_vm3, %v854_v50, 0.0  ;;  %v863_v55 = vsel %vm859_vm3, %v855_v52, 0.0  ;;  %s4399_s3 = scalar_lea.vmem %s4398_s26, %s3791_s29  ;;  %s3662_s26 = smov 56  }
 0x13d   : > { %861 = vadd.xlane.f32.xlu0 %v860_v53  ;;  %3364 = vmatpush3.bf16.msra.mxu1 %v3363_v14  ;;  %v2910_v25 = vld [vmem:[%s4399_s3] ss:$0 sm:$0xff]  ;;  %s4401_s20 = scalar_lea.vmem %s4400_s4, %s3791_s29  ;;  %s3663_s3 = smov 80  }
 0x13e   : > { %3365 = vmatprep.subr.bf16.mxu1 %v3655_v10  ;;  %v2911_v27 = vld [vmem:[%s4401_s20] ss:$0 sm:$0xff]  ;;  %s3666_s4 = smov 72   ;;  %s3667_s20 = smov 104  }
 0x141   : > { %864 = vadd.xlane.f32.xlu0 %v863_v55 }
 0x1c4   : > { %v869_v57 = vpop.xlane.xlu1 %868 }
 0x1c5   : > { %v873_v59 = vmul.f32 0.03125, %v869_v57 }
 0x1c7   : > { %v876_v61 = vsub.f32 %v856_v51, %v873_v59 }
 0x1c9   : > { %v879_v1 = vmul.f32 %v876_v61, %v876_v61 }
 0x1ca   : > { %v862_v56 = vpop.xlane.xlu0 %861 }
 0x1cb   : > { %v871_v58 = vmul.f32 0.03125, %v862_v56  ;;  %v886_v4 = vsel %vm866_vm4, %v879_v1, 0.0 }
 0x1cd   : > { %v874_v60 = vsub.f32 %v854_v50, %v871_v58 }
 0x1ce   : > { %v865_v62 = vpop.xlane.xlu0 %864 }
 0x1cf   : > { %v872_v63 = vmul.f32 0.03125, %v865_v62  ;;  %v877_v0 = vmul.f32 %v874_v60, %v874_v60 }
 0x1d1   : > { %v875_v2 = vsub.f32 %v855_v52, %v872_v63  ;;  %v880_v3 = vsel %vm859_vm3, %v877_v0, 0.0 }
 0x1d2   : > { %881 = vadd.xlane.f32.xlu1 %v880_v3 }
 0x1d3   : > { %v878_v5 = vmul.f32 %v875_v2, %v875_v2 }
 0x1d5   : > { %v883_v6 = vsel %vm859_vm3, %v878_v5, 0.0 }
 0x1d6   : > { %887 = vadd.xlane.f32.xlu1 %v886_v4  ;;  %884 = vadd.xlane.f32.xlu0 %v883_v6 }
 0x25f   : > { %v882_v15 = vpop.xlane.xlu1 %881 }
 0x260   : > { %v889_v16 = vmul.f32 0.03125, %v882_v15 }
 0x262   : > { %v892_v17 = vadd.f32 1e-06, %v889_v16 }
 0x263   : > { %v888_v18 = vpop.xlane.xlu1 %887  ;;  %v885_v19 = vpop.xlane.xlu0 %884 }
 0x264   : > { %3545 = vrsqrt.f32 %v892_v17  ;;  %v891_v20 = vmul.f32 0.03125, %v888_v18  ;;  %v890_v21 = vmul.f32 0.03125, %v885_v19 }
 0x266   : > { %v894_v22 = vadd.f32 1e-06, %v891_v20  ;;  %v893_v23 = vadd.f32 1e-06, %v890_v21 }
 0x268   : > { %3547 = vrsqrt.f32 %v894_v22 }
 0x269   : > { %3549 = vrsqrt.f32 %v893_v23 }
 0x26e   : > { %v3546_v24 = vpop.eup %3545 }
 0x26f   : > { %v898_v26 = vmul.f32 %v3546_v24, %v874_v60 }
 0x271   : > { %v907_v28 = vmul.f32 %v2910_v25, %v898_v26 }
 0x272   : > { %v3548_v29 = vpop.eup %3547 }
 0x273   : > { %v3550_v30 = vpop.eup %3549  ;;  %v916_v31 = vadd.f32 %v2911_v27, %v907_v28  ;;  %v900_v33 = vmul.f32 %v3548_v29, %v876_v61 }
 0x274   : > { %v899_v32 = vmul.f32 %v3550_v30, %v875_v2 }
 0x275   : > { %3093 = vmatmul.mubr.msk.f32.vlgmr.msra.gmra.mrb[0].mxu1 %vm859_vm3, %v916_v31  ;;  %v909_v36 = vmul.f32 %v2910_v25, %v900_v33 }
 0x276   : > { %3095 = vmatprep.mubr.msk.f32.mxu1 %vm3656_vm5, %v3657_v13  ;;  %v908_v34 = vmul.f32 %v2910_v25, %v899_v32 }
 0x277   : > { %v918_v37 = vadd.f32 %v2911_v27, %v909_v36 }
 0x278   : > { %v917_v35 = vadd.f32 %v2911_v27, %v908_v34 }
 0x27a   : > { %3096 = vmatmul.mubr.msk.f32.gmra.mrb[2].mxu1 %vm859_vm3, %v917_v35 }
 0x27b   : > { %3098 = vmatprep.mubr.msk.f32.mxu1 %vm3656_vm5, %v3657_v13 }
 0x27e   : > { %3099 = vmatmul.mubr.msk.f32.gmra.mrb[4].mxu1 %vm859_vm3, %v918_v37 }
 0x27f   : > { %3107 = vmatprep.mubr.msk.f32.mxu1 %vm3656_vm5, %v3657_v13 }
 0x348   : > { %v1005_v38 = vpop.f32.mrb[0].mxu1 }
 0x349   : > { %v3094_v39 = vpop.f32.mrb[1].mxu1  ;;  %v4009_v42 = vadd.f32 %v2912_v40, %v1005_v38 }
 0x34d   : > { %v1010_v41 = vpop.f32.mrb[2].mxu1 }
 0x34e   : > { %v4011_v43 = vadd.f32 %v2912_v40, %v1010_v41  ;;  %v3097_v44 = vpop.f32.mrb[3].mxu1 }
 0x350   : > { %v4015_v45 = vpack.i.bf16 %v4011_v43, %v4009_v42 }
 0x351   : > { %v1015_v46 = vpop.f32.mrb[4].mxu1 }
 0x352   : > { %v4017_v47 = vadd.f32 %v2912_v40, %v1015_v46  ;;  %3506 = vrot.lane.b32.xlu0 %v4015_v45, %s3658_s28  ;;  %v3100_v48 = vpop.f32.mrb[5].mxu1 }
 0x354   : > { %1030 = vrot.lane.b32.xlu1 %v4017_v47, %s3658_s28 }
 0x356   : > { %1263 = vrot.lane.b32.xlu0 %v4009_v42, %s3659_s22 }
 0x358   : > { %3511 = vrot.lane.b32.xlu1 %v4015_v45, %s3660_s1 }
 0x35a   : > { %1267 = vrot.lane.b32.xlu0 %v4017_v47, %s3659_s22 }
 0x35c   : > { %1273 = vrot.lane.b32.xlu1 %v4017_v47, %s3660_s1 }
 0x360   : > { %1265 = vrot.lane.b32.xlu1 %v4011_v43, %s3659_s22  ;;  %s4406_s22 = scalar_lea.vmem %s4361_s10, %s3791_s29 }
 0x3c4   : > { %v3507_v49 = vpop.permute.xlu0 %3506 }
 0x3c5   : > { %v3509_v50 = vunpack.i.h.bf16 %v3507_v49  ;;  %v3508_v51 = vunpack.i.l.bf16 %v3507_v49 }
 0x3c6   : > { %v1031_v52 = vpop.permute.xlu1 %1030 }
 0x3c7   : > { %v3366_v54 = vpack.c.bf16 %v3509_v50, %v3508_v51 }
 0x3c8   : > { %v1264_v60 = vpop.permute.xlu0 %1263 }
 0x3c9   : > { %3368 = vmatpush3.bf16.xpose.msk.msra.mxu1 %vm4028_vm7, %v3366_v54 }
 0x3ca   : > { %3105 = vmatprep.subr.mxu1 %v3657_v13  ;;  %v3512_v55 = vpop.permute.xlu1 %3511 }
 0x3cb   : > { %v3514_v56 = vunpack.i.h.bf16 %v3512_v55  ;;  %v3513_v57 = vunpack.i.l.bf16 %v3512_v55 }
 0x3cc   : > { %v1268_v62 = vpop.permute.xlu0 %1267 }
 0x3cd   : > { %v3373_v58 = vpack.c.bf16 %v3514_v56, %v3513_v57 }
 0x3ce   : > { %v1274_v59 = vpop.permute.xlu1 %1273 }
 0x3d1   : > { %3106 = vmatpush3.xpose.msk.msra.mxu1 %vm1032_vm6, %v1031_v52 }
 0x3d2   : > { %3372 = vmatprep.subr.bf16.mxu1 %v3655_v10  ;;  %v1266_v61 = vpop.permute.xlu1 %1265 }
 0x3d4   : > { %3108 = vmatmul.mubr.msk.f32.vlgmr.msra.gmra.mrb[6].mxu1 %vm1032_vm6, %v4009_v42 }
 0x3d5   : > { %3375 = vmatpush3.bf16.xpose.msk.msra.mxu1 %vm4028_vm7, %v3373_v58  ;;  %3110 = vmatprep.mubr.msk.f32.mxu1 %vm3656_vm5, %v3657_v13 }
 0x3d6   : > { %3135 = vmatprep.subr.mxu1 %v3657_v13 }
 0x3d8   : > { %3111 = vmatmul.mubr.msk.f32.gmra.mrb[8].mxu1 %vm1032_vm6, %v4011_v43 }
 0x3d9   : > { %3113 = vmatprep.mubr.msk.f32.mxu1 %vm3656_vm5, %v3657_v13 }
 0x3dc   : > { %3114 = vmatmul.mubr.msk.f32.gmra.mrb[10].mxu1 %vm1032_vm6, %v4017_v47 }
 0x3dd   : > { %3136 = vmatpush3.xpose.msk.msra.mxu1 %vm1032_vm6, %v1274_v59  ;;  %3137 = vmatprep.mubr.msk.f32.mxu1 %vm3656_vm5, %v3657_v13 }
 0x3de   : > { %3161 = vmatprep.subr.mxu1 %v3657_v13 }
 0x3e0   : > { %3138 = vmatmul.mubr.msk.f32.vlgmr.msra.gmra.mrb[12].mxu1 %vm1032_vm6, %v1264_v60 }
 0x3e1   : > { %3140 = vmatprep.mubr.msk.f32.mxu1 %vm3656_vm5, %v3657_v13 }
 0x3e4   : > { %3141 = vmatmul.mubr.msk.f32.gmra.mrb[14].mxu1 %vm1032_vm6, %v1266_v61 }
 0x3e5   : > { %3143 = vmatprep.mubr.msk.f32.mxu1 %vm3656_vm5, %v3657_v13 }
 0x3e8   : > { %3144 = vmatmul.mubr.msk.f32.gmra.mrb[16].mxu1 %vm1032_vm6, %v1268_v62 }
 0x3e9   : > { %3163 = vmatprep.mubr.msk.f32.mxu1 %vm3656_vm5, %v3657_v13 }
 0x4a7   : > { %v1111_v63 = vpop.f32.mrb[6].mxu1 }
 0x4a8   : > { %v1125_v0 = vmul.f32 0.35355338, %v1111_v63  ;;  %v3109_v1 = vpop.f32.mrb[7].mxu1 }
 0x4aa   : > { %v1129_v2 = vsel %vm1128_vm8, %v1125_v0, -inf }
 0x4ab   : > { %1130 = vmax.xlane.f32.xlu1 %v1129_v2  ;;  %v1116_v3 = vpop.f32.mrb[8].mxu1 }
 0x4ac   : > { %v1126_v4 = vmul.f32 0.35355338, %v1116_v3  ;;  %v3112_v5 = vpop.f32.mrb[9].mxu1 }
 0x4ae   : > { %v1132_v6 = vsel %vm1128_vm8, %v1126_v4, -inf }
 0x4af   : > { %1133 = vmax.xlane.f32.xlu0 %v1132_v6  ;;  %v1121_v7 = vpop.f32.mrb[10].mxu1 }
 0x4b0   : > { %v1127_v8 = vmul.f32 0.35355338, %v1121_v7  ;;  %v3115_v9 = vpop.f32.mrb[11].mxu1 }
 0x4b2   : > { %v1136_v11 = vsel %vm1135_vm9, %v1127_v8, -inf }
 0x4b3   : > { %1137 = vmax.xlane.f32.xlu0 %v1136_v11  ;;  %v1353_v12 = vpop.f32.mrb[12].mxu1 }
 0x4b4   : > { %v1367_v14 = vmul.f32 0.35355338, %v1353_v12  ;;  %v3139_v15 = vpop.f32.mrb[13].mxu1 }
 0x4b6   : > { %v1370_v16 = vsel %vm1128_vm8, %v1367_v14, -inf }
 0x4b7   : > { %1371 = vmax.xlane.f32.xlu0 %v1370_v16  ;;  %v1358_v17 = vpop.f32.mrb[14].mxu1 }
 0x4b8   : > { %v1368_v18 = vmul.f32 0.35355338, %v1358_v17  ;;  %v3142_v19 = vpop.f32.mrb[15].mxu1 }
 0x4ba   : > { %v1373_v20 = vsel %vm1128_vm8, %v1368_v18, -inf }
 0x4bb   : > { %1374 = vmax.xlane.f32.xlu1 %v1373_v20  ;;  %v1363_v21 = vpop.f32.mrb[16].mxu1 }
 0x4bc   : > { %v1369_v22 = vmul.f32 0.35355338, %v1363_v21  ;;  %v3145_v23 = vpop.f32.mrb[17].mxu1 }
 0x4be   : > { %v1376_v24 = vsel %vm1135_vm9, %v1369_v22, -inf }
 0x4bf   : > { %1377 = vmax.xlane.f32.xlu0 %v1376_v24 }
 0x4cc   : > { %1167 = vrot.lane.b32.xlu1 %v4017_v47, %s3661_s25 }
 0x4d5   : > { %3516 = vrot.lane.b32.xlu0 %v4015_v45, %s3661_s25 }
 0x538   : > { %v1131_v25 = vpop.xlane.xlu1 %1130 }
 0x539   : > { %v1139_v26 = vsub.f32 %v1125_v0, %v1131_v25 }
 0x53b   : > { %v1142_v27 = vmul.f32 1.442695, %v1139_v26  ;;  %v1019_v26 = vld [vmem:[%s3819_s18] sm:$0xff] }
 0x53c   : > { %v1134_v28 = vpop.xlane.xlu0 %1133 }
 0x53d   : > { %3551 = vpow2.f32 %v1142_v27  ;;  %v1140_v29 = vsub.f32 %v1126_v4, %v1134_v28  ;;  %v1020_v27 = vld [vmem:[%s3819_s18 + $0x8] sm:$0xff] }
 0x53e   : > { %3162 = vmatpush3.msra.mxu1 %v1020_v27 }
 0x53f   : > { %v1144_v30 = vmul.f32 1.442695, %v1140_v29  ;;  %3379 = vmatprep.subr.bf16.mxu1 %v3655_v10 }
 0x540   : > { %v1138_v31 = vpop.xlane.xlu0 %1137 }
 0x541   : > { %3553 = vpow2.f32 %v1144_v30  ;;  %v1141_v32 = vsub.f32 %v1127_v8, %v1138_v31 }
 0x543   : > { %v1146_v33 = vmul.f32 1.442695, %v1141_v32 }
 0x544   : > { %v1372_v34 = vpop.xlane.xlu0 %1371 }
 0x545   : > { %3555 = vpow2.f32 %v1146_v33  ;;  %v1379_v35 = vsub.f32 %v1367_v14, %v1372_v34 }
 0x547   : > { %v3552_v36 = vpop.eup %3551  ;;  %v1382_v37 = vmul.f32 1.442695, %v1379_v35 }
 0x548   : > { %v1375_v38 = vpop.xlane.xlu1 %1374  ;;  %v1148_v39 = vsel %vm1128_vm8, %v3552_v36, 0.0 }
 0x549   : > { %3557 = vpow2.f32 %v1382_v37  ;;  %v1380_v40 = vsub.f32 %v1368_v18, %v1375_v38  ;;  %1149 = vadd.xlane.f32.xlu1 %v1148_v39 }
 0x54b   : > { %v3554_v41 = vpop.eup %3553  ;;  %v1384_v44 = vmul.f32 1.442695, %v1380_v40 }
 0x54c   : > { %v1378_v46 = vpop.xlane.xlu0 %1377  ;;  %v1151_v48 = vsel %vm1128_vm8, %v3554_v41, 0.0  ;;  %v1168_v61 = vpop.permute.xlu1 %1167 }
 0x54d   : > { %3559 = vpow2.f32 %v1384_v44  ;;  %v1381_v49 = vsub.f32 %v1369_v22, %v1378_v46  ;;  %1152 = vadd.xlane.f32.xlu0 %v1151_v48 }
 0x54f   : > { %v3556_v50 = vpop.eup %3555  ;;  %v1386_v51 = vmul.f32 1.442695, %v1381_v49 }
 0x550   : > { %v3517_v52 = vpop.permute.xlu0 %3516  ;;  %v1154_v54 = vsel %vm1135_vm9, %v3556_v50, 0.0 }
 0x551   : > { %3561 = vpow2.f32 %v1386_v51  ;;  %v3519_v55 = vunpack.i.h.bf16 %v3517_v52  ;;  %v3518_v56 = vunpack.i.l.bf16 %v3517_v52  ;;  %1155 = vadd.xlane.f32.xlu1 %v1154_v54 }
 0x553   : > { %v3558_v57 = vpop.eup %3557  ;;  %v3370_v58 = vpack.c.bf16 %v3519_v55, %v3518_v56 }
 0x554   : > { %v1388_v59 = vsel %vm1128_vm8, %v3558_v57, 0.0 }
 0x555   : > { %1389 = vadd.xlane.f32.xlu0 %v1388_v59  ;;  %3371 = vmatpush3.bf16.msra.mxu0 %v3370_v58 }
 0x556   : > { %3120 = vmatprep.subr.mxu0 %v3657_v13 }
 0x557   : > { %v3560_v60 = vpop.eup %3559 }
 0x558   : > { %v1391_v62 = vsel %vm1128_vm8, %v3560_v60, 0.0 }
 0x559   : > { %1392 = vadd.xlane.f32.xlu1 %v1391_v62  ;;  %3121 = vmatpush3.msk.msra.mxu0 %vm1180_vm10, %v1168_v61 }
 0x55a   : > { %3376 = vmatprep.subr.bf16.mxu0 %v3655_v10 }
 0x55b   : > { %v3562_v63 = vpop.eup %3561 }
 0x55c   : > { %v1394_v0 = vsel %vm1135_vm9, %v3562_v63, 0.0 }
 0x55d   : > { %1395 = vadd.xlane.f32.xlu1 %v1394_v0 }
 0x56b   : > { %1407 = vrot.lane.b32.xlu0 %v4017_v47, %s3662_s26 }
 0x56e   : > { %3521 = vrot.lane.b32.xlu1 %v4015_v45, %s3662_s26  ;;  %s4407_s26 = scalar_lea.vmem %s4362_s11, %s3791_s29  ;;  %s4408_s29 = sld [smem:[#allocation3_spill]] }
 0x56f   : > { %1690 = vrot.lane.b32.xlu0 %v4017_v47, %s3663_s3 }
 0x572   : > { %3526 = vrot.lane.b32.xlu1 %v4015_v45, %s3663_s3 }
 0x573   : > { %1682 = vrot.lane.b32.xlu0 %v4011_v43, %s3664_s27 }
 0x574   : > { %p2976_p8 = scmp.ne.s32.totalorder %s4408_s29, 6 }
 0x576   : > { %1680 = vrot.lane.b32.xlu1 %v4009_v42, %s3664_s27 }
 0x57a   : > { %1684 = vrot.lane.b32.xlu1 %v4017_v47, %s3664_s27 }
 0x5d6   : > { %v1150_v1 = vpop.xlane.xlu1 %1149 }
 0x5d7   : > { %3563 = vrcp.f32 %v1150_v1 }
 0x5da   : > { %v1153_v2 = vpop.xlane.xlu0 %1152 }
 0x5db   : > { %3565 = vrcp.f32 %v1153_v2 }
 0x5de   : > { %v1156_v3 = vpop.xlane.xlu1 %1155 }
 0x5df   : > { %3567 = vrcp.f32 %v1156_v3 }
 0x5e1   : > { %v3564_v4 = vpop.eup %3563 }
 0x5e2   : > { %v1160_v5 = vmul.f32 %v3564_v4, %v3552_v36  ;;  %v1390_v7 = vpop.xlane.xlu0 %1389 }
 0x5e3   : > { %3569 = vrcp.f32 %v1390_v7 }
 0x5e4   : > { %3123 = vmatmul.mubr.msk.f32.vlgmr.msra.gmra.mrb[0].mxu0 %vm1128_vm8, %v1160_v5 }
 0x5e5   : > { %v3566_v6 = vpop.eup %3565  ;;  %3125 = vmatprep.mubr.msk.f32.mxu0 %vm3656_vm5, %v3657_v13 }
 0x5e6   : > { %v1393_v8 = vpop.xlane.xlu1 %1392  ;;  %v1161_v9 = vmul.f32 %v3566_v6, %v3554_v41  ;;  %v1408_v21 = vpop.permute.xlu0 %1407 }
 0x5e7   : > { %3571 = vrcp.f32 %v1393_v8 }
 0x5e8   : > { %3126 = vmatmul.mubr.msk.f32.gmra.mrb[2].mxu0 %vm1128_vm8, %v1161_v9 }
 0x5e9   : > { %v3568_v11 = vpop.eup %3567  ;;  %3128 = vmatprep.mubr.msk.f32.mxu0 %vm3656_vm5, %v3657_v13 }
 0x5ea   : > { %v1396_v12 = vpop.xlane.xlu1 %1395  ;;  %v1162_v14 = vmul.f32 %v3568_v11, %v3556_v50  ;;  %v1691_v46 = vpop.permute.xlu0 %1690 }
 0x5eb   : > { %3573 = vrcp.f32 %v1396_v12 }
 0x5ec   : > { %3129 = vmatmul.mubr.msk.f32.gmra.mrb[4].mxu0 %vm1128_vm8, %v1162_v14 }
 0x5ed   : > { %3152 = vmatprep.mubr.msk.f32.mxu0 %vm3656_vm5, %v3657_v13  ;;  %v3570_v19 = vpop.eup %3569 }
 0x5ee   : > { %v3522_v15 = vpop.permute.xlu1 %3521  ;;  %v1400_v20 = vmul.f32 %v3570_v19, %v3558_v57  ;;  %v1683_v50 = vpop.permute.xlu0 %1682 }
 0x5ef   : > { %v3524_v16 = vunpack.i.h.bf16 %v3522_v15  ;;  %v3523_v17 = vunpack.i.l.bf16 %v3522_v15 }
 0x5f1   : > { %v3377_v18 = vpack.c.bf16 %v3524_v16, %v3523_v17  ;;  %v3572_v22 = vpop.eup %3571 }
 0x5f2   : > { %v1401_v23 = vmul.f32 %v3572_v22, %v3560_v60  ;;  %v3527_v34 = vpop.permute.xlu1 %3526 }
 0x5f3   : > { %3378 = vmatpush3.bf16.msra.mxu0 %v3377_v18  ;;  %v3529_v35 = vunpack.i.h.bf16 %v3527_v34  ;;  %v3528_v36 = vunpack.i.l.bf16 %v3527_v34 }
 0x5f4   : > { %3150 = vmatprep.subr.mxu0 %v3657_v13 }
 0x5f5   : > { %v3574_v24 = vpop.eup %3573  ;;  %v3380_v37 = vpack.c.bf16 %v3529_v35, %v3528_v36 }
 0x5f6   : > { %v1402_v25 = vmul.f32 %v3574_v24, %v3562_v63  ;;  %v1681_v49 = vpop.permute.xlu1 %1680 }
 0x5f7   : > { %3151 = vmatpush3.msk.msra.mxu0 %vm1180_vm10, %v1408_v21 }
 0x5f8   : > { %3153 = vmatmul.mubr.msk.f32.vlgmr.msra.gmra.mrb[6].mxu0 %vm1128_vm8, %v1400_v20  ;;  %3172 = vmatprep.subr.mxu0 %v3657_v13 }
 0x5f9   : > { %3155 = vmatprep.mubr.msk.f32.mxu0 %vm3656_vm5, %v3657_v13  ;;  %3173 = vmatpush3.msra.mxu0 %v1019_v26 }
 0x5fa   : > { %3383 = vmatprep.subr.bf16.mxu0 %v3655_v10  ;;  %v1685_v51 = vpop.permute.xlu1 %1684 }
 0x5fc   : > { %3156 = vmatmul.mubr.msk.f32.gmra.mrb[8].mxu0 %vm1128_vm8, %v1401_v23 }
 0x5fd   : > { %3158 = vmatprep.mubr.msk.f32.mxu0 %vm3656_vm5, %v3657_v13 }
 0x600   : > { %3159 = vmatmul.mubr.msk.f32.gmra.mrb[10].mxu0 %vm1128_vm8, %v1402_v25 }
 0x601   : > { %3174 = vmatprep.mubr.msk.f32.mxu0 %vm3656_vm5, %v3657_v13 }
 0x6b7   : > { %v1249_v28 = vpop.f32.mrb[0].mxu0 }
 0x6b8   : > { %v3124_v29 = vpop.f32.mrb[1].mxu0  ;;  %3175 = vmatmul.mubr.msk.f32.vlgmr.msra.gmra.mrb[12].mxu0 %vm1032_vm6, %v1249_v28 }
 0x6b9   : > { %3177 = vmatprep.mubr.msk.f32.mxu0 %vm3656_vm5, %v3657_v13 }
 0x6bb   : > { %v1254_v30 = vpop.f32.mrb[2].mxu0 }
 0x6bc   : > { %v3127_v31 = vpop.f32.mrb[3].mxu0  ;;  %3178 = vmatmul.mubr.msk.f32.gmra.mrb[14].mxu0 %vm1032_vm6, %v1254_v30 }
 0x6bd   : > { %3180 = vmatprep.mubr.msk.f32.mxu0 %vm3656_vm5, %v3657_v13 }
 0x6bf   : > { %v1259_v32 = vpop.f32.mrb[4].mxu0 }
 0x6c0   : > { %v3130_v33 = vpop.f32.mrb[5].mxu0  ;;  %3181 = vmatmul.mubr.msk.f32.gmra.mrb[16].mxu0 %vm1032_vm6, %v1259_v32 }
 0x6c1   : > { %3204 = vmatprep.mubr.msk.f32.mxu0 %vm3656_vm5, %v3657_v13 }
 0x6cb   : > { %v1488_v38 = vpop.f32.mrb[6].mxu0 }
 0x6cc   : > { %v3154_v39 = vpop.f32.mrb[7].mxu0  ;;  %3164 = vmatmul.mubr.msk.f32.vlgmr.msra.gmra.mrb[18].mxu1 %vm1032_vm6, %v1488_v38 }
 0x6cd   : > { %3382 = vmatpush3.bf16.xpose.msk.msra.mxu1 %vm4028_vm7, %v3380_v37  ;;  %3166 = vmatprep.mubr.msk.f32.mxu1 %vm3656_vm5, %v3657_v13 }
 0x6ce   : > { %3187 = vmatprep.subr.mxu1 %v3657_v13 }
 0x6cf   : > { %v1493_v40 = vpop.f32.mrb[8].mxu0 }
 0x6d0   : > { %v3157_v41 = vpop.f32.mrb[9].mxu0  ;;  %3167 = vmatmul.mubr.msk.f32.gmra.mrb[20].mxu1 %vm1032_vm6, %v1493_v40 }
 0x6d1   : > { %3169 = vmatprep.mubr.msk.f32.mxu1 %vm3656_vm5, %v3657_v13 }
 0x6d3   : > { %v1498_v44 = vpop.f32.mrb[10].mxu0 }
 0x6d4   : > { %v3160_v48 = vpop.f32.mrb[11].mxu0  ;;  %3170 = vmatmul.mubr.msk.f32.gmra.mrb[22].mxu1 %vm1032_vm6, %v1498_v44 }
 0x6d5   : > { %3188 = vmatpush3.xpose.msk.msra.mxu1 %vm1032_vm6, %v1691_v46  ;;  %3189 = vmatprep.mubr.msk.f32.mxu1 %vm3656_vm5, %v3657_v13 }
 0x6d6   : > { %3213 = vmatprep.subr.mxu1 %v3657_v13 }
 0x6d8   : > { %3190 = vmatmul.mubr.msk.f32.vlgmr.msra.gmra.mrb[24].mxu1 %vm1032_vm6, %v1681_v49 }
 0x6d9   : > { %3192 = vmatprep.mubr.msk.f32.mxu1 %vm3656_vm5, %v3657_v13 }
 0x6dc   : > { %3193 = vmatmul.mubr.msk.f32.gmra.mrb[26].mxu1 %vm1032_vm6, %v1683_v50 }
 0x6dd   : > { %3195 = vmatprep.mubr.msk.f32.mxu1 %vm3656_vm5, %v3657_v13 }
 0x6e0   : > { %3196 = vmatmul.mubr.msk.f32.gmra.mrb[28].mxu1 %vm1032_vm6, %v1685_v51 }
 0x6e1   : > { %3215 = vmatprep.mubr.msk.f32.mxu1 %vm3656_vm5, %v3657_v13 }
 0x78b   : > { %v1666_v52 = vpop.f32.mrb[12].mxu0 }
 0x78c   : > { %v3176_v54 = vpop.f32.mrb[13].mxu0 }
 0x78f   : > { %v1671_v55 = vpop.f32.mrb[14].mxu0 }
 0x790   : > { %v3179_v56 = vpop.f32.mrb[15].mxu0 }
 0x793   : > { %v1676_v57 = vpop.f32.mrb[16].mxu0 }
 0x794   : > { %v3182_v58 = vpop.f32.mrb[17].mxu0 }
 0x79f   : > { %v1577_v59 = vpop.f32.mrb[18].mxu1 }
 0x7a0   : > { %v4144_v60 = vadd.f32 %v1666_v52, %v1577_v59  ;;  %v3165_v61 = vpop.f32.mrb[19].mxu1 }
 0x7a3   : > { %v1582_v62 = vpop.f32.mrb[20].mxu1 }
 0x7a4   : > { %v4146_v63 = vadd.f32 %v1671_v55, %v1582_v62  ;;  %v3168_v0 = vpop.f32.mrb[21].mxu1 }
 0x7a7   : > { %v1587_v1 = vpop.f32.mrb[22].mxu1 }
 0x7a8   : > { %v4148_v2 = vadd.f32 %v1676_v57, %v1587_v1  ;;  %v3171_v3 = vpop.f32.mrb[23].mxu1  ;;  %v1021_v57 = vld [vmem:[%s3819_s18 + $0x10] sm:$0xff] }
 0x7a9   : > { %3214 = vmatpush3.msra.mxu1 %v1021_v57 }
 0x7aa   : > { %3390 = vmatprep.subr.bf16.mxu1 %v3655_v10 }
 0x7ab   : > { %v1770_v4 = vpop.f32.mrb[24].mxu1 }
 0x7ac   : > { %v1784_v5 = vmul.f32 0.35355338, %v1770_v4  ;;  %v3191_v6 = vpop.f32.mrb[25].mxu1 }
 0x7ae   : > { %v1787_v7 = vsel %vm1128_vm8, %v1784_v5, -inf }
 0x7af   : > { %1788 = vmax.xlane.f32.xlu0 %v1787_v7  ;;  %v1775_v8 = vpop.f32.mrb[26].mxu1 }
 0x7b0   : > { %v1785_v9 = vmul.f32 0.35355338, %v1775_v8  ;;  %v3194_v11 = vpop.f32.mrb[27].mxu1 }
 0x7b2   : > { %v1790_v12 = vsel %vm1128_vm8, %v1785_v9, -inf }
 0x7b3   : > { %1791 = vmax.xlane.f32.xlu1 %v1790_v12  ;;  %v1780_v14 = vpop.f32.mrb[28].mxu1 }
 0x7b4   : > { %v1786_v15 = vmul.f32 0.35355338, %v1780_v14  ;;  %v3197_v16 = vpop.f32.mrb[29].mxu1 }
 0x7b6   : > { %v1793_v17 = vsel %vm1135_vm9, %v1786_v15, -inf }
 0x7b7   : > { %1794 = vmax.xlane.f32.xlu0 %v1793_v17 }
 0x7c4   : > { %1824 = vrot.lane.b32.xlu1 %v4017_v47, %s3665_s21 }
 0x7c8   : > { %3536 = vrot.lane.b32.xlu1 %v4015_v45, %s3666_s4 }
 0x7cc   : > { %2021 = vrot.lane.b32.xlu1 %v4017_v47, %s3666_s4 }
 0x83c   : > { %v1789_v18 = vpop.xlane.xlu0 %1788 }
 0x83d   : > { %v1796_v19 = vsub.f32 %v1784_v5, %v1789_v18 }
 0x83f   : > { %v1799_v20 = vmul.f32 1.442695, %v1796_v19 }
 0x840   : > { %v1792_v21 = vpop.xlane.xlu1 %1791 }
 0x841   : > { %3575 = vpow2.f32 %v1799_v20  ;;  %v1797_v22 = vsub.f32 %v1785_v9, %v1792_v21 }
 0x843   : > { %v1801_v23 = vmul.f32 1.442695, %v1797_v22 }
 0x844   : > { %v1795_v24 = vpop.xlane.xlu0 %1794  ;;  %v1825_v33 = vpop.permute.xlu1 %1824 }
 0x845   : > { %3577 = vpow2.f32 %v1801_v23  ;;  %v1798_v25 = vsub.f32 %v1786_v15, %v1795_v24 }
 0x847   : > { %v1803_v26 = vmul.f32 1.442695, %v1798_v25 }
 0x848   : > { %v3537_v34 = vpop.permute.xlu1 %3536 }
 0x849   : > { %3579 = vpow2.f32 %v1803_v26  ;;  %v3539_v48 = vunpack.i.h.bf16 %v3537_v34  ;;  %v3538_v49 = vunpack.i.l.bf16 %v3537_v34 }
 0x84b   : > { %v3576_v27 = vpop.eup %3575  ;;  %v3387_v52 = vpack.c.bf16 %v3539_v48, %v3538_v49 }
 0x84c   : > { %v1805_v28 = vsel %vm1128_vm8, %v3576_v27, 0.0  ;;  %v2022_v36 = vpop.permute.xlu1 %2021 }
 0x84d   : > { %1806 = vadd.xlane.f32.xlu0 %v1805_v28 }
 0x84f   : > { %v3578_v29 = vpop.eup %3577 }
 0x850   : > { %v1808_v30 = vsel %vm1128_vm8, %v3578_v29, 0.0 }
 0x851   : > { %1809 = vadd.xlane.f32.xlu0 %v1808_v30 }
 0x853   : > { %v3580_v31 = vpop.eup %3579 }
 0x854   : > { %v1811_v32 = vsel %vm1135_vm9, %v3580_v31, 0.0 }
 0x855   : > { %1812 = vadd.xlane.f32.xlu1 %v1811_v32 }
 0x866   : > { %2013 = vrot.lane.b32.xlu1 %v4011_v43, %s3667_s20 }
 0x867   : > { %3531 = vrot.lane.b32.xlu0 %v4015_v45, %s3665_s21 }
 0x86b   : > { %2011 = vrot.lane.b32.xlu0 %v4009_v42, %s3667_s20 }
 0x86f   : > { %2015 = vrot.lane.b32.xlu0 %v4017_v47, %s3667_s20 }
 0x8da   : > { %v1807_v35 = vpop.xlane.xlu0 %1806 }
 0x8db   : > { %3581 = vrcp.f32 %v1807_v35 }
 0x8de   : > { %v1810_v37 = vpop.xlane.xlu0 %1809 }
 0x8df   : > { %3583 = vrcp.f32 %v1810_v37 }
 0x8e2   : > { %v1813_v38 = vpop.xlane.xlu1 %1812  ;;  %v3532_v39 = vpop.permute.xlu0 %3531 }
 0x8e3   : > { %v3534_v40 = vunpack.i.h.bf16 %v3532_v39  ;;  %v3533_v41 = vunpack.i.l.bf16 %v3532_v39  ;;  %3585 = vrcp.f32 %v1813_v38  ;;  %v1022_v38 = vld [vmem:[%s3819_s18 + $0x18] sm:$0xff] }
 0x8e5   : > { %v3384_v44 = vpack.c.bf16 %v3534_v40, %v3533_v41  ;;  %v3582_v43 = vpop.eup %3581 }
 0x8e6   : > { %v1817_v42 = vmul.f32 %v3582_v43, %v3576_v27  ;;  %v2012_v55 = vpop.permute.xlu0 %2011  ;;  %v2014_v53 = vpop.permute.xlu1 %2013 }
 0x8e7   : > { %3385 = vmatpush3.bf16.msra.mxu0 %v3384_v44 }
 0x8e8   : > { %3202 = vmatprep.subr.mxu0 %v3657_v13 }
 0x8e9   : > { %v3584_v46 = vpop.eup %3583 }
 0x8ea   : > { %v1818_v50 = vmul.f32 %v3584_v46, %v3578_v29  ;;  %v2016_v56 = vpop.permute.xlu0 %2015 }
 0x8eb   : > { %3203 = vmatpush3.msk.msra.mxu0 %vm1180_vm10, %v1825_v33 }
 0x8ec   : > { %3205 = vmatmul.mubr.msk.f32.vlgmr.msra.gmra.mrb[18].mxu0 %vm1128_vm8, %v1817_v42  ;;  %3386 = vmatprep.subr.bf16.mxu0 %v3655_v10 }
 0x8ed   : > { %3207 = vmatprep.mubr.msk.f32.mxu0 %vm3656_vm5, %v3657_v13  ;;  %v3586_v51 = vpop.eup %3585 }
 0x8ee   : > { %v1819_v54 = vmul.f32 %v3586_v51, %v3580_v31 }
 0x8f0   : > { %3208 = vmatmul.mubr.msk.f32.gmra.mrb[20].mxu0 %vm1128_vm8, %v1818_v50 }
 0x8f1   : > { %3210 = vmatprep.mubr.msk.f32.mxu0 %vm3656_vm5, %v3657_v13 }
 0x8f2   : > { %3389 = vmatpush3.bf16.xpose.msk.msra.mxu0 %vm4028_vm7, %v3387_v52 }
 0x8f3   : > { %3228 = vmatprep.subr.mxu0 %v3657_v13 }
 0x8f4   : > { %3211 = vmatmul.mubr.msk.f32.gmra.mrb[22].mxu0 %vm1128_vm8, %v1819_v54 }
 0x8f5   : > { %3230 = vmatprep.mubr.msk.f32.mxu0 %vm3656_vm5, %v3657_v13 }
 0x8fa   : > { %3229 = vmatpush3.xpose.msk.msra.mxu0 %vm1032_vm6, %v2022_v36 }
 0x8fb   : > { %3254 = vmatprep.subr.mxu0 %v3657_v13 }
 0x8fd   : > { %3231 = vmatmul.mubr.msk.f32.vlgmr.msra.gmra.mrb[24].mxu0 %vm1032_vm6, %v2012_v55 }
 0x8fe   : > { %3233 = vmatprep.mubr.msk.f32.mxu0 %vm3656_vm5, %v3657_v13  ;;  %3255 = vmatpush3.msra.mxu0 %v1022_v38  ;;  %v2415_v38 = vld [vmem:[%s3836_s30 + $0x8] sm:$0xff] }
 0x8ff   : > { %3399 = vmatprep.subr.bf16.mxu0 %v3655_v10 }
 0x901   : > { %3234 = vmatmul.mubr.msk.f32.gmra.mrb[26].mxu0 %vm1032_vm6, %v2014_v53 }
 0x902   : > { %3236 = vmatprep.mubr.msk.f32.mxu0 %vm3656_vm5, %v3657_v13 }
 0x905   : > { %3237 = vmatmul.mubr.msk.f32.gmra.mrb[28].mxu0 %vm1032_vm6, %v2016_v56 }
 0x906   : > { %3256 = vmatprep.mubr.msk.f32.mxu0 %vm3656_vm5, %v3657_v13 }
 0x9bf   : > { %v1905_v58 = vpop.f32.mrb[18].mxu0 }
 0x9c0   : > { %v3206_v59 = vpop.f32.mrb[19].mxu0  ;;  %3216 = vmatmul.mubr.msk.f32.vlgmr.msra.gmra.mrb[30].mxu1 %vm1032_vm6, %v1905_v58 }
 0x9c1   : > { %3218 = vmatprep.mubr.msk.f32.mxu1 %vm3656_vm5, %v3657_v13 }
 0x9c3   : > { %v1910_v61 = vpop.f32.mrb[20].mxu0 }
 0x9c4   : > { %v3209_v62 = vpop.f32.mrb[21].mxu0  ;;  %3219 = vmatmul.mubr.msk.f32.gmra.mrb[32].mxu1 %vm1032_vm6, %v1910_v61  ;;  %v2968_v61 = vld [vmem:[%s4405_s23] ss:$0 sm:$0xff] }
 0x9c5   : > { %3221 = vmatprep.mubr.msk.f32.mxu1 %vm3656_vm5, %v3657_v13 }
 0x9c7   : > { %v1915_v0 = vpop.f32.mrb[22].mxu0 }
 0x9c8   : > { %v3212_v1 = vpop.f32.mrb[23].mxu0  ;;  %3222 = vmatmul.mubr.msk.f32.gmra.mrb[34].mxu1 %vm1032_vm6, %v1915_v0 }
 0x9c9   : > { %3245 = vmatprep.mubr.msk.f32.mxu1 %vm3656_vm5, %v3657_v13 }
 0x9d0   : > { %v2101_v3 = vpop.f32.mrb[24].mxu0 }
 0x9d1   : > { %v2115_v4 = vmul.f32 0.35355338, %v2101_v3  ;;  %v3232_v5 = vpop.f32.mrb[25].mxu0 }
 0x9d3   : > { %v2118_v6 = vsel %vm1128_vm8, %v2115_v4, -inf }
 0x9d4   : > { %2119 = vmax.xlane.f32.xlu1 %v2118_v6  ;;  %v2106_v7 = vpop.f32.mrb[26].mxu0 }
 0x9d5   : > { %v2116_v8 = vmul.f32 0.35355338, %v2106_v7  ;;  %v3235_v9 = vpop.f32.mrb[27].mxu0 }
 0x9d7   : > { %v2121_v11 = vsel %vm1128_vm8, %v2116_v8, -inf }
 0x9d8   : > { %2122 = vmax.xlane.f32.xlu0 %v2121_v11  ;;  %v2111_v12 = vpop.f32.mrb[28].mxu0 }
 0x9d9   : > { %v2117_v14 = vmul.f32 0.35355338, %v2111_v12  ;;  %v3238_v15 = vpop.f32.mrb[29].mxu0  ;;  %v3612_v12 = vld [vmem:[#allocation2 + $0x8] sm:$0xff] }
 0x9db   : > { %v2124_v16 = vsel %vm1135_vm9, %v2117_v14, -inf }
 0x9dc   : > { %2125 = vmax.xlane.f32.xlu0 %v2124_v16 }
 0xa61   : > { %v2120_v17 = vpop.xlane.xlu1 %2119 }
 0xa62   : > { %v2127_v18 = vsub.f32 %v2115_v4, %v2120_v17  ;;  %v3611_v4 = vld [vmem:[#allocation2] sm:$0xff] }
 0xa64   : > { %v2130_v19 = vmul.f32 1.442695, %v2127_v18 }
 0xa65   : > { %v2123_v20 = vpop.xlane.xlu0 %2122 }
 0xa66   : > { %3587 = vpow2.f32 %v2130_v19  ;;  %v2128_v21 = vsub.f32 %v2116_v8, %v2123_v20  ;;  %v3613_v19 = vld [vmem:[#allocation2 + $0x10] sm:$0x1] }
 0xa68   : > { %v2132_v22 = vmul.f32 1.442695, %v2128_v21 }
 0xa69   : > { %v2126_v23 = vpop.xlane.xlu0 %2125 }
 0xa6a   : > { %3589 = vpow2.f32 %v2132_v22  ;;  %v2129_v24 = vsub.f32 %v2117_v14, %v2126_v23 }
 0xa6c   : > { %v2134_v25 = vmul.f32 1.442695, %v2129_v24 }
 0xa6e   : > { %3591 = vpow2.f32 %v2134_v25 }
 0xa70   : > { %v3588_v26 = vpop.eup %3587 }
 0xa71   : > { %v2136_v27 = vsel %vm1128_vm8, %v3588_v26, 0.0 }
 0xa72   : > { %2137 = vadd.xlane.f32.xlu0 %v2136_v27 }
 0xa74   : > { %v3590_v28 = vpop.eup %3589 }
 0xa75   : > { %v2139_v29 = vsel %vm1128_vm8, %v3590_v28, 0.0 }
 0xa76   : > { %2140 = vadd.xlane.f32.xlu1 %v2139_v29 }
 0xa78   : > { %v3592_v30 = vpop.eup %3591 }
 0xa79   : > { %v2142_v31 = vsel %vm1135_vm9, %v3592_v30, 0.0 }
 0xa7a   : > { %2143 = vadd.xlane.f32.xlu0 %v2142_v31 }
 0xa87   : > { %3541 = vrot.lane.b32.xlu1 %v4015_v45, %s3668_s8 }
 0xa90   : > { %2155 = vrot.lane.b32.xlu0 %v4017_v47, %s3668_s8 }
 0xa93   : > { %v1994_v32 = vpop.f32.mrb[30].mxu1 }
 0xa94   : > { %v2008_v33 = vadd.f32 %v1994_v32, %v4144_v60  ;;  %v3217_v34 = vpop.f32.mrb[31].mxu1 }
 0xa97   : > { %v1999_v35 = vpop.f32.mrb[32].mxu1 }
 0xa98   : > { %v2009_v36 = vadd.f32 %v1999_v35, %v4146_v63  ;;  %v3220_v37 = vpop.f32.mrb[33].mxu1 }
 0xa99   : > { %v2414_v37 = vld [vmem:[%s3836_s30] sm:$0xff] }
 0xa9b   : > { %v2004_v39 = vpop.f32.mrb[34].mxu1 }
 0xa9c   : > { %v2010_v40 = vadd.f32 %v2004_v39, %v4148_v2  ;;  %v3223_v41 = vpop.f32.mrb[35].mxu1  ;;  %v3394_v39 = vpack.c.bf16 %v2415_v38, %v2414_v37 }
 0xa9d   : > { %v2417_v41 = vld [vmem:[%s3836_s30 + $0x18] sm:$0xff] }
 0xaff   : > { %v2138_v44 = vpop.xlane.xlu0 %2137 }
 0xb00   : > { %3593 = vrcp.f32 %v2138_v44 }
 0xb03   : > { %v2141_v45 = vpop.xlane.xlu1 %2140 }
 0xb04   : > { %3595 = vrcp.f32 %v2141_v45  ;;  %v2541_v45 = vld [vmem:[%s3846_s24] sm:$0xff] }
 0xb07   : > { %v3542_v47 = vpop.permute.xlu1 %3541  ;;  %v2144_v43 = vpop.xlane.xlu0 %2143 }
 0xb08   : > { %v3544_v60 = vunpack.i.h.bf16 %v3542_v47  ;;  %v3543_v42 = vunpack.i.l.bf16 %v3542_v47  ;;  %3597 = vrcp.f32 %v2144_v43  ;;  %v2542_v47 = vld [vmem:[%s3846_s24 + $0x8] sm:$0xff] }
 0xb09   : > { %v3400_v43 = vpack.c.bf16 %v2542_v47, %v2541_v45 }
 0xb0a   : > { %v3391_v46 = vpack.c.bf16 %v3544_v60, %v3543_v42  ;;  %v3594_v63 = vpop.eup %3593 }
 0xb0b   : > { %v2148_v48 = vmul.f32 %v3594_v63, %v3588_v26  ;;  %v2156_v49 = vpop.permute.xlu0 %2155 }
 0xb0c   : > { %3392 = vmatpush3.bf16.msra.mxu1 %v3391_v46 }
 0xb0d   : > { %3243 = vmatprep.subr.mxu1 %v3657_v13 }
 0xb0e   : > { %v3596_v50 = vpop.eup %3595 }
 0xb0f   : > { %v2149_v2 = vmul.f32 %v3596_v50, %v3590_v28 }
 0xb10   : > { %3244 = vmatpush3.msk.msra.mxu1 %vm1180_vm10, %v2156_v49 }
 0xb11   : > { %3246 = vmatmul.mubr.msk.f32.vlgmr.msra.gmra.mrb[36].mxu1 %vm1128_vm8, %v2148_v48  ;;  %3393 = vmatprep.subr.bf16.mxu1 %v3655_v10 }
 0xb12   : > { %3248 = vmatprep.mubr.msk.f32.mxu1 %vm3656_vm5, %v3657_v13  ;;  %v3598_v51 = vpop.eup %3597  ;;  %3395 = vmatpush3.bf16.msra.mxu1 %v3394_v39 }
 0xb13   : > { %v2150_v52 = vmul.f32 %v3598_v51, %v3592_v30  ;;  %3396 = vmatprep.subr.bf16.mxu1 %v3655_v10 }
 0xb15   : > { %3249 = vmatmul.mubr.msk.f32.gmra.mrb[38].mxu1 %vm1128_vm8, %v2149_v2 }
 0xb16   : > { %3251 = vmatprep.mubr.msk.f32.mxu1 %vm3656_vm5, %v3657_v13 }
 0xb19   : > { %3252 = vmatmul.mubr.msk.f32.gmra.mrb[40].mxu1 %vm1128_vm8, %v2150_v52 }
 0xb1a   : > { %3273 = vmatprep.mubr.msk.f32.mxu1 %vm3656_vm5, %v3657_v13 }
 0xbe4   : > { %v2236_v54 = vpop.f32.mrb[36].mxu1 }
 0xbe5   : > { %v3247_v55 = vpop.f32.mrb[37].mxu1  ;;  %3257 = vmatmul.mubr.msk.f32.vlgmr.msra.gmra.mrb[30].mxu0 %vm1032_vm6, %v2236_v54  ;;  %v2969_v54 = vld [vmem:[%s4406_s22] ss:$0 sm:$0xff] }
 0xbe6   : > { %3259 = vmatprep.mubr.msk.f32.mxu0 %vm3656_vm5, %v3657_v13  ;;  %3401 = vmatpush3.bf16.msra.mxu0 %v3400_v43 }
 0xbe7   : > { %3402 = vmatprep.subr.bf16.mxu0 %v3655_v10 }
 0xbe8   : > { %v2241_v53 = vpop.f32.mrb[38].mxu1 }
 0xbe9   : > { %v3250_v56 = vpop.f32.mrb[39].mxu1  ;;  %3260 = vmatmul.mubr.msk.f32.gmra.mrb[32].mxu0 %vm1032_vm6, %v2241_v53  ;;  %v2970_v53 = vld [vmem:[%s4407_s26] ss:$0 sm:$0xff] }
 0xbea   : > { %3262 = vmatprep.mubr.msk.f32.mxu0 %vm3656_vm5, %v3657_v13 }
 0xbec   : > { %v2246_v57 = vpop.f32.mrb[40].mxu1 }
 0xbed   : > { %v3253_v58 = vpop.f32.mrb[41].mxu1  ;;  %3263 = vmatmul.mubr.msk.f32.gmra.mrb[34].mxu0 %vm1032_vm6, %v2246_v57 }
 0xbee   : > { %3314 = vmatprep.mubr.msk.f32.mxu0 %vm3656_vm5, %v3657_v13 }
 0xcb8   : > { %v2325_v59 = vpop.f32.mrb[30].mxu0 }
 0xcb9   : > { %v2339_v62 = vadd.f32 %v2325_v59, %v2008_v33  ;;  %v3258_v0 = vpop.f32.mrb[31].mxu0 }
 0xcbb   : > { %v2349_v1 = vadd.f32 %v2968_v61, %v2339_v62 }
 0xcbc   : > { %v2330_v3 = vpop.f32.mrb[32].mxu0 }
 0xcbd   : > { %v4239_v5 = vadd.f32 %v3611_v4, %v2349_v1  ;;  %v2340_v6 = vadd.f32 %v2330_v3, %v2009_v36  ;;  %v3261_v7 = vpop.f32.mrb[33].mxu0 }
 0xcbe   : > { %v2544_v7 = vld [vmem:[%s3846_s24 + $0x18] sm:$0xff] }
 0xcbf   : > { %v2350_v8 = vadd.f32 %v2968_v61, %v2340_v6  ;;  %v2357_v9 = vsel %vm859_vm3, %v4239_v5, 0.0  ;;  %v2543_v6 = vld [vmem:[%s3846_s24 + $0x10] sm:$0xff] }
 0xcc0   : > { %2358 = vadd.xlane.f32.xlu1 %v2357_v9  ;;  %v2335_v11 = vpop.f32.mrb[34].mxu0  ;;  %v2545_v9 = vld [vmem:[%s3846_s24 + $0x20] sm:$0xff] }
 0xcc1   : > { %v4243_v14 = vadd.f32 %v3612_v12, %v2350_v8  ;;  %v2341_v15 = vadd.f32 %v2335_v11, %v2010_v40  ;;  %v3264_v16 = vpop.f32.mrb[35].mxu0  ;;  %v2416_v40 = vld [vmem:[%s3836_s30 + $0x10] sm:$0xff]  ;;  %v3403_v8 = vpack.c.bf16 %v2544_v7, %v2543_v6  ;;  %v2546_v11 = vld [vmem:[%s3846_s24 + $0x28] sm:$0xff] }
 0xcc2   : > { %v3397_v44 = vpack.c.bf16 %v2417_v41, %v2416_v40  ;;  %v3406_v12 = vpack.c.bf16 %v2546_v11, %v2545_v9  ;;  %v2548_v16 = vld [vmem:[%s3846_s24 + $0x38] sm:$0xff] }
 0xcc3   : > { %v2351_v17 = vadd.f32 %v2968_v61, %v2341_v15  ;;  %v2360_v18 = vsel %vm859_vm3, %v4243_v14, 0.0  ;;  %3404 = vmatpush3.bf16.msra.mxu0 %v3403_v8  ;;  %v2547_v15 = vld [vmem:[%s3846_s24 + $0x30] sm:$0xff] }
 0xcc4   : > { %2361 = vadd.xlane.f32.xlu0 %v2360_v18  ;;  %3398 = vmatpush3.bf16.msra.mxu1 %v3397_v44  ;;  %v2549_v18 = vld [vmem:[%s3846_s24 + $0x40] sm:$0xff] }
 0xcc5   : > { %v4247_v20 = vadd.f32 %v3613_v19, %v2351_v17  ;;  %3405 = vmatprep.subr.bf16.mxu0 %v3655_v10  ;;  %v3409_v17 = vpack.c.bf16 %v2548_v16, %v2547_v15  ;;  %v2550_v19 = vld [vmem:[%s3846_s24 + $0x48] sm:$0xff] }
 0xcc7   : > { %v2363_v21 = vsel %vm866_vm4, %v4247_v20, 0.0  ;;  %3407 = vmatpush3.bf16.msra.mxu0 %v3406_v12 }
 0xcc8   : > { %2364 = vadd.xlane.f32.xlu1 %v2363_v21  ;;  %3408 = vmatprep.subr.bf16.mxu0 %v3655_v10  ;;  %v3412_v21 = vpack.c.bf16 %v2550_v19, %v2549_v18 }
 0xccb   : > { %3410 = vmatpush3.bf16.msra.mxu0 %v3409_v17 }
 0xccc   : > { %3411 = vmatprep.subr.bf16.mxu0 %v3655_v10 }
 0xccf   : > { %3413 = vmatpush3.bf16.msra.mxu0 %v3412_v21 }
 0xcd0   : > { %3414 = vmatprep.subr.bf16.mxu0 %v3655_v10 }
 0xd4d   : > { %v2359_v22 = vpop.xlane.xlu1 %2358 }
 0xd4e   : > { %v2366_v23 = vmul.f32 0.03125, %v2359_v22  ;;  %v2551_v22 = vld [vmem:[%s3846_s24 + $0x50] sm:$0xff] }
 0xd50   : > { %v2369_v24 = vsub.f32 %v4239_v5, %v2366_v23  ;;  %v2552_v23 = vld [vmem:[%s3846_s24 + $0x58] sm:$0xff] }
 0xd51   : > { %v2362_v25 = vpop.xlane.xlu0 %2361 }
 0xd52   : > { %v2367_v26 = vmul.f32 0.03125, %v2362_v25  ;;  %v2372_v27 = vmul.f32 %v2369_v24, %v2369_v24  ;;  %v2553_v25 = vld [vmem:[%s3846_s24 + $0x60] sm:$0xff] }
 0xd54   : > { %v2370_v28 = vsub.f32 %v4243_v14, %v2367_v26  ;;  %v2375_v29 = vsel %vm859_vm3, %v2372_v27, 0.0  ;;  %v2554_v26 = vld [vmem:[%s3846_s24 + $0x68] sm:$0xff] }
 0xd55   : > { %2376 = vadd.xlane.f32.xlu0 %v2375_v29  ;;  %v2365_v30 = vpop.xlane.xlu1 %2364  ;;  %v3418_v27 = vpack.c.bf16 %v2554_v26, %v2553_v25  ;;  %v2556_v29 = vld [vmem:[%s3846_s24 + $0x78] sm:$0xff] }
 0xd56   : > { %v2368_v31 = vmul.f32 0.03125, %v2365_v30  ;;  %v2373_v32 = vmul.f32 %v2370_v28, %v2370_v28 }
 0xd58   : > { %v2371_v33 = vsub.f32 %v4247_v20, %v2368_v31  ;;  %v2378_v34 = vsel %vm859_vm3, %v2373_v32, 0.0  ;;  %v2971_v31 = vld [vmem:[%s717_s0] ss:$0 sm:$0xff] }
 0xd59   : > { %2379 = vadd.xlane.f32.xlu1 %v2378_v34 }
 0xd5a   : > { %v2374_v35 = vmul.f32 %v2371_v33, %v2371_v33 }
 0xd5c   : > { %v2381_v36 = vsel %vm866_vm4, %v2374_v35, 0.0 }
 0xd5d   : > { %2382 = vadd.xlane.f32.xlu0 %v2381_v36 }
 0xde2   : > { %v2377_v60 = vpop.xlane.xlu0 %2376 }
 0xde3   : > { %v2384_v42 = vmul.f32 0.03125, %v2377_v60 }
 0xde5   : > { %v2387_v46 = vadd.f32 1e-06, %v2384_v42 }
 0xde6   : > { %v2380_v63 = vpop.xlane.xlu1 %2379 }
 0xde7   : > { %3599 = vrsqrt.f32 %v2387_v46  ;;  %v2385_v48 = vmul.f32 0.03125, %v2380_v63 }
 0xde9   : > { %v2388_v49 = vadd.f32 1e-06, %v2385_v48 }
 0xdea   : > { %v2383_v50 = vpop.xlane.xlu0 %2382 }
 0xdeb   : > { %3601 = vrsqrt.f32 %v2388_v49  ;;  %v2386_v2 = vmul.f32 0.03125, %v2383_v50 }
 0xded   : > { %v2389_v51 = vadd.f32 1e-06, %v2386_v2 }
 0xdef   : > { %3603 = vrsqrt.f32 %v2389_v51 }
 0xdf1   : > { %v3600_v52 = vpop.eup %3599 }
 0xdf2   : > { %v2393_v55 = vmul.f32 %v3600_v52, %v2369_v24  ;;  %v3415_v24 = vpack.c.bf16 %v2552_v23, %v2551_v22 }
 0xdf4   : > { %v2402_v56 = vmul.f32 %v2969_v54, %v2393_v55  ;;  %3416 = vmatpush3.bf16.msra.mxu0 %v3415_v24 }
 0xdf5   : > { %v3602_v57 = vpop.eup %3601  ;;  %3417 = vmatprep.subr.bf16.mxu0 %v3655_v10 }
 0xdf6   : > { %v2411_v58 = vadd.f32 %v2970_v53, %v2402_v56  ;;  %v2394_v59 = vmul.f32 %v3602_v57, %v2370_v28  ;;  %v2555_v28 = vld [vmem:[%s3846_s24 + $0x70] sm:$0xff] }
 0xdf7   : > { %v3421_v30 = vpack.c.bf16 %v2556_v29, %v2555_v28 }
 0xdf8   : > { %3274 = vmatmul.mubr.msk.f32.vlgmr.msra.gmra.mrb[42].mxu1 %vm859_vm3, %v2411_v58  ;;  %v2403_v61 = vmul.f32 %v2969_v54, %v2394_v59  ;;  %3419 = vmatpush3.bf16.msra.mxu0 %v3418_v27 }
 0xdf9   : > { %v3604_v62 = vpop.eup %3603  ;;  %3276 = vmatprep.mubr.msk.f32.mxu1 %vm3656_vm5, %v3657_v13  ;;  %3420 = vmatprep.subr.bf16.mxu0 %v3655_v10 }
 0xdfa   : > { %v2412_v0 = vadd.f32 %v2970_v53, %v2403_v61  ;;  %v2395_v1 = vmul.f32 %v3604_v62, %v2371_v33 }
 0xdfc   : > { %3277 = vmatmul.mubr.msk.f32.gmra.mrb[44].mxu1 %vm859_vm3, %v2412_v0  ;;  %v2404_v3 = vmul.f32 %v2969_v54, %v2395_v1  ;;  %3422 = vmatpush3.bf16.msra.mxu0 %v3421_v30 }
 0xdfd   : > { %3279 = vmatprep.mubr.msk.f32.mxu1 %vm3656_vm5, %v3657_v13 }
 0xdfe   : > { %v2413_v4 = vadd.f32 %v2970_v53, %v2404_v3  ;;  %v2975_v3 = vld [vmem:[%s725_s2] ss:$0 sm:$0xff] }
 0xe00   : > { %3280 = vmatmul.mubr.msk.f32.gmra.mrb[46].mxu1 %vm859_vm3, %v2413_v4 }
 0xecb   : > { %v2500_v32 = vpop.f32.mrb[42].mxu1 }
 0xecc   : > { %v2501_v33 = vadd.f32 %v2971_v31, %v2500_v32  ;;  %v3275_v34 = vpop.f32.mrb[43].mxu1 }
 0xece   : > { %v2514_v35 = vmul.f32 %v2501_v33, %v2501_v33 }
 0xecf   : > { %v2505_v36 = vpop.f32.mrb[44].mxu1 }
 0xed0   : > { %v2517_v37 = vmul.f32 %v2514_v35, %v2501_v33  ;;  %v2506_v38 = vadd.f32 %v2971_v31, %v2505_v36  ;;  %v3278_v39 = vpop.f32.mrb[45].mxu1 }
 0xed2   : > { %v2520_v40 = vmul.f32 0.044715, %v2517_v37  ;;  %v2515_v41 = vmul.f32 %v2506_v38, %v2506_v38 }
 0xed3   : > { %v2510_v10 = vpop.f32.mrb[46].mxu1 }
 0xed4   : > { %v2523_v44 = vadd.f32 %v2520_v40, %v2501_v33  ;;  %v2518_v45 = vmul.f32 %v2515_v41, %v2506_v38  ;;  %v2511_v47 = vadd.f32 %v2971_v31, %v2510_v10  ;;  %v3281_v43 = vpop.f32.mrb[47].mxu1 }
 0xed6   : > { %v2526_v60 = vmul.f32 0.7978846, %v2523_v44  ;;  %v2521_v42 = vmul.f32 0.044715, %v2518_v45  ;;  %v2516_v46 = vmul.f32 %v2511_v47, %v2511_v47 }
 0xed8   : > { %3605 = vtanh.f32 %v2526_v60  ;;  %v2524_v63 = vadd.f32 %v2521_v42, %v2506_v38  ;;  %v2519_v48 = vmul.f32 %v2516_v46, %v2511_v47 }
 0xeda   : > { %v2527_v49 = vmul.f32 0.7978846, %v2524_v63  ;;  %v2522_v50 = vmul.f32 0.044715, %v2519_v48 }
 0xedc   : > { %v2525_v2 = vadd.f32 %v2522_v50, %v2511_v47  ;;  %3607 = vtanh.f32 %v2527_v49 }
 0xede   : > { %v2528_v51 = vmul.f32 0.7978846, %v2525_v2 }
 0xee0   : > { %3609 = vtanh.f32 %v2528_v51 }
 0xee2   : > { %v3606_v52 = vpop.eup %3605 }
 0xee3   : > { %v2532_v54 = vadd.f32 1.0, %v3606_v52 }
 0xee5   : > { %v2535_v55 = vmul.f32 0.5, %v2532_v54 }
 0xee6   : > { %v3608_v53 = vpop.eup %3607 }
 0xee7   : > { %v2538_v56 = vmul.f32 %v2535_v55, %v2501_v33  ;;  %v2533_v57 = vadd.f32 1.0, %v3608_v53 }
 0xee9   : > { %3315 = vmatmul.mubr.f32.vlgmr.msra.gmra.mrb[36].mxu0 %v2538_v56  ;;  %v2536_v58 = vmul.f32 0.5, %v2533_v57 }
 0xeea   : > { %v3610_v59 = vpop.eup %3609  ;;  %3317 = vmatprep.mubr.msk.f32.mxu0 %vm3656_vm5, %v3657_v13 }
 0xeeb   : > { %v2539_v61 = vmul.f32 %v2536_v58, %v2506_v38  ;;  %v2534_v62 = vadd.f32 1.0, %v3610_v59 }
 0xeed   : > { %3318 = vmatmul.mubr.f32.gmra.mrb[38].mxu0 %v2539_v61  ;;  %v2537_v0 = vmul.f32 0.5, %v2534_v62 }
 0xeee   : > { %3320 = vmatprep.mubr.msk.f32.mxu0 %vm3656_vm5, %v3657_v13 }
 0xeef   : > { %v2540_v1 = vmul.f32 %v2537_v0, %v2511_v47 }
 0xef1   : > { %3321 = vmatmul.mubr.f32.gmra.mrb[40].mxu0 %v2540_v1 }
 0xfbc   : > { %v2630_v4 = vpop.f32.mrb[36].mxu0 }
 0xfbd   : > { %v2631_v6 = vadd.f32 %v2975_v3, %v2630_v4  ;;  %v3316_v7 = vpop.f32.mrb[37].mxu0 }
 0xfbf   : > { %v2644_v8 = vadd.f32 %v2631_v6, %v4239_v5 }
 0xfc0   : > { %v2635_v9 = vpop.f32.mrb[38].mxu0 }
 0xfc1   : > { %2647 = vst.msk [vmem:[#allocation2] sm:$0xff] %vm859_vm3, %v2644_v8  ;;  %v2636_v11 = vadd.f32 %v2975_v3, %v2635_v9  ;;  %v3319_v12 = vpop.f32.mrb[39].mxu0  ;;  %2654 = vst.msk [vmem:[%s3855_s5] sm:$0xff] (!%p2976_p8), %vm859_vm3, %v2644_v8 }
 0xfc3   : > { %v2645_v15 = vadd.f32 %v2636_v11, %v4243_v14  ;;  %2653 = sbr.rel (%p2976_p8) target bundleno = 4042 (0xfca), region = 92 }
 0xfc4   : > { %v2640_v13 = vpop.f32.mrb[40].mxu0 }
 0xfc5   : > { %2648 = vst.msk [vmem:[#allocation2 + $0x8] sm:$0xff] %vm859_vm3, %v2645_v15  ;;  %v2641_v16 = vadd.f32 %v2975_v3, %v2640_v13  ;;  %v3322_v17 = vpop.f32.mrb[41].mxu0  ;;  %2655 = vst.msk [vmem:[%s3855_s5 + $0x8] sm:$0xff] (!%p2976_p8), %vm859_vm3, %v2645_v15 }
 0xfc7   : > { %v2646_v18 = vadd.f32 %v2641_v16, %v4247_v20 }
 0xfc9   : > { %2649 = vst.msk [vmem:[#allocation2 + $0x10] sm:$0x1] %vm866_vm4, %v2646_v18 }
 0xfca PF: > { %s4409_s2 = sld [smem:[#allocation3_spill]] }
 0xfd0   : > { %p2977_p9 = scmp.ne.s32.totalorder %s4409_s2, 7 }
 0xfd1   : > { %s3669_s21 = smov (!%p2977_p9), 32   ;;  %vm2668_vm11 = vcmask (!%p2977_p9), 523520  }
 0xfd2   : > { %2659 = sbr.rel (%p2977_p9) target bundleno = 4170 (0x104a), region = 96  ;;  %2662 = vrot.lane.b32.xlu0 (!%p2977_p9), %v2644_v8, %s3669_s21 }
 0xfd6   : > { %2664 = vrot.lane.b32.xlu0 (!%p2977_p9), %v2645_v15, %s3669_s21 }
0x1044   : > { %v2663_v5 = vpop.permute.xlu0 %2662 }
0x1045   : > { %2669 = vst.msk [vmem:[%s3855_s5] sm:$0xff] %vm2668_vm11, %v2663_v5 }
0x1048   : > { %v2665_v14 = vpop.permute.xlu0 %2664 }
0x1049   : > { %2670 = vst.msk [vmem:[%s3855_s5 + $0x8] sm:$0xff] %vm2668_vm11, %v2665_v14 }
0x104a PF: > { %s4410_s4 = sld [smem:[#allocation3_spill]] }
0x1050   : > { %p2978_p10 = scmp.ne.s32.totalorder %s4410_s4, 8 }
0x1051   : > { %s3670_s20 = smov (!%p2978_p10), 64   ;;  %vm2683_vm12 = vcmask (!%p2978_p10), 785920  }
0x1052   : > { %2674 = sbr.rel (%p2978_p10) target bundleno = 4298 (0x10ca), region = 100  ;;  %2677 = vrot.lane.b32.xlu0 (!%p2978_p10), %v2644_v8, %s3670_s20 }
0x1056   : > { %2679 = vrot.lane.b32.xlu0 (!%p2978_p10), %v2645_v15, %s3670_s20 }
0x10c4   : > { %v2678_v20 = vpop.permute.xlu0 %2677 }
0x10c5   : > { %2684 = vst.msk [vmem:[%s3855_s5] sm:$0xff] %vm2683_vm12, %v2678_v20 }
0x10c8   : > { %v2680_v19 = vpop.permute.xlu0 %2679 }
0x10c9   : > { %2685 = vst.msk [vmem:[%s3855_s5 + $0x8] sm:$0xff] %vm2683_vm12, %v2680_v19 }
0x10ca PF: > { %s4411_s8 = sld [smem:[#allocation3_spill]] }
0x10d0   : > { %p2979_p11 = scmp.ne.s32.totalorder %s4411_s8, 9 }
0x10d1   : > { %s3671_s18 = smov (!%p2979_p11), 96   ;;  %vm2698_vm13 = vcmask (!%p2979_p11), 1048320  }
0x10d2   : > { %2689 = sbr.rel (%p2979_p11) target bundleno = 4426 (0x114a), region = 104  ;;  %2692 = vrot.lane.b32.xlu0 (!%p2979_p11), %v2644_v8, %s3671_s18 }
0x10d6   : > { %2694 = vrot.lane.b32.xlu0 (!%p2979_p11), %v2645_v15, %s3671_s18 }
0x1144   : > { %v2693_v21 = vpop.permute.xlu0 %2692 }
0x1145   : > { %2699 = vst.msk [vmem:[%s3855_s5] sm:$0xff] %vm2698_vm13, %v2693_v21 }
0x1148   : > { %v2695_v22 = vpop.permute.xlu0 %2694 }
0x1149   : > { %2700 = vst.msk [vmem:[%s3855_s5 + $0x8] sm:$0xff] %vm2698_vm13, %v2695_v22 }
0x114a PF: > { %s4412_s19 = sld [smem:[#allocation6_spill]]  ;;  %s4413_s21 = sld [smem:[#allocation4_spill]] }
0x114b   : > { %s4414_s22 = sld [smem:[#allocation5_spill]]  ;;  %s4415_s23 = sld [smem:[#allocation7_spill]] }
0x114c   : > { %s4416_s24 = sld [smem:[#allocation8_spill]] }
0x1150   : > { %s26_s25 = sadd.s32 1, %s4412_s19  }
0x1151   : > { %p23_p12 = scmp.ge.s32.totalorder %s26_s25, 22  }
0x1153   :  { %25 = sbr.rel (!%p23_p12) target bundleno = 9 (0x9), region = 170 }

// kernel: maniqa_forward.10
= control target key start
LH: loop header
LB: loop body
LE: loop exit
PB: predicated region body
PF: predicated region fallthrough
CT: control target
= control target key end

     0   :  { %s2330_s29 = smov 0   ;;  %s2332_s30 = smov 0   ;;  %s2590_s0 = inlined_call_operand.vmem [shape: f32[32,32], index: 0, kind: input, shape index: {}]   ;;  %s2591_s1 = inlined_call_operand.vmem [shape: f32[4,2,16,16], index: 1, kind: input, shape index: {}]   ;;  %s2592_s2 = inlined_call_operand.vmem [shape: f32[4,1,32], index: 2, kind: input, shape index: {}]   ;;  %s2593_s3 = inlined_call_operand.vmem [shape: f32[4,1,32], index: 3, kind: input, shape index: {}]   ;;  %s2594_s4 = inlined_call_operand.vmem [shape: f32[4,32,96], index: 4, kind: input, shape index: {}]   ;;  %s2595_s5 = inlined_call_operand.vmem [shape: f32[4,1,96], index: 5, kind: input, shape index: {}]   ;;  %s2596_s6 = inlined_call_operand.vmem [shape: f32[4,32,32], index: 6, kind: input, shape index: {}]   ;;  %s2597_s7 = inlined_call_operand.vmem [shape: f32[4,1,32], index: 7, kind: input, shape index: {}]   ;;  %s2598_s8 = inlined_call_operand.vmem [shape: f32[4,1,32], index: 8, kind: input, shape index: {}]   ;;  %s2599_s9 = inlined_call_operand.vmem [shape: f32[4,1,32], index: 9, kind: input, shape index: {}]   ;;  %s2600_s10 = inlined_call_operand.vmem [shape: f32[4,32,32], index: 10, kind: input, shape index: {}]   ;;  %s2601_s11 = inlined_call_operand.vmem [shape: f32[4,1,32], index: 11, kind: input, shape index: {}]   ;;  %s2602_s12 = inlined_call_operand.vmem [shape: f32[4,32,32], index: 12, kind: input, shape index: {}]   ;;  %s2603_s13 = inlined_call_operand.vmem [shape: f32[4,1,32], index: 13, kind: input, shape index: {}]   ;;  %s2604_s14 = inlined_call_operand.vmem [shape: f32[32,32], index: 14, kind: output, shape index: {}]  }
   0x1   :  { %2609 = sst [smem:[#allocation8_spill]] %s2590_s0  ;;  %s2334_s15 = smov 0  }
   0x2   :  { %2610 = sst [smem:[#allocation9_spill]] %s2591_s1  ;;  %s2336_s16 = smov 0  }
   0x3   :  { %2611 = sst [smem:[#allocation10_spill]] %s2594_s4  ;;  %s2338_s17 = smov 0  }
   0x4   :  { %2612 = sst [smem:[#allocation11_spill]] %s2596_s6 }
   0x5   :  { %2613 = sst [smem:[#allocation12_spill]] %s2598_s8 }
   0x6   :  { %2614 = sst [smem:[#allocation13_spill]] %s2599_s9 }
   0x7   :  { %2615 = sst [smem:[#allocation14_spill]] %s2602_s12 }
   0x8   :  { %2616 = sst [smem:[#allocation15_spill]] %s2603_s13 }
   0x9   :  { %2617 = sst [smem:[#allocation16_spill]] %s2604_s14 }
   0xa LB: > { %2618 = sst [smem:[#allocation2_spill]] %s2232_s29  ;;  %s33_s18 = sadd.s32 1, %s2240_s15  ;;  %s2248_s17 = sphi %s2338_s17, %s24_s17   ;;  %s2244_s16 = sphi %s2336_s16, %s2649_s16   ;;  %s2240_s15 = sphi %s2334_s15, %s2648_s15   ;;  %s2236_s30 = sphi %s2332_s30, %s2647_s30   ;;  %s2232_s29 = sphi %s2330_s29, %s2646_s29  }
   0xb   : > { %2619 = sst [smem:[#allocation3_spill]] %s2240_s15  ;;  %s36_s19 = sadd.s32 1, %s2244_s16 }
   0xc   : > { %2620 = sst [smem:[#allocation4_spill]] %s2244_s16  ;;  %p34_p0 = scmp.ge.s32.totalorder %s33_s18, 4 }
   0xd   : > { %2621 = sst [smem:[#allocation5_spill]] %s2248_s17  ;;  %p1891_p1 = scmp.ge.s32.totalorder %s2248_s17, 1 }
   0xe   : > { %p539_p2 = scmp.lt.s32.totalorder %s2248_s17, 9  ;;  %s2651_s18 = smov (%p34_p0, %s33_s18), 0 }
   0xf   : > { %2622 = sst [smem:[#allocation6_spill]] %s2651_s18  ;;  %s2653_s19 = smov (!%p34_p0, %s36_s19), %s2244_s16 }
  0x10   : > { %p540_p3 = pnand %p1891_p1, %p539_p2  ;;  %p38_p4 = scmp.ge.s32.totalorder %s2653_s19, 2 }
  0x11   : > { %s1892_s20 = sshll.u32 (!%p540_p3), %s2236_s30, 1  ;;  %p640_p5 = scmp.lt.s32.totalorder (!%p540_p3), %s2232_s29, 3 }
  0x12   : > { %s2655_s19 = smov (%p38_p4, %s2653_s19), 0  ;;  %543 = sbr.rel (%p540_p3) target bundleno = 3016 (0xbc8), region = 76 }
  0x13   : > { %2623 = sst [smem:[#allocation7_spill]] %s2655_s19  ;;  %p635_p6 = scmp.lt.s32.totalorder (!%p540_p3), %s1892_s20, 3 }
  0x14   : > { %s2624_s1 = sld [smem:[#allocation9_spill]] (!%p540_p3)  ;;  %s2625_s0 = sld [smem:[#allocation8_spill]] (!%p540_p3) }
  0x15   : > { %s2626_s4 = sld [smem:[#allocation10_spill]] (!%p540_p3)  ;;  %s2627_s6 = sld [smem:[#allocation11_spill]] (!%p540_p3) }
  0x16   : > { %s2630_s19 = sld [smem:[#allocation14_spill]] (!%p540_p3) }
  0x19   : > { %s2364_s21 = scalar_select %p640_p5, %s2232_s29, 3 }
  0x1a   : > { %s2657_s20 = smov (!%p635_p6, %s1892_s20), 3  ;;  %s2631_s29 = sld [smem:[#allocation15_spill]] }
  0x1b   : > { %s1941_s22 = sshll.u32 %s2364_s21, 5  ;;  %s1893_s26 = sshll.u32 %s2657_s20, 3 }
  0x1c   : > { %s2374_s30 = scalar_lea.vmem %s2624_s1, %s1941_s22  ;;  %s638_s16 = scalar_lea.vmem %s2625_s0, %s1893_s26 }
  0x1d   : > { %s2386_s12 = scalar_lea.vmem %s2626_s4, %s1941_s22  ;;  %s2395_s25 = scalar_lea.vmem %s2627_s6, %s1941_s22 }
  0x1e   : > { %s2412_s20 = scalar_lea.vmem %s2600_s10, %s1941_s22  ;;  %s680_s24 = scalar_lea.vmem %s2601_s11, %s2364_s21 }
  0x1f   : > { %s2421_s0 = scalar_lea.vmem %s2630_s19, %s1941_s22  ;;  %s2632_s1 = sld [smem:[#allocation16_spill]] }
  0x20   : > { %s688_s8 = scalar_lea.vmem %s2631_s29, %s2364_s21  ;;  %s2633_s4 = sld [smem:[#allocation2_spill]] }
  0x25   : > { %s2430_s9 = scalar_lea.vmem %s2632_s1, %s1893_s26 }
  0x26   : > { %p1906_p7 = scmp.ne.s32.totalorder %s2633_s4, 0 }
  0x27   : > { %v699_v0 = vld [vmem:[%s638_s16] sm:$0xff] (!%p1906_p7)  ;;  %vm701_vm0 = vcmask (!%p1906_p7), 261120   ;;  %v700_v1 = vld [vmem:[%s638_s16 + $0x8] sm:$0xff] (!%p1906_p7) }
  0x28   : > { %698 = sbr.rel (%p1906_p7) target bundleno = 47 (0x2f), region = 80  ;;  %702 = vst.msk [vmem:[%s2430_s9] sm:$0xff] (!%p1906_p7), %vm701_vm0, %v699_v0  ;;  %703 = vst.msk [vmem:[%s2430_s9 + $0x8] sm:$0xff] (!%p1906_p7), %vm701_vm0, %v700_v1 }
  0x2f PF: > { %v2436_v2 = vld [vmem:[%s2430_s9] sm:$0xff]  ;;  %vm708_vm1 = vcmask 261120   ;;  %v2439_v3 = vld [vmem:[%s2430_s9 + $0x8] sm:$0xff]  ;;  %v754_v18 = vld [vmem:[%s2386_s12 + $0x10] sm:$0xff]  ;;  %s2635_s22 = scalar_lea.vmem %s2593_s3, %s2364_s21  ;;  %s2636_s27 = scalar_lea.vmem %s2595_s5, %s2364_s21  ;;  %vm856_vm2 = vcmask 130048  }
  0x30   : > { %v709_v4 = vsel %vm708_vm1, %v2436_v2, 0.0  ;;  %v712_v5 = vsel %vm708_vm1, %v2439_v3, 0.0  ;;  %v752_v16 = vld [vmem:[%s2386_s12] sm:$0xff]  ;;  %v753_v17 = vld [vmem:[%s2386_s12 + $0x8] sm:$0xff]  ;;  %v755_v20 = vld [vmem:[%s2386_s12 + $0x18] sm:$0xff]  ;;  %s2634_s12 = scalar_lea.vmem %s2592_s2, %s2364_s21  ;;  %s2250_s28 = smov 96  }
  0x31   : > { %710 = vadd.xlane.f32.xlu0 %v709_v4  ;;  %v2063_v19 = vpack.c.bf16 %v753_v17, %v752_v16  ;;  %v2067_v21 = vpack.c.bf16 %v755_v20, %v754_v18  ;;  %v1907_v29 = vld [vmem:[%s2634_s12] ss:$0 sm:$0xff]  ;;  %s2251_s18 = smov 80   ;;  %s2252_s19 = smov 112   ;;  %vm2477_vm3 = vmpackc.low %vm856_vm2, %vm856_vm2  ;;  %v849_v54 = vld [vmem:[%s2374_s30 + $0x8] sm:$0xff] }
  0x32   : > { %v1908_v31 = vld [vmem:[%s2635_s22] ss:$0 sm:$0xff]  ;;  %s2253_s15 = smov 64   ;;  %s2254_s17 = smov 48  }
  0x33   : > { %2064 = vmatprep.subr.bf16.mxu0 %v2063_v19  ;;  %v1909_v38 = vld [vmem:[%s2636_s27] ss:$0 sm:$0xff]  ;;  %s2639_s14 = scalar_lea.vmem %s2597_s7, %s2364_s21  ;;  %s2640_s1 = sld [smem:[#allocation12_spill]] }
  0x34   : > { %2066 = vmatpush3.bf16.msra.mxu0 %v2063_v19  ;;  %v848_v51 = vld [vmem:[%s2374_s30] sm:$0xff]  ;;  %s2642_s29 = sld [smem:[#allocation13_spill]] }
  0x35   : > { %713 = vadd.xlane.f32.xlu0 %v712_v5  ;;  %2068 = vmatprep.subr.bf16.mxu0 %v2067_v21 }
  0x38   : > { %2070 = vmatpush3.bf16.msra.mxu0 %v2067_v21 }
  0x39   : > { %s2641_s6 = scalar_lea.vmem %s2640_s1, %s2364_s21 }
  0x3a   : > { %s2643_s16 = scalar_lea.vmem %s2642_s29, %s2364_s21 }
  0xbe   : > { %v711_v6 = vpop.xlane.xlu0 %710 }
  0xbf   : > { %v716_v7 = vmul.f32 0.03125, %v711_v6 }
  0xc1   : > { %v718_v8 = vsub.f32 %v2436_v2, %v716_v7 }
  0xc2   : > { %v714_v9 = vpop.xlane.xlu0 %713 }
  0xc3   : > { %v717_v10 = vmul.f32 0.03125, %v714_v9  ;;  %v720_v11 = vmul.f32 %v718_v8, %v718_v8 }
  0xc5   : > { %v719_v12 = vsub.f32 %v2439_v3, %v717_v10  ;;  %v722_v13 = vsel %vm708_vm1, %v720_v11, 0.0 }
  0xc6   : > { %723 = vadd.xlane.f32.xlu1 %v722_v13 }
  0xc7   : > { %v721_v14 = vmul.f32 %v719_v12, %v719_v12 }
  0xc9   : > { %v725_v15 = vsel %vm708_vm1, %v721_v14, 0.0 }
  0xca   : > { %726 = vadd.xlane.f32.xlu1 %v725_v15 }
 0x153   : > { %v724_v22 = vpop.xlane.xlu1 %723 }
 0x154   : > { %v728_v23 = vmul.f32 0.03125, %v724_v22 }
 0x156   : > { %v730_v24 = vadd.f32 1e-05, %v728_v23 }
 0x157   : > { %v727_v25 = vpop.xlane.xlu1 %726 }
 0x158   : > { %2182 = vrsqrt.f32 %v730_v24  ;;  %v729_v26 = vmul.f32 0.03125, %v727_v25 }
 0x15a   : > { %v731_v27 = vadd.f32 1e-05, %v729_v26  ;;  %v1919_v26 = vld [vmem:[%s2374_s30 + $0x18] sm:$0xff] }
 0x15c   : > { %2184 = vrsqrt.f32 %v731_v27 }
 0x162   : > { %v2183_v28 = vpop.eup %2182 }
 0x163   : > { %v734_v30 = vmul.f32 %v2183_v28, %v718_v8 }
 0x165   : > { %v742_v32 = vmul.f32 %v1907_v29, %v734_v30 }
 0x166   : > { %v2185_v33 = vpop.eup %2184 }
 0x167   : > { %v735_v34 = vmul.f32 %v2185_v33, %v719_v12  ;;  %v750_v35 = vadd.f32 %v1908_v31, %v742_v32 }
 0x169   : > { %v743_v36 = vmul.f32 %v1907_v29, %v735_v34  ;;  %1996 = vmatprep.mubr.msk.f32.mxu0 %vm708_vm1, %v750_v35  ;;  %v1918_v29 = vld [vmem:[%s2374_s30 + $0x10] sm:$0xff] }
 0x16b   : > { %v751_v37 = vadd.f32 %v1908_v31, %v743_v36 }
 0x16d   : > { %1997 = vmatmul.mubr.msk.f32.vlgmr.msra.gmra.mrb[0].mxu0 %vm708_vm1, %v751_v37 }
 0x240   : > { %v1998_v39 = vpop.f32.mrb[0].mxu0 }
 0x241   : > { %v841_v40 = vadd.f32 %v1998_v39, %v1909_v38  ;;  %v835_v41 = vpop.f32.mrb[1].mxu0 }
 0x242   : > { %v836_v42 = vadd.f32 %v1909_v38, %v835_v41 }
 0x244   : > { %2003 = vmatprep.mubr.msk.f32.mxu1 %vm856_vm2, %v836_v42  ;;  %v2471_v43 = vpack.i.bf16 %v841_v40, %v836_v42 }
 0x246   : > { %2163 = vrot.lane.b32.xlu0 %v2471_v43, %s2250_s28 }
 0x24a   : > { %2173 = vrot.lane.b32.xlu0 %v2471_v43, %s2251_s18 }
 0x24e   : > { %1056 = vrot.lane.b32.xlu0 %v836_v42, %s2252_s19 }
 0x252   : > { %1058 = vrot.lane.b32.xlu0 %v841_v40, %s2252_s19 }
 0x2b8   : > { %v2164_v44 = vpop.permute.xlu0 %2163 }
 0x2b9   : > { %v2166_v45 = vunpack.i.h.bf16 %v2164_v44  ;;  %v2165_v46 = vunpack.i.l.bf16 %v2164_v44 }
 0x2bb   : > { %v2071_v48 = vpack.c.bf16 %v2166_v45, %v2165_v46 }
 0x2bc   : > { %v2174_v9 = vpop.permute.xlu0 %2173 }
 0x2bd   : > { %2073 = vmatprep.subr.msk.bf16.mxu1 %vm2477_vm3, %v2071_v48  ;;  %v2176_v11 = vunpack.i.h.bf16 %v2174_v9  ;;  %v2175_v12 = vunpack.i.l.bf16 %v2174_v9 }
 0x2be   : > { %2076 = vmatpush3.bf16.xpose.msk.msra.mxu1 %vm2477_vm3, %v2071_v48 }
 0x2bf   : > { %v2081_v16 = vpack.c.bf16 %v2176_v11, %v2175_v12 }
 0x2c0   : > { %v1057_v21 = vpop.permute.xlu0 %1056 }
 0x2c4   : > { %v1059_v22 = vpop.permute.xlu0 %1058 }
 0x2c5   : > { %2004 = vmatmul.mubr.msk.f32.vlgmr.msra.gmra.mrb[0].mxu1 %vm856_vm2, %v841_v40 }
 0x398   : > { %v2005_v49 = vpop.f32.mrb[0].mxu1 }
 0x399   : > { %v931_v50 = vpop.f32.mrb[1].mxu1  ;;  %v941_v52 = vmul.f32 0.25, %v2005_v49  ;;  %v846_v49 = vld [vmem:[%s2395_s25 + $0x10] sm:$0xff] }
 0x39a   : > { %v940_v53 = vmul.f32 0.25, %v931_v50  ;;  %v847_v50 = vld [vmem:[%s2395_s25 + $0x18] sm:$0xff] }
 0x39b   : > { %v943_v57 = vadd.f32 %v941_v52, %v849_v54 }
 0x39c   : > { %v942_v55 = vadd.f32 %v940_v53, %v848_v51  ;;  %v2091_v51 = vpack.c.bf16 %v847_v50, %v846_v49 }
 0x39d   : > { %v947_v58 = vsel %vm856_vm2, %v943_v57, -inf }
 0x39e   : > { %v944_v56 = vsel %vm856_vm2, %v942_v55, -inf }
 0x39f   : > { %945 = vmax.xlane.f32.xlu1 %v944_v56 }
 0x3a3   : > { %948 = vmax.xlane.f32.xlu1 %v947_v58  ;;  %v844_v58 = vld [vmem:[%s2395_s25] sm:$0xff] }
 0x42c   : > { %v946_v59 = vpop.xlane.xlu1 %945 }
 0x42d   : > { %v950_v60 = vsub.f32 %v942_v55, %v946_v59  ;;  %v845_v59 = vld [vmem:[%s2395_s25 + $0x8] sm:$0xff] }
 0x42f   : > { %v952_v63 = vmul.f32 1.442695, %v950_v60  ;;  %v2095_v60 = vpack.c.bf16 %v845_v59, %v844_v58 }
 0x430   : > { %v949_v61 = vpop.xlane.xlu1 %948 }
 0x431   : > { %v951_v62 = vsub.f32 %v943_v57, %v949_v61 }
 0x433   : > { %v954_v0 = vmul.f32 1.442695, %v951_v62 }
 0x435   : > { %2186 = vpow2.f32 %v954_v0 }
 0x436   : > { %2188 = vpow2.f32 %v952_v63  ;;  %v1930_v63 = vld [vmem:[%s2639_s14] ss:$0 sm:$0xff] }
 0x43f   : > { %v2187_v1 = vpop.eup %2186 }
 0x440   : > { %v959_v4 = vsel %vm856_vm2, %v2187_v1, 0.0  ;;  %v2189_v5 = vpop.eup %2188 }
 0x441   : > { %960 = vadd.xlane.f32.xlu1 %v959_v4  ;;  %v956_v6 = vsel %vm856_vm2, %v2189_v5, 0.0 }
 0x445   : > { %957 = vadd.xlane.f32.xlu1 %v956_v6 }
 0x456   : > { %2168 = vrot.lane.b32.xlu1 %v2471_v43, %s2253_s15 }
 0x4ce   : > { %v961_v7 = vpop.xlane.xlu1 %960 }
 0x4cf   : > { %2190 = vrcp.f32 %v961_v7 }
 0x4d2   : > { %v958_v8 = vpop.xlane.xlu1 %957 }
 0x4d3   : > { %2192 = vrcp.f32 %v958_v8 }
 0x4d6   : > { %v2169_v10 = vpop.permute.xlu1 %2168 }
 0x4d7   : > { %v2171_v13 = vunpack.i.h.bf16 %v2169_v10  ;;  %v2170_v14 = vunpack.i.l.bf16 %v2169_v10 }
 0x4d9   : > { %v2077_v15 = vpack.c.bf16 %v2171_v13, %v2170_v14  ;;  %v2191_v17 = vpop.eup %2190 }
 0x4da   : > { %v965_v20 = vmul.f32 %v2191_v17, %v2187_v1 }
 0x4db   : > { %2078 = vmatprep.subr.bf16.mxu1 %v2077_v15 }
 0x4dc   : > { %2080 = vmatpush3.bf16.msra.mxu1 %v2077_v15 }
 0x4dd   : > { %v2193_v18 = vpop.eup %2192  ;;  %2083 = vmatprep.subr.msk.bf16.mxu1 %vm2477_vm3, %v2081_v16 }
 0x4de   : > { %v964_v19 = vmul.f32 %v2193_v18, %v2189_v5 }
 0x4e0   : > { %2010 = vmatprep.mubr.msk.f32.mxu1 %vm856_vm2, %v964_v19 }
 0x4e1   : > { %2011 = vmatmul.mubr.msk.f32.vlgmr.msra.gmra.mrb[2].mxu1 %vm856_vm2, %v965_v20  ;;  %v1479_v20 = vld [vmem:[%s2412_s20] sm:$0xff] }
 0x4e2   : > { %2017 = vmatprep.mubr.msk.f32.mxu1 %vm856_vm2, %v1057_v21  ;;  %v1480_v21 = vld [vmem:[%s2412_s20 + $0x8] sm:$0xff] }
 0x4e5   : > { %2086 = vmatpush3.bf16.xpose.msk.msra.mxu1 %vm2477_vm3, %v2081_v16 }
 0x4ec   : > { %2018 = vmatmul.mubr.msk.f32.vlgmr.msra.gmra.mrb[4].mxu1 %vm856_vm2, %v1059_v22  ;;  %v2099_v22 = vpack.c.bf16 %v1480_v21, %v1479_v20 }
 0x4ee   : > { %2100 = vmatprep.subr.bf16.mxu1 %v2099_v22 }
 0x4ef   : > { %2102 = vmatpush3.bf16.msra.mxu1 %v2099_v22 }
 0x5b4   : > { %v2012_v23 = vpop.f32.mrb[2].mxu1 }
 0x5b5   : > { %v1044_v24 = vpop.f32.mrb[3].mxu1 }
 0x5bf   : > { %v2019_v25 = vpop.f32.mrb[4].mxu1 }
 0x5c0   : > { %v1148_v27 = vmul.f32 0.25, %v2019_v25  ;;  %v1138_v28 = vpop.f32.mrb[5].mxu1 }
 0x5c1   : > { %v1147_v30 = vmul.f32 0.25, %v1138_v28 }
 0x5c2   : > { %v1150_v31 = vadd.f32 %v1919_v26, %v1148_v27 }
 0x5c3   : > { %v1149_v32 = vadd.f32 %v1918_v29, %v1147_v30 }
 0x5c4   : > { %v1154_v33 = vsel %vm856_vm2, %v1150_v31, -inf }
 0x5c5   : > { %1155 = vmax.xlane.f32.xlu0 %v1154_v33  ;;  %v1151_v34 = vsel %vm856_vm2, %v1149_v32, -inf  ;;  %v1931_v33 = vld [vmem:[%s2641_s6] ss:$0 sm:$0xff] }
 0x5c6   : > { %1152 = vmax.xlane.f32.xlu1 %v1151_v34 }
 0x5d7   : > { %2178 = vrot.lane.b32.xlu1 %v2471_v43, %s2254_s17 }
 0x652   : > { %v1156_v35 = vpop.xlane.xlu0 %1155 }
 0x653   : > { %v1158_v36 = vsub.f32 %v1150_v31, %v1156_v35  ;;  %v1153_v37 = vpop.xlane.xlu1 %1152  ;;  %v1932_v35 = vld [vmem:[%s2643_s16] ss:$0 sm:$0xff] }
 0x654   : > { %v1157_v38 = vsub.f32 %v1149_v32, %v1153_v37 }
 0x655   : > { %v1161_v39 = vmul.f32 1.442695, %v1158_v36 }
 0x656   : > { %v1159_v40 = vmul.f32 1.442695, %v1157_v38 }
 0x657   : > { %v2179_v41 = vpop.permute.xlu1 %2178 }
 0x658   : > { %2194 = vpow2.f32 %v1159_v40  ;;  %v2181_v42 = vunpack.i.h.bf16 %v2179_v41  ;;  %v2180_v44 = vunpack.i.l.bf16 %v2179_v41 }
 0x659   : > { %2196 = vpow2.f32 %v1161_v39 }
 0x65a   : > { %v2087_v45 = vpack.c.bf16 %v2181_v42, %v2180_v44  ;;  %v1589_v42 = vld [vmem:[%s2421_s0] sm:$0xff]  ;;  %v1590_v44 = vld [vmem:[%s2421_s0 + $0x8] sm:$0xff] }
 0x65c   : > { %2088 = vmatprep.subr.bf16.mxu0 %v2087_v45 }
 0x65d   : > { %2090 = vmatpush3.bf16.msra.mxu0 %v2087_v45  ;;  %v2107_v45 = vpack.c.bf16 %v1590_v44, %v1589_v42 }
 0x65e   : > { %2092 = vmatprep.subr.bf16.mxu0 %v2091_v51 }
 0x662   : > { %v2195_v46 = vpop.eup %2194 }
 0x663   : > { %v1163_v47 = vsel %vm856_vm2, %v2195_v46, 0.0  ;;  %v2197_v43 = vpop.eup %2196 }
 0x664   : > { %1164 = vadd.xlane.f32.xlu0 %v1163_v47  ;;  %v1166_v48 = vsel %vm856_vm2, %v2197_v43, 0.0  ;;  %v1592_v47 = vld [vmem:[%s2421_s0 + $0x18] sm:$0xff] }
 0x668   : > { %1167 = vadd.xlane.f32.xlu0 %v1166_v48  ;;  %v1933_v48 = vld [vmem:[%s680_s24] ss:$0 sm:$0xff] }
 0x6f1   : > { %v1165_v52 = vpop.xlane.xlu0 %1164 }
 0x6f2   : > { %2198 = vrcp.f32 %v1165_v52 }
 0x6f5   : > { %v1168_v53 = vpop.xlane.xlu0 %1167 }
 0x6f6   : > { %2200 = vrcp.f32 %v1168_v53 }
 0x6fc   : > { %v2199_v54 = vpop.eup %2198 }
 0x6fd   : > { %v1171_v55 = vmul.f32 %v2199_v54, %v2195_v46  ;;  %v1591_v46 = vld [vmem:[%s2421_s0 + $0x10] sm:$0xff] }
 0x6ff   : > { %2024 = vmatprep.mubr.msk.f32.mxu0 %vm856_vm2, %v1171_v55 }
 0x700   : > { %v2201_v56 = vpop.eup %2200 }
 0x701   : > { %v1172_v57 = vmul.f32 %v2201_v56, %v2197_v43  ;;  %v2111_v43 = vpack.c.bf16 %v1592_v47, %v1591_v46 }
 0x703   : > { %2025 = vmatmul.mubr.msk.f32.vlgmr.msra.gmra.mrb[2].mxu0 %vm856_vm2, %v1172_v57 }
 0x704   : > { %2094 = vmatpush3.bf16.msra.mxu0 %v2091_v51 }
 0x705   : > { %2096 = vmatprep.subr.bf16.mxu0 %v2095_v60 }
 0x7d6   : > { %v2026_v61 = vpop.f32.mrb[2].mxu0 }
 0x7d7   : > { %v1251_v62 = vpop.f32.mrb[3].mxu0 }
 0x7d8   : > { %2031 = vmatprep.mubr.msk.f32.mxu0 %vm856_vm2, %v1251_v62 }
 0x7d9   : > { %2032 = vmatmul.mubr.msk.f32.vlgmr.msra.gmra.mrb[4].mxu0 %vm856_vm2, %v2026_v61 }
 0x7da   : > { %2098 = vmatpush3.bf16.msra.mxu0 %v2095_v60  ;;  %2038 = vmatprep.mubr.msk.f32.mxu0 %vm856_vm2, %v1044_v24  ;;  %v1482_v24 = vld [vmem:[%s2412_s20 + $0x18] sm:$0xff] }
 0x7db   : > { %2108 = vmatprep.subr.bf16.mxu0 %v2107_v45 }
 0x7e1   : > { %2039 = vmatmul.mubr.msk.f32.vlgmr.msra.gmra.mrb[4].mxu0 %vm856_vm2, %v2012_v23  ;;  %v1481_v23 = vld [vmem:[%s2412_s20 + $0x10] sm:$0xff] }
 0x7e2   : > { %v2103_v25 = vpack.c.bf16 %v1482_v24, %v1481_v23  ;;  %2110 = vmatpush3.bf16.msra.mxu0 %v2107_v45 }
 0x7e3   : > { %2112 = vmatprep.subr.bf16.mxu0 %v2111_v43 }
 0x7e4   : > { %2104 = vmatprep.subr.bf16.mxu1 %v2103_v25 }
 0x7e5   : > { %2106 = vmatpush3.bf16.msra.mxu1 %v2103_v25 }
 0x7e6   : > { %2114 = vmatpush3.bf16.msra.mxu0 %v2111_v43 }
 0x8b4   : > { %v2040_v0 = vpop.f32.mrb[4].mxu0 }
 0x8b5   : > { %v1430_v1 = vadd.f32 %v2040_v0, %v1930_v63  ;;  %v1413_v4 = vpop.f32.mrb[5].mxu0 }
 0x8b6   : > { %v1429_v5 = vadd.f32 %v1930_v63, %v1413_v4 }
 0x8b7   : > { %v1432_v6 = vmul.f32 0.8, %v1430_v1 }
 0x8b8   : > { %v1431_v7 = vmul.f32 0.8, %v1429_v5 }
 0x8b9   : > { %v2527_v9 = vadd.f32 %v1432_v6, %v2439_v3 }
 0x8ba   : > { %v2524_v8 = vadd.f32 %v1431_v7, %v2436_v2 }
 0x8bb   : > { %v1440_v11 = vsel %vm708_vm1, %v2527_v9, 0.0 }
 0x8bc   : > { %v1437_v10 = vsel %vm708_vm1, %v2524_v8, 0.0 }
 0x8bd   : > { %1438 = vadd.xlane.f32.xlu0 %v1437_v10 }
 0x8c1   : > { %1441 = vadd.xlane.f32.xlu0 %v1440_v11  ;;  %v1936_v11 = vld [vmem:[%s688_s8] ss:$0 sm:$0xff] }
 0x94a   : > { %v1439_v12 = vpop.xlane.xlu0 %1438 }
 0x94b   : > { %v1443_v13 = vmul.f32 0.03125, %v1439_v12 }
 0x94d   : > { %v1445_v14 = vsub.f32 %v2524_v8, %v1443_v13 }
 0x94e   : > { %v1442_v2 = vpop.xlane.xlu0 %1441 }
 0x94f   : > { %v1444_v15 = vmul.f32 0.03125, %v1442_v2  ;;  %v1447_v3 = vmul.f32 %v1445_v14, %v1445_v14 }
 0x951   : > { %v1446_v16 = vsub.f32 %v2527_v9, %v1444_v15  ;;  %v1449_v17 = vsel %vm708_vm1, %v1447_v3, 0.0 }
 0x952   : > { %1450 = vadd.xlane.f32.xlu0 %v1449_v17 }
 0x953   : > { %v1448_v18 = vmul.f32 %v1446_v16, %v1446_v16 }
 0x955   : > { %v1452_v19 = vsel %vm708_vm1, %v1448_v18, 0.0 }
 0x956   : > { %1453 = vadd.xlane.f32.xlu0 %v1452_v19 }
 0x9df   : > { %v1451_v26 = vpop.xlane.xlu0 %1450 }
 0x9e0   : > { %v1455_v27 = vmul.f32 0.03125, %v1451_v26 }
 0x9e2   : > { %v1457_v28 = vadd.f32 1e-05, %v1455_v27 }
 0x9e3   : > { %v1454_v29 = vpop.xlane.xlu0 %1453 }
 0x9e4   : > { %2202 = vrsqrt.f32 %v1457_v28  ;;  %v1456_v30 = vmul.f32 0.03125, %v1454_v29 }
 0x9e6   : > { %v1458_v31 = vadd.f32 1e-05, %v1456_v30 }
 0x9e8   : > { %2204 = vrsqrt.f32 %v1458_v31 }
 0x9ee   : > { %v2203_v32 = vpop.eup %2202 }
 0x9ef   : > { %v1461_v34 = vmul.f32 %v2203_v32, %v1445_v14 }
 0x9f1   : > { %v1469_v36 = vmul.f32 %v1931_v33, %v1461_v34 }
 0x9f2   : > { %v2205_v37 = vpop.eup %2204 }
 0x9f3   : > { %v1462_v38 = vmul.f32 %v2205_v37, %v1446_v16  ;;  %v1477_v39 = vadd.f32 %v1932_v35, %v1469_v36 }
 0x9f5   : > { %v1470_v40 = vmul.f32 %v1931_v33, %v1462_v38  ;;  %2049 = vmatprep.mubr.msk.f32.mxu1 %vm708_vm1, %v1477_v39 }
 0x9f7   : > { %v1478_v41 = vadd.f32 %v1932_v35, %v1470_v40 }
 0x9f9   : > { %2050 = vmatmul.mubr.msk.f32.vlgmr.msra.gmra.mrb[6].mxu1 %vm708_vm1, %v1478_v41 }
 0xacc   : > { %v2051_v49 = vpop.f32.mrb[6].mxu1 }
 0xacd   : > { %v1568_v50 = vadd.f32 %v2051_v49, %v1933_v48  ;;  %v1562_v51 = vpop.f32.mrb[7].mxu1 }
 0xace   : > { %v1563_v52 = vadd.f32 %v1933_v48, %v1562_v51 }
 0xacf   : > { %v1572_v53 = vmul.f32 %v1568_v50, %v1568_v50 }
 0xad0   : > { %v1571_v54 = vmul.f32 %v1563_v52, %v1563_v52 }
 0xad1   : > { %v1574_v55 = vmul.f32 %v1572_v53, %v1568_v50 }
 0xad2   : > { %v1573_v56 = vmul.f32 %v1571_v54, %v1563_v52 }
 0xad3   : > { %v1576_v57 = vmul.f32 0.044715, %v1574_v55 }
 0xad4   : > { %v1575_v58 = vmul.f32 0.044715, %v1573_v56 }
 0xad5   : > { %v1578_v59 = vadd.f32 %v1576_v57, %v1568_v50 }
 0xad6   : > { %v1577_v60 = vadd.f32 %v1575_v58, %v1563_v52 }
 0xad7   : > { %v1580_v61 = vmul.f32 0.7978846, %v1578_v59 }
 0xad8   : > { %v1579_v62 = vmul.f32 0.7978846, %v1577_v60 }
 0xad9   : > { %2206 = vtanh.f32 %v1580_v61 }
 0xada   : > { %2208 = vtanh.f32 %v1579_v62 }
 0xae3   : > { %v2207_v63 = vpop.eup %2206 }
 0xae4   : > { %v2209_v0 = vpop.eup %2208  ;;  %v1584_v1 = vadd.f32 1.0, %v2207_v63 }
 0xae5   : > { %v1583_v4 = vadd.f32 1.0, %v2209_v0 }
 0xae6   : > { %v1586_v5 = vmul.f32 0.5, %v1584_v1 }
 0xae7   : > { %v1585_v6 = vmul.f32 0.5, %v1583_v4 }
 0xae8   : > { %v1588_v10 = vmul.f32 %v1586_v5, %v1568_v50 }
 0xae9   : > { %v1587_v7 = vmul.f32 %v1585_v6, %v1563_v52 }
 0xaeb   : > { %2060 = vmatprep.mubr.msk.f32.mxu0 %vm708_vm1, %v1587_v7 }
 0xaec   : > { %2061 = vmatmul.mubr.msk.f32.vlgmr.msra.gmra.mrb[6].mxu0 %vm708_vm1, %v1588_v10 }
 0xbbf   : > { %v2062_v12 = vpop.f32.mrb[6].mxu0 }
 0xbc0   : > { %v1678_v13 = vadd.f32 %v2062_v12, %v1936_v11  ;;  %v1672_v14 = vpop.f32.mrb[7].mxu0 }
 0xbc1   : > { %v1673_v2 = vadd.f32 %v1936_v11, %v1672_v14 }
 0xbc2   : > { %v1682_v15 = vmul.f32 0.8, %v1678_v13 }
 0xbc3   : > { %v1681_v3 = vmul.f32 0.8, %v1673_v2 }
 0xbc4   : > { %v1684_v17 = vadd.f32 %v1682_v15, %v2527_v9 }
 0xbc5   : > { %v1683_v16 = vadd.f32 %v1681_v3, %v2524_v8 }
 0xbc6   : > { %1686 = vst.msk [vmem:[%s2430_s9 + $0x8] sm:$0xff] %vm708_vm1, %v1684_v17 }
 0xbc7   : > { %1685 = vst.msk [vmem:[%s2430_s9] sm:$0xff] %vm708_vm1, %v1683_v16 }
 0xbc8 PF: > { %s2645_s27 = sld [smem:[#allocation5_spill]]  ;;  %s2646_s29 = sld [smem:[#allocation3_spill]] }
 0xbc9   : > { %s2647_s30 = sld [smem:[#allocation4_spill]]  ;;  %s2648_s15 = sld [smem:[#allocation6_spill]] }
 0xbca   : > { %s2649_s16 = sld [smem:[#allocation7_spill]] }
 0xbce   : > { %s24_s17 = sadd.s32 1, %s2645_s27  }
 0xbcf   : > { %p21_p8 = scmp.ge.s32.totalorder %s24_s17, 10  }
 0xbd1   :  { %23 = sbr.rel (!%p21_p8) target bundleno = 10 (0xa), region = 150 }

// kernel: maniqa_forward.11
= control target key start
LH: loop header
LB: loop body
LE: loop exit
PB: predicated region body
PF: predicated region fallthrough
CT: control target
= control target key end

     0   :  { %s2666_s13 = smov 0   ;;  %s2977_s0 = inlined_call_operand.vmem [shape: f32[32,32], index: 0, kind: input, shape index: {}]   ;;  %s2978_s1 = inlined_call_operand.vmem [shape: f32[2,16,16], index: 1, kind: input, shape index: {}]   ;;  %s2979_s2 = inlined_call_operand.vmem [shape: f32[2,1,16], index: 2, kind: input, shape index: {}]   ;;  %s2980_s3 = inlined_call_operand.vmem [shape: f32[2,16,16], index: 3, kind: input, shape index: {}]   ;;  %s2981_s4 = inlined_call_operand.vmem [shape: f32[2,1,16], index: 4, kind: input, shape index: {}]   ;;  %s2982_s5 = inlined_call_operand.vmem [shape: f32[2,16,16], index: 5, kind: input, shape index: {}]   ;;  %s2983_s6 = inlined_call_operand.vmem [shape: f32[2,1,16], index: 6, kind: input, shape index: {}]   ;;  %s2984_s7 = inlined_call_operand.vmem [shape: f32[2,32,16], index: 7, kind: input, shape index: {}]   ;;  %s2985_s8 = inlined_call_operand.vmem [shape: f32[32,16], index: 8, kind: input, shape index: {}]   ;;  %s2986_s9 = inlined_call_operand.vmem [shape: f32[1,16], index: 9, kind: input, shape index: {}]   ;;  %s2987_s10 = inlined_call_operand.vmem [shape: f32[32,16], index: 10, kind: output, shape index: {}]  }
   0x1 LB: > { %s2088_s14 = sadd.s32 4294967295, %s2609_s13   ;;  %p2092_p0 = scmp.ge.s32.totalorder %s2609_s13, 1  ;;  %s2609_s13 = sphi %s2666_s13, %s20_s13  }
   0x2   : > { %p313_p1 = scmp.lt.s32.totalorder %s2609_s13, 3 }
   0x4   : > { %p314_p2 = pnand %p2092_p0, %p313_p1 }
   0x5   : > { %s2093_s15 = sshll.u32 (!%p314_p2), %s2088_s14, 1  ;;  %v397_v0 = vld [vmem:[%s2978_s1] sm:$0xff] (!%p314_p2)  ;;  %v398_v1 = vld [vmem:[%s2978_s1 + $0x8] sm:$0xff] (!%p314_p2)  ;;  %vm406_vm0 = vcmask (!%p314_p2), 130048   ;;  %vm805_vm2 = vcmask (!%p314_p2), 261120  }
   0x6   : > { %317 = sbr.rel (%p314_p2) target bundleno = 2963 (0xb93), region = 60  ;;  %p352_p3 = scmp.lt.s32.totalorder (!%p314_p2), %s2093_s15, 3  ;;  %v598_v2 = vld [vmem:[%s2982_s5] sm:$0xff] (!%p314_p2)  ;;  %v2458_v4 = vpack.c.bf16 (!%p314_p2), %v398_v1, %v397_v0  ;;  %v599_v5 = vld [vmem:[%s2982_s5 + $0x8] sm:$0xff] (!%p314_p2)  ;;  %vm2744_vm1 = vmpackc.low (!%p314_p2), %vm406_vm0, %vm406_vm0 }
   0x7   : > { %v2466_v6 = vpack.c.bf16 (!%p314_p2), %v599_v5, %v598_v2  ;;  %v504_v8 = vld [vmem:[%s2980_s3] sm:$0xff] (!%p314_p2)  ;;  %v505_v9 = vld [vmem:[%s2980_s3 + $0x8] sm:$0xff] (!%p314_p2) }
   0x8   : > { %2459 = vmatprep.subr.bf16.mxu1 (!%p314_p2), %v2458_v4  ;;  %v2462_v10 = vpack.c.bf16 (!%p314_p2), %v505_v9, %v504_v8  ;;  %v2107_v15 = vld [vmem:[%s2983_s6] ss:$0 sm:$0xff] (!%p314_p2) }
   0x9   : > { %2467 = vmatprep.subr.bf16.mxu0 (!%p314_p2), %v2466_v6  ;;  %2461 = vmatpush3.bf16.msra.mxu1 (!%p314_p2), %v2458_v4  ;;  %v2097_v16 = vld [vmem:[%s2979_s2] ss:$0 sm:$0xff] (!%p314_p2) }
   0xa   : > { %2469 = vmatpush3.bf16.msra.mxu0 (!%p314_p2), %v2466_v6  ;;  %2463 = vmatprep.subr.bf16.mxu1 (!%p314_p2), %v2462_v10  ;;  %v2102_v31 = vld [vmem:[%s2981_s4] ss:$0 sm:$0xff] (!%p314_p2) }
   0xb   : > { %v1938_v37 = vld [vmem:[%s2985_s8] sm:$0xff] (!%p314_p2) }
   0xd   : > { %s2991_s15 = smov (!%p352_p3, %s2093_s15), 3 }
   0xe   : > { %s2094_s16 = sshll.u32 %s2991_s15, 3 }
   0xf   : > { %s355_s19 = scalar_lea.vmem %s2977_s0, %s2094_s16  ;;  %s361_s14 = scalar_lea.vmem %s2987_s10, %s2094_s16 }
  0x10   : > { %v363_v3 = vld [vmem:[%s355_s19] sm:$0xff]  ;;  %v364_v7 = vld [vmem:[%s355_s19 + $0x8] sm:$0xff] }
  0x11   : > { %365 = vxpose.xlu0.b32.start [1/2] (short) (narrow) %v363_v3, 32 }
  0x15   : > { %366 = vxpose.xlu0.b32.end [2/2] (short) (narrow) %v364_v7, 32 }
  0x91   : > { %v2700_v11 = vpop.trf.xlu0 }
  0x92   : > { %2295 = vmatprep.mubr.msk.f32.mxu1 %vm406_vm0, %v2700_v11  ;;  %2315 = vmatprep.mubr.msk.f32.mxu0 %vm406_vm0, %v2700_v11 }
  0x95   : > { %v2706_v12 = vpop.trf.xlu0 }
  0x96   : > { %2296 = vmatmul.mubr.msk.f32.vlgmr.msra.gmra.mrb[0].mxu1 %vm406_vm0, %v2706_v12  ;;  %2316 = vmatmul.mubr.msk.f32.vlgmr.msra.gmra.mrb[0].mxu0 %vm406_vm0, %v2706_v12 }
  0x97   : > { %2465 = vmatpush3.bf16.msra.mxu1 %v2462_v10 }
  0x99   : > { %v2712_v13 = vpop.trf.xlu0 }
  0x9a   : > { %2298 = vmatprep.mubr.msk.f32.mxu1 %vm406_vm0, %v2712_v13  ;;  %2318 = vmatprep.mubr.msk.f32.mxu0 %vm406_vm0, %v2712_v13 }
  0x9d   : > { %v2718_v14 = vpop.trf.xlu0 }
  0x9e   : > { %2299 = vmatmul.mubr.msk.f32.gmra.mrb[2].mxu1 %vm406_vm0, %v2718_v14  ;;  %2319 = vmatmul.mubr.msk.f32.gmra.mrb[2].mxu0 %vm406_vm0, %v2718_v14 }
  0x9f   : > { %2305 = vmatprep.mubr.msk.f32.mxu1 %vm406_vm0, %v2700_v11 }
  0xa2   : > { %2306 = vmatmul.mubr.msk.f32.vlgmr.msra.gmra.mrb[4].mxu1 %vm406_vm0, %v2706_v12 }
  0xa3   : > { %2308 = vmatprep.mubr.msk.f32.mxu1 %vm406_vm0, %v2712_v13 }
  0xa6   : > { %2309 = vmatmul.mubr.msk.f32.gmra.mrb[6].mxu1 %vm406_vm0, %v2718_v14 }
 0x169   : > { %v2297_v17 = vpop.f32.mrb[0].mxu1  ;;  %v2317_v18 = vpop.f32.mrb[0].mxu0 }
 0x16a   : > { %v679_v19 = vadd.f32 %v2317_v18, %v2107_v15  ;;  %v485_v20 = vpop.f32.mrb[1].mxu1  ;;  %v673_v21 = vpop.f32.mrb[1].mxu0  ;;  %v491_v44 = vadd.f32 %v2297_v17, %v2097_v16 }
 0x16b   : > { %v486_v22 = vadd.f32 %v2097_v16, %v485_v20  ;;  %v674_v23 = vadd.f32 %v2107_v15, %v673_v21 }
 0x16d   : > { %v2482_v24 = vpack.c.bf16 %v679_v19, %v674_v23  ;;  %2329 = vmatprep.mubr.msk.f32.mxu1 %vm406_vm0, %v486_v22 }
 0x16f   : > { %2483 = vmatprep.subr.bf16.mxu0 %v2482_v24 }
 0x170   : > { %2485 = vmatpush3.bf16.msra.mxu0 %v2482_v24 }
 0x171   : > { %v2300_v25 = vpop.f32.mrb[2].mxu1  ;;  %v2320_v26 = vpop.f32.mrb[2].mxu0 }
 0x172   : > { %v689_v27 = vadd.f32 %v2320_v26, %v2107_v15  ;;  %v495_v28 = vpop.f32.mrb[3].mxu1  ;;  %v683_v29 = vpop.f32.mrb[3].mxu0  ;;  %v501_v46 = vadd.f32 %v2300_v25, %v2097_v16 }
 0x173   : > { %v684_v30 = vadd.f32 %v2107_v15, %v683_v29  ;;  %v496_v45 = vadd.f32 %v2097_v16, %v495_v28 }
 0x175   : > { %v2486_v32 = vpack.c.bf16 %v689_v27, %v684_v30  ;;  %v2307_v33 = vpop.f32.mrb[4].mxu1 }
 0x176   : > { %v585_v34 = vadd.f32 %v2307_v33, %v2102_v31  ;;  %v579_v35 = vpop.f32.mrb[5].mxu1  ;;  %v2141_v33 = vld [vmem:[%s2978_s1 + $0x18] sm:$0xff] }
 0x177   : > { %v580_v36 = vadd.f32 %v2102_v31, %v579_v35  ;;  %2487 = vmatprep.subr.bf16.mxu0 %v2486_v32 }
 0x178   : > { %2489 = vmatpush3.bf16.msra.mxu0 %v2486_v32  ;;  %v2140_v32 = vld [vmem:[%s2978_s1 + $0x10] sm:$0xff] }
 0x179   : > { %v2470_v38 = vpack.c.bf16 %v585_v34, %v580_v36  ;;  %v2310_v39 = vpop.f32.mrb[6].mxu1  ;;  %v2502_v34 = vpack.c.bf16 %v2141_v33, %v2140_v32 }
 0x17a   : > { %v595_v40 = vadd.f32 %v2310_v39, %v2102_v31  ;;  %v589_v41 = vpop.f32.mrb[7].mxu1 }
 0x17b   : > { %v590_v42 = vadd.f32 %v2102_v31, %v589_v41  ;;  %2472 = vmatprep.subr.msk.bf16.mxu1 %vm2744_vm1, %v2470_v38  ;;  %v2774_v31 = vld [vmem:[%s2984_s7 + $0x20] sm:$0xff] }
 0x17c   : > { %2475 = vmatpush3.bf16.xpose.msk.msra.mxu1 %vm2744_vm1, %v2470_v38 }
 0x17d   : > { %v2476_v43 = vpack.c.bf16 %v595_v40, %v590_v42  ;;  %v2793_v42 = vld [vmem:[%s2984_s7 + $0x28] sm:$0xff] }
 0x17f   : > { %2478 = vmatprep.subr.msk.bf16.mxu1 %vm2744_vm1, %v2476_v43 }
 0x184   : > { %2481 = vmatpush3.bf16.xpose.msk.msra.mxu1 %vm2744_vm1, %v2476_v43  ;;  %v2798_v43 = vld [vmem:[%s2984_s7 + $0x30] sm:$0xff] }
 0x185   : > { %2503 = vmatprep.subr.bf16.mxu1 %v2502_v34 }
 0x18b   : > { %2330 = vmatmul.mubr.msk.f32.vlgmr.msra.gmra.mrb[8].mxu1 %vm406_vm0, %v491_v44  ;;  %v2809_v44 = vld [vmem:[%s2984_s7 + $0x38] sm:$0xff] }
 0x18c   : > { %2332 = vmatprep.mubr.msk.f32.mxu1 %vm406_vm0, %v496_v45  ;;  %2505 = vmatpush3.bf16.msra.mxu1 %v2502_v34  ;;  %v2814_v45 = vld [vmem:[%s2984_s7] sm:$0xff] }
 0x18f   : > { %2333 = vmatmul.mubr.msk.f32.gmra.mrb[10].mxu1 %vm406_vm0, %v501_v46  ;;  %v2823_v46 = vld [vmem:[%s2984_s7 + $0x8] sm:$0xff] }
 0x25e   : > { %v2331_v47 = vpop.f32.mrb[8].mxu1 }
 0x25f   : > { %v782_v48 = vpop.f32.mrb[9].mxu1  ;;  %v802_v50 = vmul.f32 0.25, %v2331_v47  ;;  %v2828_v47 = vld [vmem:[%s2984_s7 + $0x10] sm:$0xff] }
 0x260   : > { %v801_v49 = vmul.f32 0.25, %v782_v48  ;;  %v2837_v48 = vld [vmem:[%s2984_s7 + $0x18] sm:$0xff] }
 0x261   : > { %v809_v56 = vsel %vm805_vm2, %v802_v50, -inf }
 0x262   : > { %v2334_v51 = vpop.f32.mrb[10].mxu1  ;;  %v806_v52 = vsel %vm805_vm2, %v801_v49, -inf }
 0x263   : > { %807 = vmax.xlane.f32.xlu1 %v806_v52  ;;  %v792_v53 = vpop.f32.mrb[11].mxu1  ;;  %v804_v55 = vmul.f32 0.25, %v2334_v51  ;;  %v2148_v52 = vld [vmem:[%s2980_s3 + $0x10] sm:$0xff] }
 0x264   : > { %v803_v54 = vmul.f32 0.25, %v792_v53  ;;  %v2149_v53 = vld [vmem:[%s2980_s3 + $0x18] sm:$0xff] }
 0x265   : > { %v815_v58 = vsel %vm805_vm2, %v804_v55, -inf }
 0x266   : > { %v812_v57 = vsel %vm805_vm2, %v803_v54, -inf }
 0x267   : > { %810 = vmax.xlane.f32.xlu1 %v809_v56  ;;  %813 = vmax.xlane.f32.xlu0 %v812_v57 }
 0x26b   : > { %816 = vmax.xlane.f32.xlu1 %v815_v58 }
 0x2f0   : > { %v808_v59 = vpop.xlane.xlu1 %807 }
 0x2f1   : > { %v818_v60 = vsub.f32 %v801_v49, %v808_v59  ;;  %v2156_v49 = vld [vmem:[%s2982_s5 + $0x10] sm:$0xff] }
 0x2f3   : > { %v822_v0 = vmul.f32 1.442695, %v818_v60 }
 0x2f4   : > { %v811_v61 = vpop.xlane.xlu1 %810  ;;  %v814_v62 = vpop.xlane.xlu0 %813 }
 0x2f5   : > { %v819_v63 = vsub.f32 %v802_v50, %v811_v61  ;;  %v820_v2 = vsub.f32 %v803_v54, %v814_v62  ;;  %v2157_v50 = vld [vmem:[%s2982_s5 + $0x18] sm:$0xff]  ;;  %v2506_v54 = vpack.c.bf16 %v2149_v53, %v2148_v52 }
 0x2f6   : > { %v2510_v51 = vpack.c.bf16 %v2157_v50, %v2156_v49 }
 0x2f7   : > { %v824_v1 = vmul.f32 1.442695, %v819_v63  ;;  %v826_v4 = vmul.f32 1.442695, %v820_v2  ;;  %2507 = vmatprep.subr.bf16.mxu1 %v2506_v54 }
 0x2f8   : > { %v817_v3 = vpop.xlane.xlu1 %816 }
 0x2f9   : > { %2571 = vpow2.f32 %v824_v1  ;;  %v821_v5 = vsub.f32 %v804_v55, %v817_v3 }
 0x2fa   : > { %2573 = vpow2.f32 %v822_v0 }
 0x2fb   : > { %2575 = vpow2.f32 %v826_v4  ;;  %v828_v6 = vmul.f32 1.442695, %v821_v5 }
 0x2fd   : > { %2577 = vpow2.f32 %v828_v6 }
 0x303   : > { %v2572_v7 = vpop.eup %2571 }
 0x304   : > { %v833_v8 = vsel %vm805_vm2, %v2572_v7, 0.0  ;;  %v2574_v9 = vpop.eup %2573 }
 0x305   : > { %834 = vadd.xlane.f32.xlu1 %v833_v8  ;;  %v830_v10 = vsel %vm805_vm2, %v2574_v9, 0.0  ;;  %v2576_v15 = vpop.eup %2575 }
 0x306   : > { %v836_v16 = vsel %vm805_vm2, %v2576_v15, 0.0 }
 0x307   : > { %v2578_v17 = vpop.eup %2577 }
 0x308   : > { %v839_v18 = vsel %vm805_vm2, %v2578_v17, 0.0 }
 0x309   : > { %831 = vadd.xlane.f32.xlu1 %v830_v10 }
 0x30d   : > { %837 = vadd.xlane.f32.xlu1 %v836_v16 }
 0x311   : > { %840 = vadd.xlane.f32.xlu1 %v839_v18 }
 0x392   : > { %v835_v19 = vpop.xlane.xlu1 %834 }
 0x393   : > { %2579 = vrcp.f32 %v835_v19 }
 0x396   : > { %v832_v20 = vpop.xlane.xlu1 %831 }
 0x397   : > { %2581 = vrcp.f32 %v832_v20 }
 0x39a   : > { %v838_v21 = vpop.xlane.xlu1 %837 }
 0x39b   : > { %2583 = vrcp.f32 %v838_v21 }
 0x39d   : > { %v2580_v23 = vpop.eup %2579 }
 0x39e   : > { %v841_v22 = vpop.xlane.xlu1 %840  ;;  %v847_v26 = vmul.f32 %v2580_v23, %v2572_v7 }
 0x39f   : > { %2585 = vrcp.f32 %v841_v22 }
 0x3a1   : > { %v2582_v24 = vpop.eup %2581 }
 0x3a2   : > { %v846_v25 = vmul.f32 %v2582_v24, %v2574_v9 }
 0x3a4   : > { %2343 = vmatprep.mubr.msk.f32.mxu0 %vm805_vm2, %v846_v25 }
 0x3a5   : > { %v2584_v27 = vpop.eup %2583  ;;  %2344 = vmatmul.mubr.msk.f32.vlgmr.msra.gmra.mrb[4].mxu0 %vm805_vm2, %v847_v26 }
 0x3a6   : > { %v848_v28 = vmul.f32 %v2584_v27, %v2576_v15  ;;  %v2151_v15 = vld [vmem:[%s2981_s4 + $0x1] ss:$0 sm:$0xff] }
 0x3a8   : > { %2346 = vmatprep.mubr.msk.f32.mxu0 %vm805_vm2, %v848_v28 }
 0x3a9   : > { %v2586_v29 = vpop.eup %2585 }
 0x3aa   : > { %v849_v30 = vmul.f32 %v2586_v29, %v2578_v17 }
 0x3ac   : > { %2347 = vmatmul.mubr.msk.f32.gmra.mrb[6].mxu0 %vm805_vm2, %v849_v30 }
 0x3ad   : > { %2353 = vmatprep.mubr.msk.f32.mxu0 %vm406_vm0, %v2774_v31 }
 0x478   : > { %v2345_v35 = vpop.f32.mrb[4].mxu0 }
 0x479   : > { %v928_v36 = vpop.f32.mrb[5].mxu0 }
 0x47a   : > { %v2496_v38 = vpack.c.bf16 %v2345_v35, %v928_v36 }
 0x47f   : > { %v2348_v39 = vpop.f32.mrb[6].mxu0 }
 0x480   : > { %v938_v40 = vpop.f32.mrb[7].mxu0 }
 0x481   : > { %v2490_v41 = vpack.c.bf16 %v2348_v39, %v938_v40 }
 0x483   : > { %2492 = vmatprep.subr.msk.bf16.mxu0 %vm2744_vm1, %v2490_v41 }
 0x484   : > { %2495 = vmatpush3.bf16.xpose.msk.msra.mxu0 %vm2744_vm1, %v2490_v41 }
 0x485   : > { %2498 = vmatprep.subr.msk.bf16.mxu0 %vm2744_vm1, %v2496_v38 }
 0x48b   : > { %2354 = vmatmul.mubr.msk.f32.vlgmr.msra.gmra.mrb[8].mxu0 %vm406_vm0, %v2793_v42 }
 0x48c   : > { %2501 = vmatpush3.bf16.xpose.msk.msra.mxu0 %vm2744_vm1, %v2496_v38  ;;  %2356 = vmatprep.mubr.msk.f32.mxu0 %vm406_vm0, %v2798_v43 }
 0x48d   : > { %2511 = vmatprep.subr.bf16.mxu0 %v2510_v51 }
 0x48f   : > { %2357 = vmatmul.mubr.msk.f32.gmra.mrb[10].mxu0 %vm406_vm0, %v2809_v44 }
 0x490   : > { %2363 = vmatprep.mubr.msk.f32.mxu0 %vm406_vm0, %v2814_v45 }
 0x493   : > { %2364 = vmatmul.mubr.msk.f32.vlgmr.msra.gmra.mrb[8].mxu0 %vm406_vm0, %v2823_v46 }
 0x494   : > { %2366 = vmatprep.mubr.msk.f32.mxu0 %vm406_vm0, %v2828_v47  ;;  %2513 = vmatpush3.bf16.msra.mxu0 %v2510_v51 }
 0x497   : > { %2367 = vmatmul.mubr.msk.f32.gmra.mrb[10].mxu0 %vm406_vm0, %v2837_v48 }
 0x566   : > { %v2365_v55 = vpop.f32.mrb[8].mxu0 }
 0x567   : > { %v1143_v56 = vpop.f32.mrb[9].mxu0  ;;  %v2857_v58 = vadd.f32 %v2365_v55, %v2706_v12 }
 0x568   : > { %v2854_v57 = vadd.f32 %v1143_v56, %v2700_v11 }
 0x56a   : > { %v2368_v59 = vpop.f32.mrb[10].mxu0  ;;  %2373 = vmatprep.mubr.msk.f32.mxu1 %vm406_vm0, %v2854_v57  ;;  %2393 = vmatprep.mubr.msk.f32.mxu0 %vm406_vm0, %v2854_v57 }
 0x56b   : > { %v1153_v60 = vpop.f32.mrb[11].mxu0  ;;  %2374 = vmatmul.mubr.msk.f32.vlgmr.msra.gmra.mrb[12].mxu1 %vm406_vm0, %v2857_v58  ;;  %2394 = vmatmul.mubr.msk.f32.vlgmr.msra.gmra.mrb[12].mxu0 %vm406_vm0, %v2857_v58  ;;  %v2871_v12 = vadd.f32 %v2368_v59, %v2718_v14  ;;  %v2143_v14 = vld [vmem:[%s2979_s2 + $0x1] ss:$0 sm:$0xff] }
 0x56c   : > { %v2868_v11 = vadd.f32 %v1153_v60, %v2712_v13  ;;  %2509 = vmatpush3.bf16.msra.mxu1 %v2506_v54  ;;  %v2159_v13 = vld [vmem:[%s2983_s6 + $0x1] ss:$0 sm:$0xff] }
 0x56e   : > { %2376 = vmatprep.mubr.msk.f32.mxu1 %vm406_vm0, %v2868_v11  ;;  %2396 = vmatprep.mubr.msk.f32.mxu0 %vm406_vm0, %v2868_v11 }
 0x56f   : > { %2377 = vmatmul.mubr.msk.f32.gmra.mrb[14].mxu1 %vm406_vm0, %v2871_v12  ;;  %2397 = vmatmul.mubr.msk.f32.gmra.mrb[14].mxu0 %vm406_vm0, %v2871_v12 }
 0x570   : > { %2383 = vmatprep.mubr.msk.f32.mxu1 %vm406_vm0, %v2854_v57 }
 0x573   : > { %2384 = vmatmul.mubr.msk.f32.vlgmr.msra.gmra.mrb[16].mxu1 %vm406_vm0, %v2857_v58 }
 0x574   : > { %2386 = vmatprep.mubr.msk.f32.mxu1 %vm406_vm0, %v2868_v11 }
 0x577   : > { %2387 = vmatmul.mubr.msk.f32.gmra.mrb[18].mxu1 %vm406_vm0, %v2871_v12 }
 0x63e   : > { %v2375_v61 = vpop.f32.mrb[12].mxu1  ;;  %v2395_v62 = vpop.f32.mrb[12].mxu0 }
 0x63f   : > { %v1453_v63 = vadd.f32 %v2395_v62, %v2159_v13  ;;  %v1255_v0 = vpop.f32.mrb[13].mxu1  ;;  %v1447_v1 = vpop.f32.mrb[13].mxu0  ;;  %v1261_v27 = vadd.f32 %v2375_v61, %v2143_v14 }
 0x640   : > { %v1256_v2 = vadd.f32 %v2143_v14, %v1255_v0  ;;  %v1448_v3 = vadd.f32 %v2159_v13, %v1447_v1 }
 0x642   : > { %v2526_v4 = vpack.c.bf16 %v1453_v63, %v1448_v3  ;;  %v2378_v5 = vpop.f32.mrb[14].mxu1  ;;  %v2398_v6 = vpop.f32.mrb[14].mxu0  ;;  %2407 = vmatprep.mubr.msk.f32.mxu1 %vm406_vm0, %v1256_v2 }
 0x643   : > { %v1463_v7 = vadd.f32 %v2398_v6, %v2159_v13  ;;  %v1265_v8 = vpop.f32.mrb[15].mxu1  ;;  %v1457_v9 = vpop.f32.mrb[15].mxu0  ;;  %v1271_v29 = vadd.f32 %v2378_v5, %v2143_v14 }
 0x644   : > { %v1458_v10 = vadd.f32 %v2159_v13, %v1457_v9  ;;  %2527 = vmatprep.subr.bf16.mxu0 %v2526_v4  ;;  %v1266_v28 = vadd.f32 %v2143_v14, %v1265_v8 }
 0x645   : > { %2529 = vmatpush3.bf16.msra.mxu0 %v2526_v4 }
 0x646   : > { %v2530_v16 = vpack.c.bf16 %v1463_v7, %v1458_v10  ;;  %v2385_v17 = vpop.f32.mrb[16].mxu1 }
 0x647   : > { %v1357_v18 = vadd.f32 %v2385_v17, %v2151_v15  ;;  %v1351_v19 = vpop.f32.mrb[17].mxu1 }
 0x648   : > { %v1352_v20 = vadd.f32 %v2151_v15, %v1351_v19  ;;  %2531 = vmatprep.subr.bf16.mxu0 %v2530_v16 }
 0x649   : > { %2533 = vmatpush3.bf16.msra.mxu0 %v2530_v16 }
 0x64a   : > { %v2514_v21 = vpack.c.bf16 %v1357_v18, %v1352_v20  ;;  %v2388_v22 = vpop.f32.mrb[18].mxu1 }
 0x64b   : > { %v1367_v23 = vadd.f32 %v2388_v22, %v2151_v15  ;;  %v1361_v24 = vpop.f32.mrb[19].mxu1 }
 0x64c   : > { %v1362_v25 = vadd.f32 %v2151_v15, %v1361_v24  ;;  %2516 = vmatprep.subr.msk.bf16.mxu1 %vm2744_vm1, %v2514_v21 }
 0x64d   : > { %2519 = vmatpush3.bf16.xpose.msk.msra.mxu1 %vm2744_vm1, %v2514_v21 }
 0x64e   : > { %v2520_v26 = vpack.c.bf16 %v1367_v23, %v1362_v25 }
 0x650   : > { %2522 = vmatprep.subr.msk.bf16.mxu1 %vm2744_vm1, %v2520_v26 }
 0x655   : > { %2525 = vmatpush3.bf16.xpose.msk.msra.mxu1 %vm2744_vm1, %v2520_v26 }
 0x65c   : > { %2408 = vmatmul.mubr.msk.f32.vlgmr.msra.gmra.mrb[20].mxu1 %vm406_vm0, %v1261_v27 }
 0x65d   : > { %2410 = vmatprep.mubr.msk.f32.mxu1 %vm406_vm0, %v1266_v28 }
 0x660   : > { %2411 = vmatmul.mubr.msk.f32.gmra.mrb[22].mxu1 %vm406_vm0, %v1271_v29 }
 0x72f   : > { %v2409_v30 = vpop.f32.mrb[20].mxu1 }
 0x730   : > { %v1576_v32 = vmul.f32 0.25, %v2409_v30  ;;  %v1556_v33 = vpop.f32.mrb[21].mxu1 }
 0x731   : > { %v1575_v34 = vmul.f32 0.25, %v1556_v33 }
 0x732   : > { %v1582_v35 = vsel %vm805_vm2, %v1576_v32, -inf }
 0x733   : > { %1583 = vmax.xlane.f32.xlu1 %v1582_v35  ;;  %v2412_v36 = vpop.f32.mrb[22].mxu1  ;;  %v1579_v40 = vsel %vm805_vm2, %v1575_v34, -inf }
 0x734   : > { %v1566_v38 = vpop.f32.mrb[23].mxu1  ;;  %v1578_v41 = vmul.f32 0.25, %v2412_v36  ;;  %v2188_v36 = vld [vmem:[%s2986_s9] ss:$0 sm:$0xff] }
 0x735   : > { %v1577_v39 = vmul.f32 0.25, %v1566_v38 }
 0x736   : > { %v1588_v50 = vsel %vm805_vm2, %v1578_v41, -inf }
 0x737   : > { %1580 = vmax.xlane.f32.xlu1 %v1579_v40  ;;  %v1585_v49 = vsel %vm805_vm2, %v1577_v39, -inf }
 0x73b   : > { %1586 = vmax.xlane.f32.xlu1 %v1585_v49 }
 0x73f   : > { %1589 = vmax.xlane.f32.xlu1 %v1588_v50 }
 0x7c0   : > { %v1584_v51 = vpop.xlane.xlu1 %1583 }
 0x7c1   : > { %v1592_v52 = vsub.f32 %v1576_v32, %v1584_v51 }
 0x7c3   : > { %v1597_v53 = vmul.f32 1.442695, %v1592_v52 }
 0x7c4   : > { %v1581_v54 = vpop.xlane.xlu1 %1580 }
 0x7c5   : > { %2587 = vpow2.f32 %v1597_v53  ;;  %v1591_v55 = vsub.f32 %v1575_v34, %v1581_v54 }
 0x7c7   : > { %v1595_v56 = vmul.f32 1.442695, %v1591_v55 }
 0x7c8   : > { %v1587_v59 = vpop.xlane.xlu1 %1586 }
 0x7c9   : > { %2589 = vpow2.f32 %v1595_v56  ;;  %v1593_v60 = vsub.f32 %v1577_v39, %v1587_v59 }
 0x7cb   : > { %v1599_v13 = vmul.f32 1.442695, %v1593_v60 }
 0x7cc   : > { %v1590_v14 = vpop.xlane.xlu1 %1589 }
 0x7cd   : > { %2591 = vpow2.f32 %v1599_v13  ;;  %v1594_v61 = vsub.f32 %v1578_v41, %v1590_v14 }
 0x7cf   : > { %v2588_v62 = vpop.eup %2587  ;;  %v1601_v63 = vmul.f32 1.442695, %v1594_v61 }
 0x7d0   : > { %v1606_v0 = vsel %vm805_vm2, %v2588_v62, 0.0 }
 0x7d1   : > { %2593 = vpow2.f32 %v1601_v63  ;;  %1607 = vadd.xlane.f32.xlu1 %v1606_v0 }
 0x7d3   : > { %v2590_v1 = vpop.eup %2589 }
 0x7d4   : > { %v1603_v2 = vsel %vm805_vm2, %v2590_v1, 0.0 }
 0x7d5   : > { %1604 = vadd.xlane.f32.xlu1 %v1603_v2 }
 0x7d7   : > { %v2592_v3 = vpop.eup %2591 }
 0x7d8   : > { %v1609_v4 = vsel %vm805_vm2, %v2592_v3, 0.0 }
 0x7d9   : > { %1610 = vadd.xlane.f32.xlu1 %v1609_v4 }
 0x7db   : > { %v2594_v5 = vpop.eup %2593 }
 0x7dc   : > { %v1612_v6 = vsel %vm805_vm2, %v2594_v5, 0.0 }
 0x7dd   : > { %1613 = vadd.xlane.f32.xlu1 %v1612_v6 }
 0x85e   : > { %v1608_v7 = vpop.xlane.xlu1 %1607 }
 0x85f   : > { %2595 = vrcp.f32 %v1608_v7 }
 0x862   : > { %v1605_v8 = vpop.xlane.xlu1 %1604 }
 0x863   : > { %2597 = vrcp.f32 %v1605_v8 }
 0x866   : > { %v1611_v9 = vpop.xlane.xlu1 %1610 }
 0x867   : > { %2599 = vrcp.f32 %v1611_v9 }
 0x869   : > { %v2596_v15 = vpop.eup %2595 }
 0x86a   : > { %v1614_v10 = vpop.xlane.xlu1 %1613  ;;  %v1620_v18 = vmul.f32 %v2596_v15, %v2588_v62 }
 0x86b   : > { %2601 = vrcp.f32 %v1614_v10 }
 0x86d   : > { %v2598_v16 = vpop.eup %2597 }
 0x86e   : > { %v1619_v17 = vmul.f32 %v2598_v16, %v2590_v1 }
 0x870   : > { %2421 = vmatprep.mubr.msk.f32.mxu0 %vm805_vm2, %v1619_v17 }
 0x871   : > { %v2600_v19 = vpop.eup %2599  ;;  %2422 = vmatmul.mubr.msk.f32.vlgmr.msra.gmra.mrb[16].mxu0 %vm805_vm2, %v1620_v18 }
 0x872   : > { %v1621_v20 = vmul.f32 %v2600_v19, %v2592_v3 }
 0x874   : > { %2424 = vmatprep.mubr.msk.f32.mxu0 %vm805_vm2, %v1621_v20 }
 0x875   : > { %v2602_v21 = vpop.eup %2601 }
 0x876   : > { %v1622_v22 = vmul.f32 %v2602_v21, %v2594_v5 }
 0x878   : > { %2425 = vmatmul.mubr.msk.f32.gmra.mrb[18].mxu0 %vm805_vm2, %v1622_v22 }
 0x879   : > { %2431 = vmatprep.mubr.msk.f32.mxu0 %vm406_vm0, %v2774_v31  ;;  %v1939_v31 = vld [vmem:[%s2985_s8 + $0x8] sm:$0xff] }
 0x944   : > { %v2423_v23 = vpop.f32.mrb[16].mxu0 }
 0x945   : > { %v1701_v24 = vpop.f32.mrb[17].mxu0 }
 0x946   : > { %v2540_v25 = vpack.c.bf16 %v2423_v23, %v1701_v24 }
 0x94b   : > { %v2426_v26 = vpop.f32.mrb[18].mxu0 }
 0x94c   : > { %v1711_v27 = vpop.f32.mrb[19].mxu0 }
 0x94d   : > { %v2534_v28 = vpack.c.bf16 %v2426_v26, %v1711_v27 }
 0x94f   : > { %2536 = vmatprep.subr.msk.bf16.mxu0 %vm2744_vm1, %v2534_v28 }
 0x950   : > { %2539 = vmatpush3.bf16.xpose.msk.msra.mxu0 %vm2744_vm1, %v2534_v28 }
 0x951   : > { %2542 = vmatprep.subr.msk.bf16.mxu0 %vm2744_vm1, %v2540_v25 }
 0x957   : > { %2432 = vmatmul.mubr.msk.f32.vlgmr.msra.gmra.mrb[20].mxu0 %vm406_vm0, %v2793_v42  ;;  %v2546_v42 = vpack.c.bf16 %v1939_v31, %v1938_v37 }
 0x958   : > { %2545 = vmatpush3.bf16.xpose.msk.msra.mxu0 %vm2744_vm1, %v2540_v25  ;;  %2434 = vmatprep.mubr.msk.f32.mxu0 %vm406_vm0, %v2798_v43 }
 0x959   : > { %2547 = vmatprep.subr.bf16.mxu1 %v2546_v42 }
 0x95a   : > { %2549 = vmatpush3.bf16.msra.mxu1 %v2546_v42 }
 0x95b   : > { %2435 = vmatmul.mubr.msk.f32.gmra.mrb[22].mxu0 %vm406_vm0, %v2809_v44 }
 0x95c   : > { %2441 = vmatprep.mubr.msk.f32.mxu0 %vm406_vm0, %v2814_v45 }
 0x95f   : > { %2442 = vmatmul.mubr.msk.f32.vlgmr.msra.gmra.mrb[20].mxu0 %vm406_vm0, %v2823_v46  ;;  %v1940_v46 = vld [vmem:[%s2985_s8 + $0x10] sm:$0xff] }
 0x960   : > { %2444 = vmatprep.mubr.msk.f32.mxu0 %vm406_vm0, %v2828_v47  ;;  %v1941_v47 = vld [vmem:[%s2985_s8 + $0x18] sm:$0xff] }
 0x961   : > { %v2550_v29 = vpack.c.bf16 %v1941_v47, %v1940_v46 }
 0x963   : > { %2445 = vmatmul.mubr.msk.f32.gmra.mrb[22].mxu0 %vm406_vm0, %v2837_v48  ;;  %2551 = vmatprep.subr.bf16.mxu1 %v2550_v29 }
 0x964   : > { %2553 = vmatpush3.bf16.msra.mxu1 %v2550_v29 }
 0xa32   : > { %v2443_v43 = vpop.f32.mrb[20].mxu0 }
 0xa33   : > { %v1883_v44 = vpop.f32.mrb[21].mxu0  ;;  %v1903_v32 = vadd.f32 %v2443_v43, %v2857_v58 }
 0xa34   : > { %v1902_v45 = vadd.f32 %v1883_v44, %v2854_v57 }
 0xa36   : > { %1906 = vxpose.xlu1.b32.start [1/4] (short) (narrow) %v1902_v45, 16  ;;  %v2446_v48 = vpop.f32.mrb[22].mxu0 }
 0xa37   : > { %v1893_v30 = vpop.f32.mrb[23].mxu0  ;;  %v1905_v33 = vadd.f32 %v2446_v48, %v2871_v12 }
 0xa38   : > { %v1904_v57 = vadd.f32 %v1893_v30, %v2868_v11 }
 0xa3a   : > { %1907 = vxpose.xlu1.b32.cont [2/4] (short) (narrow) %v1903_v32, 16 }
 0xa3e   : > { %1908 = vxpose.xlu1.b32.cont [3/4] (short) (narrow) %v1904_v57, 16 }
 0xa42   : > { %1909 = vxpose.xlu1.b32.end [4/4] (short) (narrow) %v1905_v33, 16 }
 0xab6   : > { %v1922_v34 = vpop.trf.xlu1 }
 0xab7   : > { %2455 = vmatprep.mubr.msk.f32.mxu1 %vm805_vm2, %v1922_v34 }
 0xaba   : > { %v1923_v35 = vpop.trf.xlu1 }
 0xabb   : > { %2456 = vmatmul.mubr.msk.f32.vlgmr.msra.gmra.mrb[24].mxu1 %vm805_vm2, %v1923_v35 }
 0xb8e   : > { %v2457_v58 = vpop.f32.mrb[24].mxu1 }
 0xb8f   : > { %v2021_v11 = vpop.f32.mrb[25].mxu1  ;;  %v2027_v12 = vadd.f32 %v2457_v58, %v2188_v36 }
 0xb90   : > { %v2022_v38 = vadd.f32 %v2188_v36, %v2021_v11 }
 0xb91   : > { %2031 = vst.msk [vmem:[%s361_s14 + $0x8] sm:$0xff] %vm406_vm0, %v2027_v12 }
 0xb92   : > { %2030 = vst.msk [vmem:[%s361_s14] sm:$0xff] %vm406_vm0, %v2022_v38 }
 0xb93 PF: > { %s20_s13 = sadd.s32 1, %s2609_s13  }
 0xb94   : > { %p17_p4 = scmp.ge.s32.totalorder %s20_s13, 4  }
 0xb96   :  { %19 = sbr.rel (!%p17_p4) target bundleno = 1 (0x1), region = 97 }

// kernel: maniqa_forward.9
= control target key start
LH: loop header
LB: loop body
LE: loop exit
PB: predicated region body
PF: predicated region fallthrough
CT: control target
= control target key end

     0   :  { %s8732_s13 = smov 0   ;;  %s10481_s0 = inlined_call_operand.vmem [shape: f32[32,128], index: 0, kind: input, shape index: {}]   ;;  %s10482_s1 = inlined_call_operand.vmem [shape: f32[2,16,16], index: 1, kind: input, shape index: {}]   ;;  %s10483_s2 = inlined_call_operand.vmem [shape: f32[2,1,16], index: 2, kind: input, shape index: {}]   ;;  %s10484_s3 = inlined_call_operand.vmem [shape: f32[2,16,16], index: 3, kind: input, shape index: {}]   ;;  %s10485_s4 = inlined_call_operand.vmem [shape: f32[2,1,16], index: 4, kind: input, shape index: {}]   ;;  %s10486_s5 = inlined_call_operand.vmem [shape: f32[2,16,16], index: 5, kind: input, shape index: {}]   ;;  %s10487_s6 = inlined_call_operand.vmem [shape: f32[2,1,16], index: 6, kind: input, shape index: {}]   ;;  %s10488_s7 = inlined_call_operand.vmem [shape: f32[8,128,16], index: 7, kind: input, shape index: {}]   ;;  %s10489_s8 = inlined_call_operand.vmem [shape: f32[128,32], index: 8, kind: input, shape index: {}]   ;;  %s10490_s9 = inlined_call_operand.vmem [shape: f32[1,32], index: 9, kind: input, shape index: {}]   ;;  %s10491_s10 = inlined_call_operand.vmem [shape: f32[32,32], index: 10, kind: output, shape index: {}]  }
   0x1 LB: > { %s5864_s14 = sadd.s32 4294967295, %s8675_s13   ;;  %p5868_p0 = scmp.ge.s32.totalorder %s8675_s13, 1  ;;  %s8675_s13 = sphi %s8732_s13, %s20_s13  }
   0x2   : > { %p313_p1 = scmp.lt.s32.totalorder %s8675_s13, 3 }
   0x4   : > { %p314_p2 = pnand %p5868_p0, %p313_p1 }
   0x5   : > { %s5869_s15 = sshll.u32 (!%p314_p2), %s5864_s14, 1  ;;  %v397_v0 = vld [vmem:[%s10482_s1] sm:$0xff] (!%p314_p2)  ;;  %v398_v1 = vld [vmem:[%s10482_s1 + $0x8] sm:$0xff] (!%p314_p2)  ;;  %vm406_vm0 = vcmask (!%p314_p2), 130048   ;;  %vm5805_vm2 = vcmask (!%p314_p2), 261120  }
   0x6   : > { %317 = sbr.rel (%p314_p2) target bundleno = 3821 (0xeed), region = 60  ;;  %p352_p3 = scmp.lt.s32.totalorder (!%p314_p2), %s5869_s15, 3  ;;  %v7868_v3 = vpack.c.bf16 (!%p314_p2), %v398_v1, %v397_v0  ;;  %v600_v5 = vld [vmem:[%s10484_s3] sm:$0xff] (!%p314_p2)  ;;  %v601_v6 = vld [vmem:[%s10484_s3 + $0x8] sm:$0xff] (!%p314_p2)  ;;  %vm8933_vm1 = vmpackc.low (!%p314_p2), %vm406_vm0, %vm406_vm0 }
   0x7   : > { %v7872_v7 = vpack.c.bf16 (!%p314_p2), %v601_v6, %v600_v5  ;;  %v754_v9 = vld [vmem:[%s10486_s5] sm:$0xff] (!%p314_p2)  ;;  %v755_v10 = vld [vmem:[%s10486_s5 + $0x8] sm:$0xff] (!%p314_p2) }
   0x8   : > { %7869 = vmatprep.subr.bf16.mxu0 (!%p314_p2), %v7868_v3  ;;  %v7876_v11 = vpack.c.bf16 (!%p314_p2), %v755_v10, %v754_v9  ;;  %v5873_v27 = vld [vmem:[%s10483_s2] ss:$0 sm:$0xff] (!%p314_p2)  ;;  %v8642_v1 = vld [vmem:[%s10488_s7 + $0x328] sm:$0xff] (!%p314_p2) }
   0x9   : > { %7871 = vmatpush3.bf16.msra.mxu0 (!%p314_p2), %v7868_v3  ;;  %v5890_v60 = vld [vmem:[%s10485_s4] ss:$0 sm:$0xff] (!%p314_p2) }
   0xa   : > { %7873 = vmatprep.subr.bf16.mxu0 (!%p314_p2), %v7872_v7 }
   0xd   : > { %s10495_s15 = smov (!%p352_p3, %s5869_s15), 3 }
   0xe   : > { %s5870_s16 = sshll.u32 %s10495_s15, 3 }
   0xf   : > { %s355_s19 = scalar_lea.vmem %s10481_s0, %s5870_s16  ;;  %s361_s26 = scalar_lea.vmem %s10491_s10, %s5870_s16 }
  0x10   : > { %v363_v2 = vld [vmem:[%s355_s19] sm:$0xff]  ;;  %v364_v4 = vld [vmem:[%s355_s19 + $0x8] sm:$0xff] }
  0x11   : > { %365 = vxpose.xlu0.b32.start [1/2] (short) %v363_v2, 128 }
  0x15   : > { %366 = vxpose.xlu0.b32.end [2/2] (short) %v364_v4, 128 }
  0x91   : > { %v8760_v8 = vpop.trf.xlu0 }
  0x92   : > { %6997 = vmatprep.mubr.msk.f32.mxu0 %vm406_vm0, %v8760_v8 }
  0x95   : > { %v8770_v12 = vpop.trf.xlu0 }
  0x96   : > { %6998 = vmatmul.mubr.msk.f32.vlgmr.msra.gmra.mrb[0].mxu0 %vm406_vm0, %v8770_v12 }
  0x97   : > { %7875 = vmatpush3.bf16.msra.mxu0 %v7872_v7 }
  0x98   : > { %7877 = vmatprep.subr.bf16.mxu0 %v7876_v11 }
  0x99   : > { %v8774_v13 = vpop.trf.xlu0 }
  0x9a   : > { %7000 = vmatprep.mubr.msk.f32.mxu0 %vm406_vm0, %v8774_v13 }
  0x9d   : > { %v8778_v14 = vpop.trf.xlu0 }
  0x9e   : > { %7001 = vmatmul.mubr.msk.f32.gmra.mrb[2].mxu0 %vm406_vm0, %v8778_v14 }
  0xa1   : > { %v8782_v15 = vpop.trf.xlu0 }
  0xa2   : > { %7003 = vmatprep.mubr.msk.f32.mxu0 %vm406_vm0, %v8782_v15 }
  0xa5   : > { %v8786_v16 = vpop.trf.xlu0 }
  0xa6   : > { %7004 = vmatmul.mubr.msk.f32.gmra.mrb[4].mxu0 %vm406_vm0, %v8786_v16 }
  0xa9   : > { %v8790_v17 = vpop.trf.xlu0 }
  0xaa   : > { %7006 = vmatprep.mubr.msk.f32.mxu0 %vm406_vm0, %v8790_v17 }
  0xad   : > { %v8794_v18 = vpop.trf.xlu0 }
  0xae   : > { %7007 = vmatmul.mubr.msk.f32.gmra.mrb[6].mxu0 %vm406_vm0, %v8794_v18 }
  0xb1   : > { %v8798_v19 = vpop.trf.xlu0 }
  0xb2   : > { %7009 = vmatprep.mubr.msk.f32.mxu0 %vm406_vm0, %v8798_v19 }
  0xb5   : > { %v8802_v20 = vpop.trf.xlu0 }
  0xb6   : > { %7010 = vmatmul.mubr.msk.f32.gmra.mrb[8].mxu0 %vm406_vm0, %v8802_v20 }
  0xb9   : > { %v8806_v21 = vpop.trf.xlu0 }
  0xba   : > { %7012 = vmatprep.mubr.msk.f32.mxu0 %vm406_vm0, %v8806_v21 }
  0xbd   : > { %v8810_v22 = vpop.trf.xlu0 }
  0xbe   : > { %7013 = vmatmul.mubr.msk.f32.gmra.mrb[10].mxu0 %vm406_vm0, %v8810_v22 }
  0xc1   : > { %v8814_v23 = vpop.trf.xlu0 }
  0xc2   : > { %7015 = vmatprep.mubr.msk.f32.mxu0 %vm406_vm0, %v8814_v23 }
  0xc5   : > { %v8818_v24 = vpop.trf.xlu0 }
  0xc6   : > { %7016 = vmatmul.mubr.msk.f32.gmra.mrb[12].mxu0 %vm406_vm0, %v8818_v24 }
  0xc9   : > { %v8822_v25 = vpop.trf.xlu0 }
  0xca   : > { %7018 = vmatprep.mubr.msk.f32.mxu0 %vm406_vm0, %v8822_v25 }
  0xcd   : > { %v8826_v26 = vpop.trf.xlu0 }
  0xce   : > { %7019 = vmatmul.mubr.msk.f32.gmra.mrb[14].mxu0 %vm406_vm0, %v8826_v26 }
  0xcf   : > { %7025 = vmatprep.mubr.msk.f32.mxu0 %vm406_vm0, %v8760_v8 }
  0xd2   : > { %7026 = vmatmul.mubr.msk.f32.vlgmr.msra.gmra.mrb[16].mxu0 %vm406_vm0, %v8770_v12 }
  0xd3   : > { %7028 = vmatprep.mubr.msk.f32.mxu0 %vm406_vm0, %v8774_v13  ;;  %7879 = vmatpush3.bf16.msra.mxu0 %v7876_v11 }
  0xd6   : > { %7029 = vmatmul.mubr.msk.f32.gmra.mrb[18].mxu0 %vm406_vm0, %v8778_v14 }
  0xd7   : > { %7031 = vmatprep.mubr.msk.f32.mxu0 %vm406_vm0, %v8782_v15 }
  0xda   : > { %7032 = vmatmul.mubr.msk.f32.gmra.mrb[20].mxu0 %vm406_vm0, %v8786_v16 }
  0xdb   : > { %7034 = vmatprep.mubr.msk.f32.mxu0 %vm406_vm0, %v8790_v17 }
  0xde   : > { %7035 = vmatmul.mubr.msk.f32.gmra.mrb[22].mxu0 %vm406_vm0, %v8794_v18 }
  0xdf   : > { %7037 = vmatprep.mubr.msk.f32.mxu0 %vm406_vm0, %v8798_v19 }
  0xe2   : > { %7038 = vmatmul.mubr.msk.f32.gmra.mrb[24].mxu0 %vm406_vm0, %v8802_v20 }
  0xe3   : > { %7040 = vmatprep.mubr.msk.f32.mxu0 %vm406_vm0, %v8806_v21 }
  0xe6   : > { %7041 = vmatmul.mubr.msk.f32.gmra.mrb[26].mxu0 %vm406_vm0, %v8810_v22 }
  0xe7   : > { %7043 = vmatprep.mubr.msk.f32.mxu0 %vm406_vm0, %v8814_v23 }
  0xea   : > { %7044 = vmatmul.mubr.msk.f32.gmra.mrb[28].mxu0 %vm406_vm0, %v8818_v24 }
  0xeb   : > { %7046 = vmatprep.mubr.msk.f32.mxu0 %vm406_vm0, %v8822_v25 }
  0xee   : > { %7047 = vmatmul.mubr.msk.f32.gmra.mrb[30].mxu0 %vm406_vm0, %v8826_v26 }
  0xef   : > { %7053 = vmatprep.mubr.msk.f32.mxu0 %vm406_vm0, %v8760_v8 }
  0xf2   : > { %7054 = vmatmul.mubr.msk.f32.vlgmr.msra.gmra.mrb[32].mxu0 %vm406_vm0, %v8770_v12 }
  0xf3   : > { %7056 = vmatprep.mubr.msk.f32.mxu0 %vm406_vm0, %v8774_v13 }
  0xf6   : > { %7057 = vmatmul.mubr.msk.f32.gmra.mrb[34].mxu0 %vm406_vm0, %v8778_v14 }
  0xf7   : > { %7059 = vmatprep.mubr.msk.f32.mxu0 %vm406_vm0, %v8782_v15 }
  0xfa   : > { %7060 = vmatmul.mubr.msk.f32.gmra.mrb[36].mxu0 %vm406_vm0, %v8786_v16 }
  0xfb   : > { %7062 = vmatprep.mubr.msk.f32.mxu0 %vm406_vm0, %v8790_v17 }
  0xfe   : > { %7063 = vmatmul.mubr.msk.f32.gmra.mrb[38].mxu0 %vm406_vm0, %v8794_v18 }
  0xff   : > { %7065 = vmatprep.mubr.msk.f32.mxu0 %vm406_vm0, %v8798_v19 }
 0x102   : > { %7066 = vmatmul.mubr.msk.f32.gmra.mrb[40].mxu0 %vm406_vm0, %v8802_v20 }
 0x103   : > { %7068 = vmatprep.mubr.msk.f32.mxu0 %vm406_vm0, %v8806_v21 }
 0x106   : > { %7069 = vmatmul.mubr.msk.f32.gmra.mrb[42].mxu0 %vm406_vm0, %v8810_v22 }
 0x107   : > { %7071 = vmatprep.mubr.msk.f32.mxu0 %vm406_vm0, %v8814_v23 }
 0x10a   : > { %7072 = vmatmul.mubr.msk.f32.gmra.mrb[44].mxu0 %vm406_vm0, %v8818_v24 }
 0x10b   : > { %7074 = vmatprep.mubr.msk.f32.mxu0 %vm406_vm0, %v8822_v25 }
 0x10e   : > { %7075 = vmatmul.mubr.msk.f32.gmra.mrb[46].mxu0 %vm406_vm0, %v8826_v26 }
 0x169   : > { %v6999_v28 = vpop.f32.mrb[0].mxu0 }
 0x16a   : > { %v8897_v29 = vadd.f32 %v6999_v28, %v5873_v27  ;;  %v521_v30 = vpop.f32.mrb[1].mxu0 }
 0x16b   : > { %v522_v31 = vadd.f32 %v5873_v27, %v521_v30 }
 0x16d   : > { %7109 = vmatprep.mubr.msk.f32.mxu0 %vm406_vm0, %v522_v31 }
 0x171   : > { %v7002_v32 = vpop.f32.mrb[2].mxu0 }
 0x172   : > { %v8900_v33 = vadd.f32 %v7002_v32, %v5873_v27  ;;  %v531_v34 = vpop.f32.mrb[3].mxu0 }
 0x173   : > { %v8902_v35 = vadd.f32 %v5873_v27, %v531_v34 }
 0x179   : > { %v7005_v36 = vpop.f32.mrb[4].mxu0 }
 0x17a   : > { %v8904_v37 = vadd.f32 %v7005_v36, %v5873_v27  ;;  %v541_v38 = vpop.f32.mrb[5].mxu0 }
 0x17b   : > { %v8906_v39 = vadd.f32 %v5873_v27, %v541_v38 }
 0x181   : > { %v7008_v40 = vpop.f32.mrb[6].mxu0 }
 0x182   : > { %v8908_v41 = vadd.f32 %v7008_v40, %v5873_v27  ;;  %v551_v42 = vpop.f32.mrb[7].mxu0 }
 0x183   : > { %v8910_v43 = vadd.f32 %v5873_v27, %v551_v42 }
 0x189   : > { %v7011_v44 = vpop.f32.mrb[8].mxu0 }
 0x18a   : > { %v8912_v45 = vadd.f32 %v7011_v44, %v5873_v27  ;;  %v561_v46 = vpop.f32.mrb[9].mxu0 }
 0x18b   : > { %v8914_v47 = vadd.f32 %v5873_v27, %v561_v46 }
 0x191   : > { %v7014_v48 = vpop.f32.mrb[10].mxu0 }
 0x192   : > { %v8916_v49 = vadd.f32 %v7014_v48, %v5873_v27  ;;  %v571_v50 = vpop.f32.mrb[11].mxu0 }
 0x193   : > { %v8918_v51 = vadd.f32 %v5873_v27, %v571_v50 }
 0x199   : > { %v7017_v52 = vpop.f32.mrb[12].mxu0 }
 0x19a   : > { %v8920_v53 = vadd.f32 %v7017_v52, %v5873_v27  ;;  %v581_v54 = vpop.f32.mrb[13].mxu0 }
 0x19b   : > { %v8922_v55 = vadd.f32 %v5873_v27, %v581_v54 }
 0x1a1   : > { %v7020_v56 = vpop.f32.mrb[14].mxu0 }
 0x1a2   : > { %v8924_v57 = vadd.f32 %v7020_v56, %v5873_v27  ;;  %v591_v58 = vpop.f32.mrb[15].mxu0 }
 0x1a3   : > { %v8926_v59 = vadd.f32 %v5873_v27, %v591_v58 }
 0x1a5   : > { %v7027_v61 = vpop.f32.mrb[16].mxu0 }
 0x1a6   : > { %v681_v62 = vadd.f32 %v7027_v61, %v5890_v60  ;;  %v675_v63 = vpop.f32.mrb[17].mxu0 }
 0x1a7   : > { %v676_v0 = vadd.f32 %v5890_v60, %v675_v63 }
 0x1a9   : > { %v7880_v2 = vpack.c.bf16 %v681_v62, %v676_v0  ;;  %v7030_v3 = vpop.f32.mrb[18].mxu0 }
 0x1aa   : > { %v691_v4 = vadd.f32 %v7030_v3, %v5890_v60  ;;  %v685_v5 = vpop.f32.mrb[19].mxu0 }
 0x1ab   : > { %v686_v6 = vadd.f32 %v5890_v60, %v685_v5  ;;  %7882 = vmatprep.subr.msk.bf16.mxu0 %vm8933_vm1, %v7880_v2 }
 0x1ac   : > { %7885 = vmatpush3.bf16.xpose.msk.msra.mxu0 %vm8933_vm1, %v7880_v2 }
 0x1ad   : > { %v7886_v7 = vpack.c.bf16 %v691_v4, %v686_v6  ;;  %v7033_v9 = vpop.f32.mrb[20].mxu0  ;;  %v5907_v6 = vld [vmem:[%s10487_s6] ss:$0 sm:$0xff] }
 0x1ae   : > { %v701_v10 = vadd.f32 %v7033_v9, %v5890_v60  ;;  %v695_v11 = vpop.f32.mrb[21].mxu0 }
 0x1af   : > { %v696_v27 = vadd.f32 %v5890_v60, %v695_v11  ;;  %7888 = vmatprep.subr.msk.bf16.mxu0 %vm8933_vm1, %v7886_v7 }
 0x1b1   : > { %v7892_v28 = vpack.c.bf16 %v701_v10, %v696_v27  ;;  %v7036_v30 = vpop.f32.mrb[22].mxu0 }
 0x1b2   : > { %v711_v31 = vadd.f32 %v7036_v30, %v5890_v60  ;;  %v705_v32 = vpop.f32.mrb[23].mxu0 }
 0x1b3   : > { %v706_v34 = vadd.f32 %v5890_v60, %v705_v32 }
 0x1b4   : > { %7891 = vmatpush3.bf16.xpose.msk.msra.mxu0 %vm8933_vm1, %v7886_v7 }
 0x1b5   : > { %v7898_v36 = vpack.c.bf16 %v711_v31, %v706_v34  ;;  %v7039_v38 = vpop.f32.mrb[24].mxu0  ;;  %7894 = vmatprep.subr.msk.bf16.mxu0 %vm8933_vm1, %v7892_v28 }
 0x1b6   : > { %v721_v40 = vadd.f32 %v7039_v38, %v5890_v60  ;;  %v715_v42 = vpop.f32.mrb[25].mxu0 }
 0x1b7   : > { %v716_v44 = vadd.f32 %v5890_v60, %v715_v42 }
 0x1b9   : > { %v7904_v46 = vpack.c.bf16 %v721_v40, %v716_v44  ;;  %v7042_v48 = vpop.f32.mrb[26].mxu0 }
 0x1ba   : > { %v731_v50 = vadd.f32 %v7042_v48, %v5890_v60  ;;  %v725_v52 = vpop.f32.mrb[27].mxu0 }
 0x1bb   : > { %v726_v54 = vadd.f32 %v5890_v60, %v725_v52 }
 0x1bc   : > { %7897 = vmatpush3.bf16.xpose.msk.msra.mxu0 %vm8933_vm1, %v7892_v28 }
 0x1bd   : > { %v7910_v56 = vpack.c.bf16 %v731_v50, %v726_v54  ;;  %v7045_v58 = vpop.f32.mrb[28].mxu0  ;;  %7900 = vmatprep.subr.msk.bf16.mxu0 %vm8933_vm1, %v7898_v36 }
 0x1be   : > { %v741_v61 = vadd.f32 %v7045_v58, %v5890_v60  ;;  %v735_v62 = vpop.f32.mrb[29].mxu0 }
 0x1bf   : > { %v736_v63 = vadd.f32 %v5890_v60, %v735_v62 }
 0x1c1   : > { %v7916_v0 = vpack.c.bf16 %v741_v61, %v736_v63  ;;  %v7048_v2 = vpop.f32.mrb[30].mxu0 }
 0x1c2   : > { %v751_v3 = vadd.f32 %v7048_v2, %v5890_v60  ;;  %v745_v4 = vpop.f32.mrb[31].mxu0 }
 0x1c3   : > { %v746_v5 = vadd.f32 %v5890_v60, %v745_v4 }
 0x1c4   : > { %7903 = vmatpush3.bf16.xpose.msk.msra.mxu0 %vm8933_vm1, %v7898_v36 }
 0x1c5   : > { %v7922_v7 = vpack.c.bf16 %v751_v3, %v746_v5  ;;  %v7055_v9 = vpop.f32.mrb[32].mxu0  ;;  %7906 = vmatprep.subr.msk.bf16.mxu0 %vm8933_vm1, %v7904_v46 }
 0x1c6   : > { %v835_v10 = vadd.f32 %v7055_v9, %v5907_v6  ;;  %v829_v11 = vpop.f32.mrb[33].mxu0 }
 0x1c7   : > { %v830_v27 = vadd.f32 %v5907_v6, %v829_v11 }
 0x1c9   : > { %v7928_v28 = vpack.c.bf16 %v835_v10, %v830_v27  ;;  %v7058_v30 = vpop.f32.mrb[34].mxu0 }
 0x1ca   : > { %v845_v31 = vadd.f32 %v7058_v30, %v5907_v6  ;;  %v839_v32 = vpop.f32.mrb[35].mxu0 }
 0x1cb   : > { %v840_v60 = vadd.f32 %v5907_v6, %v839_v32 }
 0x1cc   : > { %7909 = vmatpush3.bf16.xpose.msk.msra.mxu0 %vm8933_vm1, %v7904_v46 }
 0x1cd   : > { %v7932_v34 = vpack.c.bf16 %v845_v31, %v840_v60  ;;  %v7061_v38 = vpop.f32.mrb[36].mxu0  ;;  %7912 = vmatprep.subr.msk.bf16.mxu0 %vm8933_vm1, %v7910_v56 }
 0x1ce   : > { %v855_v36 = vadd.f32 %v7061_v38, %v5907_v6  ;;  %v849_v40 = vpop.f32.mrb[37].mxu0 }
 0x1cf   : > { %v850_v42 = vadd.f32 %v5907_v6, %v849_v40 }
 0x1d1   : > { %v7936_v44 = vpack.c.bf16 %v855_v36, %v850_v42  ;;  %v7064_v48 = vpop.f32.mrb[38].mxu0 }
 0x1d2   : > { %v865_v50 = vadd.f32 %v7064_v48, %v5907_v6  ;;  %v859_v52 = vpop.f32.mrb[39].mxu0 }
 0x1d3   : > { %v860_v54 = vadd.f32 %v5907_v6, %v859_v52 }
 0x1d4   : > { %7915 = vmatpush3.bf16.xpose.msk.msra.mxu0 %vm8933_vm1, %v7910_v56 }
 0x1d5   : > { %v7940_v58 = vpack.c.bf16 %v865_v50, %v860_v54  ;;  %v7067_v61 = vpop.f32.mrb[40].mxu0  ;;  %7918 = vmatprep.subr.msk.bf16.mxu0 %vm8933_vm1, %v7916_v0 }
 0x1d6   : > { %v875_v46 = vadd.f32 %v7067_v61, %v5907_v6  ;;  %v869_v62 = vpop.f32.mrb[41].mxu0 }
 0x1d7   : > { %v870_v63 = vadd.f32 %v5907_v6, %v869_v62 }
 0x1d9   : > { %v7944_v2 = vpack.c.bf16 %v875_v46, %v870_v63  ;;  %v7070_v3 = vpop.f32.mrb[42].mxu0 }
 0x1da   : > { %v885_v4 = vadd.f32 %v7070_v3, %v5907_v6  ;;  %v879_v5 = vpop.f32.mrb[43].mxu0 }
 0x1db   : > { %v880_v9 = vadd.f32 %v5907_v6, %v879_v5 }
 0x1dc   : > { %7921 = vmatpush3.bf16.xpose.msk.msra.mxu0 %vm8933_vm1, %v7916_v0 }
 0x1dd   : > { %v7948_v10 = vpack.c.bf16 %v885_v4, %v880_v9  ;;  %v7073_v11 = vpop.f32.mrb[44].mxu0  ;;  %7924 = vmatprep.subr.msk.bf16.mxu0 %vm8933_vm1, %v7922_v7 }
 0x1de   : > { %v895_v56 = vadd.f32 %v7073_v11, %v5907_v6  ;;  %v889_v27 = vpop.f32.mrb[45].mxu0 }
 0x1df   : > { %v890_v30 = vadd.f32 %v5907_v6, %v889_v27 }
 0x1e1   : > { %v7952_v31 = vpack.c.bf16 %v895_v56, %v890_v30  ;;  %v7076_v32 = vpop.f32.mrb[46].mxu0 }
 0x1e2   : > { %v905_v60 = vadd.f32 %v7076_v32, %v5907_v6  ;;  %v899_v38 = vpop.f32.mrb[47].mxu0 }
 0x1e3   : > { %v900_v36 = vadd.f32 %v5907_v6, %v899_v38 }
 0x1e4   : > { %7927 = vmatpush3.bf16.xpose.msk.msra.mxu0 %vm8933_vm1, %v7922_v7 }
 0x1e5   : > { %v7956_v40 = vpack.c.bf16 %v905_v60, %v900_v36  ;;  %7929 = vmatprep.subr.bf16.mxu0 %v7928_v28 }
 0x1eb   : > { %7110 = vmatmul.mubr.msk.f32.vlgmr.msra.gmra.mrb[48].mxu0 %vm406_vm0, %v8897_v29 }
 0x1ec   : > { %7112 = vmatprep.mubr.msk.f32.mxu0 %vm406_vm0, %v8902_v35  ;;  %7931 = vmatpush3.bf16.msra.mxu0 %v7928_v28 }
 0x1ed   : > { %7933 = vmatprep.subr.bf16.mxu0 %v7932_v34 }
 0x1ef   : > { %7113 = vmatmul.mubr.msk.f32.gmra.mrb[50].mxu0 %vm406_vm0, %v8900_v33 }
 0x1f0   : > { %7115 = vmatprep.mubr.msk.f32.mxu0 %vm406_vm0, %v8906_v39  ;;  %7935 = vmatpush3.bf16.msra.mxu0 %v7932_v34 }
 0x1f1   : > { %7937 = vmatprep.subr.bf16.mxu0 %v7936_v44 }
 0x1f3   : > { %7116 = vmatmul.mubr.msk.f32.gmra.mrb[52].mxu0 %vm406_vm0, %v8904_v37 }
 0x1f4   : > { %7118 = vmatprep.mubr.msk.f32.mxu0 %vm406_vm0, %v8910_v43  ;;  %7939 = vmatpush3.bf16.msra.mxu0 %v7936_v44 }
 0x1f5   : > { %7941 = vmatprep.subr.bf16.mxu0 %v7940_v58 }
 0x1f7   : > { %7119 = vmatmul.mubr.msk.f32.gmra.mrb[54].mxu0 %vm406_vm0, %v8908_v41 }
 0x1f8   : > { %7121 = vmatprep.mubr.msk.f32.mxu0 %vm406_vm0, %v8914_v47  ;;  %7943 = vmatpush3.bf16.msra.mxu0 %v7940_v58 }
 0x1f9   : > { %7945 = vmatprep.subr.bf16.mxu0 %v7944_v2 }
 0x1fb   : > { %7122 = vmatmul.mubr.msk.f32.gmra.mrb[56].mxu0 %vm406_vm0, %v8912_v45 }
 0x1fc   : > { %7124 = vmatprep.mubr.msk.f32.mxu0 %vm406_vm0, %v8918_v51  ;;  %7947 = vmatpush3.bf16.msra.mxu0 %v7944_v2 }
 0x1fd   : > { %7949 = vmatprep.subr.bf16.mxu0 %v7948_v10 }
 0x1ff   : > { %7125 = vmatmul.mubr.msk.f32.gmra.mrb[58].mxu0 %vm406_vm0, %v8916_v49 }
 0x200   : > { %7127 = vmatprep.mubr.msk.f32.mxu0 %vm406_vm0, %v8922_v55  ;;  %7951 = vmatpush3.bf16.msra.mxu0 %v7948_v10 }
 0x201   : > { %7953 = vmatprep.subr.bf16.mxu0 %v7952_v31 }
 0x203   : > { %7128 = vmatmul.mubr.msk.f32.gmra.mrb[60].mxu0 %vm406_vm0, %v8920_v53 }
 0x204   : > { %7130 = vmatprep.mubr.msk.f32.mxu0 %vm406_vm0, %v8926_v59  ;;  %7955 = vmatpush3.bf16.msra.mxu0 %v7952_v31 }
 0x205   : > { %7957 = vmatprep.subr.bf16.mxu0 %v7956_v40 }
 0x207   : > { %7131 = vmatmul.mubr.msk.f32.gmra.mrb[62].mxu0 %vm406_vm0, %v8924_v57 }
 0x208   : > { %7959 = vmatpush3.bf16.msra.mxu0 %v7956_v40 }
 0x2be   : > { %v7111_v29 = vpop.f32.mrb[48].mxu0 }
 0x2bf   : > { %v1070_v33 = vpop.f32.mrb[49].mxu0  ;;  %v1150_v41 = vmul.f32 0.25, %v7111_v29 }
 0x2c0   : > { %v1149_v35 = vmul.f32 0.25, %v1070_v33 }
 0x2c2   : > { %1165 = vmax.xlane.f32.xlu1 %v1149_v35  ;;  %v7114_v37 = vpop.f32.mrb[50].mxu0 }
 0x2c3   : > { %v1080_v39 = vpop.f32.mrb[51].mxu0  ;;  %v1152_v49 = vmul.f32 0.25, %v7114_v37 }
 0x2c4   : > { %v1151_v43 = vmul.f32 0.25, %v1080_v39 }
 0x2c6   : > { %1167 = vmax.xlane.f32.xlu1 %v1150_v41  ;;  %1169 = vmax.xlane.f32.xlu0 %v1151_v43  ;;  %v7117_v45 = vpop.f32.mrb[52].mxu0 }
 0x2c7   : > { %v1090_v47 = vpop.f32.mrb[53].mxu0  ;;  %v1154_v0 = vmul.f32 0.25, %v7117_v45 }
 0x2c8   : > { %v1153_v55 = vmul.f32 0.25, %v1090_v47 }
 0x2ca   : > { %1171 = vmax.xlane.f32.xlu1 %v1152_v49  ;;  %v7120_v51 = vpop.f32.mrb[54].mxu0 }
 0x2cb   : > { %v1100_v53 = vpop.f32.mrb[55].mxu0  ;;  %v1156_v38 = vmul.f32 0.25, %v7120_v51 }
 0x2cc   : > { %v1155_v30 = vmul.f32 0.25, %v1100_v53 }
 0x2ce   : > { %1173 = vmax.xlane.f32.xlu1 %v1153_v55  ;;  %v7123_v57 = vpop.f32.mrb[56].mxu0 }
 0x2cf   : > { %v1110_v59 = vpop.f32.mrb[57].mxu0  ;;  %v1158_v29 = vmul.f32 0.25, %v7123_v57 }
 0x2d0   : > { %v1157_v40 = vmul.f32 0.25, %v1110_v59 }
 0x2d2   : > { %1175 = vmax.xlane.f32.xlu1 %v1154_v0  ;;  %v7126_v6 = vpop.f32.mrb[58].mxu0 }
 0x2d3   : > { %v1120_v7 = vpop.f32.mrb[59].mxu0  ;;  %v9013_v39 = vmul.f32 0.25, %v7126_v6 }
 0x2d4   : > { %v1159_v37 = vmul.f32 0.25, %v1120_v7 }
 0x2d6   : > { %v9002_v28 = vpop.f32.mrb[60].mxu0 }
 0x2d7   : > { %v9004_v34 = vpop.f32.mrb[61].mxu0 }
 0x2da   : > { %v9006_v42 = vpop.f32.mrb[62].mxu0 }
 0x2db   : > { %v9008_v44 = vpop.f32.mrb[63].mxu0 }
 0x34f   : > { %v1166_v48 = vpop.xlane.xlu1 %1165 }
 0x350   : > { %v1197_v52 = vsub.f32 %v1149_v35, %v1166_v48 }
 0x352   : > { %v1213_v46 = vmul.f32 1.442695, %v1197_v52 }
 0x353   : > { %v1168_v50 = vpop.xlane.xlu1 %1167  ;;  %v1170_v58 = vpop.xlane.xlu0 %1169 }
 0x354   : > { %v1198_v54 = vsub.f32 %v1150_v41, %v1168_v50  ;;  %v1199_v62 = vsub.f32 %v1151_v43, %v1170_v58 }
 0x356   : > { %v1215_v61 = vmul.f32 1.442695, %v1198_v54  ;;  %v1217_v2 = vmul.f32 1.442695, %v1199_v62 }
 0x357   : > { %v1172_v63 = vpop.xlane.xlu1 %1171 }
 0x358   : > { %8413 = vpow2.f32 %v1215_v61  ;;  %v1200_v3 = vsub.f32 %v1152_v49, %v1172_v63 }
 0x359   : > { %8415 = vpow2.f32 %v1213_v46 }
 0x35a   : > { %8417 = vpow2.f32 %v1217_v2  ;;  %v1219_v4 = vmul.f32 1.442695, %v1200_v3 }
 0x35b   : > { %v1174_v11 = vpop.xlane.xlu1 %1173 }
 0x35c   : > { %8419 = vpow2.f32 %v1219_v4  ;;  %v1201_v27 = vsub.f32 %v1153_v55, %v1174_v11  ;;  %v1161_v11 = vmul.f32 0.25, %v9004_v34 }
 0x35e   : > { %v1221_v32 = vmul.f32 1.442695, %v1201_v27 }
 0x35f   : > { %v1176_v31 = vpop.xlane.xlu1 %1175 }
 0x360   : > { %v1202_v60 = vsub.f32 %v1154_v0, %v1176_v31  ;;  %8421 = vpow2.f32 %v1221_v32 }
 0x362   : > { %v8414_v5 = vpop.eup %8413  ;;  %v1223_v36 = vmul.f32 1.442695, %v1202_v60 }
 0x363   : > { %1247 = vadd.xlane.f32.xlu1 %v8414_v5  ;;  %v8416_v9 = vpop.eup %8415 }
 0x364   : > { %v8418_v10 = vpop.eup %8417  ;;  %8423 = vpow2.f32 %v1223_v36 }
 0x366   : > { %v8420_v56 = vpop.eup %8419 }
 0x367   : > { %1245 = vadd.xlane.f32.xlu1 %v8416_v9 }
 0x36a   : > { %v8422_v33 = vpop.eup %8421 }
 0x36b   : > { %1249 = vadd.xlane.f32.xlu1 %v8418_v10 }
 0x36e   : > { %v9010_v35 = vpop.eup %8423 }
 0x36f   : > { %1251 = vadd.xlane.f32.xlu1 %v8420_v56 }
 0x373   : > { %1177 = vmax.xlane.f32.xlu1 %v1155_v30 }
 0x377   : > { %1179 = vmax.xlane.f32.xlu1 %v1156_v38 }
 0x37b   : > { %1181 = vmax.xlane.f32.xlu1 %v1157_v40 }
 0x37f   : > { %1183 = vmax.xlane.f32.xlu1 %v1158_v29 }
 0x383   : > { %1253 = vadd.xlane.f32.xlu1 %v8422_v33 }
 0x387   : > { %1255 = vadd.xlane.f32.xlu1 %v9010_v35 }
 0x38b   : > { %1185 = vmax.xlane.f32.xlu1 %v1159_v37 }
 0x38f   : > { %1187 = vmax.xlane.f32.xlu1 %v9013_v39 }
 0x3f0   : > { %v1248_v41 = vpop.xlane.xlu1 %1247 }
 0x3f1   : > { %8425 = vrcp.f32 %v1248_v41 }
 0x3f4   : > { %v1246_v43 = vpop.xlane.xlu1 %1245 }
 0x3f5   : > { %8427 = vrcp.f32 %v1246_v43 }
 0x3f8   : > { %v1250_v45 = vpop.xlane.xlu1 %1249 }
 0x3f9   : > { %8429 = vrcp.f32 %v1250_v45 }
 0x3fb   : > { %v8426_v49 = vpop.eup %8425 }
 0x3fc   : > { %v1252_v47 = vpop.xlane.xlu1 %1251  ;;  %v1294_v57 = vmul.f32 %v8426_v49, %v8414_v5 }
 0x3fd   : > { %8431 = vrcp.f32 %v1252_v47 }
 0x3ff   : > { %v8428_v51 = vpop.eup %8427 }
 0x400   : > { %v1178_v53 = vpop.xlane.xlu1 %1177  ;;  %v1293_v55 = vmul.f32 %v8428_v51, %v8416_v9 }
 0x401   : > { %v1203_v59 = vsub.f32 %v1155_v30, %v1178_v53 }
 0x402   : > { %7165 = vmatprep.mubr.f32.mxu0 %v1293_v55 }
 0x403   : > { %v8430_v0 = vpop.eup %8429  ;;  %v1225_v6 = vmul.f32 1.442695, %v1203_v59  ;;  %7166 = vmatmul.mubr.f32.vlgmr.msra.gmra.mrb[64].mxu0 %v1294_v57 }
 0x404   : > { %v1180_v7 = vpop.xlane.xlu1 %1179  ;;  %v1295_v48 = vmul.f32 %v8430_v0, %v8418_v10 }
 0x405   : > { %8433 = vpow2.f32 %v1225_v6  ;;  %v1204_v50 = vsub.f32 %v1156_v38, %v1180_v7 }
 0x406   : > { %7168 = vmatprep.mubr.f32.mxu0 %v1295_v48 }
 0x407   : > { %v8432_v52 = vpop.eup %8431  ;;  %v1227_v54 = vmul.f32 1.442695, %v1204_v50 }
 0x408   : > { %v1182_v58 = vpop.xlane.xlu1 %1181  ;;  %v1296_v61 = vmul.f32 %v8432_v52, %v8420_v56  ;;  %v1162_v56 = vmul.f32 0.25, %v9002_v28  ;;  %v1163_v28 = vmul.f32 0.25, %v9008_v44 }
 0x409   : > { %8435 = vpow2.f32 %v1227_v54  ;;  %v1205_v4 = vsub.f32 %v1157_v40, %v1182_v58 }
 0x40a   : > { %7169 = vmatmul.mubr.f32.gmra.mrb[66].mxu0 %v1296_v61 }
 0x40b   : > { %v1229_v10 = vmul.f32 1.442695, %v1205_v4 }
 0x40c   : > { %v1184_v46 = vpop.xlane.xlu1 %1183 }
 0x40d   : > { %v1206_v62 = vsub.f32 %v1158_v29, %v1184_v46 }
 0x40f   : > { %v8434_v63 = vpop.eup %8433  ;;  %v1231_v2 = vmul.f32 1.442695, %v1206_v62 }
 0x410   : > { %v1254_v3 = vpop.xlane.xlu1 %1253  ;;  %1257 = vadd.xlane.f32.xlu1 %v8434_v63 }
 0x411   : > { %8437 = vrcp.f32 %v1254_v3 }
 0x412   : > { %8439 = vpow2.f32 %v1231_v2 }
 0x413   : > { %v8436_v5 = vpop.eup %8435 }
 0x414   : > { %v1256_v9 = vpop.xlane.xlu1 %1255  ;;  %1259 = vadd.xlane.f32.xlu1 %v8436_v5 }
 0x415   : > { %8441 = vrcp.f32 %v1256_v9 }
 0x416   : > { %8443 = vpow2.f32 %v1229_v10 }
 0x418   : > { %v1186_v27 = vpop.xlane.xlu1 %1185  ;;  %1189 = vmax.xlane.f32.xlu1 %v1161_v11 }
 0x419   : > { %v1207_v31 = vsub.f32 %v1159_v37, %v1186_v27 }
 0x41b   : > { %v8438_v30 = vpop.eup %8437  ;;  %v1233_v29 = vmul.f32 1.442695, %v1207_v31 }
 0x41c   : > { %1191 = vmax.xlane.f32.xlu1 %v1162_v56  ;;  %v1297_v32 = vmul.f32 %v8438_v30, %v8422_v33  ;;  %v8440_v60 = vpop.eup %8439  ;;  %v1188_v38 = vpop.xlane.xlu1 %1187  ;;  %v1164_v33 = vmul.f32 0.25, %v9006_v42 }
 0x41d   : > { %v1208_v41 = vsub.f32 %v9013_v39, %v1188_v38  ;;  %8445 = vpow2.f32 %v1233_v29 }
 0x41e   : > { %7171 = vmatprep.mubr.f32.mxu0 %v1297_v32 }
 0x41f   : > { %v8442_v36 = vpop.eup %8441  ;;  %v1235_v43 = vmul.f32 1.442695, %v1208_v41 }
 0x420   : > { %1263 = vadd.xlane.f32.xlu1 %v8440_v60  ;;  %v1298_v40 = vmul.f32 %v8442_v36, %v9010_v35  ;;  %v8444_v34 = vpop.eup %8443 }
 0x421   : > { %8447 = vpow2.f32 %v1235_v43 }
 0x422   : > { %7172 = vmatmul.mubr.f32.gmra.mrb[68].mxu0 %v1298_v40 }
 0x424   : > { %1261 = vadd.xlane.f32.xlu1 %v8444_v34 }
 0x427   : > { %v8446_v37 = vpop.eup %8445 }
 0x428   : > { %1193 = vmax.xlane.f32.xlu1 %v1163_v28 }
 0x42b   : > { %v8448_v45 = vpop.eup %8447 }
 0x42c   : > { %1195 = vmax.xlane.f32.xlu1 %v1164_v33 }
 0x430   : > { %1265 = vadd.xlane.f32.xlu1 %v8446_v37 }
 0x434   : > { %1267 = vadd.xlane.f32.xlu1 %v8448_v45 }
 0x49d   : > { %v1258_v35 = vpop.xlane.xlu1 %1257 }
 0x49e   : > { %8449 = vrcp.f32 %v1258_v35 }
 0x4a1   : > { %v1260_v47 = vpop.xlane.xlu1 %1259 }
 0x4a2   : > { %8451 = vrcp.f32 %v1260_v47 }
 0x4a5   : > { %v1190_v39 = vpop.xlane.xlu1 %1189 }
 0x4a6   : > { %v1209_v49 = vsub.f32 %v1161_v11, %v1190_v39 }
 0x4a8   : > { %v8450_v51 = vpop.eup %8449  ;;  %v1237_v53 = vmul.f32 1.442695, %v1209_v49 }
 0x4a9   : > { %v1192_v55 = vpop.xlane.xlu1 %1191  ;;  %v1299_v57 = vmul.f32 %v8450_v51, %v8434_v63 }
 0x4aa   : > { %8453 = vpow2.f32 %v1237_v53  ;;  %v1210_v44 = vsub.f32 %v1162_v56, %v1192_v55 }
 0x4ab   : > { %7174 = vmatprep.mubr.f32.mxu0 %v1299_v57 }
 0x4ac   : > { %v8452_v59 = vpop.eup %8451  ;;  %v1239_v42 = vmul.f32 1.442695, %v1210_v44  ;;  %v5956_v44 = vld [vmem:[%s10488_s7 + $0x80] sm:$0xff] }
 0x4ad   : > { %v1264_v0 = vpop.xlane.xlu1 %1263  ;;  %v1300_v6 = vmul.f32 %v8452_v59, %v8436_v5  ;;  %v5957_v59 = vld [vmem:[%s10488_s7 + $0x88] sm:$0xff] }
 0x4ae   : > { %8455 = vpow2.f32 %v1239_v42  ;;  %v5958_v42 = vld [vmem:[%s10488_s7 + $0x90] sm:$0xff] }
 0x4af   : > { %7175 = vmatmul.mubr.f32.gmra.mrb[70].mxu0 %v1300_v6  ;;  %8457 = vrcp.f32 %v1264_v0  ;;  %v5959_v0 = vld [vmem:[%s10488_s7 + $0x98] sm:$0xff]  ;;  %v5960_v6 = vld [vmem:[%s10488_s7 + $0xa0] sm:$0xff] }
 0x4b1   : > { %v1262_v7 = vpop.xlane.xlu1 %1261 }
 0x4b2   : > { %8459 = vrcp.f32 %v1262_v7  ;;  %v5961_v7 = vld [vmem:[%s10488_s7 + $0xa8] sm:$0xff] }
 0x4b4   : > { %v8454_v48 = vpop.eup %8453 }
 0x4b5   : > { %1269 = vadd.xlane.f32.xlu1 %v8454_v48  ;;  %v1194_v50 = vpop.xlane.xlu1 %1193 }
 0x4b6   : > { %v1211_v52 = vsub.f32 %v1163_v28, %v1194_v50  ;;  %v5963_v50 = vld [vmem:[%s10488_s7 + $0xb8] sm:$0xff] }
 0x4b8   : > { %v8456_v54 = vpop.eup %8455  ;;  %v1241_v58 = vmul.f32 1.442695, %v1211_v52  ;;  %v5964_v52 = vld [vmem:[%s10488_s7 + $0xc0] sm:$0xff] }
 0x4b9   : > { %1271 = vadd.xlane.f32.xlu0 %v8456_v54  ;;  %v1196_v61 = vpop.xlane.xlu1 %1195  ;;  %v8458_v62 = vpop.eup %8457 }
 0x4ba   : > { %8461 = vpow2.f32 %v1241_v58  ;;  %v1212_v46 = vsub.f32 %v1164_v33, %v1196_v61  ;;  %v1302_v5 = vmul.f32 %v8458_v62, %v8440_v60  ;;  %v5966_v58 = vld [vmem:[%s10488_s7 + $0xd0] sm:$0xff]  ;;  %v5967_v61 = vld [vmem:[%s10488_s7 + $0xd8] sm:$0xff]  ;;  %v5969_v62 = vld [vmem:[%s10488_s7 + $0xe8] sm:$0xff] }
 0x4bc   : > { %v8460_v63 = vpop.eup %8459  ;;  %v1243_v2 = vmul.f32 1.442695, %v1212_v46  ;;  %v5968_v46 = vld [vmem:[%s10488_s7 + $0xe0] sm:$0xff] }
 0x4bd   : > { %v1266_v3 = vpop.xlane.xlu1 %1265  ;;  %v1301_v4 = vmul.f32 %v8460_v63, %v8444_v34  ;;  %v5970_v63 = vld [vmem:[%s10488_s7 + $0xf0] sm:$0xff] }
 0x4be   : > { %8463 = vpow2.f32 %v1243_v2  ;;  %v5971_v2 = vld [vmem:[%s10488_s7 + $0xf8] sm:$0xff] }
 0x4bf   : > { %8465 = vrcp.f32 %v1266_v3  ;;  %7177 = vmatprep.mubr.f32.mxu0 %v1301_v4  ;;  %v1454_v4 = vld [vmem:[%s10488_s7] sm:$0xff] }
 0x4c0   : > { %7178 = vmatmul.mubr.f32.gmra.mrb[72].mxu0 %v1302_v5 }
 0x4c1   : > { %v1268_v9 = vpop.xlane.xlu1 %1267 }
 0x4c2   : > { %8467 = vrcp.f32 %v1268_v9 }
 0x4c4   : > { %v8462_v10 = vpop.eup %8461 }
 0x4c5   : > { %1273 = vadd.xlane.f32.xlu1 %v8462_v10 }
 0x4c8   : > { %v8464_v11 = vpop.eup %8463 }
 0x4c9   : > { %v8466_v27 = vpop.eup %8465  ;;  %1275 = vadd.xlane.f32.xlu0 %v8464_v11 }
 0x4ca   : > { %v1303_v56 = vmul.f32 %v8466_v27, %v8446_v37  ;;  %v1457_v27 = vld [vmem:[%s10488_s7 + $0x18] sm:$0xff] }
 0x4cc   : > { %v8468_v30 = vpop.eup %8467  ;;  %7180 = vmatprep.mubr.f32.mxu0 %v1303_v56  ;;  %v1458_v56 = vld [vmem:[%s10488_s7 + $0x20] sm:$0xff] }
 0x4cd   : > { %v1304_v31 = vmul.f32 %v8468_v30, %v8448_v45  ;;  %v1459_v30 = vld [vmem:[%s10488_s7 + $0x28] sm:$0xff] }
 0x4cf   : > { %7181 = vmatmul.mubr.f32.gmra.mrb[74].mxu0 %v1304_v31  ;;  %v1460_v31 = vld [vmem:[%s10488_s7 + $0x30] sm:$0xff] }
 0x4d6   : > { %v7167_v32 = vpop.f32.mrb[64].mxu0 }
 0x4d7   : > { %v1375_v38 = vpop.f32.mrb[65].mxu0 }
 0x4d8   : > { %v7966_v36 = vpack.c.bf16 %v7167_v32, %v1375_v38  ;;  %v1461_v32 = vld [vmem:[%s10488_s7 + $0x38] sm:$0xff]  ;;  %v1462_v38 = vld [vmem:[%s10488_s7 + $0x40] sm:$0xff] }
 0x4dd   : > { %v7170_v40 = vpop.f32.mrb[66].mxu0 }
 0x4de   : > { %v1385_v60 = vpop.f32.mrb[67].mxu0 }
 0x4df   : > { %v7960_v29 = vpack.c.bf16 %v7170_v40, %v1385_v60 }
 0x4e1   : > { %7962 = vmatprep.subr.msk.bf16.mxu0 %vm8933_vm1, %v7960_v29 }
 0x4e2   : > { %7965 = vmatpush3.bf16.xpose.msk.msra.mxu0 %vm8933_vm1, %v7960_v29  ;;  %v1463_v29 = vld [vmem:[%s10488_s7 + $0x48] sm:$0xff] }
 0x4e3   : > { %7968 = vmatprep.subr.msk.bf16.mxu0 %vm8933_vm1, %v7966_v36 }
 0x4f5   : > { %v7173_v41 = vpop.f32.mrb[68].mxu0 }
 0x4f6   : > { %v1395_v34 = vpop.f32.mrb[69].mxu0 }
 0x4f7   : > { %v9028_v43 = vpack.c.bf16 %v7173_v41, %v1395_v34  ;;  %v1464_v41 = vld [vmem:[%s10488_s7 + $0x50] sm:$0xff]  ;;  %v1465_v34 = vld [vmem:[%s10488_s7 + $0x58] sm:$0xff] }
 0x542   : > { %v1270_v28 = vpop.xlane.xlu1 %1269 }
 0x543   : > { %8469 = vrcp.f32 %v1270_v28  ;;  %v1467_v28 = vld [vmem:[%s10488_s7 + $0x68] sm:$0xff] }
 0x546   : > { %v1272_v33 = vpop.xlane.xlu0 %1271 }
 0x547   : > { %8471 = vrcp.f32 %v1272_v33  ;;  %v1468_v33 = vld [vmem:[%s10488_s7 + $0x70] sm:$0xff] }
 0x54d   : > { %v8470_v37 = vpop.eup %8469 }
 0x54e   : > { %v1305_v45 = vmul.f32 %v8470_v37, %v8454_v48  ;;  %v5962_v48 = vld [vmem:[%s10488_s7 + $0xb0] sm:$0xff]  ;;  %v1469_v37 = vld [vmem:[%s10488_s7 + $0x78] sm:$0xff] }
 0x550   : > { %7183 = vmatprep.mubr.f32.mxu0 %v1305_v45 }
 0x551   : > { %v8472_v35 = vpop.eup %8471 }
 0x552   : > { %v1274_v47 = vpop.xlane.xlu1 %1273  ;;  %v1306_v39 = vmul.f32 %v8472_v35, %v8456_v54  ;;  %v5965_v54 = vld [vmem:[%s10488_s7 + $0xc8] sm:$0xff]  ;;  %v6008_v35 = vld [vmem:[%s10488_s7 + $0x100] sm:$0xff] }
 0x553   : > { %8473 = vrcp.f32 %v1274_v47 }
 0x554   : > { %7184 = vmatmul.mubr.f32.gmra.mrb[76].mxu0 %v1306_v39 }
 0x556   : > { %v1276_v49 = vpop.xlane.xlu0 %1275 }
 0x557   : > { %8475 = vrcp.f32 %v1276_v49  ;;  %v6009_v49 = vld [vmem:[%s10488_s7 + $0x108] sm:$0xff] }
 0x55d   : > { %v8474_v51 = vpop.eup %8473 }
 0x55e   : > { %v1307_v53 = vmul.f32 %v8474_v51, %v8462_v10  ;;  %v1455_v10 = vld [vmem:[%s10488_s7 + $0x8] sm:$0xff]  ;;  %v6010_v51 = vld [vmem:[%s10488_s7 + $0x110] sm:$0xff] }
 0x560   : > { %7186 = vmatprep.mubr.f32.mxu0 %v1307_v53  ;;  %v6011_v53 = vld [vmem:[%s10488_s7 + $0x118] sm:$0xff] }
 0x561   : > { %v8476_v55 = vpop.eup %8475 }
 0x562   : > { %v1308_v57 = vmul.f32 %v8476_v55, %v8464_v11  ;;  %v1456_v11 = vld [vmem:[%s10488_s7 + $0x10] sm:$0xff]  ;;  %v6012_v55 = vld [vmem:[%s10488_s7 + $0x120] sm:$0xff] }
 0x564   : > { %7187 = vmatmul.mubr.f32.gmra.mrb[78].mxu0 %v1308_v57  ;;  %v6013_v57 = vld [vmem:[%s10488_s7 + $0x128] sm:$0xff] }
 0x565   : > { %7193 = vmatprep.mubr.msk.f32.mxu0 %vm406_vm0, %v5956_v44  ;;  %v6014_v44 = vld [vmem:[%s10488_s7 + $0x130] sm:$0xff] }
 0x568   : > { %7194 = vmatmul.mubr.msk.f32.vlgmr.msra.gmra.mrb[80].mxu0 %vm406_vm0, %v5957_v59  ;;  %v6015_v59 = vld [vmem:[%s10488_s7 + $0x138] sm:$0xff] }
 0x569   : > { %7971 = vmatpush3.bf16.xpose.msk.msra.mxu0 %vm8933_vm1, %v7966_v36  ;;  %7196 = vmatprep.mubr.msk.f32.mxu0 %vm406_vm0, %v5958_v42  ;;  %v6016_v42 = vld [vmem:[%s10488_s7 + $0x140] sm:$0xff] }
 0x56a   : > { %7974 = vmatprep.subr.msk.bf16.mxu0 %vm8933_vm1, %v9028_v43 }
 0x56c   : > { %7197 = vmatmul.mubr.msk.f32.gmra.mrb[82].mxu0 %vm406_vm0, %v5959_v0  ;;  %v6017_v0 = vld [vmem:[%s10488_s7 + $0x148] sm:$0xff] }
 0x56d   : > { %7199 = vmatprep.mubr.msk.f32.mxu0 %vm406_vm0, %v5960_v6  ;;  %v6018_v6 = vld [vmem:[%s10488_s7 + $0x150] sm:$0xff] }
 0x570   : > { %7200 = vmatmul.mubr.msk.f32.gmra.mrb[84].mxu0 %vm406_vm0, %v5961_v7  ;;  %v6019_v7 = vld [vmem:[%s10488_s7 + $0x158] sm:$0xff] }
 0x571   : > { %7202 = vmatprep.mubr.msk.f32.mxu0 %vm406_vm0, %v5962_v48  ;;  %v6020_v48 = vld [vmem:[%s10488_s7 + $0x160] sm:$0xff] }
 0x574   : > { %7203 = vmatmul.mubr.msk.f32.gmra.mrb[86].mxu0 %vm406_vm0, %v5963_v50  ;;  %v6021_v50 = vld [vmem:[%s10488_s7 + $0x168] sm:$0xff] }
 0x575   : > { %7205 = vmatprep.mubr.msk.f32.mxu0 %vm406_vm0, %v5964_v52  ;;  %v6022_v52 = vld [vmem:[%s10488_s7 + $0x170] sm:$0xff] }
 0x578   : > { %7206 = vmatmul.mubr.msk.f32.gmra.mrb[88].mxu0 %vm406_vm0, %v5965_v54  ;;  %v6023_v54 = vld [vmem:[%s10488_s7 + $0x178] sm:$0xff] }
 0x579   : > { %7208 = vmatprep.mubr.msk.f32.mxu0 %vm406_vm0, %v5966_v58  ;;  %v6042_v58 = vld [vmem:[%s10488_s7 + $0x180] sm:$0xff] }
 0x57c   : > { %7209 = vmatmul.mubr.msk.f32.gmra.mrb[90].mxu0 %vm406_vm0, %v5967_v61  ;;  %v6043_v61 = vld [vmem:[%s10488_s7 + $0x188] sm:$0xff] }
 0x57d   : > { %7211 = vmatprep.mubr.msk.f32.mxu0 %vm406_vm0, %v5968_v46  ;;  %v6044_v46 = vld [vmem:[%s10488_s7 + $0x190] sm:$0xff] }
 0x580   : > { %7212 = vmatmul.mubr.msk.f32.gmra.mrb[92].mxu0 %vm406_vm0, %v5969_v62  ;;  %v6045_v62 = vld [vmem:[%s10488_s7 + $0x198] sm:$0xff] }
 0x581   : > { %7214 = vmatprep.mubr.msk.f32.mxu0 %vm406_vm0, %v5970_v63  ;;  %v6046_v63 = vld [vmem:[%s10488_s7 + $0x1a0] sm:$0xff] }
 0x582   : > { %v7176_v3 = vpop.f32.mrb[70].mxu0 }
 0x583   : > { %v1405_v5 = vpop.f32.mrb[71].mxu0 }
 0x584   : > { %v7978_v9 = vpack.c.bf16 %v7176_v3, %v1405_v5  ;;  %7215 = vmatmul.mubr.msk.f32.gmra.mrb[94].mxu0 %vm406_vm0, %v5971_v2  ;;  %v6047_v2 = vld [vmem:[%s10488_s7 + $0x1a8] sm:$0xff]  ;;  %v6048_v3 = vld [vmem:[%s10488_s7 + $0x1b0] sm:$0xff]  ;;  %v6050_v5 = vld [vmem:[%s10488_s7 + $0x1c0] sm:$0xff] }
 0x585   : > { %7221 = vmatprep.mubr.msk.f32.mxu0 %vm406_vm0, %v1454_v4  ;;  %v6049_v4 = vld [vmem:[%s10488_s7 + $0x1b8] sm:$0xff] }
 0x588   : > { %7222 = vmatmul.mubr.msk.f32.vlgmr.msra.gmra.mrb[80].mxu0 %vm406_vm0, %v1455_v10  ;;  %v6052_v10 = vld [vmem:[%s10488_s7 + $0x1d0] sm:$0xff] }
 0x589   : > { %7977 = vmatpush3.bf16.xpose.msk.msra.mxu0 %vm8933_vm1, %v9028_v43  ;;  %7224 = vmatprep.mubr.msk.f32.mxu0 %vm406_vm0, %v1456_v11  ;;  %v1466_v43 = vld [vmem:[%s10488_s7 + $0x60] sm:$0xff]  ;;  %v6053_v11 = vld [vmem:[%s10488_s7 + $0x1d8] sm:$0xff] }
 0x58a   : > { %7980 = vmatprep.subr.msk.bf16.mxu0 %vm8933_vm1, %v7978_v9 }
 0x58c   : > { %7225 = vmatmul.mubr.msk.f32.gmra.mrb[82].mxu0 %vm406_vm0, %v1457_v27  ;;  %v6054_v27 = vld [vmem:[%s10488_s7 + $0x1e0] sm:$0xff] }
 0x58d   : > { %7227 = vmatprep.mubr.msk.f32.mxu0 %vm406_vm0, %v1458_v56  ;;  %v6055_v56 = vld [vmem:[%s10488_s7 + $0x1e8] sm:$0xff] }
 0x590   : > { %7228 = vmatmul.mubr.msk.f32.gmra.mrb[84].mxu0 %vm406_vm0, %v1459_v30  ;;  %v6056_v30 = vld [vmem:[%s10488_s7 + $0x1f0] sm:$0xff] }
 0x591   : > { %7230 = vmatprep.mubr.msk.f32.mxu0 %vm406_vm0, %v1460_v31  ;;  %v6057_v31 = vld [vmem:[%s10488_s7 + $0x1f8] sm:$0xff] }
 0x593   : > { %v7179_v36 = vpop.f32.mrb[72].mxu0 }
 0x594   : > { %v1415_v40 = vpop.f32.mrb[73].mxu0  ;;  %7231 = vmatmul.mubr.msk.f32.gmra.mrb[86].mxu0 %vm406_vm0, %v1461_v32  ;;  %v6076_v32 = vld [vmem:[%s10488_s7 + $0x200] sm:$0xff] }
 0x595   : > { %v7984_v60 = vpack.c.bf16 %v7179_v36, %v1415_v40  ;;  %7233 = vmatprep.mubr.msk.f32.mxu0 %vm406_vm0, %v1462_v38  ;;  %v6077_v38 = vld [vmem:[%s10488_s7 + $0x208] sm:$0xff]  ;;  %v6078_v36 = vld [vmem:[%s10488_s7 + $0x210] sm:$0xff]  ;;  %v6079_v40 = vld [vmem:[%s10488_s7 + $0x218] sm:$0xff] }
 0x598   : > { %7234 = vmatmul.mubr.msk.f32.gmra.mrb[88].mxu0 %vm406_vm0, %v1463_v29  ;;  %v6081_v29 = vld [vmem:[%s10488_s7 + $0x228] sm:$0xff] }
 0x599   : > { %7236 = vmatprep.mubr.msk.f32.mxu0 %vm406_vm0, %v1464_v41  ;;  %v6082_v41 = vld [vmem:[%s10488_s7 + $0x230] sm:$0xff] }
 0x59c   : > { %7237 = vmatmul.mubr.msk.f32.gmra.mrb[90].mxu0 %vm406_vm0, %v1465_v34  ;;  %v6083_v34 = vld [vmem:[%s10488_s7 + $0x238] sm:$0xff] }
 0x59d   : > { %7239 = vmatprep.mubr.msk.f32.mxu0 %vm406_vm0, %v1466_v43  ;;  %v6084_v43 = vld [vmem:[%s10488_s7 + $0x240] sm:$0xff] }
 0x5a0   : > { %7240 = vmatmul.mubr.msk.f32.gmra.mrb[92].mxu0 %vm406_vm0, %v1467_v28  ;;  %v6085_v28 = vld [vmem:[%s10488_s7 + $0x248] sm:$0xff] }
 0x5a1   : > { %7242 = vmatprep.mubr.msk.f32.mxu0 %vm406_vm0, %v1468_v33  ;;  %v6086_v33 = vld [vmem:[%s10488_s7 + $0x250] sm:$0xff] }
 0x5a2   : > { %v7182_v45 = vpop.f32.mrb[74].mxu0 }
 0x5a3   : > { %v1425_v47 = vpop.f32.mrb[75].mxu0 }
 0x5a4   : > { %v9170_v39 = vpack.c.bf16 %v7182_v45, %v1425_v47  ;;  %7243 = vmatmul.mubr.msk.f32.gmra.mrb[94].mxu0 %vm406_vm0, %v1469_v37  ;;  %v6087_v37 = vld [vmem:[%s10488_s7 + $0x258] sm:$0xff]  ;;  %v6088_v45 = vld [vmem:[%s10488_s7 + $0x260] sm:$0xff]  ;;  %v6090_v47 = vld [vmem:[%s10488_s7 + $0x270] sm:$0xff] }
 0x5a5   : > { %7249 = vmatprep.mubr.msk.f32.mxu0 %vm406_vm0, %v6008_v35  ;;  %v6089_v35 = vld [vmem:[%s10488_s7 + $0x268] sm:$0xff] }
 0x5a8   : > { %7250 = vmatmul.mubr.msk.f32.vlgmr.msra.gmra.mrb[80].mxu0 %vm406_vm0, %v6009_v49  ;;  %v6110_v49 = vld [vmem:[%s10488_s7 + $0x280] sm:$0xff] }
 0x5a9   : > { %7983 = vmatpush3.bf16.xpose.msk.msra.mxu0 %vm8933_vm1, %v7978_v9  ;;  %7252 = vmatprep.mubr.msk.f32.mxu0 %vm406_vm0, %v6010_v51  ;;  %v6051_v9 = vld [vmem:[%s10488_s7 + $0x1c8] sm:$0xff] }
 0x5aa   : > { %7986 = vmatprep.subr.msk.bf16.mxu0 %vm8933_vm1, %v7984_v60  ;;  %v6111_v51 = vld [vmem:[%s10488_s7 + $0x288] sm:$0xff] }
 0x5ac   : > { %7253 = vmatmul.mubr.msk.f32.gmra.mrb[82].mxu0 %vm406_vm0, %v6011_v53  ;;  %v6112_v53 = vld [vmem:[%s10488_s7 + $0x290] sm:$0xff] }
 0x5ad   : > { %7255 = vmatprep.mubr.msk.f32.mxu0 %vm406_vm0, %v6012_v55  ;;  %v6113_v55 = vld [vmem:[%s10488_s7 + $0x298] sm:$0xff] }
 0x5b0   : > { %7256 = vmatmul.mubr.msk.f32.gmra.mrb[84].mxu0 %vm406_vm0, %v6013_v57  ;;  %v6114_v57 = vld [vmem:[%s10488_s7 + $0x2a0] sm:$0xff] }
 0x5b1   : > { %7258 = vmatprep.mubr.msk.f32.mxu0 %vm406_vm0, %v6014_v44  ;;  %v6115_v44 = vld [vmem:[%s10488_s7 + $0x2a8] sm:$0xff] }
 0x5b4   : > { %7259 = vmatmul.mubr.msk.f32.gmra.mrb[86].mxu0 %vm406_vm0, %v6015_v59  ;;  %v6116_v59 = vld [vmem:[%s10488_s7 + $0x2b0] sm:$0xff] }
 0x5b5   : > { %7261 = vmatprep.mubr.msk.f32.mxu0 %vm406_vm0, %v6016_v42  ;;  %v6117_v42 = vld [vmem:[%s10488_s7 + $0x2b8] sm:$0xff] }
 0x5b8   : > { %7262 = vmatmul.mubr.msk.f32.gmra.mrb[88].mxu0 %vm406_vm0, %v6017_v0  ;;  %v6118_v0 = vld [vmem:[%s10488_s7 + $0x2c0] sm:$0xff] }
 0x5b9   : > { %7264 = vmatprep.mubr.msk.f32.mxu0 %vm406_vm0, %v6018_v6  ;;  %v6119_v6 = vld [vmem:[%s10488_s7 + $0x2c8] sm:$0xff] }
 0x5bc   : > { %7265 = vmatmul.mubr.msk.f32.gmra.mrb[90].mxu0 %vm406_vm0, %v6019_v7  ;;  %v6120_v7 = vld [vmem:[%s10488_s7 + $0x2d0] sm:$0xff] }
 0x5bd   : > { %7267 = vmatprep.mubr.msk.f32.mxu0 %vm406_vm0, %v6020_v48  ;;  %v6121_v48 = vld [vmem:[%s10488_s7 + $0x2d8] sm:$0xff] }
 0x5c0   : > { %7268 = vmatmul.mubr.msk.f32.gmra.mrb[92].mxu0 %vm406_vm0, %v6021_v50  ;;  %v6122_v50 = vld [vmem:[%s10488_s7 + $0x2e0] sm:$0xff] }
 0x5c1   : > { %7270 = vmatprep.mubr.msk.f32.mxu0 %vm406_vm0, %v6022_v52  ;;  %v6123_v52 = vld [vmem:[%s10488_s7 + $0x2e8] sm:$0xff] }
 0x5c4   : > { %7271 = vmatmul.mubr.msk.f32.gmra.mrb[94].mxu0 %vm406_vm0, %v6023_v54  ;;  %v6124_v54 = vld [vmem:[%s10488_s7 + $0x2f0] sm:$0xff] }
 0x5c5   : > { %7277 = vmatprep.mubr.msk.f32.mxu0 %vm406_vm0, %v6042_v58  ;;  %v6125_v58 = vld [vmem:[%s10488_s7 + $0x2f8] sm:$0xff] }
 0x5c8   : > { %7278 = vmatmul.mubr.msk.f32.vlgmr.msra.gmra.mrb[80].mxu0 %vm406_vm0, %v6043_v61  ;;  %v6144_v61 = vld [vmem:[%s10488_s7 + $0x300] sm:$0xff] }
 0x5c9   : > { %7989 = vmatpush3.bf16.xpose.msk.msra.mxu0 %vm8933_vm1, %v7984_v60  ;;  %7280 = vmatprep.mubr.msk.f32.mxu0 %vm406_vm0, %v6044_v46  ;;  %v6080_v60 = vld [vmem:[%s10488_s7 + $0x220] sm:$0xff] }
 0x5ca   : > { %7992 = vmatprep.subr.msk.bf16.mxu0 %vm8933_vm1, %v9170_v39 }
 0x5cc   : > { %7281 = vmatmul.mubr.msk.f32.gmra.mrb[82].mxu0 %vm406_vm0, %v6045_v62 }
 0x5cd   : > { %7283 = vmatprep.mubr.msk.f32.mxu0 %vm406_vm0, %v6046_v63 }
 0x5d0   : > { %7284 = vmatmul.mubr.msk.f32.gmra.mrb[84].mxu0 %vm406_vm0, %v6047_v2  ;;  %v6145_v2 = vld [vmem:[%s10488_s7 + $0x308] sm:$0xff] }
 0x5d1   : > { %7286 = vmatprep.mubr.msk.f32.mxu0 %vm406_vm0, %v6048_v3  ;;  %v6146_v3 = vld [vmem:[%s10488_s7 + $0x310] sm:$0xff] }
 0x5d4   : > { %7287 = vmatmul.mubr.msk.f32.gmra.mrb[86].mxu0 %vm406_vm0, %v6049_v4  ;;  %v6147_v4 = vld [vmem:[%s10488_s7 + $0x318] sm:$0xff] }
 0x5d5   : > { %7289 = vmatprep.mubr.msk.f32.mxu0 %vm406_vm0, %v6050_v5  ;;  %v6148_v5 = vld [vmem:[%s10488_s7 + $0x320] sm:$0xff] }
 0x5d8   : > { %7290 = vmatmul.mubr.msk.f32.gmra.mrb[88].mxu0 %vm406_vm0, %v6051_v9 }
 0x5d9   : > { %7292 = vmatprep.mubr.msk.f32.mxu0 %vm406_vm0, %v6052_v10 }
 0x5dc   : > { %7293 = vmatmul.mubr.msk.f32.gmra.mrb[90].mxu0 %vm406_vm0, %v6053_v11  ;;  %v6149_v11 = vld [vmem:[%s10488_s7 + $0x328] sm:$0xff] }
 0x5dd   : > { %7295 = vmatprep.mubr.msk.f32.mxu0 %vm406_vm0, %v6054_v27 }
 0x5e0   : > { %7296 = vmatmul.mubr.msk.f32.gmra.mrb[92].mxu0 %vm406_vm0, %v6055_v56  ;;  %v6150_v56 = vld [vmem:[%s10488_s7 + $0x330] sm:$0xff] }
 0x5e1   : > { %7298 = vmatprep.mubr.msk.f32.mxu0 %vm406_vm0, %v6056_v30  ;;  %v6151_v30 = vld [vmem:[%s10488_s7 + $0x338] sm:$0xff] }
 0x5e4   : > { %7299 = vmatmul.mubr.msk.f32.gmra.mrb[94].mxu0 %vm406_vm0, %v6057_v31  ;;  %v6152_v31 = vld [vmem:[%s10488_s7 + $0x340] sm:$0xff] }
 0x5e5   : > { %7305 = vmatprep.mubr.msk.f32.mxu0 %vm406_vm0, %v6076_v32  ;;  %v6153_v32 = vld [vmem:[%s10488_s7 + $0x348] sm:$0xff] }
 0x5e8   : > { %7306 = vmatmul.mubr.msk.f32.vlgmr.msra.gmra.mrb[80].mxu0 %vm406_vm0, %v6077_v38  ;;  %v6154_v38 = vld [vmem:[%s10488_s7 + $0x350] sm:$0xff] }
 0x5e9   : > { %7995 = vmatpush3.bf16.xpose.msk.msra.mxu0 %vm8933_vm1, %v9170_v39  ;;  %7308 = vmatprep.mubr.msk.f32.mxu0 %vm406_vm0, %v6078_v36  ;;  %v6091_v39 = vld [vmem:[%s10488_s7 + $0x278] sm:$0xff] }
 0x5ea   : > { %v6155_v36 = vld [vmem:[%s10488_s7 + $0x358] sm:$0xff] }
 0x5ec   : > { %7309 = vmatmul.mubr.msk.f32.gmra.mrb[82].mxu0 %vm406_vm0, %v6079_v40  ;;  %v6156_v40 = vld [vmem:[%s10488_s7 + $0x360] sm:$0xff] }
 0x5ed   : > { %7311 = vmatprep.mubr.msk.f32.mxu0 %vm406_vm0, %v6080_v60  ;;  %v6157_v60 = vld [vmem:[%s10488_s7 + $0x368] sm:$0xff] }
 0x5f0   : > { %7312 = vmatmul.mubr.msk.f32.gmra.mrb[84].mxu0 %vm406_vm0, %v6081_v29  ;;  %v6158_v29 = vld [vmem:[%s10488_s7 + $0x370] sm:$0xff] }
 0x5f1   : > { %7314 = vmatprep.mubr.msk.f32.mxu0 %vm406_vm0, %v6082_v41  ;;  %v6159_v41 = vld [vmem:[%s10488_s7 + $0x378] sm:$0xff] }
 0x5f4   : > { %7315 = vmatmul.mubr.msk.f32.gmra.mrb[86].mxu0 %vm406_vm0, %v6083_v34  ;;  %v6178_v34 = vld [vmem:[%s10488_s7 + $0x380] sm:$0xff] }
 0x5f5   : > { %7317 = vmatprep.mubr.msk.f32.mxu0 %vm406_vm0, %v6084_v43  ;;  %v6179_v43 = vld [vmem:[%s10488_s7 + $0x388] sm:$0xff] }
 0x5f8   : > { %7318 = vmatmul.mubr.msk.f32.gmra.mrb[88].mxu0 %vm406_vm0, %v6085_v28  ;;  %v6180_v28 = vld [vmem:[%s10488_s7 + $0x390] sm:$0xff] }
 0x5f9   : > { %7320 = vmatprep.mubr.msk.f32.mxu0 %vm406_vm0, %v6086_v33  ;;  %v6181_v33 = vld [vmem:[%s10488_s7 + $0x398] sm:$0xff] }
 0x5fc   : > { %7321 = vmatmul.mubr.msk.f32.gmra.mrb[90].mxu0 %vm406_vm0, %v6087_v37  ;;  %v6182_v37 = vld [vmem:[%s10488_s7 + $0x3a0] sm:$0xff] }
 0x5fd   : > { %7323 = vmatprep.mubr.msk.f32.mxu0 %vm406_vm0, %v6088_v45  ;;  %v6183_v45 = vld [vmem:[%s10488_s7 + $0x3a8] sm:$0xff] }
 0x600   : > { %7324 = vmatmul.mubr.msk.f32.gmra.mrb[92].mxu0 %vm406_vm0, %v6089_v35  ;;  %v6184_v35 = vld [vmem:[%s10488_s7 + $0x3b0] sm:$0xff] }
 0x601   : > { %7326 = vmatprep.mubr.msk.f32.mxu0 %vm406_vm0, %v6090_v47  ;;  %v6185_v47 = vld [vmem:[%s10488_s7 + $0x3b8] sm:$0xff] }
 0x604   : > { %7327 = vmatmul.mubr.msk.f32.gmra.mrb[94].mxu0 %vm406_vm0, %v6091_v39  ;;  %v6186_v39 = vld [vmem:[%s10488_s7 + $0x3c0] sm:$0xff] }
 0x605   : > { %7333 = vmatprep.mubr.msk.f32.mxu0 %vm406_vm0, %v6110_v49  ;;  %v6187_v49 = vld [vmem:[%s10488_s7 + $0x3c8] sm:$0xff] }
 0x608   : > { %7334 = vmatmul.mubr.msk.f32.vlgmr.msra.gmra.mrb[80].mxu0 %vm406_vm0, %v6111_v51  ;;  %v6188_v51 = vld [vmem:[%s10488_s7 + $0x3d0] sm:$0xff] }
 0x609   : > { %7336 = vmatprep.mubr.msk.f32.mxu0 %vm406_vm0, %v6112_v53  ;;  %v6189_v53 = vld [vmem:[%s10488_s7 + $0x3d8] sm:$0xff] }
 0x60c   : > { %7337 = vmatmul.mubr.msk.f32.gmra.mrb[82].mxu0 %vm406_vm0, %v6113_v55  ;;  %v6190_v55 = vld [vmem:[%s10488_s7 + $0x3e0] sm:$0xff] }
 0x60d   : > { %7339 = vmatprep.mubr.msk.f32.mxu0 %vm406_vm0, %v6114_v57  ;;  %v6191_v57 = vld [vmem:[%s10488_s7 + $0x3e8] sm:$0xff] }
 0x610   : > { %7340 = vmatmul.mubr.msk.f32.gmra.mrb[84].mxu0 %vm406_vm0, %v6115_v44  ;;  %v6192_v44 = vld [vmem:[%s10488_s7 + $0x3f0] sm:$0xff] }
 0x611   : > { %7342 = vmatprep.mubr.msk.f32.mxu0 %vm406_vm0, %v6116_v59  ;;  %v6193_v59 = vld [vmem:[%s10488_s7 + $0x3f8] sm:$0xff] }
 0x614   : > { %7343 = vmatmul.mubr.msk.f32.gmra.mrb[86].mxu0 %vm406_vm0, %v6117_v42  ;;  %v6212_v42 = vld [vmem:[%s10482_s1 + $0x10] sm:$0xff] }
 0x615   : > { %7345 = vmatprep.mubr.msk.f32.mxu0 %vm406_vm0, %v6118_v0  ;;  %v6213_v0 = vld [vmem:[%s10482_s1 + $0x18] sm:$0xff] }
 0x618   : > { %7346 = vmatmul.mubr.msk.f32.gmra.mrb[88].mxu0 %vm406_vm0, %v6119_v6  ;;  %v8008_v6 = vpack.c.bf16 %v6213_v0, %v6212_v42 }
 0x619   : > { %7348 = vmatprep.mubr.msk.f32.mxu0 %vm406_vm0, %v6120_v7  ;;  %v6232_v7 = vld [vmem:[%s10484_s3 + $0x10] sm:$0xff] }
 0x61a   : > { %8009 = vmatprep.subr.bf16.mxu1 %v8008_v6 }
 0x61b   : > { %8011 = vmatpush3.bf16.msra.mxu1 %v8008_v6 }
 0x61c   : > { %7349 = vmatmul.mubr.msk.f32.gmra.mrb[90].mxu0 %vm406_vm0, %v6121_v48  ;;  %v6233_v48 = vld [vmem:[%s10484_s3 + $0x18] sm:$0xff] }
 0x61d   : > { %7351 = vmatprep.mubr.msk.f32.mxu0 %vm406_vm0, %v6122_v50  ;;  %v8012_v50 = vpack.c.bf16 %v6233_v48, %v6232_v7 }
 0x61f   : > { %8013 = vmatprep.subr.bf16.mxu1 %v8012_v50 }
 0x620   : > { %7352 = vmatmul.mubr.msk.f32.gmra.mrb[92].mxu0 %vm406_vm0, %v6123_v52 }
 0x621   : > { %7354 = vmatprep.mubr.msk.f32.mxu0 %vm406_vm0, %v6124_v54  ;;  %v6252_v54 = vld [vmem:[%s10486_s5 + $0x10] sm:$0xff] }
 0x624   : > { %7355 = vmatmul.mubr.msk.f32.gmra.mrb[94].mxu0 %vm406_vm0, %v6125_v58  ;;  %v6253_v58 = vld [vmem:[%s10486_s5 + $0x18] sm:$0xff] }
 0x625   : > { %7361 = vmatprep.mubr.msk.f32.mxu0 %vm406_vm0, %v6144_v61 }
 0x627   : > { %v7185_v46 = vpop.f32.mrb[76].mxu0 }
 0x628   : > { %v1435_v62 = vpop.f32.mrb[77].mxu0 }
 0x629   : > { %v7996_v63 = vpack.c.bf16 %v7185_v46, %v1435_v62 }
 0x62b   : > { %7998 = vmatprep.subr.msk.bf16.mxu0 %vm8933_vm1, %v7996_v63 }
 0x62c   : > { %8001 = vmatpush3.bf16.xpose.msk.msra.mxu0 %vm8933_vm1, %v7996_v63  ;;  %v8016_v63 = vpack.c.bf16 %v6253_v58, %v6252_v54 }
 0x633   : > { %7362 = vmatmul.mubr.msk.f32.vlgmr.msra.gmra.mrb[80].mxu0 %vm406_vm0, %v6145_v2 }
 0x634   : > { %7364 = vmatprep.mubr.msk.f32.mxu0 %vm406_vm0, %v6146_v3 }
 0x637   : > { %v7188_v9 = vpop.f32.mrb[78].mxu0  ;;  %7365 = vmatmul.mubr.msk.f32.gmra.mrb[82].mxu0 %vm406_vm0, %v6147_v4 }
 0x638   : > { %v1445_v10 = vpop.f32.mrb[79].mxu0  ;;  %7367 = vmatprep.mubr.msk.f32.mxu0 %vm406_vm0, %v6148_v5 }
 0x639   : > { %v8002_v27 = vpack.c.bf16 %v7188_v9, %v1445_v10 }
 0x63b   : > { %7368 = vmatmul.mubr.msk.f32.gmra.mrb[84].mxu0 %vm406_vm0, %v6149_v11  ;;  %8004 = vmatprep.subr.msk.bf16.mxu0 %vm8933_vm1, %v8002_v27 }
 0x63c   : > { %8007 = vmatpush3.bf16.xpose.msk.msra.mxu0 %vm8933_vm1, %v8002_v27  ;;  %7370 = vmatprep.mubr.msk.f32.mxu0 %vm406_vm0, %v6150_v56 }
 0x63f   : > { %7371 = vmatmul.mubr.msk.f32.gmra.mrb[86].mxu0 %vm406_vm0, %v6151_v30 }
 0x640   : > { %7373 = vmatprep.mubr.msk.f32.mxu0 %vm406_vm0, %v6152_v31 }
 0x643   : > { %7374 = vmatmul.mubr.msk.f32.gmra.mrb[88].mxu0 %vm406_vm0, %v6153_v32 }
 0x644   : > { %7376 = vmatprep.mubr.msk.f32.mxu0 %vm406_vm0, %v6154_v38 }
 0x647   : > { %7377 = vmatmul.mubr.msk.f32.gmra.mrb[90].mxu0 %vm406_vm0, %v6155_v36 }
 0x648   : > { %7379 = vmatprep.mubr.msk.f32.mxu0 %vm406_vm0, %v6156_v40 }
 0x64b   : > { %7380 = vmatmul.mubr.msk.f32.gmra.mrb[92].mxu0 %vm406_vm0, %v6157_v60 }
 0x64c   : > { %7382 = vmatprep.mubr.msk.f32.mxu0 %vm406_vm0, %v6158_v29 }
 0x64f   : > { %7383 = vmatmul.mubr.msk.f32.gmra.mrb[94].mxu0 %vm406_vm0, %v6159_v41 }
 0x650   : > { %7389 = vmatprep.mubr.msk.f32.mxu0 %vm406_vm0, %v6178_v34 }
 0x653   : > { %7390 = vmatmul.mubr.msk.f32.vlgmr.msra.gmra.mrb[80].mxu0 %vm406_vm0, %v6179_v43 }
 0x654   : > { %7392 = vmatprep.mubr.msk.f32.mxu0 %vm406_vm0, %v6180_v28 }
 0x657   : > { %7393 = vmatmul.mubr.msk.f32.gmra.mrb[82].mxu0 %vm406_vm0, %v6181_v33 }
 0x658   : > { %7395 = vmatprep.mubr.msk.f32.mxu0 %vm406_vm0, %v6182_v37 }
 0x65b   : > { %7396 = vmatmul.mubr.msk.f32.gmra.mrb[84].mxu0 %vm406_vm0, %v6183_v45 }
 0x65c   : > { %7398 = vmatprep.mubr.msk.f32.mxu0 %vm406_vm0, %v6184_v35 }
 0x65f   : > { %7399 = vmatmul.mubr.msk.f32.gmra.mrb[86].mxu0 %vm406_vm0, %v6185_v47 }
 0x660   : > { %7401 = vmatprep.mubr.msk.f32.mxu0 %vm406_vm0, %v6186_v39 }
 0x663   : > { %7402 = vmatmul.mubr.msk.f32.gmra.mrb[88].mxu0 %vm406_vm0, %v6187_v49 }
 0x664   : > { %7404 = vmatprep.mubr.msk.f32.mxu0 %vm406_vm0, %v6188_v51 }
 0x667   : > { %7405 = vmatmul.mubr.msk.f32.gmra.mrb[90].mxu0 %vm406_vm0, %v6189_v53 }
 0x668   : > { %7407 = vmatprep.mubr.msk.f32.mxu0 %vm406_vm0, %v6190_v55 }
 0x66b   : > { %7408 = vmatmul.mubr.msk.f32.gmra.mrb[92].mxu0 %vm406_vm0, %v6191_v57 }
 0x66c   : > { %7410 = vmatprep.mubr.msk.f32.mxu0 %vm406_vm0, %v6192_v44 }
 0x66f   : > { %7411 = vmatmul.mubr.msk.f32.gmra.mrb[94].mxu0 %vm406_vm0, %v6193_v59 }
 0x726   : > { %v7391_v52 = vpop.f32.mrb[80].mxu0 }
 0x727   : > { %v3182_v61 = vpop.f32.mrb[81].mxu0  ;;  %v9596_v62 = vadd.f32 %v7391_v52, %v8770_v12 }
 0x728   : > { %v9593_v46 = vadd.f32 %v3182_v61, %v8760_v8 }
 0x72a   : > { %v7394_v2 = vpop.f32.mrb[82].mxu0  ;;  %7417 = vmatprep.mubr.msk.f32.mxu1 %vm406_vm0, %v9593_v46 }
 0x72b   : > { %v3192_v3 = vpop.f32.mrb[83].mxu0  ;;  %7418 = vmatmul.mubr.msk.f32.vlgmr.msra.gmra.mrb[0].mxu1 %vm406_vm0, %v9596_v62  ;;  %v9606_v5 = vadd.f32 %v7394_v2, %v8778_v14  ;;  %v6235_v2 = vld [vmem:[%s10485_s4 + $0x1] ss:$0 sm:$0xff] }
 0x72c   : > { %v9603_v4 = vadd.f32 %v3192_v3, %v8774_v13  ;;  %8015 = vmatpush3.bf16.msra.mxu1 %v8012_v50 }
 0x72d   : > { %8017 = vmatprep.subr.bf16.mxu1 %v8016_v63 }
 0x72e   : > { %v7397_v8 = vpop.f32.mrb[84].mxu0  ;;  %7420 = vmatprep.mubr.msk.f32.mxu1 %vm406_vm0, %v9603_v4 }
 0x72f   : > { %v3202_v12 = vpop.f32.mrb[85].mxu0  ;;  %7421 = vmatmul.mubr.msk.f32.gmra.mrb[2].mxu1 %vm406_vm0, %v9606_v5  ;;  %v9616_v10 = vadd.f32 %v7397_v8, %v8786_v16 }
 0x730   : > { %v9613_v9 = vadd.f32 %v3202_v12, %v8782_v15 }
 0x732   : > { %v7400_v13 = vpop.f32.mrb[86].mxu0  ;;  %7423 = vmatprep.mubr.msk.f32.mxu1 %vm406_vm0, %v9613_v9 }
 0x733   : > { %v3212_v14 = vpop.f32.mrb[87].mxu0  ;;  %7424 = vmatmul.mubr.msk.f32.gmra.mrb[4].mxu1 %vm406_vm0, %v9616_v10  ;;  %v9626_v27 = vadd.f32 %v7400_v13, %v8794_v18 }
 0x734   : > { %v9623_v11 = vadd.f32 %v3212_v14, %v8790_v17 }
 0x736   : > { %v7403_v56 = vpop.f32.mrb[88].mxu0  ;;  %7426 = vmatprep.mubr.msk.f32.mxu1 %vm406_vm0, %v9623_v11 }
 0x737   : > { %v3222_v15 = vpop.f32.mrb[89].mxu0  ;;  %7427 = vmatmul.mubr.msk.f32.gmra.mrb[6].mxu1 %vm406_vm0, %v9626_v27  ;;  %v9636_v30 = vadd.f32 %v7403_v56, %v8802_v20 }
 0x738   : > { %v9633_v16 = vadd.f32 %v3222_v15, %v8798_v19 }
 0x73a   : > { %v7406_v31 = vpop.f32.mrb[90].mxu0  ;;  %7429 = vmatprep.mubr.msk.f32.mxu1 %vm406_vm0, %v9633_v16 }
 0x73b   : > { %v3232_v17 = vpop.f32.mrb[91].mxu0  ;;  %7430 = vmatmul.mubr.msk.f32.gmra.mrb[8].mxu1 %vm406_vm0, %v9636_v30  ;;  %v9646_v32 = vadd.f32 %v7406_v31, %v8810_v22 }
 0x73c   : > { %v9643_v18 = vadd.f32 %v3232_v17, %v8806_v21 }
 0x73e   : > { %v7409_v38 = vpop.f32.mrb[92].mxu0  ;;  %7432 = vmatprep.mubr.msk.f32.mxu1 %vm406_vm0, %v9643_v18 }
 0x73f   : > { %v3242_v19 = vpop.f32.mrb[93].mxu0  ;;  %7433 = vmatmul.mubr.msk.f32.gmra.mrb[10].mxu1 %vm406_vm0, %v9646_v32  ;;  %v9656_v36 = vadd.f32 %v7409_v38, %v8818_v24 }
 0x740   : > { %v9653_v20 = vadd.f32 %v3242_v19, %v8814_v23  ;;  %v6215_v23 = vld [vmem:[%s10483_s2 + $0x1] ss:$0 sm:$0xff] }
 0x742   : > { %v7412_v40 = vpop.f32.mrb[94].mxu0  ;;  %7435 = vmatprep.mubr.msk.f32.mxu1 %vm406_vm0, %v9653_v20 }
 0x743   : > { %v3252_v21 = vpop.f32.mrb[95].mxu0  ;;  %7436 = vmatmul.mubr.msk.f32.gmra.mrb[12].mxu1 %vm406_vm0, %v9656_v36  ;;  %v9666_v60 = vadd.f32 %v7412_v40, %v8826_v26 }
 0x744   : > { %v9663_v22 = vadd.f32 %v3252_v21, %v8822_v25 }
 0x746   : > { %7438 = vmatprep.mubr.msk.f32.mxu1 %vm406_vm0, %v9663_v22 }
 0x747   : > { %7439 = vmatmul.mubr.msk.f32.gmra.mrb[14].mxu1 %vm406_vm0, %v9666_v60 }
 0x748   : > { %7445 = vmatprep.mubr.msk.f32.mxu1 %vm406_vm0, %v9593_v46 }
 0x74b   : > { %7446 = vmatmul.mubr.msk.f32.vlgmr.msra.gmra.mrb[16].mxu1 %vm406_vm0, %v9596_v62 }
 0x74c   : > { %7448 = vmatprep.mubr.msk.f32.mxu1 %vm406_vm0, %v9603_v4  ;;  %8019 = vmatpush3.bf16.msra.mxu1 %v8016_v63 }
 0x74f   : > { %7449 = vmatmul.mubr.msk.f32.gmra.mrb[18].mxu1 %vm406_vm0, %v9606_v5 }
 0x750   : > { %7451 = vmatprep.mubr.msk.f32.mxu1 %vm406_vm0, %v9613_v9 }
 0x753   : > { %7452 = vmatmul.mubr.msk.f32.gmra.mrb[20].mxu1 %vm406_vm0, %v9616_v10 }
 0x754   : > { %7454 = vmatprep.mubr.msk.f32.mxu1 %vm406_vm0, %v9623_v11 }
 0x757   : > { %7455 = vmatmul.mubr.msk.f32.gmra.mrb[22].mxu1 %vm406_vm0, %v9626_v27 }
 0x758   : > { %7457 = vmatprep.mubr.msk.f32.mxu1 %vm406_vm0, %v9633_v16 }
 0x75b   : > { %7458 = vmatmul.mubr.msk.f32.gmra.mrb[24].mxu1 %vm406_vm0, %v9636_v30 }
 0x75c   : > { %7460 = vmatprep.mubr.msk.f32.mxu1 %vm406_vm0, %v9643_v18 }
 0x75f   : > { %7461 = vmatmul.mubr.msk.f32.gmra.mrb[26].mxu1 %vm406_vm0, %v9646_v32 }
 0x760   : > { %7463 = vmatprep.mubr.msk.f32.mxu1 %vm406_vm0, %v9653_v20 }
 0x763   : > { %7464 = vmatmul.mubr.msk.f32.gmra.mrb[28].mxu1 %vm406_vm0, %v9656_v36 }
 0x764   : > { %7466 = vmatprep.mubr.msk.f32.mxu1 %vm406_vm0, %v9663_v22 }
 0x767   : > { %7467 = vmatmul.mubr.msk.f32.gmra.mrb[30].mxu1 %vm406_vm0, %v9666_v60 }
 0x768   : > { %7473 = vmatprep.mubr.msk.f32.mxu1 %vm406_vm0, %v9593_v46 }
 0x76b   : > { %7474 = vmatmul.mubr.msk.f32.vlgmr.msra.gmra.mrb[32].mxu1 %vm406_vm0, %v9596_v62 }
 0x76c   : > { %7476 = vmatprep.mubr.msk.f32.mxu1 %vm406_vm0, %v9603_v4 }
 0x76f   : > { %7477 = vmatmul.mubr.msk.f32.gmra.mrb[34].mxu1 %vm406_vm0, %v9606_v5 }
 0x770   : > { %7479 = vmatprep.mubr.msk.f32.mxu1 %vm406_vm0, %v9613_v9 }
 0x773   : > { %7480 = vmatmul.mubr.msk.f32.gmra.mrb[36].mxu1 %vm406_vm0, %v9616_v10 }
 0x774   : > { %7482 = vmatprep.mubr.msk.f32.mxu1 %vm406_vm0, %v9623_v11 }
 0x777   : > { %7483 = vmatmul.mubr.msk.f32.gmra.mrb[38].mxu1 %vm406_vm0, %v9626_v27 }
 0x778   : > { %7485 = vmatprep.mubr.msk.f32.mxu1 %vm406_vm0, %v9633_v16 }
 0x77b   : > { %7486 = vmatmul.mubr.msk.f32.gmra.mrb[40].mxu1 %vm406_vm0, %v9636_v30 }
 0x77c   : > { %7488 = vmatprep.mubr.msk.f32.mxu1 %vm406_vm0, %v9643_v18 }
 0x77f   : > { %7489 = vmatmul.mubr.msk.f32.gmra.mrb[42].mxu1 %vm406_vm0, %v9646_v32 }
 0x780   : > { %7491 = vmatprep.mubr.msk.f32.mxu1 %vm406_vm0, %v9653_v20 }
 0x783   : > { %7492 = vmatmul.mubr.msk.f32.gmra.mrb[44].mxu1 %vm406_vm0, %v9656_v36 }
 0x784   : > { %7494 = vmatprep.mubr.msk.f32.mxu1 %vm406_vm0, %v9663_v22 }
 0x787   : > { %7495 = vmatmul.mubr.msk.f32.gmra.mrb[46].mxu1 %vm406_vm0, %v9666_v60 }
 0x7fe   : > { %v7419_v24 = vpop.f32.mrb[0].mxu1 }
 0x7ff   : > { %v9739_v25 = vadd.f32 %v7419_v24, %v6215_v23  ;;  %v3418_v26 = vpop.f32.mrb[1].mxu1 }
 0x800   : > { %v3419_v29 = vadd.f32 %v6215_v23, %v3418_v26 }
 0x802   : > { %v7422_v41 = vpop.f32.mrb[2].mxu1  ;;  %7529 = vmatprep.mubr.msk.f32.mxu1 %vm406_vm0, %v3419_v29 }
 0x803   : > { %v9742_v34 = vadd.f32 %v7422_v41, %v6215_v23  ;;  %v3428_v43 = vpop.f32.mrb[3].mxu1 }
 0x804   : > { %v9744_v28 = vadd.f32 %v6215_v23, %v3428_v43 }
 0x806   : > { %v7425_v33 = vpop.f32.mrb[4].mxu1 }
 0x807   : > { %v9746_v37 = vadd.f32 %v7425_v33, %v6215_v23  ;;  %v3438_v45 = vpop.f32.mrb[5].mxu1 }
 0x808   : > { %v9748_v35 = vadd.f32 %v6215_v23, %v3438_v45 }
 0x80a   : > { %v7428_v47 = vpop.f32.mrb[6].mxu1 }
 0x80b   : > { %v9750_v39 = vadd.f32 %v7428_v47, %v6215_v23  ;;  %v3448_v49 = vpop.f32.mrb[7].mxu1 }
 0x80c   : > { %v9752_v51 = vadd.f32 %v6215_v23, %v3448_v49 }
 0x80e   : > { %v7431_v53 = vpop.f32.mrb[8].mxu1 }
 0x80f   : > { %v9754_v55 = vadd.f32 %v7431_v53, %v6215_v23  ;;  %v3458_v57 = vpop.f32.mrb[9].mxu1 }
 0x810   : > { %v9756_v44 = vadd.f32 %v6215_v23, %v3458_v57 }
 0x812   : > { %v7434_v59 = vpop.f32.mrb[10].mxu1 }
 0x813   : > { %v9758_v42 = vadd.f32 %v7434_v59, %v6215_v23  ;;  %v3468_v0 = vpop.f32.mrb[11].mxu1 }
 0x814   : > { %v9760_v6 = vadd.f32 %v6215_v23, %v3468_v0 }
 0x816   : > { %v7437_v7 = vpop.f32.mrb[12].mxu1 }
 0x817   : > { %v9762_v48 = vadd.f32 %v7437_v7, %v6215_v23  ;;  %v3478_v50 = vpop.f32.mrb[13].mxu1 }
 0x818   : > { %v9764_v52 = vadd.f32 %v6215_v23, %v3478_v50 }
 0x81a   : > { %v7440_v54 = vpop.f32.mrb[14].mxu1 }
 0x81b   : > { %v9766_v58 = vadd.f32 %v7440_v54, %v6215_v23  ;;  %v3488_v61 = vpop.f32.mrb[15].mxu1 }
 0x81c   : > { %v9768_v63 = vadd.f32 %v6215_v23, %v3488_v61 }
 0x81e   : > { %v7447_v3 = vpop.f32.mrb[16].mxu1 }
 0x81f   : > { %v3580_v8 = vadd.f32 %v7447_v3, %v6235_v2  ;;  %v3574_v12 = vpop.f32.mrb[17].mxu1 }
 0x820   : > { %v3575_v13 = vadd.f32 %v6235_v2, %v3574_v12 }
 0x822   : > { %v8020_v14 = vpack.c.bf16 %v3580_v8, %v3575_v13  ;;  %v7450_v56 = vpop.f32.mrb[18].mxu1 }
 0x823   : > { %v3590_v15 = vadd.f32 %v7450_v56, %v6235_v2  ;;  %v3584_v31 = vpop.f32.mrb[19].mxu1 }
 0x824   : > { %v3585_v17 = vadd.f32 %v6235_v2, %v3584_v31  ;;  %8022 = vmatprep.subr.msk.bf16.mxu1 %vm8933_vm1, %v8020_v14 }
 0x825   : > { %8025 = vmatpush3.bf16.xpose.msk.msra.mxu1 %vm8933_vm1, %v8020_v14 }
 0x826   : > { %v8026_v38 = vpack.c.bf16 %v3590_v15, %v3585_v17  ;;  %v7453_v19 = vpop.f32.mrb[20].mxu1  ;;  %v6255_v17 = vld [vmem:[%s10487_s6 + $0x1] ss:$0 sm:$0xff] }
 0x827   : > { %v3600_v40 = vadd.f32 %v7453_v19, %v6235_v2  ;;  %v3594_v21 = vpop.f32.mrb[21].mxu1 }
 0x828   : > { %v3595_v23 = vadd.f32 %v6235_v2, %v3594_v21  ;;  %8028 = vmatprep.subr.msk.bf16.mxu1 %vm8933_vm1, %v8026_v38 }
 0x82a   : > { %v8032_v24 = vpack.c.bf16 %v3600_v40, %v3595_v23  ;;  %v7456_v26 = vpop.f32.mrb[22].mxu1 }
 0x82b   : > { %v3610_v29 = vadd.f32 %v7456_v26, %v6235_v2  ;;  %v3604_v41 = vpop.f32.mrb[23].mxu1 }
 0x82c   : > { %v3605_v43 = vadd.f32 %v6235_v2, %v3604_v41 }
 0x82d   : > { %8031 = vmatpush3.bf16.xpose.msk.msra.mxu1 %vm8933_vm1, %v8026_v38 }
 0x82e   : > { %v8038_v33 = vpack.c.bf16 %v3610_v29, %v3605_v43  ;;  %v7459_v45 = vpop.f32.mrb[24].mxu1  ;;  %8034 = vmatprep.subr.msk.bf16.mxu1 %vm8933_vm1, %v8032_v24 }
 0x82f   : > { %v3620_v47 = vadd.f32 %v7459_v45, %v6235_v2  ;;  %v3614_v49 = vpop.f32.mrb[25].mxu1 }
 0x830   : > { %v3615_v53 = vadd.f32 %v6235_v2, %v3614_v49 }
 0x832   : > { %v8044_v57 = vpack.c.bf16 %v3620_v47, %v3615_v53  ;;  %v7462_v59 = vpop.f32.mrb[26].mxu1 }
 0x833   : > { %v3630_v0 = vadd.f32 %v7462_v59, %v6235_v2  ;;  %v3624_v7 = vpop.f32.mrb[27].mxu1 }
 0x834   : > { %v3625_v50 = vadd.f32 %v6235_v2, %v3624_v7 }
 0x835   : > { %8037 = vmatpush3.bf16.xpose.msk.msra.mxu1 %vm8933_vm1, %v8032_v24 }
 0x836   : > { %v8050_v54 = vpack.c.bf16 %v3630_v0, %v3625_v50  ;;  %v7465_v61 = vpop.f32.mrb[28].mxu1  ;;  %8040 = vmatprep.subr.msk.bf16.mxu1 %vm8933_vm1, %v8038_v33 }
 0x837   : > { %v3640_v3 = vadd.f32 %v7465_v61, %v6235_v2  ;;  %v3634_v8 = vpop.f32.mrb[29].mxu1 }
 0x838   : > { %v3635_v12 = vadd.f32 %v6235_v2, %v3634_v8 }
 0x83a   : > { %v8056_v13 = vpack.c.bf16 %v3640_v3, %v3635_v12  ;;  %v7468_v14 = vpop.f32.mrb[30].mxu1 }
 0x83b   : > { %v3650_v56 = vadd.f32 %v7468_v14, %v6235_v2  ;;  %v3644_v15 = vpop.f32.mrb[31].mxu1 }
 0x83c   : > { %v3645_v31 = vadd.f32 %v6235_v2, %v3644_v15 }
 0x83d   : > { %8043 = vmatpush3.bf16.xpose.msk.msra.mxu1 %vm8933_vm1, %v8038_v33 }
 0x83e   : > { %v8062_v38 = vpack.c.bf16 %v3650_v56, %v3645_v31  ;;  %v7475_v19 = vpop.f32.mrb[32].mxu1  ;;  %8046 = vmatprep.subr.msk.bf16.mxu1 %vm8933_vm1, %v8044_v57 }
 0x83f   : > { %v3736_v40 = vadd.f32 %v7475_v19, %v6255_v17  ;;  %v3730_v21 = vpop.f32.mrb[33].mxu1 }
 0x840   : > { %v3731_v23 = vadd.f32 %v6255_v17, %v3730_v21 }
 0x842   : > { %v8068_v24 = vpack.c.bf16 %v3736_v40, %v3731_v23  ;;  %v7478_v26 = vpop.f32.mrb[34].mxu1 }
 0x843   : > { %v3746_v29 = vadd.f32 %v7478_v26, %v6255_v17  ;;  %v3740_v41 = vpop.f32.mrb[35].mxu1 }
 0x844   : > { %v3741_v2 = vadd.f32 %v6255_v17, %v3740_v41 }
 0x845   : > { %8049 = vmatpush3.bf16.xpose.msk.msra.mxu1 %vm8933_vm1, %v8044_v57 }
 0x846   : > { %v8072_v43 = vpack.c.bf16 %v3746_v29, %v3741_v2  ;;  %v7481_v45 = vpop.f32.mrb[36].mxu1  ;;  %8052 = vmatprep.subr.msk.bf16.mxu1 %vm8933_vm1, %v8050_v54 }
 0x847   : > { %v3756_v33 = vadd.f32 %v7481_v45, %v6255_v17  ;;  %v3750_v47 = vpop.f32.mrb[37].mxu1 }
 0x848   : > { %v3751_v49 = vadd.f32 %v6255_v17, %v3750_v47 }
 0x84a   : > { %v8076_v53 = vpack.c.bf16 %v3756_v33, %v3751_v49  ;;  %v7484_v59 = vpop.f32.mrb[38].mxu1 }
 0x84b   : > { %v3766_v0 = vadd.f32 %v7484_v59, %v6255_v17  ;;  %v3760_v7 = vpop.f32.mrb[39].mxu1 }
 0x84c   : > { %v3761_v50 = vadd.f32 %v6255_v17, %v3760_v7 }
 0x84d   : > { %8055 = vmatpush3.bf16.xpose.msk.msra.mxu1 %vm8933_vm1, %v8050_v54 }
 0x84e   : > { %v8080_v61 = vpack.c.bf16 %v3766_v0, %v3761_v50  ;;  %v7487_v3 = vpop.f32.mrb[40].mxu1  ;;  %8058 = vmatprep.subr.msk.bf16.mxu1 %vm8933_vm1, %v8056_v13 }
 0x84f   : > { %v3776_v57 = vadd.f32 %v7487_v3, %v6255_v17  ;;  %v3770_v8 = vpop.f32.mrb[41].mxu1 }
 0x850   : > { %v3771_v12 = vadd.f32 %v6255_v17, %v3770_v8 }
 0x852   : > { %v8084_v14 = vpack.c.bf16 %v3776_v57, %v3771_v12  ;;  %v7490_v56 = vpop.f32.mrb[42].mxu1 }
 0x853   : > { %v3786_v15 = vadd.f32 %v7490_v56, %v6255_v17  ;;  %v3780_v31 = vpop.f32.mrb[43].mxu1 }
 0x854   : > { %v3781_v19 = vadd.f32 %v6255_v17, %v3780_v31 }
 0x855   : > { %8061 = vmatpush3.bf16.xpose.msk.msra.mxu1 %vm8933_vm1, %v8056_v13 }
 0x856   : > { %v8088_v40 = vpack.c.bf16 %v3786_v15, %v3781_v19  ;;  %v7493_v21 = vpop.f32.mrb[44].mxu1  ;;  %8064 = vmatprep.subr.msk.bf16.mxu1 %vm8933_vm1, %v8062_v38 }
 0x857   : > { %v3796_v54 = vadd.f32 %v7493_v21, %v6255_v17  ;;  %v3790_v23 = vpop.f32.mrb[45].mxu1 }
 0x858   : > { %v3791_v26 = vadd.f32 %v6255_v17, %v3790_v23 }
 0x85a   : > { %v8092_v29 = vpack.c.bf16 %v3796_v54, %v3791_v26  ;;  %v7496_v41 = vpop.f32.mrb[46].mxu1 }
 0x85b   : > { %v3806_v2 = vadd.f32 %v7496_v41, %v6255_v17  ;;  %v3800_v45 = vpop.f32.mrb[47].mxu1 }
 0x85c   : > { %v3801_v33 = vadd.f32 %v6255_v17, %v3800_v45 }
 0x85d   : > { %8067 = vmatpush3.bf16.xpose.msk.msra.mxu1 %vm8933_vm1, %v8062_v38 }
 0x85e   : > { %v8096_v47 = vpack.c.bf16 %v3806_v2, %v3801_v33  ;;  %8069 = vmatprep.subr.bf16.mxu1 %v8068_v24 }
 0x864   : > { %7530 = vmatmul.mubr.msk.f32.vlgmr.msra.gmra.mrb[48].mxu1 %vm406_vm0, %v9739_v25 }
 0x865   : > { %7532 = vmatprep.mubr.msk.f32.mxu1 %vm406_vm0, %v9744_v28  ;;  %8071 = vmatpush3.bf16.msra.mxu1 %v8068_v24 }
 0x866   : > { %8073 = vmatprep.subr.bf16.mxu1 %v8072_v43 }
 0x868   : > { %7533 = vmatmul.mubr.msk.f32.gmra.mrb[50].mxu1 %vm406_vm0, %v9742_v34 }
 0x869   : > { %7535 = vmatprep.mubr.msk.f32.mxu1 %vm406_vm0, %v9748_v35  ;;  %8075 = vmatpush3.bf16.msra.mxu1 %v8072_v43 }
 0x86a   : > { %8077 = vmatprep.subr.bf16.mxu1 %v8076_v53 }
 0x86c   : > { %7536 = vmatmul.mubr.msk.f32.gmra.mrb[52].mxu1 %vm406_vm0, %v9746_v37 }
 0x86d   : > { %7538 = vmatprep.mubr.msk.f32.mxu1 %vm406_vm0, %v9752_v51  ;;  %8079 = vmatpush3.bf16.msra.mxu1 %v8076_v53 }
 0x86e   : > { %8081 = vmatprep.subr.bf16.mxu1 %v8080_v61 }
 0x870   : > { %7539 = vmatmul.mubr.msk.f32.gmra.mrb[54].mxu1 %vm406_vm0, %v9750_v39 }
 0x871   : > { %7541 = vmatprep.mubr.msk.f32.mxu1 %vm406_vm0, %v9756_v44  ;;  %8083 = vmatpush3.bf16.msra.mxu1 %v8080_v61 }
 0x872   : > { %8085 = vmatprep.subr.bf16.mxu1 %v8084_v14 }
 0x874   : > { %7542 = vmatmul.mubr.msk.f32.gmra.mrb[56].mxu1 %vm406_vm0, %v9754_v55 }
 0x875   : > { %7544 = vmatprep.mubr.msk.f32.mxu1 %vm406_vm0, %v9760_v6  ;;  %8087 = vmatpush3.bf16.msra.mxu1 %v8084_v14 }
 0x876   : > { %8089 = vmatprep.subr.bf16.mxu1 %v8088_v40 }
 0x878   : > { %7545 = vmatmul.mubr.msk.f32.gmra.mrb[58].mxu1 %vm406_vm0, %v9758_v42 }
 0x879   : > { %7547 = vmatprep.mubr.msk.f32.mxu1 %vm406_vm0, %v9764_v52  ;;  %8091 = vmatpush3.bf16.msra.mxu1 %v8088_v40 }
 0x87a   : > { %8093 = vmatprep.subr.bf16.mxu1 %v8092_v29 }
 0x87c   : > { %7548 = vmatmul.mubr.msk.f32.gmra.mrb[60].mxu1 %vm406_vm0, %v9762_v48 }
 0x87d   : > { %7550 = vmatprep.mubr.msk.f32.mxu1 %vm406_vm0, %v9768_v63  ;;  %8095 = vmatpush3.bf16.msra.mxu1 %v8092_v29 }
 0x87e   : > { %8097 = vmatprep.subr.bf16.mxu1 %v8096_v47 }
 0x880   : > { %7551 = vmatmul.mubr.msk.f32.gmra.mrb[62].mxu1 %vm406_vm0, %v9766_v58 }
 0x881   : > { %8099 = vmatpush3.bf16.msra.mxu1 %v8096_v47 }
 0x937   : > { %v7531_v25 = vpop.f32.mrb[48].mxu1 }
 0x938   : > { %v4051_v34 = vmul.f32 0.25, %v7531_v25  ;;  %v3971_v28 = vpop.f32.mrb[49].mxu1 }
 0x939   : > { %v4050_v37 = vmul.f32 0.25, %v3971_v28 }
 0x93a   : > { %4068 = vmax.xlane.f32.xlu0 %v4051_v34 }
 0x93b   : > { %4066 = vmax.xlane.f32.xlu1 %v4050_v37  ;;  %v7534_v35 = vpop.f32.mrb[50].mxu1 }
 0x93c   : > { %v4053_v39 = vmul.f32 0.25, %v7534_v35  ;;  %v3981_v51 = vpop.f32.mrb[51].mxu1 }
 0x93d   : > { %v4052_v55 = vmul.f32 0.25, %v3981_v51 }
 0x93e   : > { %4072 = vmax.xlane.f32.xlu0 %v4053_v39 }
 0x93f   : > { %4070 = vmax.xlane.f32.xlu1 %v4052_v55  ;;  %v7537_v44 = vpop.f32.mrb[52].mxu1 }
 0x940   : > { %v4055_v42 = vmul.f32 0.25, %v7537_v44  ;;  %v3991_v6 = vpop.f32.mrb[53].mxu1 }
 0x941   : > { %v4054_v48 = vmul.f32 0.25, %v3991_v6 }
 0x942   : > { %4076 = vmax.xlane.f32.xlu0 %v4055_v42 }
 0x943   : > { %4074 = vmax.xlane.f32.xlu1 %v4054_v48  ;;  %v7540_v52 = vpop.f32.mrb[54].mxu1 }
 0x944   : > { %v4001_v58 = vpop.f32.mrb[55].mxu1  ;;  %v4057_v45 = vmul.f32 0.25, %v7540_v52 }
 0x945   : > { %v4056_v33 = vmul.f32 0.25, %v4001_v58 }
 0x947   : > { %v7543_v63 = vpop.f32.mrb[56].mxu1 }
 0x948   : > { %v4011_v13 = vpop.f32.mrb[57].mxu1  ;;  %v4059_v47 = vmul.f32 0.25, %v7543_v63 }
 0x949   : > { %v4058_v25 = vmul.f32 0.25, %v4011_v13 }
 0x94b   : > { %v7546_v17 = vpop.f32.mrb[58].mxu1 }
 0x94c   : > { %v4021_v38 = vpop.f32.mrb[59].mxu1 }
 0x94d   : > { %v4060_v35 = vmul.f32 0.25, %v4021_v38 }
 0x94f   : > { %v9838_v24 = vpop.f32.mrb[60].mxu1 }
 0x950   : > { %v9840_v43 = vpop.f32.mrb[61].mxu1 }
 0x953   : > { %v9842_v49 = vpop.f32.mrb[62].mxu1 }
 0x954   : > { %v9844_v53 = vpop.f32.mrb[63].mxu1 }
 0x9c7   : > { %v4069_v59 = vpop.xlane.xlu0 %4068 }
 0x9c8   : > { %v4099_v0 = vsub.f32 %v4051_v34, %v4069_v59  ;;  %v4067_v7 = vpop.xlane.xlu1 %4066 }
 0x9c9   : > { %v4098_v50 = vsub.f32 %v4050_v37, %v4067_v7  ;;  %v4061_v37 = vmul.f32 0.25, %v7546_v17 }
 0x9ca   : > { %v4116_v61 = vmul.f32 1.442695, %v4099_v0 }
 0x9cb   : > { %v4114_v3 = vmul.f32 1.442695, %v4098_v50  ;;  %v4073_v57 = vpop.xlane.xlu0 %4072 }
 0x9cc   : > { %8477 = vpow2.f32 %v4116_v61  ;;  %v4101_v8 = vsub.f32 %v4053_v39, %v4073_v57  ;;  %v4071_v12 = vpop.xlane.xlu1 %4070 }
 0x9cd   : > { %8479 = vpow2.f32 %v4114_v3  ;;  %v4100_v14 = vsub.f32 %v4052_v55, %v4071_v12 }
 0x9ce   : > { %v4120_v56 = vmul.f32 1.442695, %v4101_v8 }
 0x9cf   : > { %v4118_v15 = vmul.f32 1.442695, %v4100_v14  ;;  %v4077_v31 = vpop.xlane.xlu0 %4076 }
 0x9d0   : > { %8481 = vpow2.f32 %v4120_v56  ;;  %v4075_v19 = vpop.xlane.xlu1 %4074  ;;  %v4103_v40 = vsub.f32 %v4055_v42, %v4077_v31 }
 0x9d1   : > { %8483 = vpow2.f32 %v4118_v15  ;;  %v4102_v21 = vsub.f32 %v4054_v48, %v4075_v19 }
 0x9d2   : > { %v4124_v26 = vmul.f32 1.442695, %v4103_v40 }
 0x9d3   : > { %v4122_v29 = vmul.f32 1.442695, %v4102_v21 }
 0x9d4   : > { %8485 = vpow2.f32 %v4124_v26 }
 0x9d5   : > { %8487 = vpow2.f32 %v4122_v29 }
 0x9d6   : > { %v8478_v54 = vpop.eup %8477 }
 0x9d7   : > { %v8480_v23 = vpop.eup %8479  ;;  %4148 = vadd.xlane.f32.xlu0 %v8478_v54 }
 0x9d8   : > { %4146 = vadd.xlane.f32.xlu1 %v8480_v23 }
 0x9da   : > { %v8482_v41 = vpop.eup %8481 }
 0x9db   : > { %v8484_v2 = vpop.eup %8483  ;;  %4152 = vadd.xlane.f32.xlu0 %v8482_v41 }
 0x9dc   : > { %4150 = vadd.xlane.f32.xlu1 %v8484_v2 }
 0x9de   : > { %v9846_v34 = vpop.eup %8485 }
 0x9df   : > { %4080 = vmax.xlane.f32.xlu0 %v4057_v45  ;;  %v9848_v28 = vpop.eup %8487 }
 0x9e0   : > { %4078 = vmax.xlane.f32.xlu1 %v4056_v33 }
 0x9e3   : > { %4084 = vmax.xlane.f32.xlu0 %v4059_v47 }
 0x9e4   : > { %4082 = vmax.xlane.f32.xlu1 %v4058_v25 }
 0x9e7   : > { %4156 = vadd.xlane.f32.xlu0 %v9846_v34 }
 0x9e8   : > { %4154 = vadd.xlane.f32.xlu1 %v9848_v28 }
 0x9eb   : > { %4088 = vmax.xlane.f32.xlu0 %v4061_v37 }
 0x9ec   : > { %4086 = vmax.xlane.f32.xlu1 %v4060_v35 }
 0xa64   : > { %v4149_v39 = vpop.xlane.xlu0 %4148 }
 0xa65   : > { %8489 = vrcp.f32 %v4149_v39  ;;  %v4147_v51 = vpop.xlane.xlu1 %4146 }
 0xa66   : > { %8491 = vrcp.f32 %v4147_v51 }
 0xa68   : > { %v4153_v55 = vpop.xlane.xlu0 %4152 }
 0xa69   : > { %8493 = vrcp.f32 %v4153_v55  ;;  %v4151_v44 = vpop.xlane.xlu1 %4150 }
 0xa6a   : > { %8495 = vrcp.f32 %v4151_v44 }
 0xa6c   : > { %v4081_v42 = vpop.xlane.xlu0 %4080 }
 0xa6d   : > { %v4105_v6 = vsub.f32 %v4057_v45, %v4081_v42  ;;  %v4079_v48 = vpop.xlane.xlu1 %4078  ;;  %v4063_v45 = vmul.f32 0.25, %v9838_v24  ;;  %v4065_v24 = vmul.f32 0.25, %v9842_v49 }
 0xa6e   : > { %v4104_v52 = vsub.f32 %v4056_v33, %v4079_v48 }
 0xa6f   : > { %v8490_v58 = vpop.eup %8489  ;;  %v4128_v63 = vmul.f32 1.442695, %v4105_v6 }
 0xa70   : > { %v8492_v13 = vpop.eup %8491  ;;  %v4126_v59 = vmul.f32 1.442695, %v4104_v52  ;;  %v4085_v17 = vpop.xlane.xlu0 %4084  ;;  %v4195_v50 = vmul.f32 %v8490_v58, %v8478_v54 }
 0xa71   : > { %8497 = vpow2.f32 %v4128_v63  ;;  %v4107_v38 = vsub.f32 %v4059_v47, %v4085_v17  ;;  %v4083_v0 = vpop.xlane.xlu1 %4082  ;;  %v4194_v7 = vmul.f32 %v8492_v13, %v8480_v23 }
 0xa72   : > { %8499 = vpow2.f32 %v4126_v59  ;;  %v4106_v61 = vsub.f32 %v4058_v25, %v4083_v0 }
 0xa73   : > { %v8494_v3 = vpop.eup %8493  ;;  %7585 = vmatprep.mubr.f32.mxu1 %v4194_v7  ;;  %v4132_v12 = vmul.f32 1.442695, %v4107_v38 }
 0xa74   : > { %v8496_v57 = vpop.eup %8495  ;;  %v4157_v8 = vpop.xlane.xlu0 %4156  ;;  %7586 = vmatmul.mubr.f32.vlgmr.msra.gmra.mrb[64].mxu1 %v4195_v50  ;;  %v4130_v15 = vmul.f32 1.442695, %v4106_v61  ;;  %v4197_v31 = vmul.f32 %v8494_v3, %v8482_v41  ;;  %v4062_v41 = vmul.f32 0.25, %v9840_v43  ;;  %v4064_v43 = vmul.f32 0.25, %v9844_v53 }
 0xa75   : > { %v4155_v14 = vpop.xlane.xlu1 %4154  ;;  %v4196_v56 = vmul.f32 %v8496_v57, %v8484_v2  ;;  %8501 = vrcp.f32 %v4157_v8 }
 0xa76   : > { %8503 = vrcp.f32 %v4155_v14 }
 0xa77   : > { %7588 = vmatprep.mubr.f32.mxu1 %v4196_v56  ;;  %8505 = vpow2.f32 %v4132_v12 }
 0xa78   : > { %v4089_v19 = vpop.xlane.xlu0 %4088  ;;  %7589 = vmatmul.mubr.f32.gmra.mrb[66].mxu1 %v4197_v31  ;;  %8507 = vpow2.f32 %v4130_v15 }
 0xa79   : > { %v4109_v40 = vsub.f32 %v4061_v37, %v4089_v19  ;;  %v4087_v21 = vpop.xlane.xlu1 %4086 }
 0xa7a   : > { %v4108_v54 = vsub.f32 %v4060_v35, %v4087_v21 }
 0xa7b   : > { %v8498_v23 = vpop.eup %8497  ;;  %v4136_v29 = vmul.f32 1.442695, %v4109_v40 }
 0xa7c   : > { %v8500_v26 = vpop.eup %8499  ;;  %4160 = vadd.xlane.f32.xlu0 %v8498_v23  ;;  %v4134_v2 = vmul.f32 1.442695, %v4108_v54 }
 0xa7d   : > { %4158 = vadd.xlane.f32.xlu1 %v8500_v26  ;;  %8509 = vpow2.f32 %v4136_v29 }
 0xa7e   : > { %8511 = vpow2.f32 %v4134_v2 }
 0xa7f   : > { %v8502_v33 = vpop.eup %8501 }
 0xa80   : > { %4092 = vmax.xlane.f32.xlu0 %v4063_v45  ;;  %v8504_v47 = vpop.eup %8503  ;;  %v4199_v39 = vmul.f32 %v8502_v33, %v9846_v34 }
 0xa81   : > { %4090 = vmax.xlane.f32.xlu1 %v4062_v41  ;;  %v8506_v25 = vpop.eup %8505  ;;  %v4198_v37 = vmul.f32 %v8504_v47, %v9848_v28 }
 0xa82   : > { %v8508_v35 = vpop.eup %8507 }
 0xa83   : > { %7591 = vmatprep.mubr.f32.mxu1 %v4198_v37 }
 0xa84   : > { %4164 = vadd.xlane.f32.xlu0 %v8506_v25  ;;  %7592 = vmatmul.mubr.f32.gmra.mrb[68].mxu1 %v4199_v39 }
 0xa85   : > { %4162 = vadd.xlane.f32.xlu1 %v8508_v35 }
 0xa87   : > { %v8510_v51 = vpop.eup %8509 }
 0xa88   : > { %4096 = vmax.xlane.f32.xlu0 %v4065_v24  ;;  %v8512_v55 = vpop.eup %8511 }
 0xa89   : > { %4094 = vmax.xlane.f32.xlu1 %v4064_v43 }
 0xa8c   : > { %4168 = vadd.xlane.f32.xlu0 %v8510_v51 }
 0xa8d   : > { %4166 = vadd.xlane.f32.xlu1 %v8512_v55 }
 0xb09   : > { %v4161_v44 = vpop.xlane.xlu0 %4160 }
 0xb0a   : > { %8513 = vrcp.f32 %v4161_v44  ;;  %v4159_v28 = vpop.xlane.xlu1 %4158 }
 0xb0b   : > { %8515 = vrcp.f32 %v4159_v28 }
 0xb0d   : > { %v4093_v42 = vpop.xlane.xlu0 %4092 }
 0xb0e   : > { %v4111_v6 = vsub.f32 %v4063_v45, %v4093_v42  ;;  %v4091_v34 = vpop.xlane.xlu1 %4090 }
 0xb0f   : > { %v4110_v48 = vsub.f32 %v4062_v41, %v4091_v34 }
 0xb10   : > { %v4140_v52 = vmul.f32 1.442695, %v4111_v6 }
 0xb11   : > { %v4138_v58 = vmul.f32 1.442695, %v4110_v48  ;;  %v4165_v49 = vpop.xlane.xlu0 %4164 }
 0xb12   : > { %8517 = vpow2.f32 %v4140_v52  ;;  %v4163_v63 = vpop.xlane.xlu1 %4162 }
 0xb13   : > { %8519 = vpow2.f32 %v4138_v58 }
 0xb14   : > { %v8514_v53 = vpop.eup %8513  ;;  %8521 = vrcp.f32 %v4165_v49  ;;  %v8541_v49 = vld [vmem:[%s10488_s7 + $0x80] sm:$0xff] }
 0xb15   : > { %v8516_v13 = vpop.eup %8515  ;;  %8523 = vrcp.f32 %v4163_v63  ;;  %v4097_v59 = vpop.xlane.xlu0 %4096  ;;  %v4201_v50 = vmul.f32 %v8514_v53, %v8498_v23  ;;  %v8542_v63 = vld [vmem:[%s10488_s7 + $0x88] sm:$0xff]  ;;  %v8543_v53 = vld [vmem:[%s10488_s7 + $0x90] sm:$0xff] }
 0xb16   : > { %v4113_v17 = vsub.f32 %v4065_v24, %v4097_v59  ;;  %v4095_v38 = vpop.xlane.xlu1 %4094  ;;  %v4200_v0 = vmul.f32 %v8516_v13, %v8500_v26  ;;  %v8544_v13 = vld [vmem:[%s10488_s7 + $0x98] sm:$0xff]  ;;  %v8545_v59 = vld [vmem:[%s10488_s7 + $0xa0] sm:$0xff] }
 0xb17   : > { %v4112_v7 = vsub.f32 %v4064_v43, %v4095_v38  ;;  %v8547_v38 = vld [vmem:[%s10488_s7 + $0xb0] sm:$0xff] }
 0xb18   : > { %v4144_v61 = vmul.f32 1.442695, %v4113_v17  ;;  %7594 = vmatprep.mubr.f32.mxu1 %v4200_v0  ;;  %v8546_v17 = vld [vmem:[%s10488_s7 + $0xa8] sm:$0xff]  ;;  %v8548_v0 = vld [vmem:[%s10488_s7 + $0xb8] sm:$0xff] }
 0xb19   : > { %v4142_v3 = vmul.f32 1.442695, %v4112_v7  ;;  %7595 = vmatmul.mubr.f32.gmra.mrb[70].mxu1 %v4201_v50  ;;  %v4169_v57 = vpop.xlane.xlu0 %4168  ;;  %v8549_v7 = vld [vmem:[%s10488_s7 + $0xc0] sm:$0xff]  ;;  %v8550_v50 = vld [vmem:[%s10488_s7 + $0xc8] sm:$0xff] }
 0xb1a   : > { %8525 = vpow2.f32 %v4144_v61  ;;  %v4167_v8 = vpop.xlane.xlu1 %4166  ;;  %v8551_v61 = vld [vmem:[%s10488_s7 + $0xd0] sm:$0xff] }
 0xb1b   : > { %8527 = vpow2.f32 %v4142_v3  ;;  %v8552_v3 = vld [vmem:[%s10488_s7 + $0xd8] sm:$0xff] }
 0xb1c   : > { %v8518_v12 = vpop.eup %8517  ;;  %8529 = vrcp.f32 %v4169_v57  ;;  %v8553_v57 = vld [vmem:[%s10488_s7 + $0xe0] sm:$0xff] }
 0xb1d   : > { %v8520_v14 = vpop.eup %8519  ;;  %8531 = vrcp.f32 %v4167_v8  ;;  %4172 = vadd.xlane.f32.xlu0 %v8518_v12  ;;  %v8554_v8 = vld [vmem:[%s10488_s7 + $0xe8] sm:$0xff] }
 0xb1e   : > { %v8522_v56 = vpop.eup %8521  ;;  %4170 = vadd.xlane.f32.xlu1 %v8520_v14 }
 0xb1f   : > { %v8524_v15 = vpop.eup %8523  ;;  %v4203_v19 = vmul.f32 %v8522_v56, %v8506_v25  ;;  %v8557_v56 = vld [vmem:[%s10488_s7] sm:$0xff] }
 0xb20   : > { %v4202_v31 = vmul.f32 %v8524_v15, %v8508_v35  ;;  %v8558_v15 = vld [vmem:[%s10488_s7 + $0x8] sm:$0xff] }
 0xb22   : > { %7597 = vmatprep.mubr.f32.mxu1 %v4202_v31  ;;  %v8559_v31 = vld [vmem:[%s10488_s7 + $0x10] sm:$0xff] }
 0xb23   : > { %7598 = vmatmul.mubr.f32.gmra.mrb[72].mxu1 %v4203_v19  ;;  %v8560_v19 = vld [vmem:[%s10488_s7 + $0x18] sm:$0xff] }
 0xb24   : > { %v8526_v40 = vpop.eup %8525 }
 0xb25   : > { %v8528_v21 = vpop.eup %8527  ;;  %4176 = vadd.xlane.f32.xlu0 %v8526_v40 }
 0xb26   : > { %v8530_v54 = vpop.eup %8529  ;;  %4174 = vadd.xlane.f32.xlu1 %v8528_v21 }
 0xb27   : > { %v8532_v23 = vpop.eup %8531  ;;  %v4205_v29 = vmul.f32 %v8530_v54, %v8510_v51 }
 0xb28   : > { %v4204_v26 = vmul.f32 %v8532_v23, %v8512_v55 }
 0xb2a   : > { %7600 = vmatprep.mubr.f32.mxu1 %v4204_v26  ;;  %v8562_v26 = vld [vmem:[%s10488_s7 + $0x28] sm:$0xff] }
 0xb2b   : > { %7601 = vmatmul.mubr.f32.gmra.mrb[74].mxu1 %v4205_v29  ;;  %v8563_v29 = vld [vmem:[%s10488_s7 + $0x30] sm:$0xff] }
 0xb47   : > { %v7587_v45 = vpop.f32.mrb[64].mxu1 }
 0xb48   : > { %v4276_v2 = vpop.f32.mrb[65].mxu1 }
 0xb49   : > { %v8106_v41 = vpack.c.bf16 %v7587_v45, %v4276_v2  ;;  %v8564_v45 = vld [vmem:[%s10488_s7 + $0x38] sm:$0xff]  ;;  %v8565_v2 = vld [vmem:[%s10488_s7 + $0x40] sm:$0xff] }
 0xb4b   : > { %v7590_v33 = vpop.f32.mrb[66].mxu1 }
 0xb4c   : > { %v4286_v47 = vpop.f32.mrb[67].mxu1 }
 0xb4d   : > { %v8100_v37 = vpack.c.bf16 %v7590_v33, %v4286_v47  ;;  %v8566_v33 = vld [vmem:[%s10488_s7 + $0x48] sm:$0xff] }
 0xb4f   : > { %8102 = vmatprep.subr.msk.bf16.mxu1 %vm8933_vm1, %v8100_v37 }
 0xb50   : > { %8105 = vmatpush3.bf16.xpose.msk.msra.mxu1 %vm8933_vm1, %v8100_v37  ;;  %v8567_v37 = vld [vmem:[%s10488_s7 + $0x50] sm:$0xff] }
 0xb51   : > { %8108 = vmatprep.subr.msk.bf16.mxu1 %vm8933_vm1, %v8106_v41 }
 0xb57   : > { %v7593_v25 = vpop.f32.mrb[68].mxu1 }
 0xb58   : > { %v4296_v35 = vpop.f32.mrb[69].mxu1 }
 0xb59   : > { %v8112_v39 = vpack.c.bf16 %v7593_v25, %v4296_v35  ;;  %v8568_v35 = vld [vmem:[%s10488_s7 + $0x58] sm:$0xff] }
 0xbaa   : > { %v4173_v24 = vpop.xlane.xlu0 %4172 }
 0xbab   : > { %8533 = vrcp.f32 %v4173_v24  ;;  %v4171_v43 = vpop.xlane.xlu1 %4170 }
 0xbac   : > { %8535 = vrcp.f32 %v4171_v43  ;;  %v8570_v43 = vld [vmem:[%s10488_s7 + $0x68] sm:$0xff] }
 0xbb2   : > { %v4177_v51 = vpop.xlane.xlu0 %4176 }
 0xbb3   : > { %8537 = vrcp.f32 %v4177_v51  ;;  %v4175_v55 = vpop.xlane.xlu1 %4174 }
 0xbb4   : > { %8539 = vrcp.f32 %v4175_v55  ;;  %v8571_v55 = vld [vmem:[%s10488_s7 + $0x70] sm:$0xff] }
 0xbb5   : > { %v8534_v44 = vpop.eup %8533 }
 0xbb6   : > { %v8536_v28 = vpop.eup %8535  ;;  %v4207_v6 = vmul.f32 %v8534_v44, %v8518_v12  ;;  %v8555_v12 = vld [vmem:[%s10488_s7 + $0xf0] sm:$0xff] }
 0xbb7   : > { %v4206_v42 = vmul.f32 %v8536_v28, %v8520_v14  ;;  %v8556_v14 = vld [vmem:[%s10488_s7 + $0xf8] sm:$0xff] }
 0xbb8   : > { %v8572_v28 = vld [vmem:[%s10488_s7 + $0x78] sm:$0xff] }
 0xbb9   : > { %7603 = vmatprep.mubr.f32.mxu1 %v4206_v42  ;;  %v8573_v42 = vld [vmem:[%s10488_s7 + $0x100] sm:$0xff] }
 0xbba   : > { %7604 = vmatmul.mubr.f32.gmra.mrb[76].mxu1 %v4207_v6  ;;  %v8574_v6 = vld [vmem:[%s10488_s7 + $0x108] sm:$0xff] }
 0xbbd   : > { %v8538_v34 = vpop.eup %8537 }
 0xbbe   : > { %v8540_v48 = vpop.eup %8539  ;;  %v4209_v58 = vmul.f32 %v8538_v34, %v8526_v40  ;;  %v8561_v40 = vld [vmem:[%s10488_s7 + $0x20] sm:$0xff]  ;;  %v8575_v34 = vld [vmem:[%s10488_s7 + $0x110] sm:$0xff] }
 0xbbf   : > { %v4208_v52 = vmul.f32 %v8540_v48, %v8528_v21  ;;  %v8576_v48 = vld [vmem:[%s10488_s7 + $0x118] sm:$0xff] }
 0xbc1   : > { %7606 = vmatprep.mubr.f32.mxu1 %v4208_v52  ;;  %v8577_v52 = vld [vmem:[%s10488_s7 + $0x120] sm:$0xff] }
 0xbc2   : > { %7607 = vmatmul.mubr.f32.gmra.mrb[78].mxu1 %v4209_v58  ;;  %v8578_v58 = vld [vmem:[%s10488_s7 + $0x128] sm:$0xff] }
 0xbc3   : > { %7613 = vmatprep.mubr.msk.f32.mxu1 %vm406_vm0, %v8541_v49  ;;  %v8579_v49 = vld [vmem:[%s10488_s7 + $0x130] sm:$0xff] }
 0xbc6   : > { %7614 = vmatmul.mubr.msk.f32.vlgmr.msra.gmra.mrb[80].mxu1 %vm406_vm0, %v8542_v63  ;;  %v8580_v63 = vld [vmem:[%s10488_s7 + $0x138] sm:$0xff] }
 0xbc7   : > { %8111 = vmatpush3.bf16.xpose.msk.msra.mxu1 %vm8933_vm1, %v8106_v41  ;;  %7616 = vmatprep.mubr.msk.f32.mxu1 %vm406_vm0, %v8543_v53  ;;  %v8581_v53 = vld [vmem:[%s10488_s7 + $0x140] sm:$0xff] }
 0xbc8   : > { %8114 = vmatprep.subr.msk.bf16.mxu1 %vm8933_vm1, %v8112_v39 }
 0xbca   : > { %7617 = vmatmul.mubr.msk.f32.gmra.mrb[82].mxu1 %vm406_vm0, %v8544_v13  ;;  %v8582_v13 = vld [vmem:[%s10488_s7 + $0x148] sm:$0xff] }
 0xbcb   : > { %7619 = vmatprep.mubr.msk.f32.mxu1 %vm406_vm0, %v8545_v59  ;;  %v8583_v59 = vld [vmem:[%s10488_s7 + $0x150] sm:$0xff] }
 0xbce   : > { %7620 = vmatmul.mubr.msk.f32.gmra.mrb[84].mxu1 %vm406_vm0, %v8546_v17  ;;  %v8584_v17 = vld [vmem:[%s10488_s7 + $0x158] sm:$0xff] }
 0xbcf   : > { %7622 = vmatprep.mubr.msk.f32.mxu1 %vm406_vm0, %v8547_v38  ;;  %v8585_v38 = vld [vmem:[%s10488_s7 + $0x160] sm:$0xff] }
 0xbd2   : > { %7623 = vmatmul.mubr.msk.f32.gmra.mrb[86].mxu1 %vm406_vm0, %v8548_v0  ;;  %v8586_v0 = vld [vmem:[%s10488_s7 + $0x168] sm:$0xff] }
 0xbd3   : > { %7625 = vmatprep.mubr.msk.f32.mxu1 %vm406_vm0, %v8549_v7  ;;  %v8587_v7 = vld [vmem:[%s10488_s7 + $0x170] sm:$0xff] }
 0xbd6   : > { %7626 = vmatmul.mubr.msk.f32.gmra.mrb[88].mxu1 %vm406_vm0, %v8550_v50  ;;  %v8588_v50 = vld [vmem:[%s10488_s7 + $0x178] sm:$0xff] }
 0xbd7   : > { %7628 = vmatprep.mubr.msk.f32.mxu1 %vm406_vm0, %v8551_v61  ;;  %v8589_v61 = vld [vmem:[%s10488_s7 + $0x180] sm:$0xff] }
 0xbda   : > { %7629 = vmatmul.mubr.msk.f32.gmra.mrb[90].mxu1 %vm406_vm0, %v8552_v3  ;;  %v8590_v3 = vld [vmem:[%s10488_s7 + $0x188] sm:$0xff] }
 0xbdb   : > { %7631 = vmatprep.mubr.msk.f32.mxu1 %vm406_vm0, %v8553_v57  ;;  %v8591_v57 = vld [vmem:[%s10488_s7 + $0x190] sm:$0xff] }
 0xbde   : > { %7632 = vmatmul.mubr.msk.f32.gmra.mrb[92].mxu1 %vm406_vm0, %v8554_v8  ;;  %v8592_v8 = vld [vmem:[%s10488_s7 + $0x198] sm:$0xff] }
 0xbdf   : > { %7634 = vmatprep.mubr.msk.f32.mxu1 %vm406_vm0, %v8555_v12  ;;  %v8593_v12 = vld [vmem:[%s10488_s7 + $0x1a0] sm:$0xff] }
 0xbe2   : > { %7635 = vmatmul.mubr.msk.f32.gmra.mrb[94].mxu1 %vm406_vm0, %v8556_v14  ;;  %v8594_v14 = vld [vmem:[%s10488_s7 + $0x1a8] sm:$0xff] }
 0xbe3   : > { %7641 = vmatprep.mubr.msk.f32.mxu1 %vm406_vm0, %v8557_v56  ;;  %v8595_v56 = vld [vmem:[%s10488_s7 + $0x1b0] sm:$0xff] }
 0xbe6   : > { %7642 = vmatmul.mubr.msk.f32.vlgmr.msra.gmra.mrb[80].mxu1 %vm406_vm0, %v8558_v15  ;;  %v8596_v15 = vld [vmem:[%s10488_s7 + $0x1b8] sm:$0xff] }
 0xbe7   : > { %8117 = vmatpush3.bf16.xpose.msk.msra.mxu1 %vm8933_vm1, %v8112_v39  ;;  %7644 = vmatprep.mubr.msk.f32.mxu1 %vm406_vm0, %v8559_v31  ;;  %v8569_v39 = vld [vmem:[%s10488_s7 + $0x60] sm:$0xff] }
 0xbe8   : > { %v8597_v31 = vld [vmem:[%s10488_s7 + $0x1c0] sm:$0xff] }
 0xbea   : > { %7645 = vmatmul.mubr.msk.f32.gmra.mrb[82].mxu1 %vm406_vm0, %v8560_v19  ;;  %v8598_v19 = vld [vmem:[%s10488_s7 + $0x1c8] sm:$0xff] }
 0xbeb   : > { %7647 = vmatprep.mubr.msk.f32.mxu1 %vm406_vm0, %v8561_v40  ;;  %v8599_v40 = vld [vmem:[%s10488_s7 + $0x1d0] sm:$0xff] }
 0xbec   : > { %v7596_v21 = vpop.f32.mrb[70].mxu1 }
 0xbed   : > { %v4306_v54 = vpop.f32.mrb[71].mxu1 }
 0xbee   : > { %v8118_v23 = vpack.c.bf16 %v7596_v21, %v4306_v54  ;;  %7648 = vmatmul.mubr.msk.f32.gmra.mrb[84].mxu1 %vm406_vm0, %v8562_v26  ;;  %v8600_v21 = vld [vmem:[%s10488_s7 + $0x1d8] sm:$0xff]  ;;  %v8601_v54 = vld [vmem:[%s10488_s7 + $0x1e0] sm:$0xff]  ;;  %v8603_v26 = vld [vmem:[%s10488_s7 + $0x1f0] sm:$0xff] }
 0xbef   : > { %7650 = vmatprep.mubr.msk.f32.mxu1 %vm406_vm0, %v8563_v29  ;;  %v8604_v29 = vld [vmem:[%s10488_s7 + $0x1f8] sm:$0xff] }
 0xbf0   : > { %8120 = vmatprep.subr.msk.bf16.mxu1 %vm8933_vm1, %v8118_v23 }
 0xbf2   : > { %7651 = vmatmul.mubr.msk.f32.gmra.mrb[86].mxu1 %vm406_vm0, %v8564_v45  ;;  %v8605_v45 = vld [vmem:[%s10488_s7 + $0x200] sm:$0xff] }
 0xbf3   : > { %7653 = vmatprep.mubr.msk.f32.mxu1 %vm406_vm0, %v8565_v2  ;;  %v8606_v2 = vld [vmem:[%s10488_s7 + $0x208] sm:$0xff] }
 0xbf6   : > { %v7599_v41 = vpop.f32.mrb[72].mxu1  ;;  %7654 = vmatmul.mubr.msk.f32.gmra.mrb[88].mxu1 %vm406_vm0, %v8566_v33  ;;  %v8608_v33 = vld [vmem:[%s10488_s7 + $0x218] sm:$0xff] }
 0xbf7   : > { %v4316_v47 = vpop.f32.mrb[73].mxu1  ;;  %7656 = vmatprep.mubr.msk.f32.mxu1 %vm406_vm0, %v8567_v37  ;;  %v8610_v37 = vld [vmem:[%s10488_s7 + $0x228] sm:$0xff] }
 0xbf8   : > { %v8124_v25 = vpack.c.bf16 %v7599_v41, %v4316_v47  ;;  %v8607_v41 = vld [vmem:[%s10488_s7 + $0x210] sm:$0xff]  ;;  %v8609_v47 = vld [vmem:[%s10488_s7 + $0x220] sm:$0xff] }
 0xbfa   : > { %7657 = vmatmul.mubr.msk.f32.gmra.mrb[90].mxu1 %vm406_vm0, %v8568_v35  ;;  %v8612_v35 = vld [vmem:[%s10488_s7 + $0x238] sm:$0xff] }
 0xbfb   : > { %7659 = vmatprep.mubr.msk.f32.mxu1 %vm406_vm0, %v8569_v39  ;;  %v8613_v39 = vld [vmem:[%s10488_s7 + $0x240] sm:$0xff] }
 0xbfe   : > { %v7602_v24 = vpop.f32.mrb[74].mxu1  ;;  %7660 = vmatmul.mubr.msk.f32.gmra.mrb[92].mxu1 %vm406_vm0, %v8570_v43  ;;  %v8615_v43 = vld [vmem:[%s10488_s7 + $0x250] sm:$0xff] }
 0xbff   : > { %v4326_v51 = vpop.f32.mrb[75].mxu1  ;;  %7662 = vmatprep.mubr.msk.f32.mxu1 %vm406_vm0, %v8571_v55  ;;  %v8617_v55 = vld [vmem:[%s10488_s7 + $0x260] sm:$0xff] }
 0xc00   : > { %v9996_v44 = vpack.c.bf16 %v7602_v24, %v4326_v51  ;;  %v8614_v24 = vld [vmem:[%s10488_s7 + $0x248] sm:$0xff]  ;;  %v8616_v51 = vld [vmem:[%s10488_s7 + $0x258] sm:$0xff] }
 0xc02   : > { %7663 = vmatmul.mubr.msk.f32.gmra.mrb[94].mxu1 %vm406_vm0, %v8572_v28  ;;  %v8619_v28 = vld [vmem:[%s10488_s7 + $0x270] sm:$0xff] }
 0xc03   : > { %7669 = vmatprep.mubr.msk.f32.mxu1 %vm406_vm0, %v8573_v42  ;;  %v8620_v42 = vld [vmem:[%s10488_s7 + $0x278] sm:$0xff] }
 0xc06   : > { %7670 = vmatmul.mubr.msk.f32.vlgmr.msra.gmra.mrb[80].mxu1 %vm406_vm0, %v8574_v6  ;;  %v8621_v6 = vld [vmem:[%s10488_s7 + $0x280] sm:$0xff] }
 0xc07   : > { %8123 = vmatpush3.bf16.xpose.msk.msra.mxu1 %vm8933_vm1, %v8118_v23  ;;  %7672 = vmatprep.mubr.msk.f32.mxu1 %vm406_vm0, %v8575_v34  ;;  %v8602_v23 = vld [vmem:[%s10488_s7 + $0x1e8] sm:$0xff] }
 0xc08   : > { %8126 = vmatprep.subr.msk.bf16.mxu1 %vm8933_vm1, %v8124_v25  ;;  %v8622_v34 = vld [vmem:[%s10488_s7 + $0x288] sm:$0xff] }
 0xc0a   : > { %7673 = vmatmul.mubr.msk.f32.gmra.mrb[82].mxu1 %vm406_vm0, %v8576_v48  ;;  %v8623_v48 = vld [vmem:[%s10488_s7 + $0x290] sm:$0xff] }
 0xc0b   : > { %7675 = vmatprep.mubr.msk.f32.mxu1 %vm406_vm0, %v8577_v52  ;;  %v8624_v52 = vld [vmem:[%s10488_s7 + $0x298] sm:$0xff] }
 0xc0e   : > { %7676 = vmatmul.mubr.msk.f32.gmra.mrb[84].mxu1 %vm406_vm0, %v8578_v58  ;;  %v8625_v58 = vld [vmem:[%s10488_s7 + $0x2a0] sm:$0xff] }
 0xc0f   : > { %7678 = vmatprep.mubr.msk.f32.mxu1 %vm406_vm0, %v8579_v49  ;;  %v8626_v49 = vld [vmem:[%s10488_s7 + $0x2a8] sm:$0xff] }
 0xc12   : > { %7679 = vmatmul.mubr.msk.f32.gmra.mrb[86].mxu1 %vm406_vm0, %v8580_v63  ;;  %v8627_v63 = vld [vmem:[%s10488_s7 + $0x2b0] sm:$0xff] }
 0xc13   : > { %7681 = vmatprep.mubr.msk.f32.mxu1 %vm406_vm0, %v8581_v53  ;;  %v8628_v53 = vld [vmem:[%s10488_s7 + $0x2b8] sm:$0xff] }
 0xc16   : > { %7682 = vmatmul.mubr.msk.f32.gmra.mrb[88].mxu1 %vm406_vm0, %v8582_v13  ;;  %v8629_v13 = vld [vmem:[%s10488_s7 + $0x2c0] sm:$0xff] }
 0xc17   : > { %7684 = vmatprep.mubr.msk.f32.mxu1 %vm406_vm0, %v8583_v59  ;;  %v8630_v59 = vld [vmem:[%s10488_s7 + $0x2c8] sm:$0xff] }
 0xc1a   : > { %7685 = vmatmul.mubr.msk.f32.gmra.mrb[90].mxu1 %vm406_vm0, %v8584_v17  ;;  %v8631_v17 = vld [vmem:[%s10488_s7 + $0x2d0] sm:$0xff] }
 0xc1b   : > { %7687 = vmatprep.mubr.msk.f32.mxu1 %vm406_vm0, %v8585_v38  ;;  %v8632_v38 = vld [vmem:[%s10488_s7 + $0x2d8] sm:$0xff] }
 0xc1e   : > { %7688 = vmatmul.mubr.msk.f32.gmra.mrb[92].mxu1 %vm406_vm0, %v8586_v0  ;;  %v8633_v0 = vld [vmem:[%s10488_s7 + $0x2e0] sm:$0xff] }
 0xc1f   : > { %7690 = vmatprep.mubr.msk.f32.mxu1 %vm406_vm0, %v8587_v7  ;;  %v8634_v7 = vld [vmem:[%s10488_s7 + $0x2e8] sm:$0xff] }
 0xc22   : > { %7691 = vmatmul.mubr.msk.f32.gmra.mrb[94].mxu1 %vm406_vm0, %v8588_v50  ;;  %v8635_v50 = vld [vmem:[%s10488_s7 + $0x2f0] sm:$0xff] }
 0xc23   : > { %7697 = vmatprep.mubr.msk.f32.mxu1 %vm406_vm0, %v8589_v61  ;;  %v8636_v61 = vld [vmem:[%s10488_s7 + $0x2f8] sm:$0xff] }
 0xc26   : > { %7698 = vmatmul.mubr.msk.f32.vlgmr.msra.gmra.mrb[80].mxu1 %vm406_vm0, %v8590_v3  ;;  %v8637_v3 = vld [vmem:[%s10488_s7 + $0x300] sm:$0xff] }
 0xc27   : > { %8129 = vmatpush3.bf16.xpose.msk.msra.mxu1 %vm8933_vm1, %v8124_v25  ;;  %7700 = vmatprep.mubr.msk.f32.mxu1 %vm406_vm0, %v8591_v57  ;;  %v8611_v25 = vld [vmem:[%s10488_s7 + $0x230] sm:$0xff] }
 0xc28   : > { %8132 = vmatprep.subr.msk.bf16.mxu1 %vm8933_vm1, %v9996_v44 }
 0xc2a   : > { %7701 = vmatmul.mubr.msk.f32.gmra.mrb[82].mxu1 %vm406_vm0, %v8592_v8 }
 0xc2b   : > { %7703 = vmatprep.mubr.msk.f32.mxu1 %vm406_vm0, %v8593_v12 }
 0xc2e   : > { %7704 = vmatmul.mubr.msk.f32.gmra.mrb[84].mxu1 %vm406_vm0, %v8594_v14 }
 0xc2f   : > { %7706 = vmatprep.mubr.msk.f32.mxu1 %vm406_vm0, %v8595_v56 }
 0xc32   : > { %7707 = vmatmul.mubr.msk.f32.gmra.mrb[86].mxu1 %vm406_vm0, %v8596_v15 }
 0xc33   : > { %7709 = vmatprep.mubr.msk.f32.mxu1 %vm406_vm0, %v8597_v31  ;;  %v8638_v31 = vld [vmem:[%s10488_s7 + $0x308] sm:$0xff] }
 0xc36   : > { %7710 = vmatmul.mubr.msk.f32.gmra.mrb[88].mxu1 %vm406_vm0, %v8598_v19  ;;  %v8639_v19 = vld [vmem:[%s10488_s7 + $0x310] sm:$0xff] }
 0xc37   : > { %7712 = vmatprep.mubr.msk.f32.mxu1 %vm406_vm0, %v8599_v40  ;;  %v8640_v40 = vld [vmem:[%s10488_s7 + $0x318] sm:$0xff] }
 0xc3a   : > { %7713 = vmatmul.mubr.msk.f32.gmra.mrb[90].mxu1 %vm406_vm0, %v8600_v21  ;;  %v8641_v21 = vld [vmem:[%s10488_s7 + $0x320] sm:$0xff] }
 0xc3b   : > { %7715 = vmatprep.mubr.msk.f32.mxu1 %vm406_vm0, %v8601_v54  ;;  %v8643_v54 = vld [vmem:[%s10488_s7 + $0x330] sm:$0xff] }
 0xc3e   : > { %7716 = vmatmul.mubr.msk.f32.gmra.mrb[92].mxu1 %vm406_vm0, %v8602_v23  ;;  %v8644_v23 = vld [vmem:[%s10488_s7 + $0x338] sm:$0xff] }
 0xc3f   : > { %7718 = vmatprep.mubr.msk.f32.mxu1 %vm406_vm0, %v8603_v26  ;;  %v8645_v26 = vld [vmem:[%s10488_s7 + $0x340] sm:$0xff] }
 0xc42   : > { %7719 = vmatmul.mubr.msk.f32.gmra.mrb[94].mxu1 %vm406_vm0, %v8604_v29  ;;  %v8646_v29 = vld [vmem:[%s10488_s7 + $0x348] sm:$0xff] }
 0xc43   : > { %7725 = vmatprep.mubr.msk.f32.mxu1 %vm406_vm0, %v8605_v45  ;;  %v8647_v45 = vld [vmem:[%s10488_s7 + $0x350] sm:$0xff] }
 0xc46   : > { %7726 = vmatmul.mubr.msk.f32.vlgmr.msra.gmra.mrb[80].mxu1 %vm406_vm0, %v8606_v2  ;;  %v8648_v2 = vld [vmem:[%s10488_s7 + $0x358] sm:$0xff] }
 0xc47   : > { %8135 = vmatpush3.bf16.xpose.msk.msra.mxu1 %vm8933_vm1, %v9996_v44  ;;  %7728 = vmatprep.mubr.msk.f32.mxu1 %vm406_vm0, %v8607_v41  ;;  %v8618_v44 = vld [vmem:[%s10488_s7 + $0x268] sm:$0xff]  ;;  %v8649_v41 = vld [vmem:[%s10488_s7 + $0x360] sm:$0xff] }
 0xc4a   : > { %7729 = vmatmul.mubr.msk.f32.gmra.mrb[82].mxu1 %vm406_vm0, %v8608_v33  ;;  %v8650_v33 = vld [vmem:[%s10488_s7 + $0x368] sm:$0xff] }
 0xc4b   : > { %7731 = vmatprep.mubr.msk.f32.mxu1 %vm406_vm0, %v8609_v47  ;;  %v8651_v47 = vld [vmem:[%s10488_s7 + $0x370] sm:$0xff] }
 0xc4e   : > { %7732 = vmatmul.mubr.msk.f32.gmra.mrb[84].mxu1 %vm406_vm0, %v8610_v37  ;;  %v8652_v37 = vld [vmem:[%s10488_s7 + $0x378] sm:$0xff] }
 0xc4f   : > { %7734 = vmatprep.mubr.msk.f32.mxu1 %vm406_vm0, %v8611_v25  ;;  %v8653_v25 = vld [vmem:[%s10488_s7 + $0x380] sm:$0xff] }
 0xc52   : > { %7735 = vmatmul.mubr.msk.f32.gmra.mrb[86].mxu1 %vm406_vm0, %v8612_v35  ;;  %v8654_v35 = vld [vmem:[%s10488_s7 + $0x388] sm:$0xff] }
 0xc53   : > { %7737 = vmatprep.mubr.msk.f32.mxu1 %vm406_vm0, %v8613_v39  ;;  %v8655_v39 = vld [vmem:[%s10488_s7 + $0x390] sm:$0xff] }
 0xc56   : > { %7738 = vmatmul.mubr.msk.f32.gmra.mrb[88].mxu1 %vm406_vm0, %v8614_v24  ;;  %v8656_v24 = vld [vmem:[%s10488_s7 + $0x398] sm:$0xff] }
 0xc57   : > { %7740 = vmatprep.mubr.msk.f32.mxu1 %vm406_vm0, %v8615_v43  ;;  %v8657_v43 = vld [vmem:[%s10488_s7 + $0x3a0] sm:$0xff] }
 0xc5a   : > { %7741 = vmatmul.mubr.msk.f32.gmra.mrb[90].mxu1 %vm406_vm0, %v8616_v51  ;;  %v8658_v51 = vld [vmem:[%s10488_s7 + $0x3a8] sm:$0xff] }
 0xc5b   : > { %7743 = vmatprep.mubr.msk.f32.mxu1 %vm406_vm0, %v8617_v55  ;;  %v8659_v55 = vld [vmem:[%s10488_s7 + $0x3b0] sm:$0xff] }
 0xc5e   : > { %7744 = vmatmul.mubr.msk.f32.gmra.mrb[92].mxu1 %vm406_vm0, %v8618_v44  ;;  %v8660_v44 = vld [vmem:[%s10488_s7 + $0x3b8] sm:$0xff] }
 0xc5f   : > { %7746 = vmatprep.mubr.msk.f32.mxu1 %vm406_vm0, %v8619_v28  ;;  %v8661_v28 = vld [vmem:[%s10488_s7 + $0x3c0] sm:$0xff] }
 0xc62   : > { %7747 = vmatmul.mubr.msk.f32.gmra.mrb[94].mxu1 %vm406_vm0, %v8620_v42  ;;  %v8662_v42 = vld [vmem:[%s10488_s7 + $0x3c8] sm:$0xff] }
 0xc63   : > { %7753 = vmatprep.mubr.msk.f32.mxu1 %vm406_vm0, %v8621_v6  ;;  %v8663_v6 = vld [vmem:[%s10488_s7 + $0x3d0] sm:$0xff] }
 0xc66   : > { %7754 = vmatmul.mubr.msk.f32.vlgmr.msra.gmra.mrb[80].mxu1 %vm406_vm0, %v8622_v34  ;;  %v8664_v34 = vld [vmem:[%s10488_s7 + $0x3d8] sm:$0xff] }
 0xc67   : > { %7756 = vmatprep.mubr.msk.f32.mxu1 %vm406_vm0, %v8623_v48  ;;  %v8665_v48 = vld [vmem:[%s10488_s7 + $0x3e0] sm:$0xff] }
 0xc6a   : > { %7757 = vmatmul.mubr.msk.f32.gmra.mrb[82].mxu1 %vm406_vm0, %v8624_v52  ;;  %v8666_v52 = vld [vmem:[%s10488_s7 + $0x3e8] sm:$0xff] }
 0xc6b   : > { %7759 = vmatprep.mubr.msk.f32.mxu1 %vm406_vm0, %v8625_v58  ;;  %v8667_v58 = vld [vmem:[%s10488_s7 + $0x3f0] sm:$0xff] }
 0xc6e   : > { %7760 = vmatmul.mubr.msk.f32.gmra.mrb[84].mxu1 %vm406_vm0, %v8626_v49  ;;  %v8668_v49 = vld [vmem:[%s10488_s7 + $0x3f8] sm:$0xff] }
 0xc6f   : > { %7762 = vmatprep.mubr.msk.f32.mxu1 %vm406_vm0, %v8627_v63  ;;  %v5707_v63 = vld [vmem:[%s10489_s8] sm:$0xff] }
 0xc72   : > { %7763 = vmatmul.mubr.msk.f32.gmra.mrb[86].mxu1 %vm406_vm0, %v8628_v53  ;;  %v5708_v53 = vld [vmem:[%s10489_s8 + $0x8] sm:$0xff] }
 0xc73   : > { %7765 = vmatprep.mubr.msk.f32.mxu1 %vm406_vm0, %v8629_v13  ;;  %v5709_v13 = vld [vmem:[%s10489_s8 + $0x10] sm:$0xff] }
 0xc76   : > { %7766 = vmatmul.mubr.msk.f32.gmra.mrb[88].mxu1 %vm406_vm0, %v8630_v59  ;;  %v8148_v59 = vpack.c.bf16 %v5708_v53, %v5707_v63 }
 0xc77   : > { %7768 = vmatprep.mubr.msk.f32.mxu1 %vm406_vm0, %v8631_v17  ;;  %v5710_v17 = vld [vmem:[%s10489_s8 + $0x18] sm:$0xff] }
 0xc78   : > { %8149 = vmatprep.subr.bf16.mxu0 %v8148_v59 }
 0xc79   : > { %8151 = vmatpush3.bf16.msra.mxu0 %v8148_v59 }
 0xc7a   : > { %7769 = vmatmul.mubr.msk.f32.gmra.mrb[90].mxu1 %vm406_vm0, %v8632_v38  ;;  %v8152_v38 = vpack.c.bf16 %v5710_v17, %v5709_v13 }
 0xc7b   : > { %7771 = vmatprep.mubr.msk.f32.mxu1 %vm406_vm0, %v8633_v0  ;;  %v5711_v0 = vld [vmem:[%s10489_s8 + $0x20] sm:$0xff] }
 0xc7c   : > { %8153 = vmatprep.subr.bf16.mxu0 %v8152_v38 }
 0xc7d   : > { %8155 = vmatpush3.bf16.msra.mxu0 %v8152_v38 }
 0xc7e   : > { %7772 = vmatmul.mubr.msk.f32.gmra.mrb[92].mxu1 %vm406_vm0, %v8634_v7  ;;  %v5712_v7 = vld [vmem:[%s10489_s8 + $0x28] sm:$0xff] }
 0xc7f   : > { %7774 = vmatprep.mubr.msk.f32.mxu1 %vm406_vm0, %v8635_v50  ;;  %v8156_v50 = vpack.c.bf16 %v5712_v7, %v5711_v0 }
 0xc81   : > { %8157 = vmatprep.subr.bf16.mxu0 %v8156_v50 }
 0xc82   : > { %7775 = vmatmul.mubr.msk.f32.gmra.mrb[94].mxu1 %vm406_vm0, %v8636_v61  ;;  %v5713_v61 = vld [vmem:[%s10489_s8 + $0x30] sm:$0xff]  ;;  %8159 = vmatpush3.bf16.msra.mxu0 %v8156_v50 }
 0xc83   : > { %7781 = vmatprep.mubr.msk.f32.mxu1 %vm406_vm0, %v8637_v3  ;;  %v5714_v3 = vld [vmem:[%s10489_s8 + $0x38] sm:$0xff] }
 0xc8d   : > { %v7605_v57 = vpop.f32.mrb[76].mxu1 }
 0xc8e   : > { %v4336_v8 = vpop.f32.mrb[77].mxu1 }
 0xc8f   : > { %v8136_v12 = vpack.c.bf16 %v7605_v57, %v4336_v8  ;;  %v8160_v57 = vpack.c.bf16 %v5714_v3, %v5713_v61  ;;  %v5715_v8 = vld [vmem:[%s10489_s8 + $0x40] sm:$0xff] }
 0xc91   : > { %8138 = vmatprep.subr.msk.bf16.mxu1 %vm8933_vm1, %v8136_v12  ;;  %8161 = vmatprep.subr.bf16.mxu0 %v8160_v57 }
 0xc92   : > { %8141 = vmatpush3.bf16.xpose.msk.msra.mxu1 %vm8933_vm1, %v8136_v12  ;;  %v5716_v12 = vld [vmem:[%s10489_s8 + $0x48] sm:$0xff]  ;;  %8163 = vmatpush3.bf16.msra.mxu0 %v8160_v57 }
 0xc95   : > { %v7608_v14 = vpop.f32.mrb[78].mxu1 }
 0xc96   : > { %v4346_v56 = vpop.f32.mrb[79].mxu1 }
 0xc97   : > { %v8142_v15 = vpack.c.bf16 %v7608_v14, %v4346_v56  ;;  %v8164_v14 = vpack.c.bf16 %v5716_v12, %v5715_v8  ;;  %v5717_v56 = vld [vmem:[%s10489_s8 + $0x50] sm:$0xff] }
 0xc99   : > { %7782 = vmatmul.mubr.msk.f32.vlgmr.msra.gmra.mrb[80].mxu1 %vm406_vm0, %v8638_v31  ;;  %8144 = vmatprep.subr.msk.bf16.mxu1 %vm8933_vm1, %v8142_v15 }
 0xc9a   : > { %8147 = vmatpush3.bf16.xpose.msk.msra.mxu1 %vm8933_vm1, %v8142_v15  ;;  %7784 = vmatprep.mubr.msk.f32.mxu1 %vm406_vm0, %v8639_v19  ;;  %v5718_v15 = vld [vmem:[%s10489_s8 + $0x58] sm:$0xff]  ;;  %v5719_v19 = vld [vmem:[%s10489_s8 + $0x60] sm:$0xff] }
 0xc9b   : > { %8165 = vmatprep.subr.bf16.mxu0 %v8164_v14  ;;  %v8168_v31 = vpack.c.bf16 %v5718_v15, %v5717_v56 }
 0xc9c   : > { %8167 = vmatpush3.bf16.msra.mxu0 %v8164_v14 }
 0xc9d   : > { %7785 = vmatmul.mubr.msk.f32.gmra.mrb[82].mxu1 %vm406_vm0, %v8640_v40  ;;  %v5720_v40 = vld [vmem:[%s10489_s8 + $0x68] sm:$0xff]  ;;  %8169 = vmatprep.subr.bf16.mxu0 %v8168_v31 }
 0xc9e   : > { %7787 = vmatprep.mubr.msk.f32.mxu1 %vm406_vm0, %v8641_v21  ;;  %v8172_v21 = vpack.c.bf16 %v5720_v40, %v5719_v19 }
 0xca0   : > { %8171 = vmatpush3.bf16.msra.mxu0 %v8168_v31 }
 0xca1   : > { %7788 = vmatmul.mubr.msk.f32.gmra.mrb[84].mxu1 %vm406_vm0, %v8642_v1  ;;  %8173 = vmatprep.subr.bf16.mxu0 %v8172_v21 }
 0xca2   : > { %7790 = vmatprep.mubr.msk.f32.mxu1 %vm406_vm0, %v8643_v54 }
 0xca4   : > { %8175 = vmatpush3.bf16.msra.mxu0 %v8172_v21 }
 0xca5   : > { %7791 = vmatmul.mubr.msk.f32.gmra.mrb[86].mxu1 %vm406_vm0, %v8644_v23 }
 0xca6   : > { %7793 = vmatprep.mubr.msk.f32.mxu1 %vm406_vm0, %v8645_v26 }
 0xca9   : > { %7794 = vmatmul.mubr.msk.f32.gmra.mrb[88].mxu1 %vm406_vm0, %v8646_v29  ;;  %v5721_v29 = vld [vmem:[%s10489_s8 + $0x70] sm:$0xff] }
 0xcaa   : > { %7796 = vmatprep.mubr.msk.f32.mxu1 %vm406_vm0, %v8647_v45  ;;  %v5722_v45 = vld [vmem:[%s10489_s8 + $0x78] sm:$0xff] }
 0xcad   : > { %7797 = vmatmul.mubr.msk.f32.gmra.mrb[90].mxu1 %vm406_vm0, %v8648_v2 }
 0xcae   : > { %7799 = vmatprep.mubr.msk.f32.mxu1 %vm406_vm0, %v8649_v41  ;;  %v8176_v41 = vpack.c.bf16 %v5722_v45, %v5721_v29 }
 0xcb0   : > { %8177 = vmatprep.subr.bf16.mxu0 %v8176_v41 }
 0xcb1   : > { %7800 = vmatmul.mubr.msk.f32.gmra.mrb[92].mxu1 %vm406_vm0, %v8650_v33  ;;  %8179 = vmatpush3.bf16.msra.mxu0 %v8176_v41 }
 0xcb2   : > { %7802 = vmatprep.mubr.msk.f32.mxu1 %vm406_vm0, %v8651_v47 }
 0xcb5   : > { %7803 = vmatmul.mubr.msk.f32.gmra.mrb[94].mxu1 %vm406_vm0, %v8652_v37 }
 0xcb6   : > { %7809 = vmatprep.mubr.msk.f32.mxu1 %vm406_vm0, %v8653_v25 }
 0xcb9   : > { %7810 = vmatmul.mubr.msk.f32.vlgmr.msra.gmra.mrb[80].mxu1 %vm406_vm0, %v8654_v35 }
 0xcba   : > { %7812 = vmatprep.mubr.msk.f32.mxu1 %vm406_vm0, %v8655_v39 }
 0xcbd   : > { %7813 = vmatmul.mubr.msk.f32.gmra.mrb[82].mxu1 %vm406_vm0, %v8656_v24 }
 0xcbe   : > { %7815 = vmatprep.mubr.msk.f32.mxu1 %vm406_vm0, %v8657_v43 }
 0xcc1   : > { %7816 = vmatmul.mubr.msk.f32.gmra.mrb[84].mxu1 %vm406_vm0, %v8658_v51 }
 0xcc2   : > { %7818 = vmatprep.mubr.msk.f32.mxu1 %vm406_vm0, %v8659_v55 }
 0xcc5   : > { %7819 = vmatmul.mubr.msk.f32.gmra.mrb[86].mxu1 %vm406_vm0, %v8660_v44 }
 0xcc6   : > { %7821 = vmatprep.mubr.msk.f32.mxu1 %vm406_vm0, %v8661_v28 }
 0xcc9   : > { %7822 = vmatmul.mubr.msk.f32.gmra.mrb[88].mxu1 %vm406_vm0, %v8662_v42 }
 0xcca   : > { %7824 = vmatprep.mubr.msk.f32.mxu1 %vm406_vm0, %v8663_v6 }
 0xccd   : > { %7825 = vmatmul.mubr.msk.f32.gmra.mrb[90].mxu1 %vm406_vm0, %v8664_v34 }
 0xcce   : > { %7827 = vmatprep.mubr.msk.f32.mxu1 %vm406_vm0, %v8665_v48 }
 0xcd1   : > { %7828 = vmatmul.mubr.msk.f32.gmra.mrb[92].mxu1 %vm406_vm0, %v8666_v52 }
 0xcd2   : > { %7830 = vmatprep.mubr.msk.f32.mxu1 %vm406_vm0, %v8667_v58 }
 0xcd5   : > { %7831 = vmatmul.mubr.msk.f32.gmra.mrb[94].mxu1 %vm406_vm0, %v8668_v49 }
 0xd8c   : > { %v7811_v1 = vpop.f32.mrb[80].mxu1 }
 0xd8d   : > { %v5564_v54 = vpop.f32.mrb[81].mxu1  ;;  %v5660_v33 = vadd.f32 %v7811_v1, %v9596_v62 }
 0xd8e   : > { %v5659_v23 = vadd.f32 %v5564_v54, %v9593_v46 }
 0xd90   : > { %5675 = vxpose.xlu1.b32.start [1/16] (narrow) %v5659_v23, 16  ;;  %v7814_v26 = vpop.f32.mrb[82].mxu1 }
 0xd91   : > { %v5574_v2 = vpop.f32.mrb[83].mxu1  ;;  %v5662_v39 = vadd.f32 %v7814_v26, %v9606_v5 }
 0xd92   : > { %v5661_v46 = vadd.f32 %v5574_v2, %v9603_v4 }
 0xd94   : > { %5676 = vxpose.xlu1.b32.cont [2/16] (narrow) %v5660_v33, 16  ;;  %v7817_v47 = vpop.f32.mrb[84].mxu1 }
 0xd95   : > { %v5584_v37 = vpop.f32.mrb[85].mxu1  ;;  %v5664_v44 = vadd.f32 %v7817_v47, %v9616_v10 }
 0xd96   : > { %v5663_v51 = vadd.f32 %v5584_v37, %v9613_v9 }
 0xd98   : > { %5677 = vxpose.xlu1.b32.cont [3/16] (narrow) %v5661_v46, 16  ;;  %v7820_v25 = vpop.f32.mrb[86].mxu1 }
 0xd99   : > { %v5594_v35 = vpop.f32.mrb[87].mxu1  ;;  %v5666_v5 = vadd.f32 %v7820_v25, %v9626_v27 }
 0xd9a   : > { %v5665_v4 = vadd.f32 %v5594_v35, %v9623_v11 }
 0xd9c   : > { %5678 = vxpose.xlu1.b32.cont [4/16] (narrow) %v5662_v39, 16  ;;  %v7823_v24 = vpop.f32.mrb[88].mxu1 }
 0xd9d   : > { %v5604_v43 = vpop.f32.mrb[89].mxu1  ;;  %v5668_v9 = vadd.f32 %v7823_v24, %v9636_v30 }
 0xd9e   : > { %v5667_v48 = vadd.f32 %v5604_v43, %v9633_v16 }
 0xda0   : > { %5679 = vxpose.xlu1.b32.cont [5/16] (narrow) %v5663_v51, 16  ;;  %v7826_v55 = vpop.f32.mrb[90].mxu1 }
 0xda1   : > { %v5614_v62 = vpop.f32.mrb[91].mxu1  ;;  %v5670_v10 = vadd.f32 %v7826_v55, %v9646_v32  ;;  %v6448_v32 = vld [vmem:[%s10490_s9] ss:$0 sm:$0xff] }
 0xda2   : > { %v5669_v52 = vadd.f32 %v5614_v62, %v9643_v18 }
 0xda4   : > { %5680 = vxpose.xlu1.b32.cont [6/16] (narrow) %v5664_v44, 16  ;;  %v7829_v28 = vpop.f32.mrb[92].mxu1 }
 0xda5   : > { %v5624_v42 = vpop.f32.mrb[93].mxu1  ;;  %v5672_v58 = vadd.f32 %v7829_v28, %v9656_v36 }
 0xda6   : > { %v5671_v11 = vadd.f32 %v5624_v42, %v9653_v20 }
 0xda8   : > { %5681 = vxpose.xlu1.b32.cont [7/16] (narrow) %v5665_v4, 16  ;;  %v7832_v6 = vpop.f32.mrb[94].mxu1 }
 0xda9   : > { %v5634_v34 = vpop.f32.mrb[95].mxu1  ;;  %v5674_v16 = vadd.f32 %v7832_v6, %v9666_v60 }
 0xdaa   : > { %v5673_v27 = vadd.f32 %v5634_v34, %v9663_v22 }
 0xdac   : > { %5682 = vxpose.xlu1.b32.cont [8/16] (narrow) %v5666_v5, 16 }
 0xdb0   : > { %5683 = vxpose.xlu1.b32.cont [9/16] (narrow) %v5667_v48, 16 }
 0xdb4   : > { %5684 = vxpose.xlu1.b32.cont [10/16] (narrow) %v5668_v9, 16 }
 0xdb8   : > { %5685 = vxpose.xlu1.b32.cont [11/16] (narrow) %v5669_v52, 16 }
 0xdbc   : > { %5686 = vxpose.xlu1.b32.cont [12/16] (narrow) %v5670_v10, 16 }
 0xdc0   : > { %5687 = vxpose.xlu1.b32.cont [13/16] (narrow) %v5671_v11, 16 }
 0xdc4   : > { %5688 = vxpose.xlu1.b32.cont [14/16] (narrow) %v5672_v58, 16 }
 0xdc8   : > { %5689 = vxpose.xlu1.b32.cont [15/16] (narrow) %v5673_v27, 16 }
 0xdcc   : > { %5690 = vxpose.xlu1.b32.end [16/16] (narrow) %v5674_v16, 16 }
 0xe10   : > { %v5691_v30 = vpop.trf.xlu1 }
 0xe11   : > { %7865 = vmatprep.mubr.f32.mxu0 %v5691_v30 }
 0xe14   : > { %v5692_v18 = vpop.trf.xlu1 }
 0xe15   : > { %7866 = vmatmul.mubr.f32.vlgmr.msra.gmra.mrb[96].mxu0 %v5692_v18 }
 0xee8   : > { %v7867_v49 = vpop.f32.mrb[96].mxu0 }
 0xee9   : > { %v5796_v20 = vpop.f32.mrb[97].mxu0  ;;  %v5802_v22 = vadd.f32 %v7867_v49, %v6448_v32 }
 0xeea   : > { %v5797_v36 = vadd.f32 %v6448_v32, %v5796_v20 }
 0xeeb   : > { %5807 = vst.msk [vmem:[%s361_s26 + $0x8] sm:$0xff] %vm5805_vm2, %v5802_v22 }
 0xeec   : > { %5806 = vst.msk [vmem:[%s361_s26] sm:$0xff] %vm5805_vm2, %v5797_v36 }
 0xeed PF: > { %s20_s13 = sadd.s32 1, %s8675_s13  }
 0xeee   : > { %p17_p4 = scmp.ge.s32.totalorder %s20_s13, 4  }
 0xef0   :  { %19 = sbr.rel (!%p17_p4) target bundleno = 1 (0x1), region = 103 }

// kernel: maniqa_forward.13
= control target key start
LH: loop header
LB: loop body
LE: loop exit
PB: predicated region body
PF: predicated region fallthrough
CT: control target
= control target key end

     0   :  { %vm46_vm0 = vcmask 130048   ;;  %v699_v36 = vmov 0.0|0.0   ;;  %vm700_vm1 = vmmov 0   ;;  %v701_v37 = vmov 0.0   ;;  %s804_s1 = inlined_call_operand.vmem [shape: f32[16,32], index: 1, kind: input, shape index: {}]   ;;  %s805_s0 = inlined_call_operand.vmem [shape: f32[32,16], index: 0, kind: input, shape index: {}]   ;;  %s806_s3 = inlined_call_operand.vmem [shape: f32[16,1], index: 3, kind: input, shape index: {}]   ;;  %s807_s5 = inlined_call_operand.vmem [shape: f32[16,1], index: 5, kind: input, shape index: {}]   ;;  %s808_s2 = inlined_call_operand.vmem [shape: f32[1,32], index: 2, kind: input, shape index: {}]   ;;  %s809_s4 = inlined_call_operand.<no memory space> [shape: f32[1,1], index: 4, kind: input, shape index: {}]   ;;  %s810_s6 = inlined_call_operand.<no memory space> [shape: f32[1,1], index: 6, kind: input, shape index: {}]   ;;  %s811_s7 = inlined_call_operand.vmem [shape: f32[2,32], index: 7, kind: input, shape index: {}]   ;;  %s812_s8 = inlined_call_operand.vmem [shape: f32[2,1], index: 8, kind: output, shape index: {}]  }
   0x1   :  { %v37_v0 = vld [vmem:[%s804_s1] sm:$0xff]  ;;  %v38_v1 = vld [vmem:[%s804_s1 + $0x8] sm:$0xff]  ;;  %v35_v4 = vld [vmem:[%s805_s0 + $0x10] sm:$0xff]  ;;  %v13_v22 = vstv %s809_s4  ;;  %vm397_vm2 = vcmask 261120   ;;  %vm543_vm3 = vcmask 1024  }
   0x2   :  { %v33_v2 = vld [vmem:[%s805_s0] sm:$0xff]  ;;  %v650_v3 = vpack.c.bf16 %v38_v1, %v37_v0  ;;  %605 = vmatprep.mubr.msk.f32.mxu1 %vm46_vm0, %v35_v4  ;;  %v34_v5 = vld [vmem:[%s805_s0 + $0x8] sm:$0xff]  ;;  %v36_v6 = vld [vmem:[%s805_s0 + $0x18] sm:$0xff]  ;;  %14 = vst [vmem:[#allocation2] sm:$0x1] %v13_v22  ;;  %v15_v27 = vstv %s810_s6 }
   0x3   :  { %602 = vmatprep.mubr.msk.f32.mxu0 %vm46_vm0, %v33_v2  ;;  %v148_v7 = vld [vmem:[%s806_s3] sm:$0xff]  ;;  %v149_v8 = vld [vmem:[%s806_s3 + $0x8] sm:$0xff]  ;;  %16 = vst [vmem:[#allocation3] sm:$0x1] %v15_v27 }
   0x4   :  { %651 = vmatprep.subr.bf16.mxu0 %v650_v3  ;;  %674 = vmatprep.subr.bf16.mxu1 %v650_v3  ;;  %v654_v9 = vpack.c.bf16 %v149_v8, %v148_v7  ;;  %v258_v10 = vld [vmem:[%s807_s5] sm:$0xff]  ;;  %v259_v11 = vld [vmem:[%s807_s5 + $0x8] sm:$0xff]  ;;  %s698_s5 = smov 112  }
   0x5   :  { %653 = vmatpush3.bf16.msra.mxu0 %v650_v3  ;;  %675 = vmatpush3.bf16.msra.mxu1 %v650_v3  ;;  %v658_v12 = vpack.c.bf16 %v259_v11, %v258_v10  ;;  %v549_v13 = vld [vmem:[%s808_s2] ss:$0 sm:$0xff] }
   0x6   :  { %655 = vmatprep.subr.bf16.mxu1 %v654_v9 }
   0x7   :  { %659 = vmatprep.subr.bf16.mxu0 %v658_v12 }
   0x8   :  { %603 = vmatmul.mubr.msk.f32.vlgmr.msra.gmra.mrb[0].mxu0 %vm46_vm0, %v34_v5  ;;  %606 = vmatmul.mubr.msk.f32.vlgmr.msra.gmra.mrb[0].mxu1 %vm46_vm0, %v36_v6 }
   0x9   :  { %657 = vmatpush3.bf16.msra.mxu1 %v654_v9  ;;  %661 = vmatpush3.bf16.msra.mxu0 %v658_v12  ;;  %v554_v57 = vld [vmem:[#allocation2] ss:$0 sm:$0xff] }
   0xa   :  { %668 = vmatprep.subr.bf16.mxu0 %v699_v36  ;;  %662 = vmatprep.subr.bf16.mxu1 %v699_v36  ;;  %v559_v38 = vld [vmem:[#allocation3] ss:$0 sm:$0xff] }
  0xdb   :  { %v604_v14 = vpop.f32.mrb[0].mxu0  ;;  %v607_v15 = vpop.f32.mrb[0].mxu1 }
  0xdc   :  { %v131_v16 = vadd.f32 %v604_v14, %v549_v13  ;;  %v125_v17 = vpop.f32.mrb[1].mxu0  ;;  %v135_v18 = vpop.f32.mrb[1].mxu1  ;;  %v141_v19 = vadd.f32 %v607_v15, %v549_v13 }
  0xdd   :  { %v126_v20 = vadd.f32 %v549_v13, %v125_v17  ;;  %v136_v21 = vadd.f32 %v549_v13, %v135_v18 }
  0xde   :  { %v145_v25 = vmax.f32 %v131_v16, 0.0  ;;  %v147_v26 = vmax.f32 %v141_v19, 0.0  ;;  %v392_v16 = vld [vmem:[%s811_s7] sm:$0x3] }
  0xdf   :  { %v144_v23 = vmax.f32 %v126_v20, 0.0  ;;  %v146_v24 = vmax.f32 %v136_v21, 0.0 }
  0xe1   :  { %271 = vrot.lane.b32.xlu1 %v146_v24, %s698_s5  ;;  %267 = vrot.lane.b32.xlu0 %v144_v23, %s698_s5 }
  0xe2   :  { %612 = vmatprep.mubr.msk.f32.mxu1 %vm46_vm0, %v144_v23 }
  0xe3   :  { %613 = vmatmul.mubr.msk.f32.vlgmr.msra.gmra.mrb[2].mxu1 %vm46_vm0, %v145_v25 }
  0xe4   :  { %615 = vmatprep.mubr.msk.f32.mxu1 %vm46_vm0, %v146_v24 }
  0xe5   :  { %273 = vrot.lane.b32.xlu1 %v147_v26, %s698_s5  ;;  %269 = vrot.lane.b32.xlu0 %v145_v25, %s698_s5 }
  0xe7   :  { %616 = vmatmul.mubr.msk.f32.gmra.mrb[4].mxu1 %vm46_vm0, %v147_v26 }
  0xe8   :  { %636 = vmatprep.mubr.msk.f32.mxu1 %vm700_vm1, %v701_v37 }
 0x153   :  { %v268_v28 = vpop.permute.xlu0 %267  ;;  %v272_v29 = vpop.permute.xlu1 %271 }
 0x154   :  { %622 = vmatprep.mubr.msk.f32.mxu0 %vm46_vm0, %v268_v28 }
 0x157   :  { %v270_v30 = vpop.permute.xlu0 %269  ;;  %v274_v31 = vpop.permute.xlu1 %273 }
 0x158   :  { %623 = vmatmul.mubr.msk.f32.vlgmr.msra.gmra.mrb[2].mxu0 %vm46_vm0, %v270_v30 }
 0x159   :  { %625 = vmatprep.mubr.msk.f32.mxu0 %vm46_vm0, %v272_v29 }
 0x15c   :  { %626 = vmatmul.mubr.msk.f32.gmra.mrb[4].mxu0 %vm46_vm0, %v274_v31 }
 0x15d   :  { %647 = vmatprep.mubr.msk.f32.mxu0 %vm700_vm1, %v701_v37 }
 0x1b6   :  { %v614_v32 = vpop.f32.mrb[2].mxu1 }
 0x1b7   :  { %v235_v33 = vpop.f32.mrb[3].mxu1  ;;  %v241_v60 = vadd.f32 %v614_v32, %v554_v57 }
 0x1b8   :  { %v236_v61 = vadd.f32 %v554_v57, %v235_v33 }
 0x1b9   :  { %v255_v62 = vmax.f32 %v241_v60, 0.0 }
 0x1ba   :  { %v617_v34 = vpop.f32.mrb[4].mxu1  ;;  %v254_v1 = vmax.f32 %v236_v61, 0.0 }
 0x1bb   :  { %v245_v35 = vpop.f32.mrb[5].mxu1  ;;  %v251_v63 = vadd.f32 %v617_v34, %v554_v57 }
 0x1bc   :  { %v246_v2 = vadd.f32 %v554_v57, %v245_v35 }
 0x1bd   :  { %v257_v7 = vmax.f32 %v251_v63, 0.0 }
 0x1be   :  { %v256_v9 = vmax.f32 %v246_v2, 0.0 }
 0x22b   :  { %v624_v39 = vpop.f32.mrb[2].mxu0 }
 0x22c   :  { %v355_v40 = vadd.f32 %v624_v39, %v559_v38  ;;  %v349_v41 = vpop.f32.mrb[3].mxu0 }
 0x22d   :  { %v350_v42 = vadd.f32 %v559_v38, %v349_v41 }
 0x22e   :  { %v565_v43 = vmul.f32 -1.442695, %v355_v40 }
 0x22f   :  { %v564_v44 = vmul.f32 -1.442695, %v350_v42  ;;  %v627_v45 = vpop.f32.mrb[4].mxu0 }
 0x230   :  { %680 = vpow2.f32 %v565_v43  ;;  %v365_v46 = vadd.f32 %v627_v45, %v559_v38  ;;  %v359_v47 = vpop.f32.mrb[5].mxu0 }
 0x231   :  { %682 = vpow2.f32 %v564_v44  ;;  %v360_v48 = vadd.f32 %v559_v38, %v359_v47 }
 0x232   :  { %v567_v49 = vmul.f32 -1.442695, %v365_v46 }
 0x233   :  { %v566_v50 = vmul.f32 -1.442695, %v360_v48 }
 0x234   :  { %684 = vpow2.f32 %v567_v49 }
 0x235   :  { %686 = vpow2.f32 %v566_v50 }
 0x23a   :  { %v681_v51 = vpop.eup %680 }
 0x23b   :  { %v683_v52 = vpop.eup %682  ;;  %v381_v53 = vadd.f32 1.0, %v681_v51 }
 0x23c   :  { %v380_v54 = vadd.f32 1.0, %v683_v52 }
 0x23d   :  { %688 = vrcp.f32 %v381_v53 }
 0x23e   :  { %v685_v55 = vpop.eup %684  ;;  %690 = vrcp.f32 %v380_v54 }
 0x23f   :  { %v687_v56 = vpop.eup %686  ;;  %v383_v58 = vadd.f32 1.0, %v685_v55 }
 0x240   :  { %v382_v59 = vadd.f32 1.0, %v687_v56 }
 0x241   :  { %692 = vrcp.f32 %v383_v58 }
 0x242   :  { %694 = vrcp.f32 %v382_v59 }
 0x247   :  { %v689_v0 = vpop.eup %688 }
 0x248   :  { %v691_v3 = vpop.eup %690  ;;  %v394_v4 = vmul.f32 %v689_v0, %v255_v62 }
 0x249   :  { %v669_v5 = vpack.c.bf16 %v689_v0, %v691_v3  ;;  %v393_v6 = vmul.f32 %v691_v3, %v254_v1 }
 0x24b   :  { %v693_v8 = vpop.eup %692  ;;  %670 = vmatpush3.bf16.msra.mxu0 %v669_v5  ;;  %v663_v10 = vpack.c.bf16 %v394_v4, %v393_v6 }
 0x24c   :  { %v695_v11 = vpop.eup %694  ;;  %671 = vmatprep.subr.bf16.mxu0 %v699_v36  ;;  %v396_v12 = vmul.f32 %v693_v8, %v257_v7 }
 0x24d   :  { %664 = vmatpush3.bf16.msra.mxu1 %v663_v10  ;;  %v672_v13 = vpack.c.bf16 %v693_v8, %v695_v11  ;;  %v395_v14 = vmul.f32 %v695_v11, %v256_v9 }
 0x24e   :  { %665 = vmatprep.subr.bf16.mxu1 %v699_v36 }
 0x24f   :  { %673 = vmatpush3.bf16.msra.mxu0 %v672_v13  ;;  %v666_v15 = vpack.c.bf16 %v396_v12, %v395_v14 }
 0x251   :  { %667 = vmatpush3.bf16.msra.mxu1 %v666_v15 }
 0x252   :  { %648 = vmatmul.mubr.msk.f32.vlgmr.msra.gmra.mrb[6].mxu0 %vm397_vm2, %v392_v16 }
 0x254   :  { %637 = vmatmul.mubr.msk.f32.vlgmr.msra.gmra.mrb[6].mxu1 %vm397_vm2, %v392_v16 }
 0x325   :  { %v537_v17 = vpop.f32.mrb[6].mxu0 }
 0x326   :  { %696 = vrcp.f32 %v537_v17  ;;  %v649_v18 = vpop.f32.mrb[7].mxu0 }
 0x327   :  { %v467_v19 = vpop.f32.mrb[6].mxu1 }
 0x328   :  { %v638_v20 = vpop.f32.mrb[7].mxu1 }
 0x330   :  { %v697_v21 = vpop.eup %696 }
 0x331   :  { %v542_v22 = vmul.f32 %v697_v21, %v467_v19 }
 0x333   :  { %544 = vst.msk [vmem:[%s812_s8] sm:$0x3] %vm543_vm3, %v542_v22 }

// kernel: maniqa_forward.12
= control target key start
LH: loop header
LB: loop body
LE: loop exit
PB: predicated region body
PF: predicated region fallthrough
CT: control target
= control target key end

     0   :  { %s2291_s29 = smov 0   ;;  %s2293_s30 = smov 0   ;;  %s2544_s0 = inlined_call_operand.vmem [shape: f32[32,16], index: 0, kind: input, shape index: {}]   ;;  %s2545_s1 = inlined_call_operand.vmem [shape: f32[4,2,16,16], index: 1, kind: input, shape index: {}]   ;;  %s2546_s2 = inlined_call_operand.vmem [shape: f32[4,1,16], index: 2, kind: input, shape index: {}]   ;;  %s2547_s3 = inlined_call_operand.vmem [shape: f32[4,1,16], index: 3, kind: input, shape index: {}]   ;;  %s2548_s4 = inlined_call_operand.vmem [shape: f32[4,16,48], index: 4, kind: input, shape index: {}]   ;;  %s2549_s5 = inlined_call_operand.vmem [shape: f32[4,1,48], index: 5, kind: input, shape index: {}]   ;;  %s2550_s6 = inlined_call_operand.vmem [shape: f32[4,16,16], index: 6, kind: input, shape index: {}]   ;;  %s2551_s7 = inlined_call_operand.vmem [shape: f32[4,1,16], index: 7, kind: input, shape index: {}]   ;;  %s2552_s8 = inlined_call_operand.vmem [shape: f32[4,1,16], index: 8, kind: input, shape index: {}]   ;;  %s2553_s9 = inlined_call_operand.vmem [shape: f32[4,1,16], index: 9, kind: input, shape index: {}]   ;;  %s2554_s10 = inlined_call_operand.vmem [shape: f32[4,16,32], index: 10, kind: input, shape index: {}]   ;;  %s2555_s11 = inlined_call_operand.vmem [shape: f32[4,1,32], index: 11, kind: input, shape index: {}]   ;;  %s2556_s12 = inlined_call_operand.vmem [shape: f32[4,32,16], index: 12, kind: input, shape index: {}]   ;;  %s2557_s13 = inlined_call_operand.vmem [shape: f32[4,1,16], index: 13, kind: input, shape index: {}]   ;;  %s2558_s14 = inlined_call_operand.vmem [shape: f32[32,16], index: 14, kind: output, shape index: {}]  }
   0x1   :  { %2564 = sst [smem:[#allocation9_spill]] %s2544_s0  ;;  %s2295_s15 = smov 0  }
   0x2   :  { %2565 = sst [smem:[#allocation10_spill]] %s2545_s1  ;;  %s2297_s16 = smov 0  }
   0x3   :  { %2566 = sst [smem:[#allocation11_spill]] %s2548_s4  ;;  %s2299_s17 = smov 0  }
   0x4   :  { %2567 = sst [smem:[#allocation12_spill]] %s2550_s6 }
   0x5   :  { %2568 = sst [smem:[#allocation13_spill]] %s2552_s8 }
   0x6   :  { %2569 = sst [smem:[#allocation14_spill]] %s2553_s9 }
   0x7   :  { %2570 = sst [smem:[#allocation15_spill]] %s2556_s12 }
   0x8   :  { %2571 = sst [smem:[#allocation16_spill]] %s2557_s13 }
   0x9   :  { %2572 = sst [smem:[#allocation17_spill]] %s2558_s14 }
   0xa LB: > { %2573 = sst [smem:[#allocation2_spill]] %s2193_s29  ;;  %s33_s18 = sadd.s32 1, %s2201_s15  ;;  %s2209_s17 = sphi %s2299_s17, %s24_s17   ;;  %s2205_s16 = sphi %s2297_s16, %s2606_s16   ;;  %s2201_s15 = sphi %s2295_s15, %s2605_s15   ;;  %s2197_s30 = sphi %s2293_s30, %s2604_s30   ;;  %s2193_s29 = sphi %s2291_s29, %s2603_s29  }
   0xb   : > { %2574 = sst [smem:[#allocation3_spill]] %s2201_s15  ;;  %s36_s19 = sadd.s32 1, %s2205_s16 }
   0xc   : > { %2575 = sst [smem:[#allocation4_spill]] %s2205_s16  ;;  %p34_p0 = scmp.ge.s32.totalorder %s33_s18, 4 }
   0xd   : > { %2576 = sst [smem:[#allocation5_spill]] %s2209_s17  ;;  %p1886_p1 = scmp.ge.s32.totalorder %s2209_s17, 1 }
   0xe   : > { %p539_p2 = scmp.lt.s32.totalorder %s2209_s17, 9  ;;  %s2608_s18 = smov (%p34_p0, %s33_s18), 0 }
   0xf   : > { %2577 = sst [smem:[#allocation6_spill]] %s2608_s18  ;;  %s2610_s19 = smov (!%p34_p0, %s36_s19), %s2205_s16 }
  0x10   : > { %p540_p3 = pnand %p1886_p1, %p539_p2  ;;  %p38_p4 = scmp.ge.s32.totalorder %s2610_s19, 2 }
  0x12   : > { %s2612_s19 = smov (%p38_p4, %s2610_s19), 0  ;;  %543 = sbr.rel (%p540_p3) target bundleno = 3023 (0xbcf), region = 76 }
  0x13   : > { %2578 = sst [smem:[#allocation7_spill]] %s2612_s19 }
  0x19   : > { %s1887_s20 = sshll.u32 %s2197_s30, 1  ;;  %p640_p5 = scmp.lt.s32.totalorder %s2193_s29, 3 }
  0x1a   : > { %p635_p6 = scmp.lt.s32.totalorder %s1887_s20, 3  ;;  %s2579_s1 = sld [smem:[#allocation10_spill]] }
  0x1b   : > { %s2325_s21 = scalar_select %p640_p5, %s2193_s29, 3 }
  0x1c   : > { %s2614_s20 = smov (!%p635_p6, %s1887_s20), 3  ;;  %s2580_s0 = sld [smem:[#allocation9_spill]] }
  0x1d   : > { %s1936_s22 = sshll.u32 %s2325_s21, 5  ;;  %s1888_s26 = sshll.u32 %s2614_s20, 3 }
  0x1e   : > { %s1937_s14 = sshll.u32 %s2325_s21, 4  ;;  %s2581_s4 = sld [smem:[#allocation11_spill]] }
  0x1f   : > { %s2582_s6 = sld [smem:[#allocation12_spill]]  ;;  %s2586_s19 = sld [smem:[#allocation15_spill]] }
  0x20   : > { %s2335_s30 = scalar_lea.vmem %s2579_s1, %s1936_s22  ;;  %s2588_s23 = sld [smem:[#allocation17_spill]] }
  0x22   : > { %s638_s16 = scalar_lea.vmem %s2580_s0, %s1888_s26  ;;  %s2587_s0 = sld [smem:[#allocation16_spill]] }
  0x24   : > { %s2352_s25 = scalar_lea.vmem %s2581_s4, %s1937_s14  ;;  %s2374_s4 = scalar_lea.vmem %s2554_s10, %s1937_s14 }
  0x25   : > { %s2357_s1 = scalar_lea.vmem %s2582_s6, %s1937_s14  ;;  %s680_s6 = scalar_lea.vmem %s2555_s11, %s2325_s21 }
  0x26   : > { %2583 = sst [smem:[#allocation8_spill]] %s2357_s1  ;;  %s2383_s15 = scalar_lea.vmem %s2586_s19, %s1936_s22 }
  0x27   : > { %s2392_s9 = scalar_lea.vmem %s2588_s23, %s1888_s26  ;;  %s2589_s14 = sld [smem:[#allocation2_spill]] }
  0x28   : > { %s688_s8 = scalar_lea.vmem %s2587_s0, %s2325_s21 }
  0x2d   : > { %p1901_p7 = scmp.ne.s32.totalorder %s2589_s14, 0 }
  0x2e   : > { %v699_v0 = vld [vmem:[%s638_s16] sm:$0xff] (!%p1901_p7)  ;;  %vm701_vm0 = vcmask (!%p1901_p7), 130048   ;;  %v700_v1 = vld [vmem:[%s638_s16 + $0x8] sm:$0xff] (!%p1901_p7) }
  0x2f   : > { %698 = sbr.rel (%p1901_p7) target bundleno = 54 (0x36), region = 80  ;;  %702 = vst.msk [vmem:[%s2392_s9] sm:$0xff] (!%p1901_p7), %vm701_vm0, %v699_v0  ;;  %703 = vst.msk [vmem:[%s2392_s9 + $0x8] sm:$0xff] (!%p1901_p7), %vm701_vm0, %v700_v1 }
  0x36 PF: > { %v2398_v2 = vld [vmem:[%s2392_s9] sm:$0xff]  ;;  %vm708_vm1 = vcmask 130048   ;;  %v2401_v3 = vld [vmem:[%s2392_s9 + $0x8] sm:$0xff]  ;;  %s2590_s16 = scalar_lea.vmem %s2546_s2, %s2325_s21  ;;  %s2591_s26 = scalar_lea.vmem %s2547_s3, %s2325_s21  ;;  %vm852_vm2 = vcmask 64512   ;;  %vm1594_vm4 = vcmask 261120  }
  0x37   : > { %v709_v4 = vsel %vm708_vm1, %v2398_v2, 0.0  ;;  %v712_v5 = vsel %vm708_vm1, %v2401_v3, 0.0  ;;  %v752_v16 = vld [vmem:[%s2352_s25] sm:$0xff]  ;;  %v753_v17 = vld [vmem:[%s2352_s25 + $0x8] sm:$0xff]  ;;  %s2592_s20 = scalar_lea.vmem %s2549_s5, %s2325_s21  ;;  %s2211_s27 = smov 112   ;;  %vm2437_vm3 = vmpackc.low %vm852_vm2, %vm852_vm2 }
  0x38   : > { %710 = vadd.xlane.f32.xlu0 %v709_v4  ;;  %v2040_v18 = vpack.c.bf16 %v753_v17, %v752_v16  ;;  %v1902_v26 = vld [vmem:[%s2590_s16] ss:$0 sm:$0xff]  ;;  %s2212_s28 = smov 104   ;;  %s2213_s18 = smov 120   ;;  %v845_v51 = vld [vmem:[%s2335_s30 + $0x8] sm:$0xff] }
  0x39   : > { %v1903_v28 = vld [vmem:[%s2591_s26] ss:$0 sm:$0xff]  ;;  %s2214_s19 = smov 96   ;;  %s2215_s29 = smov 88  }
  0x3a   : > { %2041 = vmatprep.subr.bf16.mxu1 %v2040_v18  ;;  %v1904_v35 = vld [vmem:[%s2592_s20] ss:$0 sm:$0xff]  ;;  %s2595_s17 = sld [smem:[#allocation8_spill]]  ;;  %s2596_s13 = scalar_lea.vmem %s2551_s7, %s2325_s21 }
  0x3b   : > { %2043 = vmatpush3.bf16.msra.mxu1 %v2040_v18  ;;  %v844_v48 = vld [vmem:[%s2335_s30] sm:$0xff]  ;;  %s2597_s1 = sld [smem:[#allocation13_spill]]  ;;  %s2599_s25 = sld [smem:[#allocation14_spill]] }
  0x3c   : > { %713 = vadd.xlane.f32.xlu0 %v712_v5 }
  0x41   : > { %s2598_s16 = scalar_lea.vmem %s2597_s1, %s2325_s21  ;;  %s2600_s26 = scalar_lea.vmem %s2599_s25, %s2325_s21 }
  0xc5   : > { %v711_v6 = vpop.xlane.xlu0 %710 }
  0xc6   : > { %v716_v7 = vmul.f32 0.0625, %v711_v6 }
  0xc8   : > { %v718_v8 = vsub.f32 %v2398_v2, %v716_v7 }
  0xc9   : > { %v714_v9 = vpop.xlane.xlu0 %713 }
  0xca   : > { %v717_v10 = vmul.f32 0.0625, %v714_v9  ;;  %v720_v11 = vmul.f32 %v718_v8, %v718_v8 }
  0xcc   : > { %v719_v12 = vsub.f32 %v2401_v3, %v717_v10  ;;  %v722_v13 = vsel %vm708_vm1, %v720_v11, 0.0 }
  0xcd   : > { %723 = vadd.xlane.f32.xlu1 %v722_v13 }
  0xce   : > { %v721_v14 = vmul.f32 %v719_v12, %v719_v12 }
  0xd0   : > { %v725_v15 = vsel %vm708_vm1, %v721_v14, 0.0 }
  0xd1   : > { %726 = vadd.xlane.f32.xlu1 %v725_v15 }
 0x15a   : > { %v724_v19 = vpop.xlane.xlu1 %723 }
 0x15b   : > { %v728_v20 = vmul.f32 0.0625, %v724_v19 }
 0x15d   : > { %v730_v21 = vadd.f32 1e-05, %v728_v20 }
 0x15e   : > { %v727_v22 = vpop.xlane.xlu1 %726 }
 0x15f   : > { %2143 = vrsqrt.f32 %v730_v21  ;;  %v729_v23 = vmul.f32 0.0625, %v727_v22 }
 0x161   : > { %v731_v24 = vadd.f32 1e-05, %v729_v23  ;;  %v1914_v23 = vld [vmem:[%s2335_s30 + $0x18] sm:$0xff] }
 0x163   : > { %2145 = vrsqrt.f32 %v731_v24 }
 0x169   : > { %v2144_v25 = vpop.eup %2143 }
 0x16a   : > { %v734_v27 = vmul.f32 %v2144_v25, %v718_v8 }
 0x16c   : > { %v742_v29 = vmul.f32 %v1902_v26, %v734_v27 }
 0x16d   : > { %v2146_v30 = vpop.eup %2145 }
 0x16e   : > { %v735_v31 = vmul.f32 %v2146_v30, %v719_v12  ;;  %v750_v32 = vadd.f32 %v1903_v28, %v742_v29 }
 0x170   : > { %v743_v33 = vmul.f32 %v1902_v26, %v735_v31  ;;  %1981 = vmatprep.mubr.msk.f32.mxu1 %vm708_vm1, %v750_v32  ;;  %v1913_v26 = vld [vmem:[%s2335_s30 + $0x10] sm:$0xff] }
 0x172   : > { %v751_v34 = vadd.f32 %v1903_v28, %v743_v33 }
 0x174   : > { %1982 = vmatmul.mubr.msk.f32.vlgmr.msra.gmra.mrb[0].mxu1 %vm708_vm1, %v751_v34 }
 0x247   : > { %v1983_v36 = vpop.f32.mrb[0].mxu1 }
 0x248   : > { %v839_v37 = vadd.f32 %v1983_v36, %v1904_v35  ;;  %v833_v38 = vpop.f32.mrb[1].mxu1 }
 0x249   : > { %v834_v39 = vadd.f32 %v1904_v35, %v833_v38 }
 0x24b   : > { %1988 = vmatprep.mubr.msk.f32.mxu1 %vm852_vm2, %v834_v39  ;;  %v2431_v40 = vpack.i.bf16 %v839_v37, %v834_v39 }
 0x24d   : > { %2124 = vrot.lane.b32.xlu0 %v2431_v40, %s2211_s27 }
 0x251   : > { %2134 = vrot.lane.b32.xlu0 %v2431_v40, %s2212_s28 }
 0x255   : > { %1052 = vrot.lane.b32.xlu0 %v834_v39, %s2213_s18 }
 0x259   : > { %1054 = vrot.lane.b32.xlu0 %v839_v37, %s2213_s18 }
 0x2bf   : > { %v2125_v41 = vpop.permute.xlu0 %2124 }
 0x2c0   : > { %v2127_v42 = vunpack.i.h.bf16 %v2125_v41  ;;  %v2126_v43 = vunpack.i.l.bf16 %v2125_v41 }
 0x2c2   : > { %v2044_v45 = vpack.c.bf16 %v2127_v42, %v2126_v43 }
 0x2c3   : > { %v2135_v6 = vpop.permute.xlu0 %2134 }
 0x2c4   : > { %2046 = vmatprep.subr.msk.bf16.mxu1 %vm2437_vm3, %v2044_v45  ;;  %v2137_v8 = vunpack.i.h.bf16 %v2135_v6  ;;  %v2136_v9 = vunpack.i.l.bf16 %v2135_v6 }
 0x2c5   : > { %2049 = vmatpush3.bf16.xpose.msk.msra.mxu1 %vm2437_vm3, %v2044_v45 }
 0x2c6   : > { %v2054_v13 = vpack.c.bf16 %v2137_v8, %v2136_v9 }
 0x2c7   : > { %v1053_v18 = vpop.permute.xlu0 %1052 }
 0x2cb   : > { %v1055_v19 = vpop.permute.xlu0 %1054 }
 0x2cc   : > { %1989 = vmatmul.mubr.msk.f32.vlgmr.msra.gmra.mrb[2].mxu1 %vm852_vm2, %v839_v37 }
 0x39f   : > { %v1990_v46 = vpop.f32.mrb[2].mxu1 }
 0x3a0   : > { %v927_v47 = vpop.f32.mrb[3].mxu1  ;;  %v937_v49 = vmul.f32 0.35355338, %v1990_v46  ;;  %v843_v46 = vld [vmem:[%s2595_s17 + $0x8] sm:$0xff] }
 0x3a1   : > { %v936_v50 = vmul.f32 0.35355338, %v927_v47 }
 0x3a2   : > { %v939_v54 = vadd.f32 %v937_v49, %v845_v51 }
 0x3a3   : > { %v938_v52 = vadd.f32 %v936_v50, %v844_v48 }
 0x3a4   : > { %v943_v55 = vsel %vm708_vm1, %v939_v54, -inf }
 0x3a5   : > { %v940_v53 = vsel %vm708_vm1, %v938_v52, -inf }
 0x3a6   : > { %941 = vmax.xlane.f32.xlu1 %v940_v53  ;;  %v842_v53 = vld [vmem:[%s2595_s17] sm:$0xff] }
 0x3aa   : > { %944 = vmax.xlane.f32.xlu1 %v943_v55 }
 0x433   : > { %v942_v56 = vpop.xlane.xlu1 %941 }
 0x434   : > { %v946_v57 = vsub.f32 %v938_v52, %v942_v56  ;;  %v1925_v56 = vld [vmem:[%s2596_s13] ss:$0 sm:$0xff] }
 0x436   : > { %v948_v60 = vmul.f32 1.442695, %v946_v57 }
 0x437   : > { %v945_v58 = vpop.xlane.xlu1 %944 }
 0x438   : > { %v947_v59 = vsub.f32 %v939_v54, %v945_v58 }
 0x43a   : > { %v950_v61 = vmul.f32 1.442695, %v947_v59 }
 0x43c   : > { %2147 = vpow2.f32 %v950_v61 }
 0x43d   : > { %2149 = vpow2.f32 %v948_v60 }
 0x446   : > { %v2148_v62 = vpop.eup %2147 }
 0x447   : > { %v955_v63 = vsel %vm708_vm1, %v2148_v62, 0.0  ;;  %v2150_v0 = vpop.eup %2149 }
 0x448   : > { %956 = vadd.xlane.f32.xlu1 %v955_v63  ;;  %v952_v1 = vsel %vm708_vm1, %v2150_v0, 0.0 }
 0x44c   : > { %953 = vadd.xlane.f32.xlu1 %v952_v1 }
 0x45d   : > { %2129 = vrot.lane.b32.xlu1 %v2431_v40, %s2214_s19 }
 0x4d5   : > { %v957_v4 = vpop.xlane.xlu1 %956 }
 0x4d6   : > { %2151 = vrcp.f32 %v957_v4 }
 0x4d9   : > { %v954_v5 = vpop.xlane.xlu1 %953 }
 0x4da   : > { %2153 = vrcp.f32 %v954_v5 }
 0x4dd   : > { %v2130_v7 = vpop.permute.xlu1 %2129 }
 0x4de   : > { %v2132_v10 = vunpack.i.h.bf16 %v2130_v7  ;;  %v2131_v11 = vunpack.i.l.bf16 %v2130_v7 }
 0x4e0   : > { %v2050_v12 = vpack.c.bf16 %v2132_v10, %v2131_v11  ;;  %v2152_v14 = vpop.eup %2151 }
 0x4e1   : > { %v961_v17 = vmul.f32 %v2152_v14, %v2148_v62  ;;  %v1476_v14 = vld [vmem:[%s2374_s4 + $0x8] sm:$0xff] }
 0x4e2   : > { %2051 = vmatprep.subr.bf16.mxu0 %v2050_v12 }
 0x4e3   : > { %2053 = vmatpush3.bf16.msra.mxu0 %v2050_v12 }
 0x4e4   : > { %v2154_v15 = vpop.eup %2153  ;;  %2056 = vmatprep.subr.msk.bf16.mxu0 %vm2437_vm3, %v2054_v13 }
 0x4e5   : > { %v960_v16 = vmul.f32 %v2154_v15, %v2150_v0 }
 0x4e7   : > { %1995 = vmatprep.mubr.msk.f32.mxu0 %vm708_vm1, %v960_v16 }
 0x4e8   : > { %1996 = vmatmul.mubr.msk.f32.vlgmr.msra.gmra.mrb[0].mxu0 %vm708_vm1, %v961_v17 }
 0x4e9   : > { %2002 = vmatprep.mubr.msk.f32.mxu0 %vm852_vm2, %v1053_v18 }
 0x4ec   : > { %2059 = vmatpush3.bf16.xpose.msk.msra.mxu0 %vm2437_vm3, %v2054_v13  ;;  %v1475_v13 = vld [vmem:[%s2374_s4] sm:$0xff] }
 0x4ed   : > { %v2064_v15 = vpack.c.bf16 %v1476_v14, %v1475_v13 }
 0x4ef   : > { %2065 = vmatprep.subr.bf16.mxu0 %v2064_v15 }
 0x4f3   : > { %2003 = vmatmul.mubr.msk.f32.vlgmr.msra.gmra.mrb[2].mxu0 %vm852_vm2, %v1055_v19 }
 0x4f4   : > { %2067 = vmatpush3.bf16.msra.mxu0 %v2064_v15 }
 0x5bb   : > { %v1997_v20 = vpop.f32.mrb[0].mxu0 }
 0x5bc   : > { %v1040_v21 = vpop.f32.mrb[1].mxu0 }
 0x5c6   : > { %v2004_v22 = vpop.f32.mrb[2].mxu0 }
 0x5c7   : > { %v1144_v24 = vmul.f32 0.35355338, %v2004_v22  ;;  %v1134_v25 = vpop.f32.mrb[3].mxu0 }
 0x5c8   : > { %v1143_v27 = vmul.f32 0.35355338, %v1134_v25  ;;  %v1927_v25 = vld [vmem:[%s2600_s26] ss:$0 sm:$0xff] }
 0x5c9   : > { %v1146_v28 = vadd.f32 %v1914_v23, %v1144_v24  ;;  %v1926_v23 = vld [vmem:[%s2598_s16] ss:$0 sm:$0xff] }
 0x5ca   : > { %v1145_v29 = vadd.f32 %v1913_v26, %v1143_v27 }
 0x5cb   : > { %v1150_v30 = vsel %vm708_vm1, %v1146_v28, -inf }
 0x5cc   : > { %1151 = vmax.xlane.f32.xlu0 %v1150_v30  ;;  %v1147_v31 = vsel %vm708_vm1, %v1145_v29, -inf }
 0x5cd   : > { %1148 = vmax.xlane.f32.xlu1 %v1147_v31 }
 0x5de   : > { %2139 = vrot.lane.b32.xlu1 %v2431_v40, %s2215_s29 }
 0x659   : > { %v1152_v32 = vpop.xlane.xlu0 %1151 }
 0x65a   : > { %v1154_v33 = vsub.f32 %v1146_v28, %v1152_v32  ;;  %v1149_v34 = vpop.xlane.xlu1 %1148  ;;  %v1583_v32 = vld [vmem:[%s2383_s15] sm:$0xff] }
 0x65b   : > { %v1153_v35 = vsub.f32 %v1145_v29, %v1149_v34 }
 0x65c   : > { %v1157_v36 = vmul.f32 1.442695, %v1154_v33  ;;  %v1584_v33 = vld [vmem:[%s2383_s15 + $0x8] sm:$0xff] }
 0x65d   : > { %v1155_v37 = vmul.f32 1.442695, %v1153_v35  ;;  %v2068_v34 = vpack.c.bf16 %v1584_v33, %v1583_v32  ;;  %v1585_v35 = vld [vmem:[%s2383_s15 + $0x10] sm:$0xff] }
 0x65e   : > { %v2140_v38 = vpop.permute.xlu1 %2139 }
 0x65f   : > { %2155 = vpow2.f32 %v1155_v37  ;;  %v2142_v39 = vunpack.i.h.bf16 %v2140_v38  ;;  %v2141_v41 = vunpack.i.l.bf16 %v2140_v38  ;;  %2069 = vmatprep.subr.bf16.mxu0 %v2068_v34  ;;  %v1928_v38 = vld [vmem:[%s680_s6] ss:$0 sm:$0xff] }
 0x660   : > { %2157 = vpow2.f32 %v1157_v36  ;;  %v1586_v36 = vld [vmem:[%s2383_s15 + $0x18] sm:$0xff] }
 0x661   : > { %v2060_v42 = vpack.c.bf16 %v2142_v39, %v2141_v41  ;;  %v2072_v37 = vpack.c.bf16 %v1586_v36, %v1585_v35 }
 0x663   : > { %2061 = vmatprep.subr.bf16.mxu1 %v2060_v42 }
 0x664   : > { %2063 = vmatpush3.bf16.msra.mxu1 %v2060_v42 }
 0x665   : > { %2012 = vmatprep.subr.mxu1 %v843_v46 }
 0x669   : > { %v2156_v43 = vpop.eup %2155 }
 0x66a   : > { %v1159_v44 = vsel %vm708_vm1, %v2156_v43, 0.0  ;;  %v2158_v45 = vpop.eup %2157 }
 0x66b   : > { %1160 = vadd.xlane.f32.xlu0 %v1159_v44  ;;  %v1162_v40 = vsel %vm708_vm1, %v2158_v45, 0.0 }
 0x66f   : > { %1163 = vadd.xlane.f32.xlu0 %v1162_v40 }
 0x6f8   : > { %v1161_v47 = vpop.xlane.xlu0 %1160 }
 0x6f9   : > { %2159 = vrcp.f32 %v1161_v47 }
 0x6fc   : > { %v1164_v48 = vpop.xlane.xlu0 %1163 }
 0x6fd   : > { %2161 = vrcp.f32 %v1164_v48 }
 0x703   : > { %v2160_v49 = vpop.eup %2159 }
 0x704   : > { %v1167_v50 = vmul.f32 %v2160_v49, %v2156_v43 }
 0x706   : > { %2009 = vmatprep.mubr.msk.f32.mxu1 %vm708_vm1, %v1167_v50 }
 0x707   : > { %v2162_v51 = vpop.eup %2161 }
 0x708   : > { %v1168_v52 = vmul.f32 %v2162_v51, %v2158_v45 }
 0x70a   : > { %2010 = vmatmul.mubr.msk.f32.vlgmr.msra.gmra.mrb[4].mxu1 %vm708_vm1, %v1168_v52 }
 0x70b   : > { %2013 = vmatpush3.msra.mxu1 %v843_v46 }
 0x70c   : > { %2017 = vmatprep.subr.mxu1 %v842_v53 }
 0x7dd   : > { %v2011_v54 = vpop.f32.mrb[4].mxu1 }
 0x7de   : > { %v1247_v55 = vpop.f32.mrb[5].mxu1 }
 0x7df   : > { %2014 = vmatprep.mubr.msk.f32.mxu1 %vm852_vm2, %v1247_v55 }
 0x7e0   : > { %2015 = vmatmul.mubr.msk.f32.vlgmr.msra.gmra.mrb[6].mxu1 %vm852_vm2, %v2011_v54 }
 0x7e1   : > { %2018 = vmatpush3.msra.mxu1 %v842_v53  ;;  %2019 = vmatprep.mubr.msk.f32.mxu1 %vm852_vm2, %v1040_v21 }
 0x7e8   : > { %2020 = vmatmul.mubr.msk.f32.vlgmr.msra.gmra.mrb[6].mxu1 %vm852_vm2, %v1997_v20 }
 0x8bb   : > { %v2021_v57 = vpop.f32.mrb[6].mxu1 }
 0x8bc   : > { %v1426_v58 = vadd.f32 %v2021_v57, %v1925_v56  ;;  %v1409_v59 = vpop.f32.mrb[7].mxu1 }
 0x8bd   : > { %v1425_v60 = vadd.f32 %v1925_v56, %v1409_v59 }
 0x8be   : > { %v1428_v61 = vmul.f32 0.8, %v1426_v58 }
 0x8bf   : > { %v1427_v62 = vmul.f32 0.8, %v1425_v60 }
 0x8c0   : > { %v2485_v0 = vadd.f32 %v1428_v61, %v2401_v3  ;;  %v1931_v61 = vld [vmem:[%s688_s8] ss:$0 sm:$0xff] }
 0x8c1   : > { %v2482_v63 = vadd.f32 %v1427_v62, %v2398_v2 }
 0x8c2   : > { %v1436_v4 = vsel %vm708_vm1, %v2485_v0, 0.0 }
 0x8c3   : > { %v1433_v1 = vsel %vm708_vm1, %v2482_v63, 0.0 }
 0x8c4   : > { %1434 = vadd.xlane.f32.xlu0 %v1433_v1 }
 0x8c8   : > { %1437 = vadd.xlane.f32.xlu0 %v1436_v4 }
 0x951   : > { %v1435_v5 = vpop.xlane.xlu0 %1434 }
 0x952   : > { %v1439_v6 = vmul.f32 0.0625, %v1435_v5 }
 0x954   : > { %v1441_v7 = vsub.f32 %v2482_v63, %v1439_v6 }
 0x955   : > { %v1438_v8 = vpop.xlane.xlu0 %1437 }
 0x956   : > { %v1440_v2 = vmul.f32 0.0625, %v1438_v8  ;;  %v1443_v9 = vmul.f32 %v1441_v7, %v1441_v7 }
 0x958   : > { %v1442_v3 = vsub.f32 %v2485_v0, %v1440_v2  ;;  %v1445_v10 = vsel %vm708_vm1, %v1443_v9, 0.0 }
 0x959   : > { %1446 = vadd.xlane.f32.xlu0 %v1445_v10 }
 0x95a   : > { %v1444_v11 = vmul.f32 %v1442_v3, %v1442_v3 }
 0x95c   : > { %v1448_v12 = vsel %vm708_vm1, %v1444_v11, 0.0 }
 0x95d   : > { %1449 = vadd.xlane.f32.xlu0 %v1448_v12 }
 0x9e6   : > { %v1447_v16 = vpop.xlane.xlu0 %1446 }
 0x9e7   : > { %v1451_v17 = vmul.f32 0.0625, %v1447_v16 }
 0x9e9   : > { %v1453_v18 = vadd.f32 1e-05, %v1451_v17 }
 0x9ea   : > { %v1450_v19 = vpop.xlane.xlu0 %1449 }
 0x9eb   : > { %2163 = vrsqrt.f32 %v1453_v18  ;;  %v1452_v20 = vmul.f32 0.0625, %v1450_v19 }
 0x9ed   : > { %v1454_v21 = vadd.f32 1e-05, %v1452_v20 }
 0x9ef   : > { %2165 = vrsqrt.f32 %v1454_v21 }
 0x9f5   : > { %v2164_v22 = vpop.eup %2163 }
 0x9f6   : > { %v1457_v24 = vmul.f32 %v2164_v22, %v1441_v7 }
 0x9f8   : > { %v1465_v26 = vmul.f32 %v1926_v23, %v1457_v24 }
 0x9f9   : > { %v2166_v27 = vpop.eup %2165 }
 0x9fa   : > { %v1458_v28 = vmul.f32 %v2166_v27, %v1442_v3  ;;  %v1473_v29 = vadd.f32 %v1927_v25, %v1465_v26 }
 0x9fc   : > { %v1466_v30 = vmul.f32 %v1926_v23, %v1458_v28  ;;  %2026 = vmatprep.mubr.msk.f32.mxu0 %vm708_vm1, %v1473_v29 }
 0x9fe   : > { %v1474_v31 = vadd.f32 %v1927_v25, %v1466_v30 }
 0xa00   : > { %2027 = vmatmul.mubr.msk.f32.vlgmr.msra.gmra.mrb[4].mxu0 %vm708_vm1, %v1474_v31 }
 0xa01   : > { %2071 = vmatpush3.bf16.msra.mxu0 %v2068_v34 }
 0xa02   : > { %2073 = vmatprep.subr.bf16.mxu0 %v2072_v37 }
 0xa05   : > { %2075 = vmatpush3.bf16.msra.mxu0 %v2072_v37 }
 0xad3   : > { %v2028_v39 = vpop.f32.mrb[4].mxu0 }
 0xad4   : > { %v1562_v41 = vadd.f32 %v2028_v39, %v1928_v38  ;;  %v1556_v42 = vpop.f32.mrb[5].mxu0 }
 0xad5   : > { %v1557_v43 = vadd.f32 %v1928_v38, %v1556_v42 }
 0xad6   : > { %v1566_v44 = vmul.f32 %v1562_v41, %v1562_v41 }
 0xad7   : > { %v1565_v45 = vmul.f32 %v1557_v43, %v1557_v43 }
 0xad8   : > { %v1568_v40 = vmul.f32 %v1566_v44, %v1562_v41 }
 0xad9   : > { %v1567_v46 = vmul.f32 %v1565_v45, %v1557_v43 }
 0xada   : > { %v1570_v47 = vmul.f32 0.044715, %v1568_v40 }
 0xadb   : > { %v1569_v48 = vmul.f32 0.044715, %v1567_v46 }
 0xadc   : > { %v1572_v49 = vadd.f32 %v1570_v47, %v1562_v41 }
 0xadd   : > { %v1571_v50 = vadd.f32 %v1569_v48, %v1557_v43 }
 0xade   : > { %v1574_v51 = vmul.f32 0.7978846, %v1572_v49 }
 0xadf   : > { %v1573_v52 = vmul.f32 0.7978846, %v1571_v50 }
 0xae0   : > { %2167 = vtanh.f32 %v1574_v51 }
 0xae1   : > { %2169 = vtanh.f32 %v1573_v52 }
 0xaea   : > { %v2168_v53 = vpop.eup %2167 }
 0xaeb   : > { %v2170_v54 = vpop.eup %2169  ;;  %v1578_v55 = vadd.f32 1.0, %v2168_v53 }
 0xaec   : > { %v1577_v56 = vadd.f32 1.0, %v2170_v54 }
 0xaed   : > { %v1580_v57 = vmul.f32 0.5, %v1578_v55 }
 0xaee   : > { %v1579_v58 = vmul.f32 0.5, %v1577_v56 }
 0xaef   : > { %v1582_v60 = vmul.f32 %v1580_v57, %v1562_v41 }
 0xaf0   : > { %v1581_v59 = vmul.f32 %v1579_v58, %v1557_v43 }
 0xaf2   : > { %2037 = vmatprep.mubr.msk.f32.mxu0 %vm1594_vm4, %v1581_v59 }
 0xaf3   : > { %2038 = vmatmul.mubr.msk.f32.vlgmr.msra.gmra.mrb[6].mxu0 %vm1594_vm4, %v1582_v60 }
 0xbc6   : > { %v2039_v62 = vpop.f32.mrb[6].mxu0 }
 0xbc7   : > { %v1673_v1 = vadd.f32 %v2039_v62, %v1931_v61  ;;  %v1667_v4 = vpop.f32.mrb[7].mxu0 }
 0xbc8   : > { %v1668_v5 = vadd.f32 %v1931_v61, %v1667_v4 }
 0xbc9   : > { %v1677_v6 = vmul.f32 0.8, %v1673_v1 }
 0xbca   : > { %v1676_v7 = vmul.f32 0.8, %v1668_v5 }
 0xbcb   : > { %v1679_v2 = vadd.f32 %v1677_v6, %v2485_v0 }
 0xbcc   : > { %v1678_v8 = vadd.f32 %v1676_v7, %v2482_v63 }
 0xbcd   : > { %1681 = vst.msk [vmem:[%s2392_s9 + $0x8] sm:$0xff] %vm708_vm1, %v1679_v2 }
 0xbce   : > { %1680 = vst.msk [vmem:[%s2392_s9] sm:$0xff] %vm708_vm1, %v1678_v8 }
 0xbcf PF: > { %s2602_s27 = sld [smem:[#allocation5_spill]]  ;;  %s2603_s29 = sld [smem:[#allocation3_spill]] }
 0xbd0   : > { %s2604_s30 = sld [smem:[#allocation4_spill]]  ;;  %s2605_s15 = sld [smem:[#allocation6_spill]] }
 0xbd1   : > { %s2606_s16 = sld [smem:[#allocation7_spill]] }
 0xbd5   : > { %s24_s17 = sadd.s32 1, %s2602_s27  }
 0xbd6   : > { %p21_p8 = scmp.ge.s32.totalorder %s24_s17, 10  }
 0xbd8   :  { %23 = sbr.rel (!%p21_p8) target bundleno = 10 (0xa), region = 150 }

</bundles_post_ra>
